<compile_context>
chip_gen: v6e
topology: v6e:2x2x1
jax: 0.10.0
libtpu: 0.0.40
codegen_flags: <defaults>
</compile_context>

<pallas_src>
import numpy as np
import jax
import jax.numpy as jnp
from jax import lax
from jax.experimental import pallas as pl
from jax.experimental.pallas import tpu as pltpu

SR = 44100
N_FFT = 2048
HOP = 512
N_FREQ = N_FFT // 2 + 1            # 1025 (onesided)
NF_PAD = 1152                      # 9 * 128: zero-padded frequency bins
N_MELS = 128                       # torchaudio MelSpectrogram default
N_MFCC = 40                        # torchaudio MFCC default
N_OUT_PAD = 128                    # lane-dense output width (sliced to 40 outside)
AMIN = 1e-10                       # AmplitudeToDB amin (db_multiplier = 0 for ref=1.0)
DFT_DTYPE = jnp.bfloat16           # jnp.float32 for bit-closer parity with torchaudio


def _round_up(x, m):
    return -(-x // m) * m


# ---------------- deterministic parameter construction (plain numpy) -----------------

def _hann_window(n):
    i = np.arange(n, dtype=np.float64)
    return 0.5 - 0.5 * np.cos(2.0 * np.pi * i / n)          # periodic hann


def _windowed_dft_matrix():
    """(N_FFT, 2*NF_PAD) = [win*cos | win*(-sin)], freq columns zero-padded to NF_PAD."""
    n = np.arange(N_FFT, dtype=np.float64)[:, None]
    k = np.arange(N_FREQ, dtype=np.float64)[None, :]
    ang = 2.0 * np.pi * n * k / N_FFT
    win = _hann_window(N_FFT)[:, None]
    cos_w = np.zeros((N_FFT, NF_PAD), np.float64)
    sin_w = np.zeros((N_FFT, NF_PAD), np.float64)
    cos_w[:, :N_FREQ] = win * np.cos(ang)
    sin_w[:, :N_FREQ] = win * (-np.sin(ang))
    return np.concatenate([cos_w, sin_w], axis=1).astype(np.float32)   # (2048, 2304)


def _mel_fbanks_stacked():
    """torchaudio melscale_fbanks (HTK, norm=None), rows zero-padded to NF_PAD and
    stacked twice -> (2*NF_PAD, N_MELS) so that (re^2|im^2) @ fb sums the power."""
    all_freqs = np.linspace(0.0, SR / 2.0, N_FREQ)
    hz_to_mel = lambda f: 2595.0 * np.log10(1.0 + f / 700.0)
    mel_to_hz = lambda m: 700.0 * (10.0 ** (m / 2595.0) - 1.0)
    m_pts = np.linspace(hz_to_mel(0.0), hz_to_mel(SR / 2.0), N_MELS + 2)
    f_pts = mel_to_hz(m_pts)
    f_diff = f_pts[1:] - f_pts[:-1]
    slopes = f_pts[None, :] - all_freqs[:, None]
    down = (-1.0 * slopes[:, :-2]) / f_diff[:-1]
    up = slopes[:, 2:] / f_diff[1:]
    fb = np.maximum(0.0, np.minimum(down, up))              # (1025, 128)
    fbp = np.zeros((NF_PAD, N_MELS), np.float64)
    fbp[:N_FREQ] = fb
    return np.concatenate([fbp, fbp], axis=0).astype(np.float32)      # (2304, 128)


def _dct_matrix_padded():
    """torchaudio F.create_dct(n_mfcc, n_mels, norm='ortho'), columns padded to 128."""
    n = np.arange(N_MELS, dtype=np.float64)
    k = np.arange(N_MFCC, dtype=np.float64)[:, None]
    dct = np.cos(np.pi / N_MELS * (n + 0.5) * k)            # (n_mfcc, n_mels)
    dct[0] *= 1.0 / np.sqrt(2.0)
    dct *= np.sqrt(2.0 / N_MELS)
    out = np.zeros((N_MELS, N_OUT_PAD), np.float64)
    out[:, :N_MFCC] = dct.T
    return out.astype(np.float32)                           # (128, 128)


# ----------------------------------- wrapper + kernel ---------------------------------

def mfcc_forward(x):
    """x: (B, T) float32 waveform -> (B, N_MFCC) time-averaged MFCC."""
    B, T = x.shape
    n_frames = 1 + T // HOP                      # torch.stft, center=True
    tile_f = min(128, _round_up(n_frames, 8))    # MXU-sized M tile (full 128 for long audio)
    n_ft = pl.cdiv(n_frames, tile_f)
    n_rows = n_ft * tile_f + 8                   # hop-rows needed (+8 for the frame overlap)

    # center=True reflect pad, then zero-pad so the waveform reshapes to hop-rows.
    pad = N_FFT // 2
    xp = jnp.pad(x, ((0, 0), (pad, pad)), mode="reflect")
    xp = jnp.pad(xp, ((0, 0), (0, n_rows * HOP - xp.shape[1])))
    xv = xp.reshape(B, n_rows, HOP)              # (B, n_rows, 512) — no 4x framed tensor

    w_mat = jnp.asarray(_windowed_dft_matrix()).astype(DFT_DTYPE)   # (2048, 2304)
    mel2 = jnp.asarray(_mel_fbanks_stacked())                       # (2304, 128)
    dctm = jnp.asarray(_dct_matrix_padded())                        # (128, 128)
    inv_nf = np.float32(1.0 / n_frames)
    n_sub = N_FFT // HOP                                            # 4 hop-subframes

    def kernel(xa_ref, xb_ref, w_ref, mel_ref, dct_ref, out_ref, acc_ref):
        ft = pl.program_id(1)

        @pl.when(ft == 0)
        def _init():
            acc_ref[...] = jnp.zeros_like(acc_ref)

        # hop-rows covering this frame tile: (tile_f + 8, HOP)
        full = jnp.concatenate([xa_ref[0], xb_ref[0]], axis=0)

        # Windowed DFT: frame[f] = concat_j rows[f+j]  =>  Y = sum_j rows[j:j+tile_f] @ W_j
        y = None
        for j in range(n_sub):
            vj = full[j:j + tile_f, :].astype(w_ref.dtype)
            pj = jnp.dot(vj, w_ref[j * HOP:(j + 1) * HOP, :],
                         preferred_element_type=jnp.float32)        # (tile_f, 2304)
            y = pj if y is None else y + pj

        sq = y * y                                                   # re^2 | im^2 halves
        mel = jnp.dot(sq, mel_ref[...], preferred_element_type=jnp.float32)   # (tile_f, 128)
        db = 10.0 * jnp.log10(jnp.maximum(mel, AMIN))                # AmplitudeToDB
        mfcc = jnp.dot(db, dct_ref[...], preferred_element_type=jnp.float32)  # (tile_f, 128)

        # Mask padded frame rows, accumulate the time sum.
        row = lax.broadcasted_iota(jnp.int32, (tile_f, 1), 0) + ft * tile_f
        mfcc = jnp.where(row < n_frames, mfcc, 0.0)
        acc_ref[...] += jnp.sum(mfcc, axis=0, keepdims=True)

        @pl.when(ft == n_ft - 1)
        def _finalize():
            out_ref[...] = (acc_ref[...] * inv_nf)[None]

    out = pl.pallas_call(
        kernel,
        out_shape=jax.ShapeDtypeStruct((B, 1, N_OUT_PAD), jnp.float32),
        grid_spec=pltpu.PrefetchScalarGridSpec(
            num_scalar_prefetch=0,
            grid=(B, n_ft),
            in_specs=[
                # frame-tile hop-rows [ft*tile_f, ft*tile_f + tile_f)
                pl.BlockSpec((1, tile_f, HOP), lambda b, f: (b, f, 0)),
                # 8 extra hop-rows right after the tile (frame overlap)
                pl.BlockSpec((1, 8, HOP), lambda b, f: (b, (f + 1) * (tile_f // 8), 0)),
                pl.BlockSpec((N_FFT, 2 * NF_PAD), lambda b, f: (0, 0)),
                pl.BlockSpec((2 * NF_PAD, N_MELS), lambda b, f: (0, 0)),
                pl.BlockSpec((N_MELS, N_OUT_PAD), lambda b, f: (0, 0)),
            ],
            out_specs=pl.BlockSpec((1, 1, N_OUT_PAD), lambda b, f: (b, 0, 0)),
            scratch_shapes=[pltpu.VMEM((1, N_OUT_PAD), jnp.float32)],
        ),
        compiler_params=pltpu.CompilerParams(
            dimension_semantics=("parallel", "arbitrary"),   # batch across TCs on v7x
            vmem_limit_bytes=48 * 1024 * 1024,               # fits v7x's 64 MiB physical VMEM
        ),
    )(xv, xv, w_mat, mel2, dctm)
    return out[:, 0, :N_MFCC]                                # (B, N_MFCC)


if __name__ == "__main__":
    key = jax.random.PRNGKey(0)
    B, T = 2, 4096                       # 9 STFT frames with n_fft=2048, hop=512
    x = jax.random.normal(key, (B, T), dtype=jnp.float32)

    y = mfcc_forward(x)
    jax.block_until_ready(y)
    assert y.shape == (B, N_MFCC) and y.dtype == jnp.float32
    print("KERNEL_OK")
</pallas_src>

<mosaic_0001>
module attributes {stable_mosaic.version = 11 : i64} {
  func.func @kernel(%arg0: i32, %arg1: i32, %arg2: memref<1x16x512xf32, #tpu.memory_space<vmem>>, %arg3: memref<1x8x512xf32, #tpu.memory_space<vmem>>, %arg4: memref<2048x2304xbf16, #tpu.memory_space<vmem>>, %arg5: memref<2304x128xf32, #tpu.memory_space<vmem>>, %arg6: memref<128x128xf32, #tpu.memory_space<vmem>>, %arg7: memref<1x1x128xf32, #tpu.memory_space<vmem>>, %arg8: memref<1x128xf32, #tpu.memory_space<vmem>>) attributes {dimension_semantics = [#tpu.dimension_semantics<parallel>, #tpu.dimension_semantics<arbitrary>], iteration_bounds = array<i64: 2, 1>, scalar_prefetch = 0 : i64, scratch_operands = 1 : i64, tpu.core_type = #tpu.core_type<tc>, window_params = [{transform_indices = @transform_0, window_bounds = array<i64: 1, 16, 512>}, {transform_indices = @transform_1, window_bounds = array<i64: 1, 8, 512>}, {pipeline_mode = #tpu.pipeline_mode<synchronous>, transform_indices = @transform_2, window_bounds = array<i64: 2048, 2304>}, {pipeline_mode = #tpu.pipeline_mode<synchronous>, transform_indices = @transform_3, window_bounds = array<i64: 2304, 128>}, {pipeline_mode = #tpu.pipeline_mode<synchronous>, transform_indices = @transform_4, window_bounds = array<i64: 128, 128>}, {transform_indices = @transform_5, window_bounds = array<i64: 1, 1, 128>}]} {
    %c0_i32 = arith.constant 0 : i32
    %0 = arith.cmpi eq, %arg1, %c0_i32 : i32
    %1 = arith.extui %0 : i1 to i32
    %c0_i32_0 = arith.constant 0 : i32
    %2 = arith.cmpi ne, %1, %c0_i32_0 : i32
    scf.if %2 {
      %cst_31 = arith.constant 0.000000e+00 : f32
      %57 = vector.broadcast %cst_31 : f32 to vector<1x128xf32>
      %c0_32 = arith.constant 0 : index
      %c0_33 = arith.constant 0 : index
      %58 = vector.load %arg8[%c0_32, %c0_33] : memref<1x128xf32, #tpu.memory_space<vmem>>, vector<1x128xf32>
      tpu.vector_store %arg8[%c0_32, %c0_33], %57 {strides = array<i32>} : memref<1x128xf32, #tpu.memory_space<vmem>>, vector<1x128xf32>,
    } else {
    }
    %c0 = arith.constant 0 : index
    %c0_1 = arith.constant 0 : index
    %c0_2 = arith.constant 0 : index
    %3 = vector.load %arg2[%c0, %c0_1, %c0_2] : memref<1x16x512xf32, #tpu.memory_space<vmem>>, vector<1x16x512xf32>
    %4 = vector.shape_cast %3 : vector<1x16x512xf32> to vector<16x512xf32>
    %c0_3 = arith.constant 0 : index
    %c0_4 = arith.constant 0 : index
    %c0_5 = arith.constant 0 : index
    %5 = vector.load %arg3[%c0_3, %c0_4, %c0_5] : memref<1x8x512xf32, #tpu.memory_space<vmem>>, vector<1x8x512xf32>
    %6 = vector.shape_cast %5 : vector<1x8x512xf32> to vector<8x512xf32>
    %7 = tpu.concatenate %4, %6 in 0 : vector<16x512xf32>, vector<8x512xf32> -> vector<24x512xf32>
    %8 = vector.extract_strided_slice %7 {offsets = [0, 0], sizes = [16, 512], strides = [1, 1]} : vector<24x512xf32> to vector<16x512xf32>
    %9 = arith.truncf %8 : vector<16x512xf32> to vector<16x512xbf16>
    %c0_6 = arith.constant 0 : index
    %c0_7 = arith.constant 0 : index
    %10 = vector.load %arg4[%c0_6, %c0_7] : memref<2048x2304xbf16, #tpu.memory_space<vmem>>, vector<512x2304xbf16>
    %cst = arith.constant dense<0.000000e+00> : vector<16x2304xf32>
    %11 = tpu.matmul %9, %10, %cst {dimension_numbers = #tpu.dot_dimension_numbers<[1], [0], [0], [1], [0, 0, 1, 1], [], []>} : vector<16x512xbf16>, vector<512x2304xbf16>, vector<16x2304xf32> -> vector<16x2304xf32>
    %12 = vector.extract_strided_slice %7 {offsets = [1, 0], sizes = [16, 512], strides = [1, 1]} : vector<24x512xf32> to vector<16x512xf32>
    %13 = arith.truncf %12 : vector<16x512xf32> to vector<16x512xbf16>
    %c512 = arith.constant 512 : index
    %c0_8 = arith.constant 0 : index
    %14 = vector.load %arg4[%c512, %c0_8] : memref<2048x2304xbf16, #tpu.memory_space<vmem>>, vector<512x2304xbf16>
    %cst_9 = arith.constant dense<0.000000e+00> : vector<16x2304xf32>
    %15 = tpu.matmul %13, %14, %cst_9 {dimension_numbers = #tpu.dot_dimension_numbers<[1], [0], [0], [1], [0, 0, 1, 1], [], []>} : vector<16x512xbf16>, vector<512x2304xbf16>, vector<16x2304xf32> -> vector<16x2304xf32>
    %16 = arith.addf %11, %15 : vector<16x2304xf32>
    %17 = vector.extract_strided_slice %7 {offsets = [2, 0], sizes = [16, 512], strides = [1, 1]} : vector<24x512xf32> to vector<16x512xf32>
    %18 = arith.truncf %17 : vector<16x512xf32> to vector<16x512xbf16>
    %c1024 = arith.constant 1024 : index
    %c0_10 = arith.constant 0 : index
    %19 = vector.load %arg4[%c1024, %c0_10] : memref<2048x2304xbf16, #tpu.memory_space<vmem>>, vector<512x2304xbf16>
    %cst_11 = arith.constant dense<0.000000e+00> : vector<16x2304xf32>
    %20 = tpu.matmul %18, %19, %cst_11 {dimension_numbers = #tpu.dot_dimension_numbers<[1], [0], [0], [1], [0, 0, 1, 1], [], []>} : vector<16x512xbf16>, vector<512x2304xbf16>, vector<16x2304xf32> -> vector<16x2304xf32>
    %21 = arith.addf %16, %20 : vector<16x2304xf32>
    %22 = vector.extract_strided_slice %7 {offsets = [3, 0], sizes = [16, 512], strides = [1, 1]} : vector<24x512xf32> to vector<16x512xf32>
    %23 = arith.truncf %22 : vector<16x512xf32> to vector<16x512xbf16>
    %c1536 = arith.constant 1536 : index
    %c0_12 = arith.constant 0 : index
    %24 = vector.load %arg4[%c1536, %c0_12] : memref<2048x2304xbf16, #tpu.memory_space<vmem>>, vector<512x2304xbf16>
    %cst_13 = arith.constant dense<0.000000e+00> : vector<16x2304xf32>
    %25 = tpu.matmul %23, %24, %cst_13 {dimension_numbers = #tpu.dot_dimension_numbers<[1], [0], [0], [1], [0, 0, 1, 1], [], []>} : vector<16x512xbf16>, vector<512x2304xbf16>, vector<16x2304xf32> -> vector<16x2304xf32>
    %26 = arith.addf %21, %25 : vector<16x2304xf32>
    %27 = arith.mulf %26, %26 : vector<16x2304xf32>
    %c0_14 = arith.constant 0 : index
    %c0_15 = arith.constant 0 : index
    %28 = vector.load %arg5[%c0_14, %c0_15] : memref<2304x128xf32, #tpu.memory_space<vmem>>, vector<2304x128xf32>
    %cst_16 = arith.constant dense<0.000000e+00> : vector<16x128xf32>
    %29 = tpu.matmul %27, %28, %cst_16 {dimension_numbers = #tpu.dot_dimension_numbers<[1], [0], [0], [1], [0, 0, 1, 1], [], []>} : vector<16x2304xf32>, vector<2304x128xf32>, vector<16x128xf32> -> vector<16x128xf32>
    %cst_17 = arith.constant 1.000000e-10 : f32
    %30 = vector.broadcast %cst_17 : f32 to vector<16x128xf32>
    %31 = arith.maximumf %29, %30 : vector<16x128xf32>
    %32 = math.log %31 : vector<16x128xf32>
    %cst_18 = arith.constant 0.434294492 : f32
    %33 = vector.broadcast %cst_18 : f32 to vector<16x128xf32>
    %34 = arith.mulf %32, %33 : vector<16x128xf32>
    %cst_19 = arith.constant 1.000000e+01 : f32
    %35 = vector.broadcast %cst_19 : f32 to vector<16x128xf32>
    %36 = arith.mulf %35, %34 : vector<16x128xf32>
    %c0_20 = arith.constant 0 : index
    %c0_21 = arith.constant 0 : index
    %37 = vector.load %arg6[%c0_20, %c0_21] : memref<128x128xf32, #tpu.memory_space<vmem>>, vector<128x128xf32>
    %cst_22 = arith.constant dense<0.000000e+00> : vector<16x128xf32>
    %38 = tpu.matmul %36, %37, %cst_22 {dimension_numbers = #tpu.dot_dimension_numbers<[1], [0], [0], [1], [0, 0, 1, 1], [], []>} : vector<16x128xf32>, vector<128x128xf32>, vector<16x128xf32> -> vector<16x128xf32>
    %39 = tpu.iota {dimensions = array<i32: 0>} : vector<16x1xi32>
    %c16_i32 = arith.constant 16 : i32
    %40 = arith.muli %arg1, %c16_i32 : i32
    %41 = vector.broadcast %40 : i32 to vector<16x1xi32>
    %42 = arith.addi %39, %41 : vector<16x1xi32>
    %c9_i32 = arith.constant 9 : i32
    %43 = vector.broadcast %c9_i32 : i32 to vector<16x1xi32>
    %44 = arith.cmpi slt, %42, %43 : vector<16x1xi32>
    %cst_23 = arith.constant 0.000000e+00 : f32
    %45 = vector.shape_cast %44 : vector<16x1xi1> to vector<16x1xi1>
    %46 = vector.broadcast %45 : vector<16x1xi1> to vector<16x128xi1>
    %47 = vector.broadcast %cst_23 : f32 to vector<16x128xf32>
    %48 = arith.select %46, %38, %47 : vector<16x128xi1>, vector<16x128xf32>
    %c0_24 = arith.constant 0 : index
    %c0_25 = arith.constant 0 : index
    %49 = vector.load %arg8[%c0_24, %c0_25] : memref<1x128xf32, #tpu.memory_space<vmem>>, vector<1x128xf32>
    %cst_26 = arith.constant dense<0.000000e+00> : vector<128xf32>
    %50 = vector.multi_reduction <add>, %48, %cst_26 [0] : vector<16x128xf32> to vector<128xf32>
    %51 = vector.shape_cast %50 : vector<128xf32> to vector<1x128xf32>
    %52 = arith.addf %49, %51 : vector<1x128xf32>
    %c0_27 = arith.constant 0 : index
    %c0_28 = arith.constant 0 : index
    %53 = vector.load %arg8[%c0_27, %c0_28] : memref<1x128xf32, #tpu.memory_space<vmem>>, vector<1x128xf32>
    tpu.vector_store %arg8[%c0_27, %c0_28], %52 {strides = array<i32>} : memref<1x128xf32, #tpu.memory_space<vmem>>, vector<1x128xf32>,
    %c0_i32_29 = arith.constant 0 : i32
    %54 = arith.cmpi eq, %arg1, %c0_i32_29 : i32
    %55 = arith.extui %54 : i1 to i32
    %c0_i32_30 = arith.constant 0 : i32
    %56 = arith.cmpi ne, %55, %c0_i32_30 : i32
    scf.if %56 {
      %c0_31 = arith.constant 0 : index
      %c0_32 = arith.constant 0 : index
      %57 = vector.load %arg8[%c0_31, %c0_32] : memref<1x128xf32, #tpu.memory_space<vmem>>, vector<1x128xf32>
      %cst_33 = arith.constant 0.111111112 : f32
      %58 = vector.broadcast %cst_33 : f32 to vector<1x128xf32>
      %59 = arith.mulf %57, %58 : vector<1x128xf32>
      %60 = vector.shape_cast %59 : vector<1x128xf32> to vector<1x1x128xf32>
      %c0_34 = arith.constant 0 : index
      %c0_35 = arith.constant 0 : index
      %c0_36 = arith.constant 0 : index
      %61 = vector.load %arg7[%c0_34, %c0_35, %c0_36] : memref<1x1x128xf32, #tpu.memory_space<vmem>>, vector<1x1x128xf32>
      tpu.vector_store %arg7[%c0_34, %c0_35, %c0_36], %60 {strides = array<i32>} : memref<1x1x128xf32, #tpu.memory_space<vmem>>, vector<1x1x128xf32>,
    } else {
    }
    return
  }
  func.func @transform_0(%arg0: i32, %arg1: i32) -> (i32, i32, i32) {
    %c0_i32 = arith.constant 0 : i32
    %c0_i32_0 = arith.constant 0 : i32
    return %arg0, %arg1, %c0_i32 : i32, i32, i32
  }
  func.func @transform_1(%arg0: i32, %arg1: i32) -> (i32, i32, i32) {
    %c1_i32 = arith.constant 1 : i32
    %0 = arith.addi %arg1, %c1_i32 : i32
    %c2_i32 = arith.constant 2 : i32
    %1 = arith.muli %0, %c2_i32 : i32
    %c0_i32 = arith.constant 0 : i32
    %c0_i32_0 = arith.constant 0 : i32
    return %arg0, %1, %c0_i32 : i32, i32, i32
  }
  func.func @transform_2(%arg0: i32, %arg1: i32) -> (i32, i32) {
    %c0_i32 = arith.constant 0 : i32
    %c0_i32_0 = arith.constant 0 : i32
    %c0_i32_1 = arith.constant 0 : i32
    return %c0_i32, %c0_i32_0 : i32, i32
  }
  func.func @transform_3(%arg0: i32, %arg1: i32) -> (i32, i32) {
    %c0_i32 = arith.constant 0 : i32
    %c0_i32_0 = arith.constant 0 : i32
    %c0_i32_1 = arith.constant 0 : i32
    return %c0_i32, %c0_i32_0 : i32, i32
  }
  func.func @transform_4(%arg0: i32, %arg1: i32) -> (i32, i32) {
    %c0_i32 = arith.constant 0 : i32
    %c0_i32_0 = arith.constant 0 : i32
    %c0_i32_1 = arith.constant 0 : i32
    return %c0_i32, %c0_i32_0 : i32, i32
  }
  func.func @transform_5(%arg0: i32, %arg1: i32) -> (i32, i32, i32) {
    %c0_i32 = arith.constant 0 : i32
    %c0_i32_0 = arith.constant 0 : i32
    %c0_i32_1 = arith.constant 0 : i32
    return %arg0, %c0_i32, %c0_i32_0 : i32, i32, i32
  }
}

</mosaic_0001>

<bundles_post_ra>
// kernel: tpu_custom_call.1
= control target key start
LH: loop header
LB: loop body
LE: loop exit
PB: predicated region body
PF: predicated region fallthrough
CT: control target
= control target key end

     0   :  { %s26318_s0 = inlined_call_operand.hbm [shape: f32[2,24,512], index: 0, kind: input, shape index: {}]   ;;  %s26319_s1 = inlined_call_operand.hbm [shape: f32[2,24,512], index: 1, kind: input, shape index: {}]   ;;  %s26320_s2 = inlined_call_operand.hbm [shape: bf16[2048,2304], index: 2, kind: input, shape index: {}]   ;;  %s26321_s3 = inlined_call_operand.hbm [shape: f32[2304,128], index: 3, kind: input, shape index: {}]   ;;  %s26322_s4 = inlined_call_operand.hbm [shape: f32[128,128], index: 4, kind: input, shape index: {}]   ;;  %s26323_s5 = inlined_call_operand.hbm [shape: f32[2,1,128], index: 5, kind: output, shape index: {}]  }
   0x1   :  { %26346 = sst [smem:[#allocation49_spill]] %s26318_s0 }
   0x2   :  { %26347 = sst [smem:[#allocation50_spill]] %s26320_s2 }
   0x3   :  { %26348 = sst [smem:[#allocation51_spill]] %s26321_s3 }
   0x4   :  { %26349 = sst [smem:[#allocation52_spill]] %s26322_s4 }
   0x5   :  { %10 = vsyncpa [#allocation4], 0 }
   0x6   :  { %12 = vsyncpa [#allocation4 + $0x1], 0 }
   0x7   :  { %13 = vsyncpa [#allocation7], 0 }
   0x8   :  { %15 = vsyncpa [#allocation7 + $0x1], 0 }
   0x9   :  { %16 = vsyncpa [#allocation10], 0 }
   0xa   :  { %17 = vsyncpa [#allocation5], 0 }
   0xb   :  { %19 = vsyncpa [#allocation5 + $0x1], 0  ;;  %s25334_s18 = smov 0   ;;  %s25336_s19 = smov 0  }
   0xc   :  { %s25338_s20 = smov 0   ;;  %s25340_s21 = smov 0  }
   0xd   :  { %s25342_s22 = smov 0   ;;  %s25344_s23 = smov 0  }
   0xe LB: > { %26350 = sst [smem:[#allocation18_spill]] %s25277_s20  ;;  %s25365_s24 = sadd.s32 4294967295, %s25289_s23   ;;  %s25289_s23 = sphi %s25344_s23, %s25_s23   ;;  %s25285_s22 = sphi %s25342_s22, %s26461_s22   ;;  %s25281_s21 = sphi %s25340_s21, %s26460_s21   ;;  %s25277_s20 = sphi %s25338_s20, %s26456_s20   ;;  %s25273_s19 = sphi %s25336_s19, %s26459_s19   ;;  %s25269_s18 = sphi %s25334_s18, %s26458_s18  }
   0xf   : > { %26351 = sst [smem:[#allocation19_spill]] %s25289_s23  ;;  %s18778_s25 = sadd.s32 4294967294, %s25289_s23  }
  0x10   : > { %p59_p0 = scmp.ne.s32.totalorder %s25273_s19, %s25269_s18  ;;  %p26324_p1 = scmp.eq.s32.totalorder %s25365_s24, 0 }
  0x11   : > { %p184_p3 = scmp.eq.s32.totalorder %s18778_s25, 1  ;;  %p18779_p5 = scmp.ge.s32.totalorder %s25289_s23, 1 }
  0x12   : > { %p25374_p4 = por %p26324_p1, %p59_p0  ;;  %p191_p7 = scmp.lt.s32.totalorder %s25289_s23, 3 }
  0x13   : > { %p25379_p6 = por %p184_p3, %p59_p0  ;;  %s25291_s29 = smov [#allocation8]  }
  0x14   : > { %p25384_p8 = pnand %p18779_p5, %p191_p7  ;;  %s203_s30 = sshll.u32 %s25291_s29, 4  ;;  %s204_s30 = int_to_ptr.vmem [resolvable:$true] %s203_s30 }
  0x15   : > { %s26353_s27 = scalar_select %p25379_p6, 1, 0 }
  0x16   : > { %p21515_p9 = pneg %p25384_p8  ;;  %s25292_s7 = smov [#allocation9]  }
  0x17   : > { %s216_s8 = sshll.u32 %s25292_s7, 4  ;;  %s25073_s9 = scalar_lea.vmem %s204_s30, 294912  ;;  %s217_s8 = int_to_ptr.vmem [resolvable:$true] %s216_s8 }
  0x18   : > { %p25393_p11 = pnand %p21515_p9, %p26324_p1  ;;  %p25074_p13 = scmp.ne.s32.totalorder %s204_s30, %s25073_s9 }
  0x19   : > { %p25081_p5 = scmp.lt.s32.totalorder %s204_s30, %s204_s30  ;;  %p25082_p7 = scmp.lt.s32.totalorder %s25073_s9, %s25073_s9 }
  0x1a   : > { %p25064_p12 = pneg %p25393_p11 }
  0x1b   : > { %p25083_p10 = por %p25082_p7, %p25081_p5 }
  0x1c   : > { %p25076_p0 = pnand %p25074_p13, %p25064_p12 }
  0x1e   : > { %p25077_p3 = pneg %p25076_p0 }
  0x20   : > { %p25084_p9 = pnand %p25083_p10, %p25077_p3 }
  0x22   : > { %25087 = shalt.err (!%p25084_p9)
}
  0x23   : > { %s25293_s10 = smov 1152   ;;  %s25294_s11 = smov 72  }
  0x24   : > { %s26356_s2 = sld [smem:[#allocation50_spill]]  ;;  %s25099_s14 = scalar_lea.vmem %s217_s8, 36864 }
  0x25   : > { %p25100_p1 = scmp.ne.s32.totalorder %s217_s8, %s25099_s14  ;;  %p25107_p2 = scmp.lt.s32.totalorder %s217_s8, %s217_s8 }
  0x26   : > { %p25108_p6 = scmp.lt.s32.totalorder %s25099_s14, %s25099_s14 }
  0x27   : > { %p25102_p13 = pnand %p25100_p1, %p25064_p12 }
  0x28   : > { %p25109_p5 = por %p25108_p6, %p25107_p2 }
  0x29   : > { %p25103_p0 = pneg %p25102_p13 }
  0x2a   : > { %21518 = dma.hbm_to_vmem [thread:$0]  (!%p25393_p11), %s26356_s2, 294912, %s204_s30, [#allocation7], %s25293_s10, %s25293_s10, %s25294_s11  }
  0x2b   : > { %p25110_p10 = pnand %p25109_p5, %p25103_p0 }
  0x2d   : > { %25113 = shalt.err (!%p25110_p10)
}
  0x2e   : > { %s25295_s15 = smov 128   ;;  %s25296_s16 = smov 8  }
  0x2f   : > { %s26357_s3 = sld [smem:[#allocation51_spill]]  ;;  %s25297_s29 = smov [#allocation11]  }
  0x30   : > { %s229_s30 = sshll.u32 %s25297_s29, 4  ;;  %s230_s30 = int_to_ptr.vmem [resolvable:$true] %s229_s30 }
  0x31   : > { %s25125_s7 = scalar_lea.vmem %s230_s30, 2048  ;;  %p25133_p6 = scmp.lt.s32.totalorder %s230_s30, %s230_s30 }
  0x32   : > { %p25126_p1 = scmp.ne.s32.totalorder %s230_s30, %s25125_s7  ;;  %p25134_p7 = scmp.lt.s32.totalorder %s25125_s7, %s25125_s7 }
  0x34   : > { %p25128_p3 = pnand %p25126_p1, %p25064_p12  ;;  %p25135_p9 = por %p25134_p7, %p25133_p6 }
  0x35   : > { %21521 = dma.hbm_to_vmem [thread:$0]  (!%p25393_p11), %s26357_s3, 36864, %s217_s8, [#allocation10], %s25295_s15, %s25295_s15, %s25296_s16  }
  0x36   : > { %p25129_p2 = pneg %p25128_p3 }
  0x38   : > { %p25136_p13 = pnand %p25135_p9, %p25129_p2 }
  0x3a   : > { %25139 = shalt.err (!%p25136_p13)
}
  0x3b   : > { %s26358_s4 = sld [smem:[#allocation52_spill]]  ;;  %s37_s8 = sadd.s32 1, %s25285_s22 }
  0x3c   : > { %p39_p12 = scmp.ge.s32.totalorder %s37_s8, 2  ;;  %s46_s11 = sadd.s32 1, %s25277_s20 }
  0x3d   : > { %p53_p0 = scmp.ne.s32.totalorder %s25277_s20, %s25273_s19  ;;  %p54_p5 = scmp.eq.s32.totalorder %s25289_s23, 0 }
  0x3e   : > { %s26463_s8 = smov (%p39_p12, %s37_s8), 0  ;;  %p26360_p1 = scmp.eq.s32.totalorder %s25365_s24, 1 }
  0x3f   : > { %26359 = sst [smem:[#allocation20_spill]] %s26463_s8  ;;  %p55_p10 = por %p54_p5, %p53_p0 }
  0x40   : > { %p25432_p3 = por %p26360_p1, %p53_p0  ;;  %s41_s12 = ssub.s32 %s25285_s22, %s26463_s8 }
  0x41   : > { %21524 = dma.hbm_to_vmem [thread:$0]  (!%p25393_p11), %s26358_s4, 2048, %s230_s30, [#allocation10], %s25295_s15, %s25295_s15, %s25296_s16  }
  0x42   : > { %p21539_p2 = scmp.lt.s32.totalorder %s25289_s23, 2  ;;  %p44_p6 = scmp.eq.s32.totalorder %s41_s12, 0 }
  0x43   : > { %s25440_s13 = sand.u32 1, %s25277_s20   ;;  %s26325_s16 = smul.u32 1536, %s25285_s22 }
  0x44   : > { %s18784_s14 = sshll.u32 %s25440_s13, 6  ;;  %p25447_p11 = pnand %p21539_p2, %p55_p10 }
  0x45   : > { %s25444_s15 = scalar_select %p44_p6, %s25277_s20, %s46_s11  }
  0x46   : > { %s247_s17 = scalar_lea.vmem [#allocation3], %s18784_s14  ;;  %s26364_s0 = sld [smem:[#allocation49_spill]] }
  0x47   : > { %26362 = sst [smem:[#allocation21_spill]] %s25444_s15  ;;  %s264_s25 = sshll.u32 %s247_s17, 4  ;;  %s265_s25 = int_to_ptr.vmem [resolvable:$true] %s264_s25 }
  0x48   : > { %s274_s10 = sand.u32 1, %s25289_s23   ;;  %s244_s12 = scalar_lea.sflag [#allocation4], %s25440_s13 }
  0x49   : > { %p25142_p7 = pneg %p25447_p11  ;;  %s25153_s11 = scalar_lea.vmem %s265_s25, 1024 }
  0x4a   : > { %p25154_p9 = scmp.ne.s32.totalorder %s265_s25, %s25153_s11  ;;  %s25298_s14 = smov [#allocation3]  }
  0x4b   : > { %s25158_s17 = sshll.u32 %s25298_s14, 4  ;;  %s25159_s17 = int_to_ptr.vmem [resolvable:$false] %s25158_s17 }
  0x4c   : > { %s262_s9 = scalar_lea.hbm %s26364_s0, %s26325_s16  ;;  %p25156_p13 = pnand %p25154_p9, %p25142_p7 }
  0x4d   : > { %s25160_s2 = scalar_lea.vmem %s25159_s17, 2048  ;;  %p25161_p0 = scmp.lt.s32.totalorder %s265_s25, %s25159_s17 }
  0x4e   : > { %p25157_p12 = pneg %p25156_p13  ;;  %p25162_p5 = scmp.lt.s32.totalorder %s25160_s2, %s25153_s11 }
  0x50   : > { %p25163_p10 = por %p25162_p5, %p25161_p0 }
  0x52   : > { %p25164_p1 = pnand %p25163_p10, %p25157_p12 }
  0x54   : > { %25167 = shalt.err (!%p25164_p1)
}
  0x55   : > { %s25299_s30 = smov 512   ;;  %s25300_s7 = smov 32  }
  0x56   : > { %21528 = dma.hbm_to_vmem [thread:$0]  (!%p25447_p11), %s262_s9, 1024, %s265_s25, %s244_s12, %s25299_s30, %s25299_s30, %s25300_s7  }
  0x57   : > { %s18786_s16 = sshll.u32 %s25440_s13, 5  ;;  %s26365_s0 = smul.u32 1536, %s25285_s22 }
  0x58   : > { %s278_s17 = scalar_lea.vmem [#allocation6], %s18786_s16  ;;  %s275_s11 = scalar_lea.sflag [#allocation7], %s274_s10 }
  0x59   : > { %s18687_s14 = scalar_lea.hbm %s26319_s1, %s26365_s0  ;;  %s290_s2 = sshll.u32 %s278_s17, 4  ;;  %s291_s2 = int_to_ptr.vmem [resolvable:$true] %s290_s2 }
  0x5a   : > { %s18688_s8 = scalar_lea.hbm %s18687_s14, 1024  ;;  %s25181_s15 = scalar_lea.vmem %s291_s2, 512 }
  0x5b   : > { %p25182_p2 = scmp.ne.s32.totalorder %s291_s2, %s25181_s15  ;;  %s25301_s20 = smov [#allocation6]  }
  0x5c   : > { %s25186_s23 = sshll.u32 %s25301_s20, 4  ;;  %s25187_s23 = int_to_ptr.vmem [resolvable:$false] %s25186_s23 }
  0x5d   : > { %p25184_p6 = pnand %p25182_p2, %p25142_p7  ;;  %s25188_s13 = scalar_lea.vmem %s25187_s23, 1024 }
  0x5e   : > { %p25189_p13 = scmp.lt.s32.totalorder %s291_s2, %s25187_s23  ;;  %p25190_p12 = scmp.lt.s32.totalorder %s25188_s13, %s25181_s15 }
  0x5f   : > { %p25185_p9 = pneg %p25184_p6 }
  0x60   : > { %p25191_p0 = por %p25190_p12, %p25189_p13 }
  0x62   : > { %p25192_p5 = pnand %p25191_p0, %p25185_p9 }
  0x64   : > { %25195 = shalt.err (!%p25192_p5)
}
  0x65   : > { %21531 = dma.hbm_to_vmem [thread:$0]  (!%p25447_p11), %s18688_s8, 512, %s291_s2, %s275_s11  }
  0x66   : > { %299 = sbr.rel (%p25384_p8) target bundleno = 3087 (0xc0f), region = 40 }
  0x6b   : > { %s25479_s0 = sand.u32 1, %s25273_s19  }
  0x6c   : > { %s18789_s3 = sshll.u32 %s25479_s0, 6  ;;  %s302_s4 = scalar_lea.sflag [#allocation4], %s25479_s0 }
  0x6d   : > { %s25483_s20 = scalar_lea.vmem [#allocation3], %s18789_s3 }
  0x6e   : > { %25248 = dma.done.wait (%p25374_p4), %s302_s4, 1024  }
  0x6f   : > { %25250 = vsyncadd (%p25374_p4), %s302_s4, 4294966272  ;;  %s310_s23 = sand.u32 1, %s25365_s24   ;;  %s18790_s28 = sshll.u32 %s25479_s0, 5 }
  0x70   : > { %s311_s8 = scalar_lea.sflag [#allocation7], %s310_s23  ;;  %s25491_s15 = scalar_lea.vmem [#allocation6], %s18790_s28 }
  0x71   : > { %25252 = dma.done.wait (%p25374_p4), %s311_s8, 512  }
  0x72   : > { %25254 = vsyncadd (%p25374_p4), %s311_s8, 4294966784  ;;  %p26366_p8 = scmp.eq.s32.totalorder %s25365_s24, 0 }
  0x74   : > { %25256 = dma.done.wait (%p26366_p8), [#allocation7], 294912   ;;  %p26367_p11 = pmov %p26366_p8 }
  0x75   : > { %p26368_p7 = pmov %p26366_p8 }
  0x76   : > { %25258 = vsyncadd (%p26367_p11), [#allocation7], 4294672384 }
  0x77   : > { %25260 = dma.done.wait (%p26368_p7), [#allocation10], 38912   ;;  %p26369_p10 = pmov %p26368_p7 }
  0x78   : > { %v21602_v0 = vld [vmem:[#allocation8 + $0x15f4] ss:$72 sps:$4 sm:$0xff]   ;;  %v21606_v2 = vld [vmem:[#allocation8 + $0x15f0] ss:$72 sps:$4 sm:$0xff]   ;;  %v21608_v4 = vld [vmem:[#allocation8 + $0x1564] ss:$72 sps:$4 sm:$0xff]  }
  0x79   : > { %25262 = vsyncadd (%p26369_p10), [#allocation10], 4294928384  ;;  %v21604_v1 = vld [vmem:[#allocation8 + $0x1ef4] ss:$72 sps:$4 sm:$0xff]   ;;  %4475 = vmatprep.subr.bf16.mxu0 %v21602_v0  ;;  %v21607_v3 = vld [vmem:[#allocation8 + $0x1ef0] ss:$72 sps:$4 sm:$0xff]  }
  0x7a   : > { %4518 = vmatprep.subr.bf16.mxu1 %v21604_v1  ;;  %4476 = vmatpush1.bf16.msra.mxu0 %v21606_v2  ;;  %v21610_v5 = vld [vmem:[#allocation8 + $0x1e64] ss:$72 sps:$4 sm:$0xff]   ;;  %v21612_v6 = vld [vmem:[#allocation8 + $0x1560] ss:$72 sps:$4 sm:$0xff]   ;;  %v21614_v8 = vld [vmem:[#allocation8 + $0x14d4] ss:$72 sps:$4 sm:$0xff]  }
  0x7b   : > { %4519 = vmatpush1.bf16.msra.mxu1 %v21607_v3  ;;  %4477 = vmatprep.subr.bf16.mxu0 %v21608_v4  ;;  %v21613_v7 = vld [vmem:[#allocation8 + $0x1e60] ss:$72 sps:$4 sm:$0xff]   ;;  %v21616_v9 = vld [vmem:[#allocation8 + $0x1dd4] ss:$72 sps:$4 sm:$0xff]   ;;  %v21618_v10 = vld [vmem:[#allocation8 + $0x14d0] ss:$72 sps:$4 sm:$0xff]  }
  0x7c   : > { %4520 = vmatprep.subr.bf16.mxu1 %v21610_v5  ;;  %v21619_v11 = vld [vmem:[#allocation8 + $0x1dd0] ss:$72 sps:$4 sm:$0xff]   ;;  %v21620_v12 = vld [vmem:[#allocation8 + $0x1444] ss:$72 sps:$4 sm:$0xff]   ;;  %v21624_v14 = vld [vmem:[#allocation8 + $0x1440] ss:$72 sps:$4 sm:$0xff]  }
  0x7d   : > { %v21622_v13 = vld [vmem:[#allocation8 + $0x1d44] ss:$72 sps:$4 sm:$0xff]   ;;  %v21625_v15 = vld [vmem:[#allocation8 + $0x1d40] ss:$72 sps:$4 sm:$0xff]   ;;  %v21626_v16 = vld [vmem:[#allocation8 + $0x13b4] ss:$72 sps:$4 sm:$0xff]  }
  0x7e   : > { %4478 = vmatpush1.bf16.msra.mxu0 %v21612_v6  ;;  %v21628_v17 = vld [vmem:[#allocation8 + $0x1cb4] ss:$72 sps:$4 sm:$0xff]   ;;  %v21630_v18 = vld [vmem:[#allocation8 + $0x13b0] ss:$72 sps:$4 sm:$0xff]   ;;  %v21632_v20 = vld [vmem:[#allocation8 + $0x1324] ss:$72 sps:$4 sm:$0xff]  }
  0x7f   : > { %4521 = vmatpush1.bf16.msra.mxu1 %v21613_v7  ;;  %4479 = vmatprep.subr.bf16.mxu0 %v21614_v8  ;;  %v21631_v19 = vld [vmem:[#allocation8 + $0x1cb0] ss:$72 sps:$4 sm:$0xff]   ;;  %v21634_v21 = vld [vmem:[#allocation8 + $0x1c24] ss:$72 sps:$4 sm:$0xff]   ;;  %v21636_v22 = vld [vmem:[#allocation8 + $0x1320] ss:$72 sps:$4 sm:$0xff]  }
  0x80   : > { %4522 = vmatprep.subr.bf16.mxu1 %v21616_v9  ;;  %v21637_v23 = vld [vmem:[#allocation8 + $0x1c20] ss:$72 sps:$4 sm:$0xff]   ;;  %v21638_v24 = vld [vmem:[#allocation8 + $0x1294] ss:$72 sps:$4 sm:$0xff]   ;;  %v21642_v26 = vld [vmem:[#allocation8 + $0x1290] ss:$72 sps:$4 sm:$0xff]  }
  0x81   : > { %v21640_v25 = vld [vmem:[#allocation8 + $0x1b94] ss:$72 sps:$4 sm:$0xff]   ;;  %v21643_v27 = vld [vmem:[#allocation8 + $0x1b90] ss:$72 sps:$4 sm:$0xff]   ;;  %v21644_v28 = vld [vmem:[#allocation8 + $0x1204] ss:$72 sps:$4 sm:$0xff]  }
  0x82   : > { %4480 = vmatpush1.bf16.msra.mxu0 %v21618_v10  ;;  %v21646_v29 = vld [vmem:[#allocation8 + $0x1b04] ss:$72 sps:$4 sm:$0xff]   ;;  %v21648_v30 = vld [vmem:[#allocation8 + $0x1200] ss:$72 sps:$4 sm:$0xff]   ;;  %v21650_v32 = vld [vmem:[#allocation8 + $0x1a74] ss:$72 sps:$4 sm:$0xff]  }
  0x83   : > { %4523 = vmatpush1.bf16.msra.mxu1 %v21619_v11  ;;  %4481 = vmatprep.subr.bf16.mxu0 %v21620_v12  ;;  %v21649_v31 = vld [vmem:[#allocation8 + $0x1b00] ss:$72 sps:$4 sm:$0xff]   ;;  %v21652_v33 = vld [vmem:[#allocation8 + $0x2374] ss:$72 sps:$4 sm:$0xff]   ;;  %v21654_v34 = vld [vmem:[#allocation8 + $0x1a70] ss:$72 sps:$4 sm:$0xff]  }
  0x84   : > { %4524 = vmatprep.subr.bf16.mxu1 %v21622_v13  ;;  %v21655_v35 = vld [vmem:[#allocation8 + $0x2370] ss:$72 sps:$4 sm:$0xff]   ;;  %v21656_v36 = vld [vmem:[#allocation8 + $0x19e4] ss:$72 sps:$4 sm:$0xff]   ;;  %v21660_v38 = vld [vmem:[#allocation8 + $0x19e0] ss:$72 sps:$4 sm:$0xff]  }
  0x85   : > { %v21658_v37 = vld [vmem:[#allocation8 + $0x22e4] ss:$72 sps:$4 sm:$0xff]   ;;  %v21661_v39 = vld [vmem:[#allocation8 + $0x22e0] ss:$72 sps:$4 sm:$0xff]   ;;  %v21662_v40 = vld [vmem:[#allocation8 + $0x1954] ss:$72 sps:$4 sm:$0xff]  }
  0x86   : > { %4482 = vmatpush1.bf16.msra.mxu0 %v21624_v14  ;;  %v21664_v41 = vld [vmem:[#allocation8 + $0x2254] ss:$72 sps:$4 sm:$0xff]   ;;  %v21666_v42 = vld [vmem:[#allocation8 + $0x1950] ss:$72 sps:$4 sm:$0xff]   ;;  %v21668_v44 = vld [vmem:[#allocation8 + $0x18c4] ss:$72 sps:$4 sm:$0xff]  }
  0x87   : > { %4525 = vmatpush1.bf16.msra.mxu1 %v21625_v15  ;;  %4483 = vmatprep.subr.bf16.mxu0 %v21626_v16  ;;  %v21667_v43 = vld [vmem:[#allocation8 + $0x2250] ss:$72 sps:$4 sm:$0xff]   ;;  %v21670_v45 = vld [vmem:[#allocation8 + $0x21c4] ss:$72 sps:$4 sm:$0xff]   ;;  %v21672_v46 = vld [vmem:[#allocation8 + $0x18c0] ss:$72 sps:$4 sm:$0xff]  }
  0x88   : > { %4526 = vmatprep.subr.bf16.mxu1 %v21628_v17  ;;  %v21673_v47 = vld [vmem:[#allocation8 + $0x21c0] ss:$72 sps:$4 sm:$0xff]   ;;  %v373_v51 = vld [vmem:[%s25483_s20 + $0x18] sm:$0xff]  ;;  %vm1542_vm0 = vsmask.f32 7424  ;;  %v372_v3 = vld [vmem:[%s25483_s20 + $0x10] sm:$0xff] }
  0x89   : > { %v371_v48 = vld [vmem:[%s25483_s20 + $0x8] sm:$0xff]  ;;  %v21674_v52 = vld [vmem:[#allocation8 + $0x1834] ss:$72 sps:$4 sm:$0xff]   ;;  %v370_v60 = vld [vmem:[%s25483_s20] sm:$0xff]  ;;  %vm9487_vm1 = vcmask 1046528   ;;  %s21098_s24 = sshll.u32 %s25281_s21, 4 }
  0x8a   : > { %4484 = vmatpush1.bf16.msra.mxu0 %v21630_v18  ;;  %v375_v49 = vld [vmem:[%s25483_s20 + $0x28] sm:$0xff]  ;;  %v377_v55 = vld [vmem:[%s25483_s20 + $0x38] sm:$0xff]  ;;  %v374_v61 = vld [vmem:[%s25483_s20 + $0x20] sm:$0xff]  ;;  %vm13770_vm2 = vsmask.f32 6400  ;;  %s356_s26 = scalar_lea.vmem [#allocation12], %s25479_s0  ;;  %s18643_s9 = scalar_lea.hbm %s26323_s5, %s21098_s24 }
  0x8b   : > { %4527 = vmatpush1.bf16.msra.mxu1 %v21631_v19  ;;  %4485 = vmatprep.subr.bf16.mxu0 %v21632_v20  ;;  %v379_v50 = vld [vmem:[%s25491_s15 + $0x8] sm:$0xff]  ;;  %v25509_v53 = vpack.c.bf16 %v375_v49, %v371_v48  ;;  %v381_v56 = vld [vmem:[%s25491_s15 + $0x18] sm:$0xff]  ;;  %v25515_v58 = vpack.c.bf16 %v377_v55, %v373_v51  ;;  %v376_v4 = vld [vmem:[%s25483_s20 + $0x30] sm:$0xff]  ;;  %v25534_v13 = vpack.c.bf16 %v374_v61, %v370_v60  ;;  %s18645_s16 = sshll.u32 %s356_s26, 4  ;;  %s18633_s10 = scalar_lea.sflag [#allocation5], %s25479_s0  ;;  %s18646_s16 = int_to_ptr.vmem [resolvable:$true] %s18645_s16 }
  0x8c   : > { %4528 = vmatprep.subr.bf16.mxu1 %v21634_v21  ;;  %v25511_v54 = vpack.c.bf16 %v379_v50, %v379_v50  ;;  %v21676_v57 = vld [vmem:[#allocation8 + $0x2134] ss:$72 sps:$4 sm:$0xff]   ;;  %v25517_v59 = vpack.c.bf16 %v381_v56, %v381_v56  ;;  %v21678_v62 = vld [vmem:[#allocation8 + $0x1830] ss:$72 sps:$4 sm:$0xff]   ;;  %v21680_v5 = vld [vmem:[#allocation8 + $0x17a4] ss:$72 sps:$4 sm:$0xff]   ;;  %v25541_v17 = vpack.c.bf16 %v376_v4, %v372_v3 }
  0x8d   : > { %26370 = vst [vmem:[#allocation22_spill] sm:$0xff] %v25509_v53  ;;  %26371 = vst [vmem:[#allocation23_spill] sm:$0xff] %v25515_v58  ;;  %v21679_v63 = vld [vmem:[#allocation8 + $0x2130] ss:$72 sps:$4 sm:$0xff]   ;;  %v26341_v0 = vshrl.u32 %v25509_v53, 16  ;;  %v26340_v1 = vshll.u32 %v25509_v53, 16 }
  0x8e   : > { %4486 = vmatpush1.bf16.msra.mxu0 %v21636_v22  ;;  %v26339_v2 = vshll.u32 %v25511_v54, 16  ;;  %v26338_v6 = vshrl.u32 %v25515_v58, 16  ;;  %v26337_v7 = vshll.u32 %v25515_v58, 16  ;;  %v26336_v8 = vshll.u32 %v25517_v59, 16  ;;  %v21682_v9 = vld [vmem:[#allocation8 + $0x20a4] ss:$72 sps:$4 sm:$0xff]  }
  0x8f   : > { %4529 = vmatpush1.bf16.msra.mxu1 %v21637_v23  ;;  %4487 = vmatprep.subr.bf16.mxu0 %v21638_v24  ;;  %v1560_v10 = vrot.slane %v26340_v1, 1  ;;  %v378_v12 = vld [vmem:[%s25491_s15] sm:$0xff]  ;;  %v380_v14 = vld [vmem:[%s25491_s15 + $0x10] sm:$0xff]  ;;  %s25197_s12 = scalar_lea.vmem %s18646_s16, 16  ;;  %s25303_s30 = smov [#allocation12]  }
  0x90   : > { %4530 = vmatprep.subr.bf16.mxu1 %v21640_v25  ;;  %v1565_v11 = vrot.slane %v26339_v2, 1  ;;  %v1584_v15 = vrot.slane %v26337_v7, 1  ;;  %v1589_v16 = vrot.slane %v26336_v8, 1  ;;  %v21684_v19 = vld [vmem:[#allocation8 + $0x17a0] ss:$72 sps:$4 sm:$0xff]   ;;  %v25547_v22 = vpack.c.bf16 %v378_v12, %v378_v12  ;;  %p25198_p4 = scmp.ne.s32.totalorder %s18646_s16, %s25197_s12  ;;  %s25201_s7 = sshll.u32 %s25303_s30, 4  ;;  %s25202_s7 = int_to_ptr.vmem [resolvable:$false] %s25201_s7 }
  0x91   : > { %v1561_v18 = vor.u32 %v1560_v10, %v26341_v0  ;;  %v21685_v20 = vld [vmem:[#allocation8 + $0x20a0] ss:$72 sps:$4 sm:$0xff]   ;;  %v21686_v23 = vld [vmem:[#allocation8 + $0x1714] ss:$72 sps:$4 sm:$0xff]   ;;  %v26334_v25 = vshll.u32 %v25534_v13, 16  ;;  %s25203_s21 = scalar_lea.vmem %s25202_s7, 32  ;;  %p25204_p6 = scmp.lt.s32.totalorder %s18646_s16, %s25202_s7 }
  0x92   : > { %4488 = vmatpush1.bf16.msra.mxu0 %v21642_v26  ;;  %v1585_v21 = vor.u32 %v1584_v15, %v26338_v6  ;;  %v25553_v26 = vpack.c.bf16 %v380_v14, %v380_v14  ;;  %v21698_v48 = vld [vmem:[#allocation8 + $0x15f8] ss:$72 sps:$4 sm:$0xff]   ;;  %v21709_v55 = vld [vmem:[#allocation8 + $0x1e6c] ss:$72 sps:$4 sm:$0xff]   ;;  %v21704_v56 = vld [vmem:[#allocation8 + $0x1568] ss:$72 sps:$4 sm:$0xff]   ;;  %p25199_p1 = pnand %p25198_p4, %p25432_p3  ;;  %p25205_p9 = scmp.lt.s32.totalorder %s25203_s21, %s25197_s12 }
  0x93   : > { %4531 = vmatpush1.bf16.msra.mxu1 %v21643_v27  ;;  %4489 = vmatprep.subr.bf16.mxu0 %v21644_v28  ;;  %v25550_v24 = vsel %vm1542_vm0, %v1561_v18, %v1565_v11  ;;  %v26331_v27 = vshll.u32 %v25541_v17, 16  ;;  %v21688_v28 = vld [vmem:[#allocation8 + $0x2014] ss:$72 sps:$4 sm:$0xff]   ;;  %v21701_v49 = vld [vmem:[#allocation8 + $0x1ef8] ss:$72 sps:$4 sm:$0xff]  }
  0x94   : > { %4532 = vmatprep.subr.bf16.mxu1 %v21646_v29  ;;  %v25557_v29 = vsel %vm1542_vm0, %v1585_v21, %v1589_v16  ;;  %4507 = vmatprep.mubr.bf16.mxu0 %v25550_v24  ;;  %v21712_v60 = vld [vmem:[#allocation8 + $0x14dc] ss:$72 sps:$4 sm:$0xff]   ;;  %v21718_v3 = vld [vmem:[#allocation8 + $0x144c] ss:$72 sps:$4 sm:$0xff]   ;;  %v21722_v12 = vld [vmem:[#allocation8 + $0x13b8] ss:$72 sps:$4 sm:$0xff]   ;;  %p25200_p2 = pneg %p25199_p1  ;;  %p25206_p13 = por %p25205_p9, %p25204_p6 }
  0x95   : > { %4550 = vmatprep.mubr.bf16.mxu1 %v25557_v29  ;;  %v21715_v61 = vld [vmem:[#allocation8 + $0x1ddc] ss:$72 sps:$4 sm:$0xff]   ;;  %v21721_v4 = vld [vmem:[#allocation8 + $0x1d4c] ss:$72 sps:$4 sm:$0xff]   ;;  %v21725_v14 = vld [vmem:[#allocation8 + $0x1cb8] ss:$72 sps:$4 sm:$0xff]  }
  0x96   : > { %4490 = vmatpush1.bf16.msra.mxu0 %v21648_v30  ;;  %v21690_v30 = vld [vmem:[#allocation8 + $0x1710] ss:$72 sps:$4 sm:$0xff]   ;;  %v21724_v10 = vld [vmem:[#allocation8 + $0x13bc] ss:$72 sps:$4 sm:$0xff]   ;;  %v21730_v15 = vld [vmem:[#allocation8 + $0x132c] ss:$72 sps:$4 sm:$0xff]   ;;  %p25207_p12 = pnand %p25206_p13, %p25200_p2 }
  0x97   : > { %4533 = vmatpush1.bf16.msra.mxu1 %v21649_v31  ;;  %4491 = vmatprep.subr.bf16.mxu0 %v21650_v32  ;;  %v21691_v31 = vld [vmem:[#allocation8 + $0x2010] ss:$72 sps:$4 sm:$0xff]   ;;  %v21692_v32 = vld [vmem:[#allocation8 + $0x1684] ss:$72 sps:$4 sm:$0xff]   ;;  %v22673_v8 = vld [vmem:[#allocation8 + $0xbe0] ss:$72 sps:$4 sm:$0xff]  }
  0x98   : > { %4534 = vmatprep.subr.bf16.mxu1 %v21652_v33  ;;  %v26335_v33 = vshrl.u32 %v25534_v13, 16  ;;  %v21727_v11 = vld [vmem:[#allocation8 + $0x1cbc] ss:$72 sps:$4 sm:$0xff]   ;;  %v21733_v16 = vld [vmem:[#allocation8 + $0x1c2c] ss:$72 sps:$4 sm:$0xff]  }
  0x99   : > { %v21728_v18 = vld [vmem:[#allocation8 + $0x1328] ss:$72 sps:$4 sm:$0xff]   ;;  %v21739_v21 = vld [vmem:[#allocation8 + $0x1b9c] ss:$72 sps:$4 sm:$0xff]  }
  0x9a   : > { %4492 = vmatpush2.bf16.msra.mxu0 %v21654_v34  ;;  %v26333_v34 = vshll.u32 %v25547_v22, 16  ;;  %v22685_v2 = vld [vmem:[#allocation8 + $0xac0] ss:$72 sps:$4 sm:$0xff]  }
  0x9b   : > { %4535 = vmatpush2.bf16.msra.mxu1 %v21655_v35  ;;  %4493 = vmatprep.subr.bf16.mxu0 %v21656_v36  ;;  %v1548_v35 = vrot.slane %v26334_v25, 1  ;;  %v26332_v36 = vshrl.u32 %v25541_v17, 16  ;;  %v22589_v25 = vld [vmem:[#allocation8 + $0xab8] ss:$72 sps:$4 sm:$0xff]   ;;  %v22769_v1 = vld [vmem:[#allocation8 + $0xbe8] ss:$72 sps:$4 sm:$0xff]  }
  0x9c   : > { %4536 = vmatprep.subr.bf16.mxu1 %v21658_v37  ;;  %v1572_v37 = vrot.slane %v26331_v27, 1  ;;  %v22577_v27 = vld [vmem:[#allocation8 + $0xbd8] ss:$72 sps:$4 sm:$0xff]  }
  0x9e   : > { %4494 = vmatpush2.bf16.msra.mxu0 %v21660_v38  ;;  %v26330_v38 = vshll.u32 %v25553_v26, 16 }
  0x9f   : > { %4537 = vmatpush2.bf16.msra.mxu1 %v21661_v39  ;;  %4495 = vmatprep.subr.bf16.mxu0 %v21662_v40  ;;  %v21694_v39 = vld [vmem:[#allocation8 + $0x1f84] ss:$72 sps:$4 sm:$0xff]   ;;  %v21696_v40 = vld [vmem:[#allocation8 + $0x1680] ss:$72 sps:$4 sm:$0xff]  }
  0xa0   : > { %4538 = vmatprep.subr.bf16.mxu1 %v21664_v41  ;;  %v21697_v41 = vld [vmem:[#allocation8 + $0x1f80] ss:$72 sps:$4 sm:$0xff]  }
  0xa2   : > { %4496 = vmatpush2.bf16.msra.mxu0 %v21666_v42  ;;  %v1549_v42 = vor.u32 %v1548_v35, %v26335_v33  ;;  %v21743_v35 = vld [vmem:[#allocation8 + $0x1b08] ss:$72 sps:$4 sm:$0xff]  }
  0xa3   : > { %4539 = vmatpush2.bf16.msra.mxu1 %v21667_v43  ;;  %4497 = vmatprep.subr.bf16.mxu0 %v21668_v44  ;;  %v1553_v43 = vrot.slane %v26333_v34, 1  ;;  %v1573_v44 = vor.u32 %v1572_v37, %v26332_v36  ;;  %v21748_v37 = vld [vmem:[#allocation8 + $0x1a7c] ss:$72 sps:$4 sm:$0xff]   ;;  %v22670_v33 = vld [vmem:[#allocation8 + $0x2e0] ss:$72 sps:$4 sm:$0xff]  }
  0xa4   : > { %4540 = vmatprep.subr.bf16.mxu1 %v21670_v45  ;;  %v1577_v45 = vrot.slane %v26330_v38, 1  ;;  %v22574_v38 = vld [vmem:[#allocation8 + $0x2d8] ss:$72 sps:$4 sm:$0xff]  }
  0xa5   : > { %v25578_v50 = vsel %vm1542_vm0, %v1549_v42, %v1553_v43  ;;  %v21754_v42 = vld [vmem:[#allocation8 + $0x19ec] ss:$72 sps:$4 sm:$0xff]  }
  0xa6   : > { %4498 = vmatpush2.bf16.msra.mxu0 %v21672_v46  ;;  %v21700_v46 = vld [vmem:[#allocation8 + $0x15fc] ss:$72 sps:$4 sm:$0xff]   ;;  %v25581_v51 = vsel %vm1542_vm0, %v1573_v44, %v1577_v45  ;;  %v21757_v43 = vld [vmem:[#allocation8 + $0x22ec] ss:$72 sps:$4 sm:$0xff]   ;;  %v21752_v44 = vld [vmem:[#allocation8 + $0x19e8] ss:$72 sps:$4 sm:$0xff]  }
  0xa7   : > { %4541 = vmatpush2.bf16.msra.mxu1 %v21673_v47  ;;  %4499 = vmatprep.subr.bf16.mxu0 %v21674_v52  ;;  %v21703_v47 = vld [vmem:[#allocation8 + $0x1efc] ss:$72 sps:$4 sm:$0xff]   ;;  %v21706_v52 = vld [vmem:[#allocation8 + $0x156c] ss:$72 sps:$4 sm:$0xff]   ;;  %v21755_v45 = vld [vmem:[#allocation8 + $0x22e8] ss:$72 sps:$4 sm:$0xff]  }
  0xa8   : > { %4542 = vmatprep.subr.bf16.mxu1 %v21676_v57  ;;  %v21707_v57 = vld [vmem:[#allocation8 + $0x1e68] ss:$72 sps:$4 sm:$0xff]  }
  0xaa   : > { %4500 = vmatpush2.bf16.msra.mxu0 %v21678_v62  ;;  %v21710_v62 = vld [vmem:[#allocation8 + $0x14d8] ss:$72 sps:$4 sm:$0xff]  }
  0xab   : > { %4543 = vmatpush2.bf16.msra.mxu1 %v21679_v63  ;;  %4501 = vmatprep.subr.bf16.mxu0 %v21680_v5  ;;  %v21713_v63 = vld [vmem:[#allocation8 + $0x1dd8] ss:$72 sps:$4 sm:$0xff]   ;;  %v21716_v5 = vld [vmem:[#allocation8 + $0x1448] ss:$72 sps:$4 sm:$0xff]  }
  0xac   : > { %4544 = vmatprep.subr.bf16.mxu1 %v21682_v9  ;;  %v21719_v9 = vld [vmem:[#allocation8 + $0x1d48] ss:$72 sps:$4 sm:$0xff]  }
  0xae   : > { %4502 = vmatpush2.bf16.msra.mxu0 %v21684_v19  ;;  %v21731_v19 = vld [vmem:[#allocation8 + $0x1c28] ss:$72 sps:$4 sm:$0xff]  }
  0xaf   : > { %4545 = vmatpush2.bf16.msra.mxu1 %v21685_v20  ;;  %4503 = vmatprep.subr.bf16.mxu0 %v21686_v23  ;;  %v21736_v20 = vld [vmem:[#allocation8 + $0x129c] ss:$72 sps:$4 sm:$0xff]   ;;  %v21734_v23 = vld [vmem:[#allocation8 + $0x1298] ss:$72 sps:$4 sm:$0xff]  }
  0xb0   : > { %4546 = vmatprep.subr.bf16.mxu1 %v21688_v28  ;;  %v21737_v28 = vld [vmem:[#allocation8 + $0x1b98] ss:$72 sps:$4 sm:$0xff]  }
  0xb2   : > { %4504 = vmatpush2.bf16.msra.mxu0 %v21690_v30  ;;  %v21742_v30 = vld [vmem:[#allocation8 + $0x120c] ss:$72 sps:$4 sm:$0xff]  }
  0xb3   : > { %4547 = vmatpush2.bf16.msra.mxu1 %v21691_v31  ;;  %4505 = vmatprep.subr.bf16.mxu0 %v21692_v32  ;;  %v21745_v31 = vld [vmem:[#allocation8 + $0x1b0c] ss:$72 sps:$4 sm:$0xff]   ;;  %v21740_v32 = vld [vmem:[#allocation8 + $0x1208] ss:$72 sps:$4 sm:$0xff]  }
  0xb4   : > { %4548 = vmatprep.subr.bf16.mxu1 %v21694_v39  ;;  %v21751_v39 = vld [vmem:[#allocation8 + $0x237c] ss:$72 sps:$4 sm:$0xff]  }
  0xb6   : > { %4506 = vmatpush2.bf16.msra.mxu0 %v21696_v40  ;;  %v21746_v40 = vld [vmem:[#allocation8 + $0x1a78] ss:$72 sps:$4 sm:$0xff]  }
  0xb7   : > { %4549 = vmatpush2.bf16.msra.mxu1 %v21697_v41  ;;  %4561 = vmatprep.subr.bf16.mxu0 %v21700_v46  ;;  %v21749_v41 = vld [vmem:[#allocation8 + $0x2378] ss:$72 sps:$4 sm:$0xff]   ;;  %v21760_v46 = vld [vmem:[#allocation8 + $0x195c] ss:$72 sps:$4 sm:$0xff]  }
  0xb8   : > { %4604 = vmatprep.subr.bf16.mxu1 %v21703_v47  ;;  %v21763_v47 = vld [vmem:[#allocation8 + $0x225c] ss:$72 sps:$4 sm:$0xff]  }
  0xb9   : > { %4508 = vmatmul.mubr.bf16.vlgmr.msra.gmra.mxu0 %v25578_v50 }
  0xba   : > { %4551 = vmatmul.mubr.bf16.vlgmr.msra.gmra.mxu1 %v25581_v51  ;;  %4562 = vmatpush1.bf16.msra.mxu0 %v21698_v48  ;;  %v21758_v48 = vld [vmem:[#allocation8 + $0x1958] ss:$72 sps:$4 sm:$0xff]  }
  0xbb   : > { %4605 = vmatpush1.bf16.msra.mxu1 %v21701_v49  ;;  %4563 = vmatprep.subr.bf16.mxu0 %v21706_v52  ;;  %v21761_v49 = vld [vmem:[#allocation8 + $0x2258] ss:$72 sps:$4 sm:$0xff]   ;;  %v21766_v52 = vld [vmem:[#allocation8 + $0x18cc] ss:$72 sps:$4 sm:$0xff]  }
  0xbc   : > { %4606 = vmatprep.subr.bf16.mxu1 %v21709_v55  ;;  %4593 = vmatprep.mubr.bf16.mxu0 %v25550_v24  ;;  %v21769_v55 = vld [vmem:[#allocation8 + $0x21cc] ss:$72 sps:$4 sm:$0xff]  }
  0xbd   : > { %4636 = vmatprep.mubr.bf16.mxu1 %v25557_v29 }
  0xbe   : > { %4564 = vmatpush1.bf16.msra.mxu0 %v21704_v56  ;;  %v21764_v56 = vld [vmem:[#allocation8 + $0x18c8] ss:$72 sps:$4 sm:$0xff]  }
  0xbf   : > { %4607 = vmatpush1.bf16.msra.mxu1 %v21707_v57  ;;  %4565 = vmatprep.subr.bf16.mxu0 %v21712_v60  ;;  %v21767_v57 = vld [vmem:[#allocation8 + $0x21c8] ss:$72 sps:$4 sm:$0xff]   ;;  %v21772_v60 = vld [vmem:[#allocation8 + $0x183c] ss:$72 sps:$4 sm:$0xff]  }
  0xc0   : > { %4608 = vmatprep.subr.bf16.mxu1 %v21715_v61  ;;  %v21775_v61 = vld [vmem:[#allocation8 + $0x213c] ss:$72 sps:$4 sm:$0xff]  }
  0xc2   : > { %4566 = vmatpush1.bf16.msra.mxu0 %v21710_v62  ;;  %v21770_v62 = vld [vmem:[#allocation8 + $0x1838] ss:$72 sps:$4 sm:$0xff]  }
  0xc3   : > { %4609 = vmatpush1.bf16.msra.mxu1 %v21713_v63  ;;  %4567 = vmatprep.subr.bf16.mxu0 %v21718_v3  ;;  %v21773_v63 = vld [vmem:[#allocation8 + $0x2138] ss:$72 sps:$4 sm:$0xff]   ;;  %v21778_v3 = vld [vmem:[#allocation8 + $0x17ac] ss:$72 sps:$4 sm:$0xff]  }
  0xc4   : > { %4610 = vmatprep.subr.bf16.mxu1 %v21721_v4  ;;  %v21781_v4 = vld [vmem:[#allocation8 + $0x20ac] ss:$72 sps:$4 sm:$0xff]  }
  0xc6   : > { %4568 = vmatpush1.bf16.msra.mxu0 %v21716_v5  ;;  %v21776_v5 = vld [vmem:[#allocation8 + $0x17a8] ss:$72 sps:$4 sm:$0xff]  }
  0xc7   : > { %4611 = vmatpush1.bf16.msra.mxu1 %v21719_v9  ;;  %4569 = vmatprep.subr.bf16.mxu0 %v21724_v10  ;;  %v21779_v9 = vld [vmem:[#allocation8 + $0x20a8] ss:$72 sps:$4 sm:$0xff]   ;;  %v21784_v10 = vld [vmem:[#allocation8 + $0x171c] ss:$72 sps:$4 sm:$0xff]  }
  0xc8   : > { %4612 = vmatprep.subr.bf16.mxu1 %v21727_v11  ;;  %v21787_v11 = vld [vmem:[#allocation8 + $0x201c] ss:$72 sps:$4 sm:$0xff]  }
  0xca   : > { %4570 = vmatpush1.bf16.msra.mxu0 %v21722_v12  ;;  %v21782_v12 = vld [vmem:[#allocation8 + $0x1718] ss:$72 sps:$4 sm:$0xff]  }
  0xcb   : > { %4613 = vmatpush1.bf16.msra.mxu1 %v21725_v14  ;;  %4571 = vmatprep.subr.bf16.mxu0 %v21730_v15  ;;  %v21785_v14 = vld [vmem:[#allocation8 + $0x2018] ss:$72 sps:$4 sm:$0xff]   ;;  %v21790_v15 = vld [vmem:[#allocation8 + $0x168c] ss:$72 sps:$4 sm:$0xff]  }
  0xcc   : > { %4614 = vmatprep.subr.bf16.mxu1 %v21733_v16  ;;  %v21793_v16 = vld [vmem:[#allocation8 + $0x1f8c] ss:$72 sps:$4 sm:$0xff]  }
  0xce   : > { %4572 = vmatpush1.bf16.msra.mxu0 %v21728_v18  ;;  %v21788_v18 = vld [vmem:[#allocation8 + $0x1688] ss:$72 sps:$4 sm:$0xff]  }
  0xcf   : > { %4615 = vmatpush1.bf16.msra.mxu1 %v21731_v19  ;;  %4573 = vmatprep.subr.bf16.mxu0 %v21736_v20  ;;  %v21791_v19 = vld [vmem:[#allocation8 + $0x1f88] ss:$72 sps:$4 sm:$0xff]   ;;  %v21796_v20 = vld [vmem:[#allocation8 + $0x1604] ss:$72 sps:$4 sm:$0xff]  }
  0xd0   : > { %4616 = vmatprep.subr.bf16.mxu1 %v21739_v21  ;;  %v21799_v21 = vld [vmem:[#allocation8 + $0x1f04] ss:$72 sps:$4 sm:$0xff]  }
  0xd2   : > { %4574 = vmatpush1.bf16.msra.mxu0 %v21734_v23  ;;  %v21794_v23 = vld [vmem:[#allocation8 + $0x1600] ss:$72 sps:$4 sm:$0xff]  }
  0xd3   : > { %4617 = vmatpush1.bf16.msra.mxu1 %v21737_v28  ;;  %4575 = vmatprep.subr.bf16.mxu0 %v21742_v30  ;;  %v21797_v28 = vld [vmem:[#allocation8 + $0x1f00] ss:$72 sps:$4 sm:$0xff]   ;;  %v21802_v30 = vld [vmem:[#allocation8 + $0x1574] ss:$72 sps:$4 sm:$0xff]  }
  0xd4   : > { %4618 = vmatprep.subr.bf16.mxu1 %v21745_v31  ;;  %v21805_v31 = vld [vmem:[#allocation8 + $0x1e74] ss:$72 sps:$4 sm:$0xff]  }
  0xd6   : > { %4576 = vmatpush1.bf16.msra.mxu0 %v21740_v32  ;;  %v21800_v32 = vld [vmem:[#allocation8 + $0x1570] ss:$72 sps:$4 sm:$0xff]  }
  0xd7   : > { %4619 = vmatpush1.bf16.msra.mxu1 %v21743_v35  ;;  %4577 = vmatprep.subr.bf16.mxu0 %v21748_v37  ;;  %v21803_v35 = vld [vmem:[#allocation8 + $0x1e70] ss:$72 sps:$4 sm:$0xff]   ;;  %v21808_v37 = vld [vmem:[#allocation8 + $0x14e4] ss:$72 sps:$4 sm:$0xff]  }
  0xd8   : > { %4620 = vmatprep.subr.bf16.mxu1 %v21751_v39  ;;  %v21811_v39 = vld [vmem:[#allocation8 + $0x1de4] ss:$72 sps:$4 sm:$0xff]  }
  0xda   : > { %4578 = vmatpush2.bf16.msra.mxu0 %v21746_v40  ;;  %v21806_v40 = vld [vmem:[#allocation8 + $0x14e0] ss:$72 sps:$4 sm:$0xff]  }
  0xdb   : > { %4621 = vmatpush2.bf16.msra.mxu1 %v21749_v41  ;;  %4579 = vmatprep.subr.bf16.mxu0 %v21754_v42  ;;  %v21809_v41 = vld [vmem:[#allocation8 + $0x1de0] ss:$72 sps:$4 sm:$0xff]   ;;  %v21814_v42 = vld [vmem:[#allocation8 + $0x1454] ss:$72 sps:$4 sm:$0xff]  }
  0xdc   : > { %4622 = vmatprep.subr.bf16.mxu1 %v21757_v43  ;;  %v21817_v43 = vld [vmem:[#allocation8 + $0x1d54] ss:$72 sps:$4 sm:$0xff]  }
  0xde   : > { %4580 = vmatpush2.bf16.msra.mxu0 %v21752_v44  ;;  %v21812_v44 = vld [vmem:[#allocation8 + $0x1450] ss:$72 sps:$4 sm:$0xff]  }
  0xdf   : > { %4623 = vmatpush2.bf16.msra.mxu1 %v21755_v45  ;;  %4581 = vmatprep.subr.bf16.mxu0 %v21760_v46  ;;  %v21815_v45 = vld [vmem:[#allocation8 + $0x1d50] ss:$72 sps:$4 sm:$0xff]   ;;  %v21820_v46 = vld [vmem:[#allocation8 + $0x13c4] ss:$72 sps:$4 sm:$0xff]  }
  0xe0   : > { %4624 = vmatprep.subr.bf16.mxu1 %v21763_v47  ;;  %v21823_v47 = vld [vmem:[#allocation8 + $0x1cc4] ss:$72 sps:$4 sm:$0xff]  }
  0xe2   : > { %4582 = vmatpush2.bf16.msra.mxu0 %v21758_v48  ;;  %v21818_v48 = vld [vmem:[#allocation8 + $0x13c0] ss:$72 sps:$4 sm:$0xff]  }
  0xe3   : > { %4625 = vmatpush2.bf16.msra.mxu1 %v21761_v49  ;;  %4583 = vmatprep.subr.bf16.mxu0 %v21766_v52  ;;  %v21821_v49 = vld [vmem:[#allocation8 + $0x1cc0] ss:$72 sps:$4 sm:$0xff]   ;;  %v21826_v52 = vld [vmem:[#allocation8 + $0x1334] ss:$72 sps:$4 sm:$0xff]  }
  0xe4   : > { %4626 = vmatprep.subr.bf16.mxu1 %v21769_v55  ;;  %v21829_v55 = vld [vmem:[#allocation8 + $0x1c34] ss:$72 sps:$4 sm:$0xff]  }
  0xe6   : > { %4584 = vmatpush2.bf16.msra.mxu0 %v21764_v56  ;;  %v21824_v56 = vld [vmem:[#allocation8 + $0x1330] ss:$72 sps:$4 sm:$0xff]  }
  0xe7   : > { %4627 = vmatpush2.bf16.msra.mxu1 %v21767_v57  ;;  %4585 = vmatprep.subr.bf16.mxu0 %v21772_v60  ;;  %v21827_v57 = vld [vmem:[#allocation8 + $0x1c30] ss:$72 sps:$4 sm:$0xff]   ;;  %v21832_v60 = vld [vmem:[#allocation8 + $0x12a4] ss:$72 sps:$4 sm:$0xff]  }
  0xe8   : > { %4628 = vmatprep.subr.bf16.mxu1 %v21775_v61  ;;  %v21835_v61 = vld [vmem:[#allocation8 + $0x1ba4] ss:$72 sps:$4 sm:$0xff]  }
  0xea   : > { %4586 = vmatpush2.bf16.msra.mxu0 %v21770_v62  ;;  %v21830_v62 = vld [vmem:[#allocation8 + $0x12a0] ss:$72 sps:$4 sm:$0xff]  }
  0xeb   : > { %4629 = vmatpush2.bf16.msra.mxu1 %v21773_v63  ;;  %4587 = vmatprep.subr.bf16.mxu0 %v21778_v3  ;;  %v21833_v63 = vld [vmem:[#allocation8 + $0x1ba0] ss:$72 sps:$4 sm:$0xff]   ;;  %v21838_v3 = vld [vmem:[#allocation8 + $0x1214] ss:$72 sps:$4 sm:$0xff]  }
  0xec   : > { %4630 = vmatprep.subr.bf16.mxu1 %v21781_v4  ;;  %v21841_v4 = vld [vmem:[#allocation8 + $0x1b14] ss:$72 sps:$4 sm:$0xff]  }
  0xee   : > { %4588 = vmatpush2.bf16.msra.mxu0 %v21776_v5  ;;  %v21836_v5 = vld [vmem:[#allocation8 + $0x1210] ss:$72 sps:$4 sm:$0xff]  }
  0xef   : > { %4631 = vmatpush2.bf16.msra.mxu1 %v21779_v9  ;;  %4589 = vmatprep.subr.bf16.mxu0 %v21784_v10  ;;  %v21839_v9 = vld [vmem:[#allocation8 + $0x1b10] ss:$72 sps:$4 sm:$0xff]   ;;  %v21844_v10 = vld [vmem:[#allocation8 + $0x1a84] ss:$72 sps:$4 sm:$0xff]  }
  0xf0   : > { %4632 = vmatprep.subr.bf16.mxu1 %v21787_v11  ;;  %v21847_v11 = vld [vmem:[#allocation8 + $0x2384] ss:$72 sps:$4 sm:$0xff]  }
  0xf2   : > { %4590 = vmatpush2.bf16.msra.mxu0 %v21782_v12  ;;  %v21842_v12 = vld [vmem:[#allocation8 + $0x1a80] ss:$72 sps:$4 sm:$0xff]  }
  0xf3   : > { %4633 = vmatpush2.bf16.msra.mxu1 %v21785_v14  ;;  %4591 = vmatprep.subr.bf16.mxu0 %v21790_v15  ;;  %v21845_v14 = vld [vmem:[#allocation8 + $0x2380] ss:$72 sps:$4 sm:$0xff]   ;;  %v21850_v15 = vld [vmem:[#allocation8 + $0x19f4] ss:$72 sps:$4 sm:$0xff]  }
  0xf4   : > { %4634 = vmatprep.subr.bf16.mxu1 %v21793_v16  ;;  %v21853_v16 = vld [vmem:[#allocation8 + $0x22f4] ss:$72 sps:$4 sm:$0xff]  }
  0xf6   : > { %4592 = vmatpush2.bf16.msra.mxu0 %v21788_v18  ;;  %v21848_v18 = vld [vmem:[#allocation8 + $0x19f0] ss:$72 sps:$4 sm:$0xff]  }
  0xf7   : > { %4635 = vmatpush2.bf16.msra.mxu1 %v21791_v19  ;;  %4647 = vmatprep.subr.bf16.mxu0 %v21796_v20  ;;  %v21851_v19 = vld [vmem:[#allocation8 + $0x22f0] ss:$72 sps:$4 sm:$0xff]   ;;  %v21856_v20 = vld [vmem:[#allocation8 + $0x1964] ss:$72 sps:$4 sm:$0xff]  }
  0xf8   : > { %4690 = vmatprep.subr.bf16.mxu1 %v21799_v21  ;;  %v21859_v21 = vld [vmem:[#allocation8 + $0x2264] ss:$72 sps:$4 sm:$0xff]  }
  0xf9   : > { %4594 = vmatmul.mubr.bf16.vlgmr.msra.gmra.mxu0 %v25578_v50 }
  0xfa   : > { %4637 = vmatmul.mubr.bf16.vlgmr.msra.gmra.mxu1 %v25581_v51  ;;  %4648 = vmatpush1.bf16.msra.mxu0 %v21794_v23  ;;  %v21854_v23 = vld [vmem:[#allocation8 + $0x1960] ss:$72 sps:$4 sm:$0xff]  }
  0xfb   : > { %4691 = vmatpush1.bf16.msra.mxu1 %v21797_v28  ;;  %4649 = vmatprep.subr.bf16.mxu0 %v21802_v30  ;;  %v21857_v28 = vld [vmem:[#allocation8 + $0x2260] ss:$72 sps:$4 sm:$0xff]   ;;  %v21862_v30 = vld [vmem:[#allocation8 + $0x18d4] ss:$72 sps:$4 sm:$0xff]  }
  0xfc   : > { %4692 = vmatprep.subr.bf16.mxu1 %v21805_v31  ;;  %4679 = vmatprep.mubr.bf16.mxu0 %v25550_v24  ;;  %v21865_v31 = vld [vmem:[#allocation8 + $0x21d4] ss:$72 sps:$4 sm:$0xff]  }
  0xfd   : > { %4722 = vmatprep.mubr.bf16.mxu1 %v25557_v29 }
  0xfe   : > { %4650 = vmatpush1.bf16.msra.mxu0 %v21800_v32  ;;  %v21860_v32 = vld [vmem:[#allocation8 + $0x18d0] ss:$72 sps:$4 sm:$0xff]  }
  0xff   : > { %4693 = vmatpush1.bf16.msra.mxu1 %v21803_v35  ;;  %4651 = vmatprep.subr.bf16.mxu0 %v21808_v37  ;;  %v21863_v35 = vld [vmem:[#allocation8 + $0x21d0] ss:$72 sps:$4 sm:$0xff]   ;;  %v21868_v37 = vld [vmem:[#allocation8 + $0x1844] ss:$72 sps:$4 sm:$0xff]  }
 0x100   : > { %4694 = vmatprep.subr.bf16.mxu1 %v21811_v39  ;;  %v21871_v39 = vld [vmem:[#allocation8 + $0x2144] ss:$72 sps:$4 sm:$0xff]  }
 0x102   : > { %4652 = vmatpush1.bf16.msra.mxu0 %v21806_v40  ;;  %v21866_v40 = vld [vmem:[#allocation8 + $0x1840] ss:$72 sps:$4 sm:$0xff]  }
 0x103   : > { %4695 = vmatpush1.bf16.msra.mxu1 %v21809_v41  ;;  %4653 = vmatprep.subr.bf16.mxu0 %v21814_v42  ;;  %v21869_v41 = vld [vmem:[#allocation8 + $0x2140] ss:$72 sps:$4 sm:$0xff]   ;;  %v21874_v42 = vld [vmem:[#allocation8 + $0x17b4] ss:$72 sps:$4 sm:$0xff]  }
 0x104   : > { %4696 = vmatprep.subr.bf16.mxu1 %v21817_v43  ;;  %v21877_v43 = vld [vmem:[#allocation8 + $0x20b4] ss:$72 sps:$4 sm:$0xff]  }
 0x106   : > { %4654 = vmatpush1.bf16.msra.mxu0 %v21812_v44  ;;  %v21872_v44 = vld [vmem:[#allocation8 + $0x17b0] ss:$72 sps:$4 sm:$0xff]  }
 0x107   : > { %4697 = vmatpush1.bf16.msra.mxu1 %v21815_v45  ;;  %4655 = vmatprep.subr.bf16.mxu0 %v21820_v46  ;;  %v21875_v45 = vld [vmem:[#allocation8 + $0x20b0] ss:$72 sps:$4 sm:$0xff]   ;;  %v21880_v46 = vld [vmem:[#allocation8 + $0x1724] ss:$72 sps:$4 sm:$0xff]  }
 0x108   : > { %4698 = vmatprep.subr.bf16.mxu1 %v21823_v47  ;;  %v21883_v47 = vld [vmem:[#allocation8 + $0x2024] ss:$72 sps:$4 sm:$0xff]  }
 0x10a   : > { %4656 = vmatpush1.bf16.msra.mxu0 %v21818_v48  ;;  %v21878_v48 = vld [vmem:[#allocation8 + $0x1720] ss:$72 sps:$4 sm:$0xff]  }
 0x10b   : > { %4699 = vmatpush1.bf16.msra.mxu1 %v21821_v49  ;;  %4657 = vmatprep.subr.bf16.mxu0 %v21826_v52  ;;  %v21881_v49 = vld [vmem:[#allocation8 + $0x2020] ss:$72 sps:$4 sm:$0xff]   ;;  %v21886_v52 = vld [vmem:[#allocation8 + $0x1694] ss:$72 sps:$4 sm:$0xff]  }
 0x10c   : > { %4700 = vmatprep.subr.bf16.mxu1 %v21829_v55  ;;  %v21889_v55 = vld [vmem:[#allocation8 + $0x1f94] ss:$72 sps:$4 sm:$0xff]  }
 0x10e   : > { %4658 = vmatpush1.bf16.msra.mxu0 %v21824_v56  ;;  %v21884_v56 = vld [vmem:[#allocation8 + $0x1690] ss:$72 sps:$4 sm:$0xff]  }
 0x10f   : > { %4701 = vmatpush1.bf16.msra.mxu1 %v21827_v57  ;;  %4659 = vmatprep.subr.bf16.mxu0 %v21832_v60  ;;  %v21887_v57 = vld [vmem:[#allocation8 + $0x1f90] ss:$72 sps:$4 sm:$0xff]   ;;  %v21892_v60 = vld [vmem:[#allocation8 + $0x160c] ss:$72 sps:$4 sm:$0xff]  }
 0x110   : > { %4702 = vmatprep.subr.bf16.mxu1 %v21835_v61  ;;  %v21895_v61 = vld [vmem:[#allocation8 + $0x1f0c] ss:$72 sps:$4 sm:$0xff]  }
 0x112   : > { %4660 = vmatpush1.bf16.msra.mxu0 %v21830_v62  ;;  %v21890_v62 = vld [vmem:[#allocation8 + $0x1608] ss:$72 sps:$4 sm:$0xff]  }
 0x113   : > { %4703 = vmatpush1.bf16.msra.mxu1 %v21833_v63  ;;  %4661 = vmatprep.subr.bf16.mxu0 %v21838_v3  ;;  %v21893_v63 = vld [vmem:[#allocation8 + $0x1f08] ss:$72 sps:$4 sm:$0xff]   ;;  %v21898_v3 = vld [vmem:[#allocation8 + $0x157c] ss:$72 sps:$4 sm:$0xff]  }
 0x114   : > { %4704 = vmatprep.subr.bf16.mxu1 %v21841_v4  ;;  %v21901_v4 = vld [vmem:[#allocation8 + $0x1e7c] ss:$72 sps:$4 sm:$0xff]  }
 0x116   : > { %4662 = vmatpush1.bf16.msra.mxu0 %v21836_v5  ;;  %v21896_v5 = vld [vmem:[#allocation8 + $0x1578] ss:$72 sps:$4 sm:$0xff]  }
 0x117   : > { %4705 = vmatpush1.bf16.msra.mxu1 %v21839_v9  ;;  %4663 = vmatprep.subr.bf16.mxu0 %v21844_v10  ;;  %v21899_v9 = vld [vmem:[#allocation8 + $0x1e78] ss:$72 sps:$4 sm:$0xff]   ;;  %v21904_v10 = vld [vmem:[#allocation8 + $0x14ec] ss:$72 sps:$4 sm:$0xff]  }
 0x118   : > { %4706 = vmatprep.subr.bf16.mxu1 %v21847_v11  ;;  %v21907_v11 = vld [vmem:[#allocation8 + $0x1dec] ss:$72 sps:$4 sm:$0xff]  }
 0x11a   : > { %4664 = vmatpush2.bf16.msra.mxu0 %v21842_v12  ;;  %v21902_v12 = vld [vmem:[#allocation8 + $0x14e8] ss:$72 sps:$4 sm:$0xff]  }
 0x11b   : > { %4707 = vmatpush2.bf16.msra.mxu1 %v21845_v14  ;;  %4665 = vmatprep.subr.bf16.mxu0 %v21850_v15  ;;  %v21905_v14 = vld [vmem:[#allocation8 + $0x1de8] ss:$72 sps:$4 sm:$0xff]   ;;  %v21910_v15 = vld [vmem:[#allocation8 + $0x145c] ss:$72 sps:$4 sm:$0xff]  }
 0x11c   : > { %4708 = vmatprep.subr.bf16.mxu1 %v21853_v16  ;;  %v21913_v16 = vld [vmem:[#allocation8 + $0x1d5c] ss:$72 sps:$4 sm:$0xff]  }
 0x11e   : > { %4666 = vmatpush2.bf16.msra.mxu0 %v21848_v18  ;;  %v21908_v18 = vld [vmem:[#allocation8 + $0x1458] ss:$72 sps:$4 sm:$0xff]  }
 0x11f   : > { %4709 = vmatpush2.bf16.msra.mxu1 %v21851_v19  ;;  %4667 = vmatprep.subr.bf16.mxu0 %v21856_v20  ;;  %v21911_v19 = vld [vmem:[#allocation8 + $0x1d58] ss:$72 sps:$4 sm:$0xff]   ;;  %v21916_v20 = vld [vmem:[#allocation8 + $0x13cc] ss:$72 sps:$4 sm:$0xff]  }
 0x120   : > { %4710 = vmatprep.subr.bf16.mxu1 %v21859_v21  ;;  %v21919_v21 = vld [vmem:[#allocation8 + $0x1ccc] ss:$72 sps:$4 sm:$0xff]  }
 0x122   : > { %4668 = vmatpush2.bf16.msra.mxu0 %v21854_v23  ;;  %v21914_v23 = vld [vmem:[#allocation8 + $0x13c8] ss:$72 sps:$4 sm:$0xff]  }
 0x123   : > { %4711 = vmatpush2.bf16.msra.mxu1 %v21857_v28  ;;  %4669 = vmatprep.subr.bf16.mxu0 %v21862_v30  ;;  %v21917_v28 = vld [vmem:[#allocation8 + $0x1cc8] ss:$72 sps:$4 sm:$0xff]   ;;  %v21922_v30 = vld [vmem:[#allocation8 + $0x133c] ss:$72 sps:$4 sm:$0xff]  }
 0x124   : > { %4712 = vmatprep.subr.bf16.mxu1 %v21865_v31  ;;  %v21925_v31 = vld [vmem:[#allocation8 + $0x1c3c] ss:$72 sps:$4 sm:$0xff]  }
 0x126   : > { %4670 = vmatpush2.bf16.msra.mxu0 %v21860_v32  ;;  %v21920_v32 = vld [vmem:[#allocation8 + $0x1338] ss:$72 sps:$4 sm:$0xff]  }
 0x127   : > { %4713 = vmatpush2.bf16.msra.mxu1 %v21863_v35  ;;  %4671 = vmatprep.subr.bf16.mxu0 %v21868_v37  ;;  %v21923_v35 = vld [vmem:[#allocation8 + $0x1c38] ss:$72 sps:$4 sm:$0xff]   ;;  %v21928_v37 = vld [vmem:[#allocation8 + $0x12ac] ss:$72 sps:$4 sm:$0xff]  }
 0x128   : > { %4714 = vmatprep.subr.bf16.mxu1 %v21871_v39  ;;  %v21931_v39 = vld [vmem:[#allocation8 + $0x1bac] ss:$72 sps:$4 sm:$0xff]  }
 0x12a   : > { %4672 = vmatpush2.bf16.msra.mxu0 %v21866_v40  ;;  %v21926_v40 = vld [vmem:[#allocation8 + $0x12a8] ss:$72 sps:$4 sm:$0xff]  }
 0x12b   : > { %4715 = vmatpush2.bf16.msra.mxu1 %v21869_v41  ;;  %4673 = vmatprep.subr.bf16.mxu0 %v21874_v42  ;;  %v21929_v41 = vld [vmem:[#allocation8 + $0x1ba8] ss:$72 sps:$4 sm:$0xff]   ;;  %v21934_v42 = vld [vmem:[#allocation8 + $0x121c] ss:$72 sps:$4 sm:$0xff]  }
 0x12c   : > { %4716 = vmatprep.subr.bf16.mxu1 %v21877_v43  ;;  %v21937_v43 = vld [vmem:[#allocation8 + $0x1b1c] ss:$72 sps:$4 sm:$0xff]  }
 0x12e   : > { %4674 = vmatpush2.bf16.msra.mxu0 %v21872_v44  ;;  %v21932_v44 = vld [vmem:[#allocation8 + $0x1218] ss:$72 sps:$4 sm:$0xff]  }
 0x12f   : > { %4717 = vmatpush2.bf16.msra.mxu1 %v21875_v45  ;;  %4675 = vmatprep.subr.bf16.mxu0 %v21880_v46  ;;  %v21935_v45 = vld [vmem:[#allocation8 + $0x1b18] ss:$72 sps:$4 sm:$0xff]   ;;  %v21940_v46 = vld [vmem:[#allocation8 + $0x1a8c] ss:$72 sps:$4 sm:$0xff]  }
 0x130   : > { %4718 = vmatprep.subr.bf16.mxu1 %v21883_v47  ;;  %v21943_v47 = vld [vmem:[#allocation8 + $0x238c] ss:$72 sps:$4 sm:$0xff]  }
 0x132   : > { %4676 = vmatpush2.bf16.msra.mxu0 %v21878_v48  ;;  %v21938_v48 = vld [vmem:[#allocation8 + $0x1a88] ss:$72 sps:$4 sm:$0xff]  }
 0x133   : > { %4719 = vmatpush2.bf16.msra.mxu1 %v21881_v49  ;;  %4677 = vmatprep.subr.bf16.mxu0 %v21886_v52  ;;  %v21941_v49 = vld [vmem:[#allocation8 + $0x2388] ss:$72 sps:$4 sm:$0xff]   ;;  %v21946_v52 = vld [vmem:[#allocation8 + $0x19fc] ss:$72 sps:$4 sm:$0xff]  }
 0x134   : > { %4720 = vmatprep.subr.bf16.mxu1 %v21889_v55  ;;  %v21949_v55 = vld [vmem:[#allocation8 + $0x22fc] ss:$72 sps:$4 sm:$0xff]  }
 0x136   : > { %4678 = vmatpush2.bf16.msra.mxu0 %v21884_v56  ;;  %v21944_v56 = vld [vmem:[#allocation8 + $0x19f8] ss:$72 sps:$4 sm:$0xff]  }
 0x137   : > { %4721 = vmatpush2.bf16.msra.mxu1 %v21887_v57  ;;  %4733 = vmatprep.subr.bf16.mxu0 %v21892_v60  ;;  %v21947_v57 = vld [vmem:[#allocation8 + $0x22f8] ss:$72 sps:$4 sm:$0xff]   ;;  %v21952_v60 = vld [vmem:[#allocation8 + $0x196c] ss:$72 sps:$4 sm:$0xff]  }
 0x138   : > { %4776 = vmatprep.subr.bf16.mxu1 %v21895_v61  ;;  %v21955_v61 = vld [vmem:[#allocation8 + $0x226c] ss:$72 sps:$4 sm:$0xff]  }
 0x139   : > { %4680 = vmatmul.mubr.bf16.vlgmr.msra.gmra.mxu0 %v25578_v50 }
 0x13a   : > { %4723 = vmatmul.mubr.bf16.vlgmr.msra.gmra.mxu1 %v25581_v51  ;;  %4734 = vmatpush1.bf16.msra.mxu0 %v21890_v62  ;;  %v21950_v62 = vld [vmem:[#allocation8 + $0x1968] ss:$72 sps:$4 sm:$0xff]  }
 0x13b   : > { %4777 = vmatpush1.bf16.msra.mxu1 %v21893_v63  ;;  %4735 = vmatprep.subr.bf16.mxu0 %v21898_v3  ;;  %v21953_v63 = vld [vmem:[#allocation8 + $0x2268] ss:$72 sps:$4 sm:$0xff]   ;;  %v21958_v3 = vld [vmem:[#allocation8 + $0x18dc] ss:$72 sps:$4 sm:$0xff]  }
 0x13c   : > { %4778 = vmatprep.subr.bf16.mxu1 %v21901_v4  ;;  %4765 = vmatprep.mubr.bf16.mxu0 %v25550_v24  ;;  %v21961_v4 = vld [vmem:[#allocation8 + $0x21dc] ss:$72 sps:$4 sm:$0xff]  }
 0x13d   : > { %4808 = vmatprep.mubr.bf16.mxu1 %v25557_v29 }
 0x13e   : > { %4736 = vmatpush1.bf16.msra.mxu0 %v21896_v5  ;;  %v21956_v5 = vld [vmem:[#allocation8 + $0x18d8] ss:$72 sps:$4 sm:$0xff]  }
 0x13f   : > { %4779 = vmatpush1.bf16.msra.mxu1 %v21899_v9  ;;  %4737 = vmatprep.subr.bf16.mxu0 %v21904_v10  ;;  %v21959_v9 = vld [vmem:[#allocation8 + $0x21d8] ss:$72 sps:$4 sm:$0xff]   ;;  %v21964_v10 = vld [vmem:[#allocation8 + $0x184c] ss:$72 sps:$4 sm:$0xff]  }
 0x140   : > { %4780 = vmatprep.subr.bf16.mxu1 %v21907_v11  ;;  %v21967_v11 = vld [vmem:[#allocation8 + $0x214c] ss:$72 sps:$4 sm:$0xff]  }
 0x142   : > { %4738 = vmatpush1.bf16.msra.mxu0 %v21902_v12  ;;  %v21962_v12 = vld [vmem:[#allocation8 + $0x1848] ss:$72 sps:$4 sm:$0xff]  }
 0x143   : > { %4781 = vmatpush1.bf16.msra.mxu1 %v21905_v14  ;;  %4739 = vmatprep.subr.bf16.mxu0 %v21910_v15  ;;  %v21965_v14 = vld [vmem:[#allocation8 + $0x2148] ss:$72 sps:$4 sm:$0xff]   ;;  %v21970_v15 = vld [vmem:[#allocation8 + $0x17bc] ss:$72 sps:$4 sm:$0xff]  }
 0x144   : > { %4782 = vmatprep.subr.bf16.mxu1 %v21913_v16  ;;  %v21973_v16 = vld [vmem:[#allocation8 + $0x20bc] ss:$72 sps:$4 sm:$0xff]  }
 0x146   : > { %4740 = vmatpush1.bf16.msra.mxu0 %v21908_v18  ;;  %v21968_v18 = vld [vmem:[#allocation8 + $0x17b8] ss:$72 sps:$4 sm:$0xff]  }
 0x147   : > { %4783 = vmatpush1.bf16.msra.mxu1 %v21911_v19  ;;  %4741 = vmatprep.subr.bf16.mxu0 %v21916_v20  ;;  %v21971_v19 = vld [vmem:[#allocation8 + $0x20b8] ss:$72 sps:$4 sm:$0xff]   ;;  %v21976_v20 = vld [vmem:[#allocation8 + $0x172c] ss:$72 sps:$4 sm:$0xff]  }
 0x148   : > { %4784 = vmatprep.subr.bf16.mxu1 %v21919_v21  ;;  %v21979_v21 = vld [vmem:[#allocation8 + $0x202c] ss:$72 sps:$4 sm:$0xff]  }
 0x14a   : > { %4742 = vmatpush1.bf16.msra.mxu0 %v21914_v23  ;;  %v21974_v23 = vld [vmem:[#allocation8 + $0x1728] ss:$72 sps:$4 sm:$0xff]  }
 0x14b   : > { %4785 = vmatpush1.bf16.msra.mxu1 %v21917_v28  ;;  %4743 = vmatprep.subr.bf16.mxu0 %v21922_v30  ;;  %v21977_v28 = vld [vmem:[#allocation8 + $0x2028] ss:$72 sps:$4 sm:$0xff]   ;;  %v21982_v30 = vld [vmem:[#allocation8 + $0x169c] ss:$72 sps:$4 sm:$0xff]  }
 0x14c   : > { %4786 = vmatprep.subr.bf16.mxu1 %v21925_v31  ;;  %v21985_v31 = vld [vmem:[#allocation8 + $0x1f9c] ss:$72 sps:$4 sm:$0xff]  }
 0x14e   : > { %4744 = vmatpush1.bf16.msra.mxu0 %v21920_v32  ;;  %v21980_v32 = vld [vmem:[#allocation8 + $0x1698] ss:$72 sps:$4 sm:$0xff]  }
 0x14f   : > { %4787 = vmatpush1.bf16.msra.mxu1 %v21923_v35  ;;  %4745 = vmatprep.subr.bf16.mxu0 %v21928_v37  ;;  %v21983_v35 = vld [vmem:[#allocation8 + $0x1f98] ss:$72 sps:$4 sm:$0xff]   ;;  %v21988_v37 = vld [vmem:[#allocation8 + $0x1614] ss:$72 sps:$4 sm:$0xff]  }
 0x150   : > { %4788 = vmatprep.subr.bf16.mxu1 %v21931_v39  ;;  %v21991_v39 = vld [vmem:[#allocation8 + $0x1f14] ss:$72 sps:$4 sm:$0xff]  }
 0x152   : > { %4746 = vmatpush1.bf16.msra.mxu0 %v21926_v40  ;;  %v21986_v40 = vld [vmem:[#allocation8 + $0x1610] ss:$72 sps:$4 sm:$0xff]  }
 0x153   : > { %4789 = vmatpush1.bf16.msra.mxu1 %v21929_v41  ;;  %4747 = vmatprep.subr.bf16.mxu0 %v21934_v42  ;;  %v21989_v41 = vld [vmem:[#allocation8 + $0x1f10] ss:$72 sps:$4 sm:$0xff]   ;;  %v21994_v42 = vld [vmem:[#allocation8 + $0x1584] ss:$72 sps:$4 sm:$0xff]  }
 0x154   : > { %4790 = vmatprep.subr.bf16.mxu1 %v21937_v43  ;;  %v21997_v43 = vld [vmem:[#allocation8 + $0x1e84] ss:$72 sps:$4 sm:$0xff]  }
 0x156   : > { %4748 = vmatpush1.bf16.msra.mxu0 %v21932_v44 }
 0x157   : > { %4791 = vmatpush1.bf16.msra.mxu1 %v21935_v45  ;;  %4749 = vmatprep.subr.bf16.mxu0 %v21940_v46  ;;  %v21992_v46 = vld [vmem:[#allocation8 + $0x1580] ss:$72 sps:$4 sm:$0xff]  }
 0x158   : > { %4792 = vmatprep.subr.bf16.mxu1 %v21943_v47  ;;  %v21995_v47 = vld [vmem:[#allocation8 + $0x1e80] ss:$72 sps:$4 sm:$0xff]  }
 0x15a   : > { %4750 = vmatpush2.bf16.msra.mxu0 %v21938_v48 }
 0x15b   : > { %4793 = vmatpush2.bf16.msra.mxu1 %v21941_v49  ;;  %4751 = vmatprep.subr.bf16.mxu0 %v21946_v52  ;;  %v22000_v49 = vld [vmem:[#allocation8 + $0x14f4] ss:$72 sps:$4 sm:$0xff]  }
 0x15c   : > { %4794 = vmatprep.subr.bf16.mxu1 %v21949_v55 }
 0x15e   : > { %4752 = vmatpush2.bf16.msra.mxu0 %v21944_v56  ;;  %v22003_v56 = vld [vmem:[#allocation8 + $0x1df4] ss:$72 sps:$4 sm:$0xff]  }
 0x15f   : > { %4795 = vmatpush2.bf16.msra.mxu1 %v21947_v57  ;;  %4753 = vmatprep.subr.bf16.mxu0 %v21952_v60 }
 0x160   : > { %4796 = vmatprep.subr.bf16.mxu1 %v21955_v61 }
 0x162   : > { %4754 = vmatpush2.bf16.msra.mxu0 %v21950_v62  ;;  %v21998_v62 = vld [vmem:[#allocation8 + $0x14f0] ss:$72 sps:$4 sm:$0xff]  }
 0x163   : > { %4797 = vmatpush2.bf16.msra.mxu1 %v21953_v63  ;;  %4755 = vmatprep.subr.bf16.mxu0 %v21958_v3  ;;  %v22001_v63 = vld [vmem:[#allocation8 + $0x1df0] ss:$72 sps:$4 sm:$0xff]  }
 0x164   : > { %4798 = vmatprep.subr.bf16.mxu1 %v21961_v4  ;;  %v22006_v4 = vld [vmem:[#allocation8 + $0x1464] ss:$72 sps:$4 sm:$0xff]  }
 0x166   : > { %4756 = vmatpush2.bf16.msra.mxu0 %v21956_v5  ;;  %v22009_v5 = vld [vmem:[#allocation8 + $0x1d64] ss:$72 sps:$4 sm:$0xff]  }
 0x167   : > { %4799 = vmatpush2.bf16.msra.mxu1 %v21959_v9  ;;  %4757 = vmatprep.subr.bf16.mxu0 %v21964_v10  ;;  %v22004_v9 = vld [vmem:[#allocation8 + $0x1460] ss:$72 sps:$4 sm:$0xff]  }
 0x168   : > { %4800 = vmatprep.subr.bf16.mxu1 %v21967_v11  ;;  %v22007_v10 = vld [vmem:[#allocation8 + $0x1d60] ss:$72 sps:$4 sm:$0xff]   ;;  %v22012_v11 = vld [vmem:[#allocation8 + $0x13d4] ss:$72 sps:$4 sm:$0xff]  }
 0x16a   : > { %4758 = vmatpush2.bf16.msra.mxu0 %v21962_v12  ;;  %v22015_v12 = vld [vmem:[#allocation8 + $0x1cd4] ss:$72 sps:$4 sm:$0xff]  }
 0x16b   : > { %4801 = vmatpush2.bf16.msra.mxu1 %v21965_v14  ;;  %4759 = vmatprep.subr.bf16.mxu0 %v21970_v15  ;;  %v22010_v14 = vld [vmem:[#allocation8 + $0x13d0] ss:$72 sps:$4 sm:$0xff]  }
 0x16c   : > { %4802 = vmatprep.subr.bf16.mxu1 %v21973_v16  ;;  %v22013_v15 = vld [vmem:[#allocation8 + $0x1cd0] ss:$72 sps:$4 sm:$0xff]   ;;  %v22018_v16 = vld [vmem:[#allocation8 + $0x1344] ss:$72 sps:$4 sm:$0xff]  }
 0x16e   : > { %4760 = vmatpush2.bf16.msra.mxu0 %v21968_v18  ;;  %v22021_v18 = vld [vmem:[#allocation8 + $0x1c44] ss:$72 sps:$4 sm:$0xff]  }
 0x16f   : > { %4803 = vmatpush2.bf16.msra.mxu1 %v21971_v19  ;;  %4761 = vmatprep.subr.bf16.mxu0 %v21976_v20  ;;  %v22016_v19 = vld [vmem:[#allocation8 + $0x1340] ss:$72 sps:$4 sm:$0xff]  }
 0x170   : > { %4804 = vmatprep.subr.bf16.mxu1 %v21979_v21  ;;  %v22019_v20 = vld [vmem:[#allocation8 + $0x1c40] ss:$72 sps:$4 sm:$0xff]   ;;  %v22024_v21 = vld [vmem:[#allocation8 + $0x12b4] ss:$72 sps:$4 sm:$0xff]  }
 0x172   : > { %4762 = vmatpush2.bf16.msra.mxu0 %v21974_v23  ;;  %v22027_v23 = vld [vmem:[#allocation8 + $0x1bb4] ss:$72 sps:$4 sm:$0xff]  }
 0x173   : > { %4805 = vmatpush2.bf16.msra.mxu1 %v21977_v28  ;;  %4763 = vmatprep.subr.bf16.mxu0 %v21982_v30  ;;  %v22022_v28 = vld [vmem:[#allocation8 + $0x12b0] ss:$72 sps:$4 sm:$0xff]  }
 0x174   : > { %4806 = vmatprep.subr.bf16.mxu1 %v21985_v31  ;;  %v22025_v30 = vld [vmem:[#allocation8 + $0x1bb0] ss:$72 sps:$4 sm:$0xff]   ;;  %v22030_v31 = vld [vmem:[#allocation8 + $0x1224] ss:$72 sps:$4 sm:$0xff]  }
 0x176   : > { %4764 = vmatpush2.bf16.msra.mxu0 %v21980_v32  ;;  %v22033_v32 = vld [vmem:[#allocation8 + $0x1b24] ss:$72 sps:$4 sm:$0xff]  }
 0x177   : > { %4807 = vmatpush2.bf16.msra.mxu1 %v21983_v35  ;;  %4819 = vmatprep.subr.bf16.mxu0 %v21988_v37  ;;  %v22028_v35 = vld [vmem:[#allocation8 + $0x1220] ss:$72 sps:$4 sm:$0xff]  }
 0x178   : > { %4862 = vmatprep.subr.bf16.mxu1 %v21991_v39  ;;  %v22031_v37 = vld [vmem:[#allocation8 + $0x1b20] ss:$72 sps:$4 sm:$0xff]   ;;  %v22036_v39 = vld [vmem:[#allocation8 + $0x1a94] ss:$72 sps:$4 sm:$0xff]  }
 0x179   : > { %v4509_v44 = vpop.f32.mrf.mxu0  ;;  %4766 = vmatmul.mubr.bf16.vlgmr.msra.gmra.mxu0 %v25578_v50 }
 0x17a   : > { %v4552_v45 = vpop.f32.mrf.mxu1  ;;  %4809 = vmatmul.mubr.bf16.vlgmr.msra.gmra.mxu1 %v25581_v51  ;;  %4820 = vmatpush1.bf16.msra.mxu0 %v21986_v40  ;;  %v22039_v40 = vld [vmem:[#allocation8 + $0x2394] ss:$72 sps:$4 sm:$0xff]  }
 0x17b   : > { %v25597_v48 = vadd.f32 %v4552_v45, %v4509_v44  ;;  %4863 = vmatpush1.bf16.msra.mxu1 %v21989_v41  ;;  %v4511_v52 = vpop.f32.mrf.mxu0  ;;  %4821 = vmatprep.subr.bf16.mxu0 %v21994_v42  ;;  %v22034_v41 = vld [vmem:[#allocation8 + $0x1a90] ss:$72 sps:$4 sm:$0xff]   ;;  %v22045_v44 = vld [vmem:[#allocation8 + $0x2304] ss:$72 sps:$4 sm:$0xff]   ;;  %v22040_v45 = vld [vmem:[#allocation8 + $0x1a00] ss:$72 sps:$4 sm:$0xff]  }
 0x17c   : > { %v4554_v55 = vpop.f32.mrf.mxu1  ;;  %4864 = vmatprep.subr.bf16.mxu1 %v21997_v43  ;;  %4851 = vmatprep.mubr.bf16.mxu0 %v25550_v24  ;;  %v22037_v42 = vld [vmem:[#allocation8 + $0x2390] ss:$72 sps:$4 sm:$0xff]   ;;  %v22042_v43 = vld [vmem:[#allocation8 + $0x1a04] ss:$72 sps:$4 sm:$0xff]  }
 0x17d   : > { %v25599_v57 = vadd.f32 %v4554_v55, %v4511_v52  ;;  %4894 = vmatprep.mubr.bf16.mxu1 %v25557_v29  ;;  %v4513_v60 = vpop.f32.mrf.mxu0  ;;  %v22046_v52 = vld [vmem:[#allocation8 + $0x1970] ss:$72 sps:$4 sm:$0xff]  }
 0x17e   : > { %v4556_v61 = vpop.f32.mrf.mxu1  ;;  %4822 = vmatpush1.bf16.msra.mxu0 %v21992_v46  ;;  %v22043_v46 = vld [vmem:[#allocation8 + $0x2300] ss:$72 sps:$4 sm:$0xff]   ;;  %v22049_v55 = vld [vmem:[#allocation8 + $0x2270] ss:$72 sps:$4 sm:$0xff]  }
 0x17f   : > { %v25603_v3 = vadd.f32 %v4556_v61, %v4513_v60  ;;  %4865 = vmatpush1.bf16.msra.mxu1 %v21995_v47  ;;  %4823 = vmatprep.subr.bf16.mxu0 %v22000_v49  ;;  %v22048_v47 = vld [vmem:[#allocation8 + $0x1974] ss:$72 sps:$4 sm:$0xff]   ;;  %v22057_v60 = vld [vmem:[#allocation8 + $0x21e4] ss:$72 sps:$4 sm:$0xff]   ;;  %v22052_v61 = vld [vmem:[#allocation8 + $0x18e0] ss:$72 sps:$4 sm:$0xff]  }
 0x180   : > { %4866 = vmatprep.subr.bf16.mxu1 %v22003_v56  ;;  %v22051_v49 = vld [vmem:[#allocation8 + $0x2274] ss:$72 sps:$4 sm:$0xff]   ;;  %v22054_v56 = vld [vmem:[#allocation8 + $0x18e4] ss:$72 sps:$4 sm:$0xff]  }
 0x182   : > { %4824 = vmatpush1.bf16.msra.mxu0 %v21998_v62  ;;  %v22055_v62 = vld [vmem:[#allocation8 + $0x21e0] ss:$72 sps:$4 sm:$0xff]  }
 0x183   : > { %4867 = vmatpush1.bf16.msra.mxu1 %v22001_v63  ;;  %4825 = vmatprep.subr.bf16.mxu0 %v22006_v4  ;;  %v22060_v63 = vld [vmem:[#allocation8 + $0x1854] ss:$72 sps:$4 sm:$0xff]  }
 0x184   : > { %4868 = vmatprep.subr.bf16.mxu1 %v22009_v5  ;;  %v22063_v4 = vld [vmem:[#allocation8 + $0x2154] ss:$72 sps:$4 sm:$0xff]   ;;  %v22058_v5 = vld [vmem:[#allocation8 + $0x1850] ss:$72 sps:$4 sm:$0xff]  }
 0x186   : > { %4826 = vmatpush1.bf16.msra.mxu0 %v22004_v9  ;;  %v22061_v9 = vld [vmem:[#allocation8 + $0x2150] ss:$72 sps:$4 sm:$0xff]  }
 0x187   : > { %4869 = vmatpush1.bf16.msra.mxu1 %v22007_v10  ;;  %4827 = vmatprep.subr.bf16.mxu0 %v22012_v11  ;;  %v22066_v10 = vld [vmem:[#allocation8 + $0x17c4] ss:$72 sps:$4 sm:$0xff]  }
 0x188   : > { %4870 = vmatprep.subr.bf16.mxu1 %v22015_v12  ;;  %v22069_v11 = vld [vmem:[#allocation8 + $0x20c4] ss:$72 sps:$4 sm:$0xff]   ;;  %v22064_v12 = vld [vmem:[#allocation8 + $0x17c0] ss:$72 sps:$4 sm:$0xff]  }
 0x18a   : > { %4828 = vmatpush1.bf16.msra.mxu0 %v22010_v14  ;;  %v22067_v14 = vld [vmem:[#allocation8 + $0x20c0] ss:$72 sps:$4 sm:$0xff]  }
 0x18b   : > { %4871 = vmatpush1.bf16.msra.mxu1 %v22013_v15  ;;  %4829 = vmatprep.subr.bf16.mxu0 %v22018_v16  ;;  %v22072_v15 = vld [vmem:[#allocation8 + $0x1734] ss:$72 sps:$4 sm:$0xff]  }
 0x18c   : > { %4872 = vmatprep.subr.bf16.mxu1 %v22021_v18  ;;  %v22075_v16 = vld [vmem:[#allocation8 + $0x2034] ss:$72 sps:$4 sm:$0xff]   ;;  %v22070_v18 = vld [vmem:[#allocation8 + $0x1730] ss:$72 sps:$4 sm:$0xff]  }
 0x18e   : > { %4830 = vmatpush1.bf16.msra.mxu0 %v22016_v19  ;;  %v22073_v19 = vld [vmem:[#allocation8 + $0x2030] ss:$72 sps:$4 sm:$0xff]  }
 0x18f   : > { %4873 = vmatpush1.bf16.msra.mxu1 %v22019_v20  ;;  %4831 = vmatprep.subr.bf16.mxu0 %v22024_v21  ;;  %v22078_v20 = vld [vmem:[#allocation8 + $0x16a4] ss:$72 sps:$4 sm:$0xff]  }
 0x190   : > { %4874 = vmatprep.subr.bf16.mxu1 %v22027_v23  ;;  %v22081_v21 = vld [vmem:[#allocation8 + $0x1fa4] ss:$72 sps:$4 sm:$0xff]   ;;  %v22076_v23 = vld [vmem:[#allocation8 + $0x16a0] ss:$72 sps:$4 sm:$0xff]  }
 0x192   : > { %4832 = vmatpush1.bf16.msra.mxu0 %v22022_v28  ;;  %v22079_v28 = vld [vmem:[#allocation8 + $0x1fa0] ss:$72 sps:$4 sm:$0xff]  }
 0x193   : > { %4875 = vmatpush1.bf16.msra.mxu1 %v22025_v30  ;;  %4833 = vmatprep.subr.bf16.mxu0 %v22030_v31  ;;  %v22084_v30 = vld [vmem:[#allocation8 + $0x161c] ss:$72 sps:$4 sm:$0xff]  }
 0x194   : > { %4876 = vmatprep.subr.bf16.mxu1 %v22033_v32  ;;  %v22087_v31 = vld [vmem:[#allocation8 + $0x1f1c] ss:$72 sps:$4 sm:$0xff]   ;;  %v22082_v32 = vld [vmem:[#allocation8 + $0x1618] ss:$72 sps:$4 sm:$0xff]  }
 0x196   : > { %4834 = vmatpush1.bf16.msra.mxu0 %v22028_v35  ;;  %v22085_v35 = vld [vmem:[#allocation8 + $0x1f18] ss:$72 sps:$4 sm:$0xff]  }
 0x197   : > { %4877 = vmatpush1.bf16.msra.mxu1 %v22031_v37  ;;  %4835 = vmatprep.subr.bf16.mxu0 %v22036_v39  ;;  %v25605_v37 = vpop.f32.mrf.mxu0  ;;  %v25607_v39 = vpop.f32.mrf.mxu1 }
 0x198   : > { %4878 = vmatprep.subr.bf16.mxu1 %v22039_v40  ;;  %26372 = vst [vmem:[#allocation24_spill] sm:$0xff] %v25605_v37  ;;  %26373 = vst [vmem:[#allocation25_spill] sm:$0xff] %v25607_v39  ;;  %v22090_v40 = vld [vmem:[#allocation8 + $0x158c] ss:$72 sps:$4 sm:$0xff]   ;;  %v22862_v39 = vld [vmem:[#allocation8 + $0x2f0] ss:$72 sps:$4 sm:$0xff]  }
 0x199   : > { %v22865_v37 = vld [vmem:[#allocation8 + $0xbf0] ss:$72 sps:$4 sm:$0xff]  }
 0x19a   : > { %4836 = vmatpush2.bf16.msra.mxu0 %v22034_v41  ;;  %v22093_v41 = vld [vmem:[#allocation8 + $0x1e8c] ss:$72 sps:$4 sm:$0xff]  }
 0x19b   : > { %4879 = vmatpush2.bf16.msra.mxu1 %v22037_v42  ;;  %4837 = vmatprep.subr.bf16.mxu0 %v22042_v43  ;;  %v22088_v42 = vld [vmem:[#allocation8 + $0x1588] ss:$72 sps:$4 sm:$0xff]  }
 0x19c   : > { %4880 = vmatprep.subr.bf16.mxu1 %v22045_v44  ;;  %v22091_v43 = vld [vmem:[#allocation8 + $0x1e88] ss:$72 sps:$4 sm:$0xff]  }
 0x19e   : > { %4838 = vmatpush2.bf16.msra.mxu0 %v22040_v45 }
 0x19f   : > { %4881 = vmatpush2.bf16.msra.mxu1 %v22043_v46  ;;  %4839 = vmatprep.subr.bf16.mxu0 %v22048_v47 }
 0x1a0   : > { %4882 = vmatprep.subr.bf16.mxu1 %v22051_v49 }
 0x1a2   : > { %4840 = vmatpush2.bf16.msra.mxu0 %v22046_v52  ;;  %v22096_v52 = vld [vmem:[#allocation8 + $0x14fc] ss:$72 sps:$4 sm:$0xff]  }
 0x1a3   : > { %4883 = vmatpush2.bf16.msra.mxu1 %v22049_v55  ;;  %4841 = vmatprep.subr.bf16.mxu0 %v22054_v56  ;;  %v22099_v55 = vld [vmem:[#allocation8 + $0x1dfc] ss:$72 sps:$4 sm:$0xff]  }
 0x1a4   : > { %4884 = vmatprep.subr.bf16.mxu1 %v22057_v60  ;;  %v22094_v60 = vld [vmem:[#allocation8 + $0x14f8] ss:$72 sps:$4 sm:$0xff]  }
 0x1a6   : > { %4842 = vmatpush2.bf16.msra.mxu0 %v22052_v61  ;;  %v22097_v61 = vld [vmem:[#allocation8 + $0x1df8] ss:$72 sps:$4 sm:$0xff]  }
 0x1a7   : > { %4885 = vmatpush2.bf16.msra.mxu1 %v22055_v62  ;;  %4843 = vmatprep.subr.bf16.mxu0 %v22060_v63 }
 0x1a8   : > { %4886 = vmatprep.subr.bf16.mxu1 %v22063_v4 }
 0x1aa   : > { %4844 = vmatpush2.bf16.msra.mxu0 %v22058_v5  ;;  %v22102_v5 = vld [vmem:[#allocation8 + $0x146c] ss:$72 sps:$4 sm:$0xff]  }
 0x1ab   : > { %4887 = vmatpush2.bf16.msra.mxu1 %v22061_v9  ;;  %4845 = vmatprep.subr.bf16.mxu0 %v22066_v10  ;;  %v22105_v9 = vld [vmem:[#allocation8 + $0x1d6c] ss:$72 sps:$4 sm:$0xff]   ;;  %v22100_v10 = vld [vmem:[#allocation8 + $0x1468] ss:$72 sps:$4 sm:$0xff]  }
 0x1ac   : > { %4888 = vmatprep.subr.bf16.mxu1 %v22069_v11  ;;  %v22103_v11 = vld [vmem:[#allocation8 + $0x1d68] ss:$72 sps:$4 sm:$0xff]  }
 0x1ae   : > { %4846 = vmatpush2.bf16.msra.mxu0 %v22064_v12  ;;  %v22108_v12 = vld [vmem:[#allocation8 + $0x13dc] ss:$72 sps:$4 sm:$0xff]  }
 0x1af   : > { %4889 = vmatpush2.bf16.msra.mxu1 %v22067_v14  ;;  %4847 = vmatprep.subr.bf16.mxu0 %v22072_v15  ;;  %v22111_v14 = vld [vmem:[#allocation8 + $0x1cdc] ss:$72 sps:$4 sm:$0xff]   ;;  %v22106_v15 = vld [vmem:[#allocation8 + $0x13d8] ss:$72 sps:$4 sm:$0xff]  }
 0x1b0   : > { %4890 = vmatprep.subr.bf16.mxu1 %v22075_v16  ;;  %v22109_v16 = vld [vmem:[#allocation8 + $0x1cd8] ss:$72 sps:$4 sm:$0xff]  }
 0x1b2   : > { %4848 = vmatpush2.bf16.msra.mxu0 %v22070_v18  ;;  %v22114_v18 = vld [vmem:[#allocation8 + $0x134c] ss:$72 sps:$4 sm:$0xff]  }
 0x1b3   : > { %4891 = vmatpush2.bf16.msra.mxu1 %v22073_v19  ;;  %4849 = vmatprep.subr.bf16.mxu0 %v22078_v20  ;;  %v22117_v19 = vld [vmem:[#allocation8 + $0x1c4c] ss:$72 sps:$4 sm:$0xff]   ;;  %v22112_v20 = vld [vmem:[#allocation8 + $0x1348] ss:$72 sps:$4 sm:$0xff]  }
 0x1b4   : > { %4892 = vmatprep.subr.bf16.mxu1 %v22081_v21  ;;  %v22115_v21 = vld [vmem:[#allocation8 + $0x1c48] ss:$72 sps:$4 sm:$0xff]  }
 0x1b6   : > { %4850 = vmatpush2.bf16.msra.mxu0 %v22076_v23  ;;  %v22120_v23 = vld [vmem:[#allocation8 + $0x12bc] ss:$72 sps:$4 sm:$0xff]  }
 0x1b7   : > { %4893 = vmatpush2.bf16.msra.mxu1 %v22079_v28  ;;  %4905 = vmatprep.subr.bf16.mxu0 %v22084_v30  ;;  %v22123_v28 = vld [vmem:[#allocation8 + $0x1bbc] ss:$72 sps:$4 sm:$0xff]   ;;  %v22118_v30 = vld [vmem:[#allocation8 + $0x12b8] ss:$72 sps:$4 sm:$0xff]  }
 0x1b8   : > { %4948 = vmatprep.subr.bf16.mxu1 %v22087_v31  ;;  %v22121_v31 = vld [vmem:[#allocation8 + $0x1bb8] ss:$72 sps:$4 sm:$0xff]  }
 0x1b9   : > { %v4595_v44 = vpop.f32.mrf.mxu0  ;;  %4852 = vmatmul.mubr.bf16.vlgmr.msra.gmra.mxu0 %v25578_v50 }
 0x1ba   : > { %v4638_v45 = vpop.f32.mrf.mxu1  ;;  %4895 = vmatmul.mubr.bf16.vlgmr.msra.gmra.mxu1 %v25581_v51  ;;  %4906 = vmatpush1.bf16.msra.mxu0 %v22082_v32  ;;  %v22126_v32 = vld [vmem:[#allocation8 + $0x122c] ss:$72 sps:$4 sm:$0xff]  }
 0x1bb   : > { %v25611_v46 = vadd.f32 %v4638_v45, %v4595_v44  ;;  %4949 = vmatpush1.bf16.msra.mxu1 %v22085_v35  ;;  %v4597_v47 = vpop.f32.mrf.mxu0  ;;  %4907 = vmatprep.subr.bf16.mxu0 %v22090_v40  ;;  %v22129_v35 = vld [vmem:[#allocation8 + $0x1b2c] ss:$72 sps:$4 sm:$0xff]   ;;  %v22124_v40 = vld [vmem:[#allocation8 + $0x1228] ss:$72 sps:$4 sm:$0xff]   ;;  %v22130_v44 = vld [vmem:[#allocation8 + $0x1a98] ss:$72 sps:$4 sm:$0xff]  }
 0x1bc   : > { %v4640_v49 = vpop.f32.mrf.mxu1  ;;  %4950 = vmatprep.subr.bf16.mxu1 %v22093_v41  ;;  %4937 = vmatprep.mubr.bf16.mxu0 %v25550_v24  ;;  %v22127_v41 = vld [vmem:[#allocation8 + $0x1b28] ss:$72 sps:$4 sm:$0xff]   ;;  %v22133_v45 = vld [vmem:[#allocation8 + $0x2398] ss:$72 sps:$4 sm:$0xff]  }
 0x1bd   : > { %v25613_v56 = vadd.f32 %v4640_v49, %v4597_v47  ;;  %4980 = vmatprep.mubr.bf16.mxu1 %v25557_v29  ;;  %v4599_v62 = vpop.f32.mrf.mxu0  ;;  %v22138_v47 = vld [vmem:[#allocation8 + $0x1a0c] ss:$72 sps:$4 sm:$0xff]  }
 0x1be   : > { %v4642_v63 = vpop.f32.mrf.mxu1  ;;  %4908 = vmatpush1.bf16.msra.mxu0 %v22088_v42  ;;  %v22132_v42 = vld [vmem:[#allocation8 + $0x1a9c] ss:$72 sps:$4 sm:$0xff]   ;;  %v22141_v49 = vld [vmem:[#allocation8 + $0x230c] ss:$72 sps:$4 sm:$0xff]  }
 0x1bf   : > { %v25617_v4 = vadd.f32 %v4642_v63, %v4599_v62  ;;  %4951 = vmatpush1.bf16.msra.mxu1 %v22091_v43  ;;  %4909 = vmatprep.subr.bf16.mxu0 %v22096_v52  ;;  %v22135_v43 = vld [vmem:[#allocation8 + $0x239c] ss:$72 sps:$4 sm:$0xff]   ;;  %v22136_v52 = vld [vmem:[#allocation8 + $0x1a08] ss:$72 sps:$4 sm:$0xff]   ;;  %v22142_v62 = vld [vmem:[#allocation8 + $0x1978] ss:$72 sps:$4 sm:$0xff]  }
 0x1c0   : > { %4952 = vmatprep.subr.bf16.mxu1 %v22099_v55  ;;  %v22139_v55 = vld [vmem:[#allocation8 + $0x2308] ss:$72 sps:$4 sm:$0xff]   ;;  %v22145_v63 = vld [vmem:[#allocation8 + $0x2278] ss:$72 sps:$4 sm:$0xff]  }
 0x1c2   : > { %4910 = vmatpush1.bf16.msra.mxu0 %v22094_v60  ;;  %v22144_v60 = vld [vmem:[#allocation8 + $0x197c] ss:$72 sps:$4 sm:$0xff]  }
 0x1c3   : > { %4953 = vmatpush1.bf16.msra.mxu1 %v22097_v61  ;;  %4911 = vmatprep.subr.bf16.mxu0 %v22102_v5  ;;  %v22147_v61 = vld [vmem:[#allocation8 + $0x227c] ss:$72 sps:$4 sm:$0xff]   ;;  %v22150_v5 = vld [vmem:[#allocation8 + $0x18ec] ss:$72 sps:$4 sm:$0xff]  }
 0x1c4   : > { %4954 = vmatprep.subr.bf16.mxu1 %v22105_v9  ;;  %v22153_v9 = vld [vmem:[#allocation8 + $0x21ec] ss:$72 sps:$4 sm:$0xff]  }
 0x1c6   : > { %4912 = vmatpush1.bf16.msra.mxu0 %v22100_v10  ;;  %v22148_v10 = vld [vmem:[#allocation8 + $0x18e8] ss:$72 sps:$4 sm:$0xff]  }
 0x1c7   : > { %4955 = vmatpush1.bf16.msra.mxu1 %v22103_v11  ;;  %4913 = vmatprep.subr.bf16.mxu0 %v22108_v12  ;;  %v22151_v11 = vld [vmem:[#allocation8 + $0x21e8] ss:$72 sps:$4 sm:$0xff]   ;;  %v22156_v12 = vld [vmem:[#allocation8 + $0x185c] ss:$72 sps:$4 sm:$0xff]  }
 0x1c8   : > { %4956 = vmatprep.subr.bf16.mxu1 %v22111_v14  ;;  %v22159_v14 = vld [vmem:[#allocation8 + $0x215c] ss:$72 sps:$4 sm:$0xff]  }
 0x1ca   : > { %4914 = vmatpush1.bf16.msra.mxu0 %v22106_v15  ;;  %v22154_v15 = vld [vmem:[#allocation8 + $0x1858] ss:$72 sps:$4 sm:$0xff]  }
 0x1cb   : > { %4957 = vmatpush1.bf16.msra.mxu1 %v22109_v16  ;;  %4915 = vmatprep.subr.bf16.mxu0 %v22114_v18  ;;  %v22157_v16 = vld [vmem:[#allocation8 + $0x2158] ss:$72 sps:$4 sm:$0xff]   ;;  %v22162_v18 = vld [vmem:[#allocation8 + $0x17cc] ss:$72 sps:$4 sm:$0xff]  }
 0x1cc   : > { %4958 = vmatprep.subr.bf16.mxu1 %v22117_v19  ;;  %v22165_v19 = vld [vmem:[#allocation8 + $0x20cc] ss:$72 sps:$4 sm:$0xff]  }
 0x1ce   : > { %4916 = vmatpush1.bf16.msra.mxu0 %v22112_v20  ;;  %v22160_v20 = vld [vmem:[#allocation8 + $0x17c8] ss:$72 sps:$4 sm:$0xff]  }
 0x1cf   : > { %4959 = vmatpush1.bf16.msra.mxu1 %v22115_v21  ;;  %4917 = vmatprep.subr.bf16.mxu0 %v22120_v23  ;;  %v22163_v21 = vld [vmem:[#allocation8 + $0x20c8] ss:$72 sps:$4 sm:$0xff]   ;;  %v22168_v23 = vld [vmem:[#allocation8 + $0x173c] ss:$72 sps:$4 sm:$0xff]  }
 0x1d0   : > { %4960 = vmatprep.subr.bf16.mxu1 %v22123_v28  ;;  %v22171_v28 = vld [vmem:[#allocation8 + $0x203c] ss:$72 sps:$4 sm:$0xff]  }
 0x1d2   : > { %4918 = vmatpush1.bf16.msra.mxu0 %v22118_v30  ;;  %v22166_v30 = vld [vmem:[#allocation8 + $0x1738] ss:$72 sps:$4 sm:$0xff]  }
 0x1d3   : > { %4961 = vmatpush1.bf16.msra.mxu1 %v22121_v31  ;;  %4919 = vmatprep.subr.bf16.mxu0 %v22126_v32  ;;  %v22169_v31 = vld [vmem:[#allocation8 + $0x2038] ss:$72 sps:$4 sm:$0xff]   ;;  %v22174_v32 = vld [vmem:[#allocation8 + $0x16ac] ss:$72 sps:$4 sm:$0xff]  }
 0x1d4   : > { %4962 = vmatprep.subr.bf16.mxu1 %v22129_v35  ;;  %v22177_v35 = vld [vmem:[#allocation8 + $0x1fac] ss:$72 sps:$4 sm:$0xff]  }
 0x1d6   : > { %4920 = vmatpush1.bf16.msra.mxu0 %v22124_v40  ;;  %v22172_v40 = vld [vmem:[#allocation8 + $0x16a8] ss:$72 sps:$4 sm:$0xff]  }
 0x1d7   : > { %4963 = vmatpush1.bf16.msra.mxu1 %v22127_v41  ;;  %4921 = vmatprep.subr.bf16.mxu0 %v22132_v42  ;;  %v22175_v41 = vld [vmem:[#allocation8 + $0x1fa8] ss:$72 sps:$4 sm:$0xff]   ;;  %v22180_v42 = vld [vmem:[#allocation8 + $0x1624] ss:$72 sps:$4 sm:$0xff]  }
 0x1d8   : > { %4964 = vmatprep.subr.bf16.mxu1 %v22135_v43  ;;  %v22183_v43 = vld [vmem:[#allocation8 + $0x1f24] ss:$72 sps:$4 sm:$0xff]  }
 0x1da   : > { %4922 = vmatpush2.bf16.msra.mxu0 %v22130_v44  ;;  %v22178_v44 = vld [vmem:[#allocation8 + $0x1620] ss:$72 sps:$4 sm:$0xff]  }
 0x1db   : > { %4965 = vmatpush2.bf16.msra.mxu1 %v22133_v45  ;;  %4923 = vmatprep.subr.bf16.mxu0 %v22138_v47  ;;  %v22181_v45 = vld [vmem:[#allocation8 + $0x1f20] ss:$72 sps:$4 sm:$0xff]   ;;  %v25619_v47 = vpop.f32.mrf.mxu0 }
 0x1dc   : > { %4966 = vmatprep.subr.bf16.mxu1 %v22141_v49  ;;  %26374 = vst [vmem:[#allocation26_spill] sm:$0xff] %v25619_v47  ;;  %v25621_v49 = vpop.f32.mrf.mxu1  ;;  %v22781_v47 = vld [vmem:[#allocation8 + $0xac8] ss:$72 sps:$4 sm:$0xff]  }
 0x1dd   : > { %26375 = vst [vmem:[#allocation27_spill] sm:$0xff] %v25621_v49  ;;  %v22778_v49 = vld [vmem:[#allocation8 + $0x1c8] ss:$72 sps:$4 sm:$0xff]  }
 0x1de   : > { %4924 = vmatpush2.bf16.msra.mxu0 %v22136_v52  ;;  %v22186_v52 = vld [vmem:[#allocation8 + $0x1594] ss:$72 sps:$4 sm:$0xff]  }
 0x1df   : > { %4967 = vmatpush2.bf16.msra.mxu1 %v22139_v55  ;;  %4925 = vmatprep.subr.bf16.mxu0 %v22144_v60  ;;  %v22189_v55 = vld [vmem:[#allocation8 + $0x1e94] ss:$72 sps:$4 sm:$0xff]   ;;  %v22184_v60 = vld [vmem:[#allocation8 + $0x1590] ss:$72 sps:$4 sm:$0xff]  }
 0x1e0   : > { %4968 = vmatprep.subr.bf16.mxu1 %v22147_v61  ;;  %v22187_v61 = vld [vmem:[#allocation8 + $0x1e90] ss:$72 sps:$4 sm:$0xff]  }
 0x1e2   : > { %4926 = vmatpush2.bf16.msra.mxu0 %v22142_v62 }
 0x1e3   : > { %4969 = vmatpush2.bf16.msra.mxu1 %v22145_v63  ;;  %4927 = vmatprep.subr.bf16.mxu0 %v22150_v5 }
 0x1e4   : > { %4970 = vmatprep.subr.bf16.mxu1 %v22153_v9 }
 0x1e6   : > { %4928 = vmatpush2.bf16.msra.mxu0 %v22148_v10 }
 0x1e7   : > { %4971 = vmatpush2.bf16.msra.mxu1 %v22151_v11  ;;  %4929 = vmatprep.subr.bf16.mxu0 %v22156_v12  ;;  %v22192_v11 = vld [vmem:[#allocation8 + $0x1504] ss:$72 sps:$4 sm:$0xff]  }
 0x1e8   : > { %4972 = vmatprep.subr.bf16.mxu1 %v22159_v14  ;;  %v22195_v12 = vld [vmem:[#allocation8 + $0x1e04] ss:$72 sps:$4 sm:$0xff]  }
 0x1ea   : > { %4930 = vmatpush2.bf16.msra.mxu0 %v22154_v15  ;;  %v22190_v15 = vld [vmem:[#allocation8 + $0x1500] ss:$72 sps:$4 sm:$0xff]  }
 0x1eb   : > { %4973 = vmatpush2.bf16.msra.mxu1 %v22157_v16  ;;  %4931 = vmatprep.subr.bf16.mxu0 %v22162_v18  ;;  %v22193_v16 = vld [vmem:[#allocation8 + $0x1e00] ss:$72 sps:$4 sm:$0xff]  }
 0x1ec   : > { %4974 = vmatprep.subr.bf16.mxu1 %v22165_v19 }
 0x1ee   : > { %4932 = vmatpush2.bf16.msra.mxu0 %v22160_v20 }
 0x1ef   : > { %4975 = vmatpush2.bf16.msra.mxu1 %v22163_v21  ;;  %4933 = vmatprep.subr.bf16.mxu0 %v22168_v23  ;;  %v22198_v21 = vld [vmem:[#allocation8 + $0x1474] ss:$72 sps:$4 sm:$0xff]  }
 0x1f0   : > { %4976 = vmatprep.subr.bf16.mxu1 %v22171_v28  ;;  %v22201_v23 = vld [vmem:[#allocation8 + $0x1d74] ss:$72 sps:$4 sm:$0xff]   ;;  %v22196_v28 = vld [vmem:[#allocation8 + $0x1470] ss:$72 sps:$4 sm:$0xff]  }
 0x1f2   : > { %4934 = vmatpush2.bf16.msra.mxu0 %v22166_v30  ;;  %v22199_v30 = vld [vmem:[#allocation8 + $0x1d70] ss:$72 sps:$4 sm:$0xff]  }
 0x1f3   : > { %4977 = vmatpush2.bf16.msra.mxu1 %v22169_v31  ;;  %4935 = vmatprep.subr.bf16.mxu0 %v22174_v32  ;;  %v22204_v31 = vld [vmem:[#allocation8 + $0x13e4] ss:$72 sps:$4 sm:$0xff]  }
 0x1f4   : > { %4978 = vmatprep.subr.bf16.mxu1 %v22177_v35  ;;  %v22207_v32 = vld [vmem:[#allocation8 + $0x1ce4] ss:$72 sps:$4 sm:$0xff]   ;;  %v22202_v35 = vld [vmem:[#allocation8 + $0x13e0] ss:$72 sps:$4 sm:$0xff]  }
 0x1f6   : > { %4936 = vmatpush2.bf16.msra.mxu0 %v22172_v40  ;;  %v22205_v40 = vld [vmem:[#allocation8 + $0x1ce0] ss:$72 sps:$4 sm:$0xff]  }
 0x1f7   : > { %4979 = vmatpush2.bf16.msra.mxu1 %v22175_v41  ;;  %4991 = vmatprep.subr.bf16.mxu0 %v22180_v42  ;;  %v22210_v41 = vld [vmem:[#allocation8 + $0x1354] ss:$72 sps:$4 sm:$0xff]  }
 0x1f8   : > { %5034 = vmatprep.subr.bf16.mxu1 %v22183_v43  ;;  %v22213_v42 = vld [vmem:[#allocation8 + $0x1c54] ss:$72 sps:$4 sm:$0xff]   ;;  %v22208_v43 = vld [vmem:[#allocation8 + $0x1350] ss:$72 sps:$4 sm:$0xff]  }
 0x1f9   : > { %v4681_v62 = vpop.f32.mrf.mxu0  ;;  %4938 = vmatmul.mubr.bf16.vlgmr.msra.gmra.mxu0 %v25578_v50 }
 0x1fa   : > { %v4724_v63 = vpop.f32.mrf.mxu1  ;;  %4981 = vmatmul.mubr.bf16.vlgmr.msra.gmra.mxu1 %v25581_v51  ;;  %4992 = vmatpush1.bf16.msra.mxu0 %v22178_v44  ;;  %v22211_v44 = vld [vmem:[#allocation8 + $0x1c50] ss:$72 sps:$4 sm:$0xff]  }
 0x1fb   : > { %v25625_v5 = vadd.f32 %v4724_v63, %v4681_v62  ;;  %5035 = vmatpush1.bf16.msra.mxu1 %v22181_v45  ;;  %v4683_v9 = vpop.f32.mrf.mxu0  ;;  %4993 = vmatprep.subr.bf16.mxu0 %v22186_v52  ;;  %v22216_v45 = vld [vmem:[#allocation8 + $0x12c4] ss:$72 sps:$4 sm:$0xff]   ;;  %v22225_v62 = vld [vmem:[#allocation8 + $0x1b34] ss:$72 sps:$4 sm:$0xff]   ;;  %v22220_v63 = vld [vmem:[#allocation8 + $0x1230] ss:$72 sps:$4 sm:$0xff]  }
 0x1fc   : > { %v4726_v10 = vpop.f32.mrf.mxu1  ;;  %5036 = vmatprep.subr.bf16.mxu1 %v22189_v55  ;;  %5023 = vmatprep.mubr.bf16.mxu0 %v25550_v24  ;;  %v22219_v52 = vld [vmem:[#allocation8 + $0x1bc4] ss:$72 sps:$4 sm:$0xff]   ;;  %v22214_v55 = vld [vmem:[#allocation8 + $0x12c0] ss:$72 sps:$4 sm:$0xff]  }
 0x1fd   : > { %v25627_v14 = vadd.f32 %v4726_v10, %v4683_v9  ;;  %5066 = vmatprep.mubr.bf16.mxu1 %v25557_v29  ;;  %v4685_v18 = vpop.f32.mrf.mxu0  ;;  %v22223_v9 = vld [vmem:[#allocation8 + $0x1b30] ss:$72 sps:$4 sm:$0xff]   ;;  %v22228_v10 = vld [vmem:[#allocation8 + $0x1aa4] ss:$72 sps:$4 sm:$0xff]  }
 0x1fe   : > { %v4728_v19 = vpop.f32.mrf.mxu1  ;;  %4994 = vmatpush1.bf16.msra.mxu0 %v22184_v60  ;;  %v22217_v60 = vld [vmem:[#allocation8 + $0x1bc0] ss:$72 sps:$4 sm:$0xff]  }
 0x1ff   : > { %26376 = vst [vmem:[#allocation28_spill] sm:$0xff] %v25627_v14  ;;  %v25631_v20 = vadd.f32 %v4728_v19, %v4685_v18  ;;  %5037 = vmatpush1.bf16.msra.mxu1 %v22187_v61  ;;  %4995 = vmatprep.subr.bf16.mxu0 %v22192_v11  ;;  %v22222_v61 = vld [vmem:[#allocation8 + $0x1234] ss:$72 sps:$4 sm:$0xff]   ;;  %v22231_v11 = vld [vmem:[#allocation8 + $0x23a4] ss:$72 sps:$4 sm:$0xff]  }
 0x200   : > { %5038 = vmatprep.subr.bf16.mxu1 %v22195_v12  ;;  %v22226_v12 = vld [vmem:[#allocation8 + $0x1aa0] ss:$72 sps:$4 sm:$0xff]   ;;  %v22237_v18 = vld [vmem:[#allocation8 + $0x2314] ss:$72 sps:$4 sm:$0xff]   ;;  %v22232_v19 = vld [vmem:[#allocation8 + $0x1a10] ss:$72 sps:$4 sm:$0xff]  }
 0x201   : > { %v22975_v14 = vld [vmem:[#allocation8 + $0xadc] ss:$72 sps:$4 sm:$0xff]  }
 0x202   : > { %4996 = vmatpush1.bf16.msra.mxu0 %v22190_v15  ;;  %v22229_v15 = vld [vmem:[#allocation8 + $0x23a0] ss:$72 sps:$4 sm:$0xff]  }
 0x203   : > { %5039 = vmatpush1.bf16.msra.mxu1 %v22193_v16  ;;  %4997 = vmatprep.subr.bf16.mxu0 %v22198_v21  ;;  %v22234_v16 = vld [vmem:[#allocation8 + $0x1a14] ss:$72 sps:$4 sm:$0xff]   ;;  %v22235_v21 = vld [vmem:[#allocation8 + $0x2310] ss:$72 sps:$4 sm:$0xff]  }
 0x204   : > { %5040 = vmatprep.subr.bf16.mxu1 %v22201_v23  ;;  %v22240_v23 = vld [vmem:[#allocation8 + $0x1984] ss:$72 sps:$4 sm:$0xff]  }
 0x206   : > { %4998 = vmatpush1.bf16.msra.mxu0 %v22196_v28  ;;  %v22243_v28 = vld [vmem:[#allocation8 + $0x2284] ss:$72 sps:$4 sm:$0xff]  }
 0x207   : > { %5041 = vmatpush1.bf16.msra.mxu1 %v22199_v30  ;;  %4999 = vmatprep.subr.bf16.mxu0 %v22204_v31  ;;  %v22238_v30 = vld [vmem:[#allocation8 + $0x1980] ss:$72 sps:$4 sm:$0xff]  }
 0x208   : > { %5042 = vmatprep.subr.bf16.mxu1 %v22207_v32  ;;  %v22241_v31 = vld [vmem:[#allocation8 + $0x2280] ss:$72 sps:$4 sm:$0xff]   ;;  %v22246_v32 = vld [vmem:[#allocation8 + $0x18f4] ss:$72 sps:$4 sm:$0xff]  }
 0x20a   : > { %5000 = vmatpush1.bf16.msra.mxu0 %v22202_v35  ;;  %v22249_v35 = vld [vmem:[#allocation8 + $0x21f4] ss:$72 sps:$4 sm:$0xff]  }
 0x20b   : > { %5043 = vmatpush1.bf16.msra.mxu1 %v22205_v40  ;;  %5001 = vmatprep.subr.bf16.mxu0 %v22210_v41  ;;  %v22244_v40 = vld [vmem:[#allocation8 + $0x18f0] ss:$72 sps:$4 sm:$0xff]  }
 0x20c   : > { %5044 = vmatprep.subr.bf16.mxu1 %v22213_v42  ;;  %v22247_v41 = vld [vmem:[#allocation8 + $0x21f0] ss:$72 sps:$4 sm:$0xff]   ;;  %v22252_v42 = vld [vmem:[#allocation8 + $0x1864] ss:$72 sps:$4 sm:$0xff]  }
 0x20e   : > { %5002 = vmatpush1.bf16.msra.mxu0 %v22208_v43  ;;  %v22255_v43 = vld [vmem:[#allocation8 + $0x2164] ss:$72 sps:$4 sm:$0xff]  }
 0x20f   : > { %5045 = vmatpush1.bf16.msra.mxu1 %v22211_v44  ;;  %5003 = vmatprep.subr.bf16.mxu0 %v22216_v45  ;;  %v22250_v44 = vld [vmem:[#allocation8 + $0x1860] ss:$72 sps:$4 sm:$0xff]  }
 0x210   : > { %5046 = vmatprep.subr.bf16.mxu1 %v22219_v52  ;;  %v22253_v45 = vld [vmem:[#allocation8 + $0x2160] ss:$72 sps:$4 sm:$0xff]   ;;  %v22258_v52 = vld [vmem:[#allocation8 + $0x17d4] ss:$72 sps:$4 sm:$0xff]  }
 0x212   : > { %5004 = vmatpush1.bf16.msra.mxu0 %v22214_v55  ;;  %v22261_v55 = vld [vmem:[#allocation8 + $0x20d4] ss:$72 sps:$4 sm:$0xff]  }
 0x213   : > { %5047 = vmatpush1.bf16.msra.mxu1 %v22217_v60  ;;  %5005 = vmatprep.subr.bf16.mxu0 %v22222_v61  ;;  %v22256_v60 = vld [vmem:[#allocation8 + $0x17d0] ss:$72 sps:$4 sm:$0xff]  }
 0x214   : > { %5048 = vmatprep.subr.bf16.mxu1 %v22225_v62  ;;  %v22259_v61 = vld [vmem:[#allocation8 + $0x20d0] ss:$72 sps:$4 sm:$0xff]   ;;  %v22264_v62 = vld [vmem:[#allocation8 + $0x1744] ss:$72 sps:$4 sm:$0xff]  }
 0x216   : > { %5006 = vmatpush1.bf16.msra.mxu0 %v22220_v63  ;;  %v22267_v63 = vld [vmem:[#allocation8 + $0x2044] ss:$72 sps:$4 sm:$0xff]  }
 0x217   : > { %5049 = vmatpush1.bf16.msra.mxu1 %v22223_v9  ;;  %5007 = vmatprep.subr.bf16.mxu0 %v22228_v10  ;;  %v22262_v9 = vld [vmem:[#allocation8 + $0x1740] ss:$72 sps:$4 sm:$0xff]  }
 0x218   : > { %5050 = vmatprep.subr.bf16.mxu1 %v22231_v11  ;;  %v22265_v10 = vld [vmem:[#allocation8 + $0x2040] ss:$72 sps:$4 sm:$0xff]   ;;  %v22270_v11 = vld [vmem:[#allocation8 + $0x16b4] ss:$72 sps:$4 sm:$0xff]  }
 0x21a   : > { %5008 = vmatpush2.bf16.msra.mxu0 %v22226_v12  ;;  %v22273_v12 = vld [vmem:[#allocation8 + $0x1fb4] ss:$72 sps:$4 sm:$0xff]  }
 0x21b   : > { %5051 = vmatpush2.bf16.msra.mxu1 %v22229_v15  ;;  %5009 = vmatprep.subr.bf16.mxu0 %v22234_v16  ;;  %v22268_v15 = vld [vmem:[#allocation8 + $0x16b0] ss:$72 sps:$4 sm:$0xff]  }
 0x21c   : > { %5052 = vmatprep.subr.bf16.mxu1 %v22237_v18  ;;  %v22271_v16 = vld [vmem:[#allocation8 + $0x1fb0] ss:$72 sps:$4 sm:$0xff]   ;;  %v22276_v18 = vld [vmem:[#allocation8 + $0x162c] ss:$72 sps:$4 sm:$0xff]  }
 0x21e   : > { %5010 = vmatpush2.bf16.msra.mxu0 %v22232_v19  ;;  %v22279_v19 = vld [vmem:[#allocation8 + $0x1f2c] ss:$72 sps:$4 sm:$0xff]  }
 0x21f   : > { %5053 = vmatpush2.bf16.msra.mxu1 %v22235_v21  ;;  %5011 = vmatprep.subr.bf16.mxu0 %v22240_v23  ;;  %v22274_v21 = vld [vmem:[#allocation8 + $0x1628] ss:$72 sps:$4 sm:$0xff]  }
 0x220   : > { %5054 = vmatprep.subr.bf16.mxu1 %v22243_v28  ;;  %v22277_v23 = vld [vmem:[#allocation8 + $0x1f28] ss:$72 sps:$4 sm:$0xff]   ;;  %v25633_v28 = vpop.f32.mrf.mxu0 }
 0x221   : > { %26377 = vst [vmem:[#allocation29_spill] sm:$0xff] %v25633_v28  ;;  %v22783_v28 = vld [vmem:[#allocation8 + $0xacc] ss:$72 sps:$4 sm:$0xff]  }
 0x222   : > { %5012 = vmatpush2.bf16.msra.mxu0 %v22238_v30  ;;  %v25635_v30 = vpop.f32.mrf.mxu1 }
 0x223   : > { %5055 = vmatpush2.bf16.msra.mxu1 %v22241_v31  ;;  %5013 = vmatprep.subr.bf16.mxu0 %v22246_v32  ;;  %26378 = vst [vmem:[#allocation30_spill] sm:$0xff] %v25635_v30  ;;  %v22282_v31 = vld [vmem:[#allocation8 + $0x159c] ss:$72 sps:$4 sm:$0xff]  }
 0x224   : > { %5056 = vmatprep.subr.bf16.mxu1 %v22249_v35  ;;  %v22285_v32 = vld [vmem:[#allocation8 + $0x1e9c] ss:$72 sps:$4 sm:$0xff]   ;;  %v22280_v35 = vld [vmem:[#allocation8 + $0x1598] ss:$72 sps:$4 sm:$0xff]  }
 0x226   : > { %5014 = vmatpush2.bf16.msra.mxu0 %v22244_v40  ;;  %v22283_v40 = vld [vmem:[#allocation8 + $0x1e98] ss:$72 sps:$4 sm:$0xff]  }
 0x227   : > { %5057 = vmatpush2.bf16.msra.mxu1 %v22247_v41  ;;  %5015 = vmatprep.subr.bf16.mxu0 %v22252_v42 }
 0x228   : > { %5058 = vmatprep.subr.bf16.mxu1 %v22255_v43 }
 0x22a   : > { %5016 = vmatpush2.bf16.msra.mxu0 %v22250_v44 }
 0x22b   : > { %5059 = vmatpush2.bf16.msra.mxu1 %v22253_v45  ;;  %5017 = vmatprep.subr.bf16.mxu0 %v22258_v52  ;;  %v22288_v52 = vld [vmem:[#allocation8 + $0x150c] ss:$72 sps:$4 sm:$0xff]  }
 0x22c   : > { %5060 = vmatprep.subr.bf16.mxu1 %v22261_v55  ;;  %v22291_v55 = vld [vmem:[#allocation8 + $0x1e0c] ss:$72 sps:$4 sm:$0xff]  }
 0x22e   : > { %5018 = vmatpush2.bf16.msra.mxu0 %v22256_v60 }
 0x22f   : > { %5061 = vmatpush2.bf16.msra.mxu1 %v22259_v61  ;;  %5019 = vmatprep.subr.bf16.mxu0 %v22264_v62  ;;  %v22286_v61 = vld [vmem:[#allocation8 + $0x1508] ss:$72 sps:$4 sm:$0xff]  }
 0x230   : > { %5062 = vmatprep.subr.bf16.mxu1 %v22267_v63  ;;  %v22289_v62 = vld [vmem:[#allocation8 + $0x1e08] ss:$72 sps:$4 sm:$0xff]  }
 0x232   : > { %5020 = vmatpush2.bf16.msra.mxu0 %v22262_v9 }
 0x233   : > { %5063 = vmatpush2.bf16.msra.mxu1 %v22265_v10  ;;  %5021 = vmatprep.subr.bf16.mxu0 %v22270_v11  ;;  %v22294_v11 = vld [vmem:[#allocation8 + $0x147c] ss:$72 sps:$4 sm:$0xff]  }
 0x234   : > { %5064 = vmatprep.subr.bf16.mxu1 %v22273_v12  ;;  %v22297_v12 = vld [vmem:[#allocation8 + $0x1d7c] ss:$72 sps:$4 sm:$0xff]  }
 0x236   : > { %5022 = vmatpush2.bf16.msra.mxu0 %v22268_v15  ;;  %v22292_v15 = vld [vmem:[#allocation8 + $0x1478] ss:$72 sps:$4 sm:$0xff]  }
 0x237   : > { %5065 = vmatpush2.bf16.msra.mxu1 %v22271_v16  ;;  %5077 = vmatprep.subr.bf16.mxu0 %v22276_v18  ;;  %v22295_v16 = vld [vmem:[#allocation8 + $0x1d78] ss:$72 sps:$4 sm:$0xff]   ;;  %v22300_v18 = vld [vmem:[#allocation8 + $0x13ec] ss:$72 sps:$4 sm:$0xff]  }
 0x238   : > { %5120 = vmatprep.subr.bf16.mxu1 %v22279_v19  ;;  %v22303_v19 = vld [vmem:[#allocation8 + $0x1cec] ss:$72 sps:$4 sm:$0xff]  }
 0x239   : > { %v4767_v41 = vpop.f32.mrf.mxu0  ;;  %5024 = vmatmul.mubr.bf16.vlgmr.msra.gmra.mxu0 %v25578_v50 }
 0x23a   : > { %v4810_v42 = vpop.f32.mrf.mxu1  ;;  %5067 = vmatmul.mubr.bf16.vlgmr.msra.gmra.mxu1 %v25581_v51  ;;  %5078 = vmatpush1.bf16.msra.mxu0 %v22274_v21  ;;  %v22298_v21 = vld [vmem:[#allocation8 + $0x13e8] ss:$72 sps:$4 sm:$0xff]  }
 0x23b   : > { %v25639_v43 = vadd.f32 %v4810_v42, %v4767_v41  ;;  %5121 = vmatpush1.bf16.msra.mxu1 %v22277_v23  ;;  %v4769_v44 = vpop.f32.mrf.mxu0  ;;  %5079 = vmatprep.subr.bf16.mxu0 %v22282_v31  ;;  %v22301_v23 = vld [vmem:[#allocation8 + $0x1ce8] ss:$72 sps:$4 sm:$0xff]   ;;  %v22306_v31 = vld [vmem:[#allocation8 + $0x135c] ss:$72 sps:$4 sm:$0xff]   ;;  %v22312_v41 = vld [vmem:[#allocation8 + $0x12cc] ss:$72 sps:$4 sm:$0xff]  }
 0x23c   : > { %v4812_v45 = vpop.f32.mrf.mxu1  ;;  %5122 = vmatprep.subr.bf16.mxu1 %v22285_v32  ;;  %5109 = vmatprep.mubr.bf16.mxu0 %v25550_v24  ;;  %v22309_v32 = vld [vmem:[#allocation8 + $0x1c5c] ss:$72 sps:$4 sm:$0xff]   ;;  %v22315_v42 = vld [vmem:[#allocation8 + $0x1bcc] ss:$72 sps:$4 sm:$0xff]  }
 0x23d   : > { %v25641_v60 = vadd.f32 %v4812_v45, %v4769_v44  ;;  %5152 = vmatprep.mubr.bf16.mxu1 %v25557_v29  ;;  %v4771_v63 = vpop.f32.mrf.mxu0  ;;  %v22310_v44 = vld [vmem:[#allocation8 + $0x12c8] ss:$72 sps:$4 sm:$0xff]  }
 0x23e   : > { %v4814_v9 = vpop.f32.mrf.mxu1  ;;  %5080 = vmatpush1.bf16.msra.mxu0 %v22280_v35  ;;  %v22304_v35 = vld [vmem:[#allocation8 + $0x1358] ss:$72 sps:$4 sm:$0xff]   ;;  %v22313_v45 = vld [vmem:[#allocation8 + $0x1bc8] ss:$72 sps:$4 sm:$0xff]  }
 0x23f   : > { %26379 = vst [vmem:[#allocation31_spill] sm:$0xff] %v25641_v60  ;;  %v25645_v10 = vadd.f32 %v4814_v9, %v4771_v63  ;;  %5123 = vmatpush1.bf16.msra.mxu1 %v22283_v40  ;;  %5081 = vmatprep.subr.bf16.mxu0 %v22288_v52  ;;  %v22307_v40 = vld [vmem:[#allocation8 + $0x1c58] ss:$72 sps:$4 sm:$0xff]   ;;  %v22318_v52 = vld [vmem:[#allocation8 + $0x123c] ss:$72 sps:$4 sm:$0xff]  }
 0x240   : > { %5124 = vmatprep.subr.bf16.mxu1 %v22291_v55  ;;  %v22321_v55 = vld [vmem:[#allocation8 + $0x1b3c] ss:$72 sps:$4 sm:$0xff]   ;;  %v22324_v63 = vld [vmem:[#allocation8 + $0x1aac] ss:$72 sps:$4 sm:$0xff]  }
 0x241   : > { %v22327_v9 = vld [vmem:[#allocation8 + $0x23ac] ss:$72 sps:$4 sm:$0xff]  }
 0x242   : > { %5082 = vmatpush1.bf16.msra.mxu0 %v22286_v61  ;;  %v22316_v61 = vld [vmem:[#allocation8 + $0x1238] ss:$72 sps:$4 sm:$0xff]  }
 0x243   : > { %5125 = vmatpush1.bf16.msra.mxu1 %v22289_v62  ;;  %5083 = vmatprep.subr.bf16.mxu0 %v22294_v11  ;;  %v22319_v62 = vld [vmem:[#allocation8 + $0x1b38] ss:$72 sps:$4 sm:$0xff]   ;;  %v22322_v11 = vld [vmem:[#allocation8 + $0x1aa8] ss:$72 sps:$4 sm:$0xff]  }
 0x244   : > { %5126 = vmatprep.subr.bf16.mxu1 %v22297_v12  ;;  %v22325_v12 = vld [vmem:[#allocation8 + $0x23a8] ss:$72 sps:$4 sm:$0xff]  }
 0x246   : > { %5084 = vmatpush1.bf16.msra.mxu0 %v22292_v15  ;;  %v22330_v15 = vld [vmem:[#allocation8 + $0x1a1c] ss:$72 sps:$4 sm:$0xff]  }
 0x247   : > { %5127 = vmatpush1.bf16.msra.mxu1 %v22295_v16  ;;  %5085 = vmatprep.subr.bf16.mxu0 %v22300_v18  ;;  %v22333_v16 = vld [vmem:[#allocation8 + $0x231c] ss:$72 sps:$4 sm:$0xff]   ;;  %v22328_v18 = vld [vmem:[#allocation8 + $0x1a18] ss:$72 sps:$4 sm:$0xff]  }
 0x248   : > { %5128 = vmatprep.subr.bf16.mxu1 %v22303_v19  ;;  %v22331_v19 = vld [vmem:[#allocation8 + $0x2318] ss:$72 sps:$4 sm:$0xff]  }
 0x24a   : > { %5086 = vmatpush1.bf16.msra.mxu0 %v22298_v21  ;;  %v22336_v21 = vld [vmem:[#allocation8 + $0x198c] ss:$72 sps:$4 sm:$0xff]  }
 0x24b   : > { %5129 = vmatpush1.bf16.msra.mxu1 %v22301_v23  ;;  %5087 = vmatprep.subr.bf16.mxu0 %v22306_v31  ;;  %v22339_v23 = vld [vmem:[#allocation8 + $0x228c] ss:$72 sps:$4 sm:$0xff]   ;;  %v22334_v31 = vld [vmem:[#allocation8 + $0x1988] ss:$72 sps:$4 sm:$0xff]  }
 0x24c   : > { %5130 = vmatprep.subr.bf16.mxu1 %v22309_v32  ;;  %v22337_v32 = vld [vmem:[#allocation8 + $0x2288] ss:$72 sps:$4 sm:$0xff]  }
 0x24e   : > { %5088 = vmatpush1.bf16.msra.mxu0 %v22304_v35  ;;  %v22342_v35 = vld [vmem:[#allocation8 + $0x18fc] ss:$72 sps:$4 sm:$0xff]  }
 0x24f   : > { %5131 = vmatpush1.bf16.msra.mxu1 %v22307_v40  ;;  %5089 = vmatprep.subr.bf16.mxu0 %v22312_v41  ;;  %v22345_v40 = vld [vmem:[#allocation8 + $0x21fc] ss:$72 sps:$4 sm:$0xff]   ;;  %v22340_v41 = vld [vmem:[#allocation8 + $0x18f8] ss:$72 sps:$4 sm:$0xff]  }
 0x250   : > { %5132 = vmatprep.subr.bf16.mxu1 %v22315_v42  ;;  %v22343_v42 = vld [vmem:[#allocation8 + $0x21f8] ss:$72 sps:$4 sm:$0xff]  }
 0x252   : > { %5090 = vmatpush1.bf16.msra.mxu0 %v22310_v44  ;;  %v22348_v44 = vld [vmem:[#allocation8 + $0x186c] ss:$72 sps:$4 sm:$0xff]  }
 0x253   : > { %5133 = vmatpush1.bf16.msra.mxu1 %v22313_v45  ;;  %5091 = vmatprep.subr.bf16.mxu0 %v22318_v52  ;;  %v22351_v45 = vld [vmem:[#allocation8 + $0x216c] ss:$72 sps:$4 sm:$0xff]   ;;  %v22346_v52 = vld [vmem:[#allocation8 + $0x1868] ss:$72 sps:$4 sm:$0xff]  }
 0x254   : > { %5134 = vmatprep.subr.bf16.mxu1 %v22321_v55  ;;  %v22349_v55 = vld [vmem:[#allocation8 + $0x2168] ss:$72 sps:$4 sm:$0xff]  }
 0x256   : > { %5092 = vmatpush1.bf16.msra.mxu0 %v22316_v61  ;;  %v22354_v61 = vld [vmem:[#allocation8 + $0x17dc] ss:$72 sps:$4 sm:$0xff]  }
 0x257   : > { %5135 = vmatpush1.bf16.msra.mxu1 %v22319_v62  ;;  %5093 = vmatprep.subr.bf16.mxu0 %v22324_v63  ;;  %v22357_v62 = vld [vmem:[#allocation8 + $0x20dc] ss:$72 sps:$4 sm:$0xff]   ;;  %v22352_v63 = vld [vmem:[#allocation8 + $0x17d8] ss:$72 sps:$4 sm:$0xff]  }
 0x258   : > { %5136 = vmatprep.subr.bf16.mxu1 %v22327_v9  ;;  %v22355_v9 = vld [vmem:[#allocation8 + $0x20d8] ss:$72 sps:$4 sm:$0xff]  }
 0x25a   : > { %5094 = vmatpush2.bf16.msra.mxu0 %v22322_v11  ;;  %v22360_v11 = vld [vmem:[#allocation8 + $0x174c] ss:$72 sps:$4 sm:$0xff]  }
 0x25b   : > { %5137 = vmatpush2.bf16.msra.mxu1 %v22325_v12  ;;  %5095 = vmatprep.subr.bf16.mxu0 %v22330_v15  ;;  %v22363_v12 = vld [vmem:[#allocation8 + $0x204c] ss:$72 sps:$4 sm:$0xff]   ;;  %v22358_v15 = vld [vmem:[#allocation8 + $0x1748] ss:$72 sps:$4 sm:$0xff]  }
 0x25c   : > { %5138 = vmatprep.subr.bf16.mxu1 %v22333_v16  ;;  %v22361_v16 = vld [vmem:[#allocation8 + $0x2048] ss:$72 sps:$4 sm:$0xff]  }
 0x25e   : > { %5096 = vmatpush2.bf16.msra.mxu0 %v22328_v18  ;;  %v22366_v18 = vld [vmem:[#allocation8 + $0x16bc] ss:$72 sps:$4 sm:$0xff]  }
 0x25f   : > { %5139 = vmatpush2.bf16.msra.mxu1 %v22331_v19  ;;  %5097 = vmatprep.subr.bf16.mxu0 %v22336_v21  ;;  %v22369_v19 = vld [vmem:[#allocation8 + $0x1fbc] ss:$72 sps:$4 sm:$0xff]   ;;  %v22364_v21 = vld [vmem:[#allocation8 + $0x16b8] ss:$72 sps:$4 sm:$0xff]  }
 0x260   : > { %5140 = vmatprep.subr.bf16.mxu1 %v22339_v23  ;;  %v22367_v23 = vld [vmem:[#allocation8 + $0x1fb8] ss:$72 sps:$4 sm:$0xff]  }
 0x262   : > { %5098 = vmatpush2.bf16.msra.mxu0 %v22334_v31  ;;  %v22372_v31 = vld [vmem:[#allocation8 + $0x1634] ss:$72 sps:$4 sm:$0xff]  }
 0x263   : > { %5141 = vmatpush2.bf16.msra.mxu1 %v22337_v32  ;;  %5099 = vmatprep.subr.bf16.mxu0 %v22342_v35  ;;  %v22375_v32 = vld [vmem:[#allocation8 + $0x1f34] ss:$72 sps:$4 sm:$0xff]   ;;  %v22370_v35 = vld [vmem:[#allocation8 + $0x1630] ss:$72 sps:$4 sm:$0xff]  }
 0x264   : > { %5142 = vmatprep.subr.bf16.mxu1 %v22345_v40  ;;  %v22373_v40 = vld [vmem:[#allocation8 + $0x1f30] ss:$72 sps:$4 sm:$0xff]  }
 0x266   : > { %5100 = vmatpush2.bf16.msra.mxu0 %v22340_v41  ;;  %v25647_v41 = vpop.f32.mrf.mxu0 }
 0x267   : > { %5143 = vmatpush2.bf16.msra.mxu1 %v22343_v42  ;;  %5101 = vmatprep.subr.bf16.mxu0 %v22348_v44  ;;  %26380 = vst [vmem:[#allocation32_spill] sm:$0xff] %v25647_v41  ;;  %v25649_v42 = vpop.f32.mrf.mxu1  ;;  %v22378_v44 = vld [vmem:[#allocation8 + $0x15a4] ss:$72 sps:$4 sm:$0xff]   ;;  %v22879_v41 = vld [vmem:[#allocation8 + $0xad4] ss:$72 sps:$4 sm:$0xff]  }
 0x268   : > { %5144 = vmatprep.subr.bf16.mxu1 %v22351_v45  ;;  %26381 = vst [vmem:[#allocation33_spill] sm:$0xff] %v25649_v42  ;;  %v22381_v45 = vld [vmem:[#allocation8 + $0x1ea4] ss:$72 sps:$4 sm:$0xff]  }
 0x26a   : > { %5102 = vmatpush2.bf16.msra.mxu0 %v22346_v52  ;;  %v22376_v52 = vld [vmem:[#allocation8 + $0x15a0] ss:$72 sps:$4 sm:$0xff]  }
 0x26b   : > { %5145 = vmatpush2.bf16.msra.mxu1 %v22349_v55  ;;  %5103 = vmatprep.subr.bf16.mxu0 %v22354_v61  ;;  %v22379_v55 = vld [vmem:[#allocation8 + $0x1ea0] ss:$72 sps:$4 sm:$0xff]  }
 0x26c   : > { %5146 = vmatprep.subr.bf16.mxu1 %v22357_v62 }
 0x26e   : > { %5104 = vmatpush2.bf16.msra.mxu0 %v22352_v63 }
 0x26f   : > { %5147 = vmatpush2.bf16.msra.mxu1 %v22355_v9  ;;  %5105 = vmatprep.subr.bf16.mxu0 %v22360_v11 }
 0x270   : > { %5148 = vmatprep.subr.bf16.mxu1 %v22363_v12  ;;  %v22384_v12 = vld [vmem:[#allocation8 + $0x1514] ss:$72 sps:$4 sm:$0xff]  }
 0x272   : > { %5106 = vmatpush2.bf16.msra.mxu0 %v22358_v15  ;;  %v22387_v15 = vld [vmem:[#allocation8 + $0x1e14] ss:$72 sps:$4 sm:$0xff]  }
 0x273   : > { %5149 = vmatpush2.bf16.msra.mxu1 %v22361_v16  ;;  %5107 = vmatprep.subr.bf16.mxu0 %v22366_v18  ;;  %v22382_v18 = vld [vmem:[#allocation8 + $0x1510] ss:$72 sps:$4 sm:$0xff]  }
 0x274   : > { %5150 = vmatprep.subr.bf16.mxu1 %v22369_v19  ;;  %v22385_v19 = vld [vmem:[#allocation8 + $0x1e10] ss:$72 sps:$4 sm:$0xff]  }
 0x276   : > { %5108 = vmatpush2.bf16.msra.mxu0 %v22364_v21 }
 0x277   : > { %5151 = vmatpush2.bf16.msra.mxu1 %v22367_v23  ;;  %5163 = vmatprep.subr.bf16.mxu0 %v22372_v31 }
 0x278   : > { %5206 = vmatprep.subr.bf16.mxu1 %v22375_v32  ;;  %v22390_v32 = vld [vmem:[#allocation8 + $0x1484] ss:$72 sps:$4 sm:$0xff]  }
 0x279   : > { %v4853_v61 = vpop.f32.mrf.mxu0  ;;  %5110 = vmatmul.mubr.bf16.vlgmr.msra.gmra.mxu0 %v25578_v50 }
 0x27a   : > { %v4896_v62 = vpop.f32.mrf.mxu1  ;;  %5153 = vmatmul.mubr.bf16.vlgmr.msra.gmra.mxu1 %v25581_v51  ;;  %5164 = vmatpush1.bf16.msra.mxu0 %v22370_v35  ;;  %v22393_v35 = vld [vmem:[#allocation8 + $0x1d84] ss:$72 sps:$4 sm:$0xff]  }
 0x27b   : > { %v25653_v63 = vadd.f32 %v4896_v62, %v4853_v61  ;;  %5207 = vmatpush1.bf16.msra.mxu1 %v22373_v40  ;;  %v4855_v9 = vpop.f32.mrf.mxu0  ;;  %5165 = vmatprep.subr.bf16.mxu0 %v22378_v44  ;;  %v22388_v40 = vld [vmem:[#allocation8 + $0x1480] ss:$72 sps:$4 sm:$0xff]   ;;  %v22397_v61 = vld [vmem:[#allocation8 + $0x1cf0] ss:$72 sps:$4 sm:$0xff]  }
 0x27c   : > { %v4898_v11 = vpop.f32.mrf.mxu1  ;;  %5208 = vmatprep.subr.bf16.mxu1 %v22381_v45  ;;  %5195 = vmatprep.mubr.bf16.mxu0 %v25550_v24  ;;  %v22391_v44 = vld [vmem:[#allocation8 + $0x1d80] ss:$72 sps:$4 sm:$0xff]   ;;  %v22396_v45 = vld [vmem:[#allocation8 + $0x13f4] ss:$72 sps:$4 sm:$0xff]  }
 0x27d   : > { %v25655_v16 = vadd.f32 %v4898_v11, %v4855_v9  ;;  %5238 = vmatprep.mubr.bf16.mxu1 %v25557_v29  ;;  %v4857_v21 = vpop.f32.mrf.mxu0  ;;  %v22399_v24 = vld [vmem:[#allocation8 + $0x1cf4] ss:$72 sps:$4 sm:$0xff]   ;;  %v22394_v29 = vld [vmem:[#allocation8 + $0x13f0] ss:$72 sps:$4 sm:$0xff]   ;;  %v22400_v62 = vld [vmem:[#allocation8 + $0x1360] ss:$72 sps:$4 sm:$0xff]  }
 0x27e   : > { %v4900_v23 = vpop.f32.mrf.mxu1  ;;  %5166 = vmatpush1.bf16.msra.mxu0 %v22376_v52  ;;  %v22402_v52 = vld [vmem:[#allocation8 + $0x1364] ss:$72 sps:$4 sm:$0xff]   ;;  %v22403_v9 = vld [vmem:[#allocation8 + $0x1c60] ss:$72 sps:$4 sm:$0xff]   ;;  %v22408_v11 = vld [vmem:[#allocation8 + $0x12d4] ss:$72 sps:$4 sm:$0xff]  }
 0x27f   : > { %v25659_v31 = vadd.f32 %v4900_v23, %v4857_v21  ;;  %5209 = vmatpush1.bf16.msra.mxu1 %v22379_v55  ;;  %5167 = vmatprep.subr.bf16.mxu0 %v22384_v12  ;;  %v22405_v55 = vld [vmem:[#allocation8 + $0x1c64] ss:$72 sps:$4 sm:$0xff]   ;;  %v22411_v12 = vld [vmem:[#allocation8 + $0x1bd4] ss:$72 sps:$4 sm:$0xff]   ;;  %v22412_v23 = vld [vmem:[#allocation8 + $0x1240] ss:$72 sps:$4 sm:$0xff]  }
 0x280   : > { %5210 = vmatprep.subr.bf16.mxu1 %v22387_v15  ;;  %v22406_v15 = vld [vmem:[#allocation8 + $0x12d0] ss:$72 sps:$4 sm:$0xff]   ;;  %v22417_v21 = vld [vmem:[#allocation8 + $0x1b44] ss:$72 sps:$4 sm:$0xff]  }
 0x282   : > { %5168 = vmatpush1.bf16.msra.mxu0 %v22382_v18  ;;  %v22409_v18 = vld [vmem:[#allocation8 + $0x1bd0] ss:$72 sps:$4 sm:$0xff]  }
 0x283   : > { %5211 = vmatpush1.bf16.msra.mxu1 %v22385_v19  ;;  %5169 = vmatprep.subr.bf16.mxu0 %v22390_v32  ;;  %v22414_v19 = vld [vmem:[#allocation8 + $0x1244] ss:$72 sps:$4 sm:$0xff]   ;;  %v22415_v32 = vld [vmem:[#allocation8 + $0x1b40] ss:$72 sps:$4 sm:$0xff]  }
 0x284   : > { %5212 = vmatprep.subr.bf16.mxu1 %v22393_v35  ;;  %v22420_v35 = vld [vmem:[#allocation8 + $0x1ab4] ss:$72 sps:$4 sm:$0xff]  }
 0x286   : > { %5170 = vmatpush1.bf16.msra.mxu0 %v22388_v40  ;;  %v22423_v40 = vld [vmem:[#allocation8 + $0x23b4] ss:$72 sps:$4 sm:$0xff]  }
 0x287   : > { %5213 = vmatpush1.bf16.msra.mxu1 %v22391_v44  ;;  %5171 = vmatprep.subr.bf16.mxu0 %v22396_v45  ;;  %v22418_v44 = vld [vmem:[#allocation8 + $0x1ab0] ss:$72 sps:$4 sm:$0xff]  }
 0x288   : > { %5214 = vmatprep.subr.bf16.mxu1 %v22399_v24  ;;  %v22421_v45 = vld [vmem:[#allocation8 + $0x23b0] ss:$72 sps:$4 sm:$0xff]   ;;  %v22426_v24 = vld [vmem:[#allocation8 + $0x1a24] ss:$72 sps:$4 sm:$0xff]  }
 0x28a   : > { %5172 = vmatpush1.bf16.msra.mxu0 %v22394_v29  ;;  %v22429_v29 = vld [vmem:[#allocation8 + $0x2324] ss:$72 sps:$4 sm:$0xff]  }
 0x28b   : > { %5215 = vmatpush1.bf16.msra.mxu1 %v22397_v61  ;;  %5173 = vmatprep.subr.bf16.mxu0 %v22402_v52  ;;  %v22424_v61 = vld [vmem:[#allocation8 + $0x1a20] ss:$72 sps:$4 sm:$0xff]  }
 0x28c   : > { %5216 = vmatprep.subr.bf16.mxu1 %v22405_v55  ;;  %v22427_v52 = vld [vmem:[#allocation8 + $0x2320] ss:$72 sps:$4 sm:$0xff]   ;;  %v22432_v55 = vld [vmem:[#allocation8 + $0x1994] ss:$72 sps:$4 sm:$0xff]  }
 0x28e   : > { %5174 = vmatpush1.bf16.msra.mxu0 %v22400_v62  ;;  %v22435_v62 = vld [vmem:[#allocation8 + $0x2294] ss:$72 sps:$4 sm:$0xff]  }
 0x28f   : > { %5217 = vmatpush1.bf16.msra.mxu1 %v22403_v9  ;;  %5175 = vmatprep.subr.bf16.mxu0 %v22408_v11  ;;  %v22430_v9 = vld [vmem:[#allocation8 + $0x1990] ss:$72 sps:$4 sm:$0xff]  }
 0x290   : > { %5218 = vmatprep.subr.bf16.mxu1 %v22411_v12  ;;  %v22433_v11 = vld [vmem:[#allocation8 + $0x2290] ss:$72 sps:$4 sm:$0xff]   ;;  %v22438_v12 = vld [vmem:[#allocation8 + $0x1904] ss:$72 sps:$4 sm:$0xff]  }
 0x292   : > { %5176 = vmatpush1.bf16.msra.mxu0 %v22406_v15  ;;  %v22441_v15 = vld [vmem:[#allocation8 + $0x2204] ss:$72 sps:$4 sm:$0xff]  }
 0x293   : > { %5219 = vmatpush1.bf16.msra.mxu1 %v22409_v18  ;;  %5177 = vmatprep.subr.bf16.mxu0 %v22414_v19  ;;  %v22436_v18 = vld [vmem:[#allocation8 + $0x1900] ss:$72 sps:$4 sm:$0xff]  }
 0x294   : > { %5220 = vmatprep.subr.bf16.mxu1 %v22417_v21  ;;  %v22439_v19 = vld [vmem:[#allocation8 + $0x2200] ss:$72 sps:$4 sm:$0xff]   ;;  %v22444_v21 = vld [vmem:[#allocation8 + $0x1874] ss:$72 sps:$4 sm:$0xff]  }
 0x296   : > { %5178 = vmatpush1.bf16.msra.mxu0 %v22412_v23  ;;  %v22447_v23 = vld [vmem:[#allocation8 + $0x2174] ss:$72 sps:$4 sm:$0xff]  }
 0x297   : > { %5221 = vmatpush1.bf16.msra.mxu1 %v22415_v32  ;;  %5179 = vmatprep.subr.bf16.mxu0 %v22420_v35  ;;  %v22442_v32 = vld [vmem:[#allocation8 + $0x1870] ss:$72 sps:$4 sm:$0xff]  }
 0x298   : > { %5222 = vmatprep.subr.bf16.mxu1 %v22423_v40  ;;  %v22445_v35 = vld [vmem:[#allocation8 + $0x2170] ss:$72 sps:$4 sm:$0xff]   ;;  %v22450_v40 = vld [vmem:[#allocation8 + $0x17e4] ss:$72 sps:$4 sm:$0xff]  }
 0x29a   : > { %5180 = vmatpush2.bf16.msra.mxu0 %v22418_v44  ;;  %v22453_v44 = vld [vmem:[#allocation8 + $0x20e4] ss:$72 sps:$4 sm:$0xff]  }
 0x29b   : > { %5223 = vmatpush2.bf16.msra.mxu1 %v22421_v45  ;;  %5181 = vmatprep.subr.bf16.mxu0 %v22426_v24  ;;  %v22448_v45 = vld [vmem:[#allocation8 + $0x17e0] ss:$72 sps:$4 sm:$0xff]  }
 0x29c   : > { %5224 = vmatprep.subr.bf16.mxu1 %v22429_v29  ;;  %v22451_v24 = vld [vmem:[#allocation8 + $0x20e0] ss:$72 sps:$4 sm:$0xff]   ;;  %v22456_v29 = vld [vmem:[#allocation8 + $0x1754] ss:$72 sps:$4 sm:$0xff]  }
 0x29e   : > { %5182 = vmatpush2.bf16.msra.mxu0 %v22424_v61  ;;  %v22459_v61 = vld [vmem:[#allocation8 + $0x2054] ss:$72 sps:$4 sm:$0xff]  }
 0x29f   : > { %5225 = vmatpush2.bf16.msra.mxu1 %v22427_v52  ;;  %5183 = vmatprep.subr.bf16.mxu0 %v22432_v55  ;;  %v22454_v52 = vld [vmem:[#allocation8 + $0x1750] ss:$72 sps:$4 sm:$0xff]  }
 0x2a0   : > { %5226 = vmatprep.subr.bf16.mxu1 %v22435_v62  ;;  %v22457_v55 = vld [vmem:[#allocation8 + $0x2050] ss:$72 sps:$4 sm:$0xff]   ;;  %v22462_v62 = vld [vmem:[#allocation8 + $0x16c4] ss:$72 sps:$4 sm:$0xff]  }
 0x2a2   : > { %5184 = vmatpush2.bf16.msra.mxu0 %v22430_v9  ;;  %v22465_v9 = vld [vmem:[#allocation8 + $0x1fc4] ss:$72 sps:$4 sm:$0xff]  }
 0x2a3   : > { %5227 = vmatpush2.bf16.msra.mxu1 %v22433_v11  ;;  %5185 = vmatprep.subr.bf16.mxu0 %v22438_v12  ;;  %v22460_v11 = vld [vmem:[#allocation8 + $0x16c0] ss:$72 sps:$4 sm:$0xff]  }
 0x2a4   : > { %5228 = vmatprep.subr.bf16.mxu1 %v22441_v15  ;;  %v22463_v12 = vld [vmem:[#allocation8 + $0x1fc0] ss:$72 sps:$4 sm:$0xff]   ;;  %v22468_v15 = vld [vmem:[#allocation8 + $0x3f4] ss:$72 sps:$4 sm:$0xff]  }
 0x2a6   : > { %5186 = vmatpush2.bf16.msra.mxu0 %v22436_v18  ;;  %v22471_v18 = vld [vmem:[#allocation8 + $0xcf4] ss:$72 sps:$4 sm:$0xff]  }
 0x2a7   : > { %5229 = vmatpush2.bf16.msra.mxu1 %v22439_v19  ;;  %5187 = vmatprep.subr.bf16.mxu0 %v22444_v21  ;;  %v22466_v19 = vld [vmem:[#allocation8 + $0x3f0] ss:$72 sps:$4 sm:$0xff]  }
 0x2a8   : > { %5230 = vmatprep.subr.bf16.mxu1 %v22447_v23  ;;  %v22469_v21 = vld [vmem:[#allocation8 + $0xcf0] ss:$72 sps:$4 sm:$0xff]   ;;  %v25661_v23 = vpop.f32.mrf.mxu0 }
 0x2aa   : > { %5188 = vmatpush2.bf16.msra.mxu0 %v22442_v32  ;;  %v25663_v32 = vpop.f32.mrf.mxu1 }
 0x2ab   : > { %5231 = vmatpush2.bf16.msra.mxu1 %v22445_v35  ;;  %5189 = vmatprep.subr.bf16.mxu0 %v22450_v40  ;;  %v22474_v35 = vld [vmem:[#allocation8 + $0x364] ss:$72 sps:$4 sm:$0xff]  }
 0x2ac   : > { %5232 = vmatprep.subr.bf16.mxu1 %v22453_v44  ;;  %v22477_v40 = vld [vmem:[#allocation8 + $0xc64] ss:$72 sps:$4 sm:$0xff]   ;;  %v22472_v44 = vld [vmem:[#allocation8 + $0x360] ss:$72 sps:$4 sm:$0xff]  }
 0x2ae   : > { %5190 = vmatpush2.bf16.msra.mxu0 %v22448_v45  ;;  %v22475_v45 = vld [vmem:[#allocation8 + $0xc60] ss:$72 sps:$4 sm:$0xff]  }
 0x2af   : > { %5233 = vmatpush2.bf16.msra.mxu1 %v22451_v24  ;;  %5191 = vmatprep.subr.bf16.mxu0 %v22456_v29 }
 0x2b0   : > { %5234 = vmatprep.subr.bf16.mxu1 %v22459_v61 }
 0x2b2   : > { %5192 = vmatpush2.bf16.msra.mxu0 %v22454_v52 }
 0x2b3   : > { %5235 = vmatpush2.bf16.msra.mxu1 %v22457_v55  ;;  %5193 = vmatprep.subr.bf16.mxu0 %v22462_v62  ;;  %v22480_v62 = vld [vmem:[#allocation8 + $0x2d4] ss:$72 sps:$4 sm:$0xff]  }
 0x2b4   : > { %5236 = vmatprep.subr.bf16.mxu1 %v22465_v9  ;;  %v22483_v9 = vld [vmem:[#allocation8 + $0xbd4] ss:$72 sps:$4 sm:$0xff]  }
 0x2b6   : > { %5194 = vmatpush2.bf16.msra.mxu0 %v22460_v11 }
 0x2b7   : > { %5237 = vmatpush2.bf16.msra.mxu1 %v22463_v12  ;;  %8129 = vmatprep.subr.bf16.mxu0 %v22468_v15  ;;  %v22478_v12 = vld [vmem:[#allocation8 + $0x2d0] ss:$72 sps:$4 sm:$0xff]  }
 0x2b8   : > { %8172 = vmatprep.subr.bf16.mxu1 %v22471_v18  ;;  %v22481_v15 = vld [vmem:[#allocation8 + $0xbd0] ss:$72 sps:$4 sm:$0xff]  }
 0x2b9   : > { %v4939_v24 = vpop.f32.mrf.mxu0  ;;  %5196 = vmatmul.mubr.bf16.vlgmr.msra.gmra.mxu0 %v25578_v50 }
 0x2ba   : > { %v4982_v29 = vpop.f32.mrf.mxu1  ;;  %5239 = vmatmul.mubr.bf16.vlgmr.msra.gmra.mxu1 %v25581_v51  ;;  %8130 = vmatpush1.bf16.msra.mxu0 %v22466_v19  ;;  %v22486_v19 = vld [vmem:[#allocation8 + $0x244] ss:$72 sps:$4 sm:$0xff]  }
 0x2bb   : > { %v25667_v61 = vadd.f32 %v4982_v29, %v4939_v24  ;;  %8173 = vmatpush1.bf16.msra.mxu1 %v22469_v21  ;;  %v4941_v52 = vpop.f32.mrf.mxu0  ;;  %8131 = vmatprep.subr.bf16.mxu0 %v22474_v35  ;;  %v22489_v21 = vld [vmem:[#allocation8 + $0xb44] ss:$72 sps:$4 sm:$0xff]   ;;  %v22484_v35 = vld [vmem:[#allocation8 + $0x240] ss:$72 sps:$4 sm:$0xff]   ;;  %v22492_v24 = vld [vmem:[#allocation8 + $0x1b4] ss:$72 sps:$4 sm:$0xff]  }
 0x2bc   : > { %v4984_v55 = vpop.f32.mrf.mxu1  ;;  %8174 = vmatprep.subr.bf16.mxu1 %v22477_v40  ;;  %8161 = vmatprep.mubr.bf16.mxu0 %v25509_v53  ;;  %v22487_v40 = vld [vmem:[#allocation8 + $0xb40] ss:$72 sps:$4 sm:$0xff]   ;;  %v22495_v29 = vld [vmem:[#allocation8 + $0xab4] ss:$72 sps:$4 sm:$0xff]  }
 0x2bd   : > { %v25669_v11 = vadd.f32 %v4984_v55, %v4941_v52  ;;  %8204 = vmatprep.mubr.bf16.mxu1 %v25515_v58  ;;  %v4943_v50 = vpop.f32.mrf.mxu0  ;;  %v22490_v52 = vld [vmem:[#allocation8 + $0x1b0] ss:$72 sps:$4 sm:$0xff]  }
 0x2be   : > { %v4986_v51 = vpop.f32.mrf.mxu1  ;;  %8132 = vmatpush1.bf16.msra.mxu0 %v22472_v44  ;;  %v22493_v55 = vld [vmem:[#allocation8 + $0xab0] ss:$72 sps:$4 sm:$0xff]   ;;  %v22498_v44 = vld [vmem:[#allocation8 + $0x124] ss:$72 sps:$4 sm:$0xff]  }
 0x2bf   : > { %v25673_v18 = vadd.f32 %v4986_v51, %v4943_v50  ;;  %8175 = vmatpush1.bf16.msra.mxu1 %v22475_v45  ;;  %8133 = vmatprep.subr.bf16.mxu0 %v22480_v62  ;;  %v22501_v45 = vld [vmem:[#allocation8 + $0xa24] ss:$72 sps:$4 sm:$0xff]   ;;  %v22496_v62 = vld [vmem:[#allocation8 + $0x120] ss:$72 sps:$4 sm:$0xff]   ;;  %v22502_v50 = vld [vmem:[#allocation8 + $0x90] ss:$72 sps:$4 sm:$0xff]  }
 0x2c0   : > { %8176 = vmatprep.subr.bf16.mxu1 %v22483_v9  ;;  %v22499_v9 = vld [vmem:[#allocation8 + $0xa20] ss:$72 sps:$4 sm:$0xff]   ;;  %v22505_v51 = vld [vmem:[#allocation8 + $0x990] ss:$72 sps:$4 sm:$0xff]  }
 0x2c2   : > { %8134 = vmatpush1.bf16.msra.mxu0 %v22478_v12  ;;  %v22504_v12 = vld [vmem:[#allocation8 + $0x94] ss:$72 sps:$4 sm:$0xff]  }
 0x2c3   : > { %8177 = vmatpush1.bf16.msra.mxu1 %v22481_v15  ;;  %8135 = vmatprep.subr.bf16.mxu0 %v22486_v19  ;;  %v22507_v15 = vld [vmem:[#allocation8 + $0x994] ss:$72 sps:$4 sm:$0xff]   ;;  %v22510_v19 = vld [vmem:[#allocation8 + $0x4] ss:$72 sps:$4 sm:$0xff]  }
 0x2c4   : > { %8178 = vmatprep.subr.bf16.mxu1 %v22489_v21  ;;  %v22513_v21 = vld [vmem:[#allocation8 + $0x904] ss:$72 sps:$4 sm:$0xff]  }
 0x2c6   : > { %8136 = vmatpush1.bf16.msra.mxu0 %v22484_v35  ;;  %v22508_v35 = vld [vmem:[#allocation8] ss:$72 sps:$4 sm:$0xff]  }
 0x2c7   : > { %8179 = vmatpush1.bf16.msra.mxu1 %v22487_v40  ;;  %8137 = vmatprep.subr.bf16.mxu0 %v22492_v24  ;;  %v22511_v40 = vld [vmem:[#allocation8 + $0x900] ss:$72 sps:$4 sm:$0xff]   ;;  %v22516_v24 = vld [vmem:[#allocation8 + $0x874] ss:$72 sps:$4 sm:$0xff]  }
 0x2c8   : > { %8180 = vmatprep.subr.bf16.mxu1 %v22495_v29  ;;  %v22519_v29 = vld [vmem:[#allocation8 + $0x1174] ss:$72 sps:$4 sm:$0xff]  }
 0x2ca   : > { %8138 = vmatpush1.bf16.msra.mxu0 %v22490_v52  ;;  %v22514_v52 = vld [vmem:[#allocation8 + $0x870] ss:$72 sps:$4 sm:$0xff]  }
 0x2cb   : > { %8181 = vmatpush1.bf16.msra.mxu1 %v22493_v55  ;;  %8139 = vmatprep.subr.bf16.mxu0 %v22498_v44  ;;  %v22517_v55 = vld [vmem:[#allocation8 + $0x1170] ss:$72 sps:$4 sm:$0xff]   ;;  %v22522_v44 = vld [vmem:[#allocation8 + $0x7e4] ss:$72 sps:$4 sm:$0xff]  }
 0x2cc   : > { %8182 = vmatprep.subr.bf16.mxu1 %v22501_v45  ;;  %v22525_v45 = vld [vmem:[#allocation8 + $0x10e4] ss:$72 sps:$4 sm:$0xff]  }
 0x2ce   : > { %8140 = vmatpush1.bf16.msra.mxu0 %v22496_v62  ;;  %v22520_v62 = vld [vmem:[#allocation8 + $0x7e0] ss:$72 sps:$4 sm:$0xff]  }
 0x2cf   : > { %8183 = vmatpush1.bf16.msra.mxu1 %v22499_v9  ;;  %8141 = vmatprep.subr.bf16.mxu0 %v22504_v12  ;;  %v22523_v9 = vld [vmem:[#allocation8 + $0x10e0] ss:$72 sps:$4 sm:$0xff]   ;;  %v22528_v12 = vld [vmem:[#allocation8 + $0x754] ss:$72 sps:$4 sm:$0xff]  }
 0x2d0   : > { %8184 = vmatprep.subr.bf16.mxu1 %v22507_v15  ;;  %v22531_v15 = vld [vmem:[#allocation8 + $0x1054] ss:$72 sps:$4 sm:$0xff]  }
 0x2d2   : > { %8142 = vmatpush1.bf16.msra.mxu0 %v22502_v50  ;;  %v22526_v50 = vld [vmem:[#allocation8 + $0x750] ss:$72 sps:$4 sm:$0xff]  }
 0x2d3   : > { %8185 = vmatpush1.bf16.msra.mxu1 %v22505_v51  ;;  %8143 = vmatprep.subr.bf16.mxu0 %v22510_v19  ;;  %v22529_v51 = vld [vmem:[#allocation8 + $0x1050] ss:$72 sps:$4 sm:$0xff]   ;;  %v22534_v19 = vld [vmem:[#allocation8 + $0x6c4] ss:$72 sps:$4 sm:$0xff]  }
 0x2d4   : > { %8186 = vmatprep.subr.bf16.mxu1 %v22513_v21  ;;  %v22537_v21 = vld [vmem:[#allocation8 + $0xfc4] ss:$72 sps:$4 sm:$0xff]  }
 0x2d6   : > { %8144 = vmatpush1.bf16.msra.mxu0 %v22508_v35  ;;  %v22532_v35 = vld [vmem:[#allocation8 + $0x6c0] ss:$72 sps:$4 sm:$0xff]  }
 0x2d7   : > { %8187 = vmatpush1.bf16.msra.mxu1 %v22511_v40  ;;  %8145 = vmatprep.subr.bf16.mxu0 %v22516_v24  ;;  %v22535_v40 = vld [vmem:[#allocation8 + $0xfc0] ss:$72 sps:$4 sm:$0xff]   ;;  %v22540_v24 = vld [vmem:[#allocation8 + $0x634] ss:$72 sps:$4 sm:$0xff]  }
 0x2d8   : > { %8188 = vmatprep.subr.bf16.mxu1 %v22519_v29  ;;  %v22543_v29 = vld [vmem:[#allocation8 + $0xf34] ss:$72 sps:$4 sm:$0xff]  }
 0x2da   : > { %8146 = vmatpush2.bf16.msra.mxu0 %v22514_v52  ;;  %v22538_v52 = vld [vmem:[#allocation8 + $0x630] ss:$72 sps:$4 sm:$0xff]  }
 0x2db   : > { %8189 = vmatpush2.bf16.msra.mxu1 %v22517_v55  ;;  %8147 = vmatprep.subr.bf16.mxu0 %v22522_v44  ;;  %v22541_v55 = vld [vmem:[#allocation8 + $0xf30] ss:$72 sps:$4 sm:$0xff]   ;;  %v22546_v44 = vld [vmem:[#allocation8 + $0x5a4] ss:$72 sps:$4 sm:$0xff]  }
 0x2dc   : > { %8190 = vmatprep.subr.bf16.mxu1 %v22525_v45  ;;  %v22549_v45 = vld [vmem:[#allocation8 + $0xea4] ss:$72 sps:$4 sm:$0xff]  }
 0x2de   : > { %8148 = vmatpush2.bf16.msra.mxu0 %v22520_v62  ;;  %v22544_v62 = vld [vmem:[#allocation8 + $0x5a0] ss:$72 sps:$4 sm:$0xff]  }
 0x2df   : > { %8191 = vmatpush2.bf16.msra.mxu1 %v22523_v9  ;;  %8149 = vmatprep.subr.bf16.mxu0 %v22528_v12  ;;  %v22547_v9 = vld [vmem:[#allocation8 + $0xea0] ss:$72 sps:$4 sm:$0xff]   ;;  %v22552_v12 = vld [vmem:[#allocation8 + $0x514] ss:$72 sps:$4 sm:$0xff]  }
 0x2e0   : > { %8192 = vmatprep.subr.bf16.mxu1 %v22531_v15  ;;  %v22555_v15 = vld [vmem:[#allocation8 + $0xe14] ss:$72 sps:$4 sm:$0xff]  }
 0x2e2   : > { %8150 = vmatpush2.bf16.msra.mxu0 %v22526_v50  ;;  %v22550_v50 = vld [vmem:[#allocation8 + $0x510] ss:$72 sps:$4 sm:$0xff]  }
 0x2e3   : > { %8193 = vmatpush2.bf16.msra.mxu1 %v22529_v51  ;;  %8151 = vmatprep.subr.bf16.mxu0 %v22534_v19  ;;  %v22553_v51 = vld [vmem:[#allocation8 + $0xe10] ss:$72 sps:$4 sm:$0xff]   ;;  %v22558_v19 = vld [vmem:[#allocation8 + $0x484] ss:$72 sps:$4 sm:$0xff]  }
 0x2e4   : > { %8194 = vmatprep.subr.bf16.mxu1 %v22537_v21  ;;  %v22561_v21 = vld [vmem:[#allocation8 + $0xd84] ss:$72 sps:$4 sm:$0xff]  }
 0x2e6   : > { %8152 = vmatpush2.bf16.msra.mxu0 %v22532_v35  ;;  %v22556_v35 = vld [vmem:[#allocation8 + $0x480] ss:$72 sps:$4 sm:$0xff]  }
 0x2e7   : > { %8195 = vmatpush2.bf16.msra.mxu1 %v22535_v40  ;;  %8153 = vmatprep.subr.bf16.mxu0 %v22540_v24  ;;  %v22559_v40 = vld [vmem:[#allocation8 + $0xd80] ss:$72 sps:$4 sm:$0xff]   ;;  %v22564_v24 = vld [vmem:[#allocation8 + $0x3fc] ss:$72 sps:$4 sm:$0xff]  }
 0x2e8   : > { %8196 = vmatprep.subr.bf16.mxu1 %v22543_v29  ;;  %v22567_v29 = vld [vmem:[#allocation8 + $0xcfc] ss:$72 sps:$4 sm:$0xff]  }
 0x2ea   : > { %8154 = vmatpush2.bf16.msra.mxu0 %v22538_v52  ;;  %v22562_v52 = vld [vmem:[#allocation8 + $0x3f8] ss:$72 sps:$4 sm:$0xff]  }
 0x2eb   : > { %8197 = vmatpush2.bf16.msra.mxu1 %v22541_v55  ;;  %8155 = vmatprep.subr.bf16.mxu0 %v22546_v44  ;;  %v22565_v55 = vld [vmem:[#allocation8 + $0xcf8] ss:$72 sps:$4 sm:$0xff]   ;;  %v25675_v44 = vpop.f32.mrf.mxu0 }
 0x2ec   : > { %8198 = vmatprep.subr.bf16.mxu1 %v22549_v45  ;;  %v25677_v45 = vpop.f32.mrf.mxu1 }
 0x2ee   : > { %8156 = vmatpush2.bf16.msra.mxu0 %v22544_v62  ;;  %v22570_v62 = vld [vmem:[#allocation8 + $0x36c] ss:$72 sps:$4 sm:$0xff]  }
 0x2ef   : > { %8199 = vmatpush2.bf16.msra.mxu1 %v22547_v9  ;;  %8157 = vmatprep.subr.bf16.mxu0 %v22552_v12  ;;  %v22573_v9 = vld [vmem:[#allocation8 + $0xc6c] ss:$72 sps:$4 sm:$0xff]   ;;  %v22568_v12 = vld [vmem:[#allocation8 + $0x368] ss:$72 sps:$4 sm:$0xff]  }
 0x2f0   : > { %8200 = vmatprep.subr.bf16.mxu1 %v22555_v15  ;;  %v22571_v15 = vld [vmem:[#allocation8 + $0xc68] ss:$72 sps:$4 sm:$0xff]  }
 0x2f2   : > { %8158 = vmatpush2.bf16.msra.mxu0 %v22550_v50 }
 0x2f3   : > { %8201 = vmatpush2.bf16.msra.mxu1 %v22553_v51  ;;  %8159 = vmatprep.subr.bf16.mxu0 %v22558_v19 }
 0x2f4   : > { %8202 = vmatprep.subr.bf16.mxu1 %v22561_v21 }
 0x2f6   : > { %8160 = vmatpush2.bf16.msra.mxu0 %v22556_v35 }
 0x2f7   : > { %8203 = vmatpush2.bf16.msra.mxu1 %v22559_v40  ;;  %8215 = vmatprep.subr.bf16.mxu0 %v22564_v24  ;;  %v22576_v40 = vld [vmem:[#allocation8 + $0x2dc] ss:$72 sps:$4 sm:$0xff]  }
 0x2f8   : > { %8258 = vmatprep.subr.bf16.mxu1 %v22567_v29  ;;  %v22579_v24 = vld [vmem:[#allocation8 + $0xbdc] ss:$72 sps:$4 sm:$0xff]  }
 0x2f9   : > { %v5025_v50 = vpop.f32.mrf.mxu0  ;;  %8162 = vmatmul.mubr.bf16.vlgmr.msra.gmra.mxu0 %v25534_v13 }
 0x2fa   : > { %v5068_v51 = vpop.f32.mrf.mxu1  ;;  %8205 = vmatmul.mubr.bf16.vlgmr.msra.gmra.mxu1 %v25541_v17  ;;  %8216 = vmatpush1.bf16.msra.mxu0 %v22562_v52  ;;  %v22582_v52 = vld [vmem:[#allocation8 + $0x24c] ss:$72 sps:$4 sm:$0xff]  }
 0x2fb   : > { %v25681_v19 = vadd.f32 %v5068_v51, %v5025_v50  ;;  %8259 = vmatpush1.bf16.msra.mxu1 %v22565_v55  ;;  %v5027_v21 = vpop.f32.mrf.mxu0  ;;  %8217 = vmatprep.subr.bf16.mxu0 %v22570_v62  ;;  %v22585_v55 = vld [vmem:[#allocation8 + $0xb4c] ss:$72 sps:$4 sm:$0xff]   ;;  %v22580_v62 = vld [vmem:[#allocation8 + $0x248] ss:$72 sps:$4 sm:$0xff]   ;;  %v22588_v51 = vld [vmem:[#allocation8 + $0x1bc] ss:$72 sps:$4 sm:$0xff]  }
 0x2fc   : > { %v5070_v35 = vpop.f32.mrf.mxu1  ;;  %8260 = vmatprep.subr.bf16.mxu1 %v22573_v9  ;;  %8247 = vmatprep.mubr.bf16.mxu0 %v25509_v53  ;;  %v22583_v9 = vld [vmem:[#allocation8 + $0xb48] ss:$72 sps:$4 sm:$0xff]  }
 0x2fd   : > { %v25683_v29 = vadd.f32 %v5070_v35, %v5027_v21  ;;  %8290 = vmatprep.mubr.bf16.mxu1 %v25515_v58  ;;  %v5029_v36 = vpop.f32.mrf.mxu0  ;;  %v22591_v21 = vld [vmem:[#allocation8 + $0xabc] ss:$72 sps:$4 sm:$0xff]   ;;  %v22586_v35 = vld [vmem:[#allocation8 + $0x1b8] ss:$72 sps:$4 sm:$0xff]  }
 0x2fe   : > { %v5072_v34 = vpop.f32.mrf.mxu1  ;;  %8218 = vmatpush1.bf16.msra.mxu0 %v22568_v12  ;;  %v22592_v12 = vld [vmem:[#allocation8 + $0x128] ss:$72 sps:$4 sm:$0xff]  }
 0x2ff   : > { %v25687_v50 = vadd.f32 %v5072_v34, %v5029_v36  ;;  %8261 = vmatpush1.bf16.msra.mxu1 %v22571_v15  ;;  %8219 = vmatprep.subr.bf16.mxu0 %v22576_v40  ;;  %v22594_v34 = vld [vmem:[#allocation8 + $0x12c] ss:$72 sps:$4 sm:$0xff]   ;;  %v22595_v15 = vld [vmem:[#allocation8 + $0xa28] ss:$72 sps:$4 sm:$0xff]   ;;  %v22598_v40 = vld [vmem:[#allocation8 + $0x98] ss:$72 sps:$4 sm:$0xff]  }
 0x300   : > { %8262 = vmatprep.subr.bf16.mxu1 %v22579_v24  ;;  %v22597_v36 = vld [vmem:[#allocation8 + $0xa2c] ss:$72 sps:$4 sm:$0xff]   ;;  %v22601_v24 = vld [vmem:[#allocation8 + $0x998] ss:$72 sps:$4 sm:$0xff]  }
 0x302   : > { %8220 = vmatpush1.bf16.msra.mxu0 %v22574_v38  ;;  %v22603_v38 = vld [vmem:[#allocation8 + $0x99c] ss:$72 sps:$4 sm:$0xff]  }
 0x303   : > { %8263 = vmatpush1.bf16.msra.mxu1 %v22577_v27  ;;  %8221 = vmatprep.subr.bf16.mxu0 %v22582_v52  ;;  %v22600_v27 = vld [vmem:[#allocation8 + $0x9c] ss:$72 sps:$4 sm:$0xff]   ;;  %v22606_v52 = vld [vmem:[#allocation8 + $0xc] ss:$72 sps:$4 sm:$0xff]  }
 0x304   : > { %8264 = vmatprep.subr.bf16.mxu1 %v22585_v55  ;;  %v22609_v55 = vld [vmem:[#allocation8 + $0x90c] ss:$72 sps:$4 sm:$0xff]  }
 0x306   : > { %8222 = vmatpush1.bf16.msra.mxu0 %v22580_v62  ;;  %v22604_v62 = vld [vmem:[#allocation8 + $0x8] ss:$72 sps:$4 sm:$0xff]  }
 0x307   : > { %8265 = vmatpush1.bf16.msra.mxu1 %v22583_v9  ;;  %8223 = vmatprep.subr.bf16.mxu0 %v22588_v51  ;;  %v22607_v9 = vld [vmem:[#allocation8 + $0x908] ss:$72 sps:$4 sm:$0xff]   ;;  %v22615_v51 = vld [vmem:[#allocation8 + $0x117c] ss:$72 sps:$4 sm:$0xff]  }
 0x308   : > { %8266 = vmatprep.subr.bf16.mxu1 %v22591_v21  ;;  %v22610_v21 = vld [vmem:[#allocation8 + $0x878] ss:$72 sps:$4 sm:$0xff]  }
 0x30a   : > { %8224 = vmatpush1.bf16.msra.mxu0 %v22586_v35  ;;  %v22613_v35 = vld [vmem:[#allocation8 + $0x1178] ss:$72 sps:$4 sm:$0xff]  }
 0x30b   : > { %8267 = vmatpush1.bf16.msra.mxu1 %v22589_v25  ;;  %8225 = vmatprep.subr.bf16.mxu0 %v22594_v34  ;;  %v22612_v25 = vld [vmem:[#allocation8 + $0x87c] ss:$72 sps:$4 sm:$0xff]   ;;  %v22618_v34 = vld [vmem:[#allocation8 + $0x7ec] ss:$72 sps:$4 sm:$0xff]  }
 0x30c   : > { %8268 = vmatprep.subr.bf16.mxu1 %v22597_v36  ;;  %v22621_v36 = vld [vmem:[#allocation8 + $0x10ec] ss:$72 sps:$4 sm:$0xff]  }
 0x30e   : > { %8226 = vmatpush1.bf16.msra.mxu0 %v22592_v12  ;;  %v22616_v12 = vld [vmem:[#allocation8 + $0x7e8] ss:$72 sps:$4 sm:$0xff]  }
 0x30f   : > { %8269 = vmatpush1.bf16.msra.mxu1 %v22595_v15  ;;  %8227 = vmatprep.subr.bf16.mxu0 %v22600_v27  ;;  %v22619_v15 = vld [vmem:[#allocation8 + $0x10e8] ss:$72 sps:$4 sm:$0xff]   ;;  %v22624_v27 = vld [vmem:[#allocation8 + $0x75c] ss:$72 sps:$4 sm:$0xff]  }
 0x310   : > { %8270 = vmatprep.subr.bf16.mxu1 %v22603_v38  ;;  %v22627_v38 = vld [vmem:[#allocation8 + $0x105c] ss:$72 sps:$4 sm:$0xff]  }
 0x312   : > { %8228 = vmatpush1.bf16.msra.mxu0 %v22598_v40  ;;  %v22622_v40 = vld [vmem:[#allocation8 + $0x758] ss:$72 sps:$4 sm:$0xff]  }
 0x313   : > { %8271 = vmatpush1.bf16.msra.mxu1 %v22601_v24  ;;  %8229 = vmatprep.subr.bf16.mxu0 %v22606_v52  ;;  %v22625_v24 = vld [vmem:[#allocation8 + $0x1058] ss:$72 sps:$4 sm:$0xff]   ;;  %v22630_v52 = vld [vmem:[#allocation8 + $0x6cc] ss:$72 sps:$4 sm:$0xff]  }
 0x314   : > { %8272 = vmatprep.subr.bf16.mxu1 %v22609_v55  ;;  %v22633_v55 = vld [vmem:[#allocation8 + $0xfcc] ss:$72 sps:$4 sm:$0xff]  }
 0x316   : > { %8230 = vmatpush1.bf16.msra.mxu0 %v22604_v62  ;;  %v22628_v62 = vld [vmem:[#allocation8 + $0x6c8] ss:$72 sps:$4 sm:$0xff]  }
 0x317   : > { %8273 = vmatpush1.bf16.msra.mxu1 %v22607_v9  ;;  %8231 = vmatprep.subr.bf16.mxu0 %v22612_v25  ;;  %v22631_v9 = vld [vmem:[#allocation8 + $0xfc8] ss:$72 sps:$4 sm:$0xff]   ;;  %v22636_v25 = vld [vmem:[#allocation8 + $0x63c] ss:$72 sps:$4 sm:$0xff]  }
 0x318   : > { %8274 = vmatprep.subr.bf16.mxu1 %v22615_v51  ;;  %v22639_v51 = vld [vmem:[#allocation8 + $0xf3c] ss:$72 sps:$4 sm:$0xff]  }
 0x31a   : > { %8232 = vmatpush2.bf16.msra.mxu0 %v22610_v21  ;;  %v22634_v21 = vld [vmem:[#allocation8 + $0x638] ss:$72 sps:$4 sm:$0xff]  }
 0x31b   : > { %8275 = vmatpush2.bf16.msra.mxu1 %v22613_v35  ;;  %8233 = vmatprep.subr.bf16.mxu0 %v22618_v34  ;;  %v22637_v35 = vld [vmem:[#allocation8 + $0xf38] ss:$72 sps:$4 sm:$0xff]   ;;  %v22642_v34 = vld [vmem:[#allocation8 + $0x5ac] ss:$72 sps:$4 sm:$0xff]  }
 0x31c   : > { %8276 = vmatprep.subr.bf16.mxu1 %v22621_v36  ;;  %v22645_v36 = vld [vmem:[#allocation8 + $0xeac] ss:$72 sps:$4 sm:$0xff]  }
 0x31e   : > { %8234 = vmatpush2.bf16.msra.mxu0 %v22616_v12  ;;  %v22640_v12 = vld [vmem:[#allocation8 + $0x5a8] ss:$72 sps:$4 sm:$0xff]  }
 0x31f   : > { %8277 = vmatpush2.bf16.msra.mxu1 %v22619_v15  ;;  %8235 = vmatprep.subr.bf16.mxu0 %v22624_v27  ;;  %v22643_v15 = vld [vmem:[#allocation8 + $0xea8] ss:$72 sps:$4 sm:$0xff]   ;;  %v22648_v27 = vld [vmem:[#allocation8 + $0x51c] ss:$72 sps:$4 sm:$0xff]  }
 0x320   : > { %8278 = vmatprep.subr.bf16.mxu1 %v22627_v38  ;;  %v22651_v38 = vld [vmem:[#allocation8 + $0xe1c] ss:$72 sps:$4 sm:$0xff]  }
 0x322   : > { %8236 = vmatpush2.bf16.msra.mxu0 %v22622_v40  ;;  %v22646_v40 = vld [vmem:[#allocation8 + $0x518] ss:$72 sps:$4 sm:$0xff]  }
 0x323   : > { %8279 = vmatpush2.bf16.msra.mxu1 %v22625_v24  ;;  %8237 = vmatprep.subr.bf16.mxu0 %v22630_v52  ;;  %v22649_v24 = vld [vmem:[#allocation8 + $0xe18] ss:$72 sps:$4 sm:$0xff]   ;;  %v22654_v52 = vld [vmem:[#allocation8 + $0x48c] ss:$72 sps:$4 sm:$0xff]  }
 0x324   : > { %8280 = vmatprep.subr.bf16.mxu1 %v22633_v55  ;;  %v22657_v55 = vld [vmem:[#allocation8 + $0xd8c] ss:$72 sps:$4 sm:$0xff]  }
 0x326   : > { %8238 = vmatpush2.bf16.msra.mxu0 %v22628_v62  ;;  %v22652_v62 = vld [vmem:[#allocation8 + $0x488] ss:$72 sps:$4 sm:$0xff]  }
 0x327   : > { %8281 = vmatpush2.bf16.msra.mxu1 %v22631_v9  ;;  %8239 = vmatprep.subr.bf16.mxu0 %v22636_v25  ;;  %v22655_v9 = vld [vmem:[#allocation8 + $0xd88] ss:$72 sps:$4 sm:$0xff]   ;;  %v22660_v25 = vld [vmem:[#allocation8 + $0x404] ss:$72 sps:$4 sm:$0xff]  }
 0x328   : > { %8282 = vmatprep.subr.bf16.mxu1 %v22639_v51  ;;  %v22663_v51 = vld [vmem:[#allocation8 + $0xd04] ss:$72 sps:$4 sm:$0xff]  }
 0x32a   : > { %8240 = vmatpush2.bf16.msra.mxu0 %v22634_v21  ;;  %v22658_v21 = vld [vmem:[#allocation8 + $0x400] ss:$72 sps:$4 sm:$0xff]  }
 0x32b   : > { %8283 = vmatpush2.bf16.msra.mxu1 %v22637_v35  ;;  %8241 = vmatprep.subr.bf16.mxu0 %v22642_v34  ;;  %v22661_v35 = vld [vmem:[#allocation8 + $0xd00] ss:$72 sps:$4 sm:$0xff]   ;;  %v25689_v34 = vpop.f32.mrf.mxu0 }
 0x32c   : > { %8284 = vmatprep.subr.bf16.mxu1 %v22645_v36  ;;  %v25691_v36 = vpop.f32.mrf.mxu1 }
 0x32e   : > { %8242 = vmatpush2.bf16.msra.mxu0 %v22640_v12  ;;  %v22666_v12 = vld [vmem:[#allocation8 + $0x374] ss:$72 sps:$4 sm:$0xff]  }
 0x32f   : > { %8285 = vmatpush2.bf16.msra.mxu1 %v22643_v15  ;;  %8243 = vmatprep.subr.bf16.mxu0 %v22648_v27  ;;  %v22669_v15 = vld [vmem:[#allocation8 + $0xc74] ss:$72 sps:$4 sm:$0xff]   ;;  %v22664_v27 = vld [vmem:[#allocation8 + $0x370] ss:$72 sps:$4 sm:$0xff]  }
 0x330   : > { %8286 = vmatprep.subr.bf16.mxu1 %v22651_v38  ;;  %v22667_v38 = vld [vmem:[#allocation8 + $0xc70] ss:$72 sps:$4 sm:$0xff]  }
 0x332   : > { %8244 = vmatpush2.bf16.msra.mxu0 %v22646_v40 }
 0x333   : > { %8287 = vmatpush2.bf16.msra.mxu1 %v22649_v24  ;;  %8245 = vmatprep.subr.bf16.mxu0 %v22654_v52 }
 0x334   : > { %8288 = vmatprep.subr.bf16.mxu1 %v22657_v55 }
 0x336   : > { %8246 = vmatpush2.bf16.msra.mxu0 %v22652_v62 }
 0x337   : > { %8289 = vmatpush2.bf16.msra.mxu1 %v22655_v9  ;;  %8301 = vmatprep.subr.bf16.mxu0 %v22660_v25  ;;  %v22672_v9 = vld [vmem:[#allocation8 + $0x2e4] ss:$72 sps:$4 sm:$0xff]  }
 0x338   : > { %8344 = vmatprep.subr.bf16.mxu1 %v22663_v51  ;;  %v22675_v25 = vld [vmem:[#allocation8 + $0xbe4] ss:$72 sps:$4 sm:$0xff]  }
 0x339   : > { %v5111_v40 = vpop.f32.mrf.mxu0  ;;  %8248 = vmatmul.mubr.bf16.vlgmr.msra.gmra.mxu0 %v25534_v13 }
 0x33a   : > { %v5154_v24 = vpop.f32.mrf.mxu1  ;;  %8291 = vmatmul.mubr.bf16.vlgmr.msra.gmra.mxu1 %v25541_v17  ;;  %8302 = vmatpush1.bf16.msra.mxu0 %v22658_v21  ;;  %v22678_v21 = vld [vmem:[#allocation8 + $0x254] ss:$72 sps:$4 sm:$0xff]  }
 0x33b   : > { %v25695_v52 = vadd.f32 %v5154_v24, %v5111_v40  ;;  %8345 = vmatpush1.bf16.msra.mxu1 %v22661_v35  ;;  %v5113_v55 = vpop.f32.mrf.mxu0  ;;  %8303 = vmatprep.subr.bf16.mxu0 %v22666_v12  ;;  %v22681_v35 = vld [vmem:[#allocation8 + $0xb54] ss:$72 sps:$4 sm:$0xff]   ;;  %v22676_v12 = vld [vmem:[#allocation8 + $0x250] ss:$72 sps:$4 sm:$0xff]   ;;  %v22684_v24 = vld [vmem:[#allocation8 + $0x1c4] ss:$72 sps:$4 sm:$0xff]  }
 0x33c   : > { %v5156_v62 = vpop.f32.mrf.mxu1  ;;  %8346 = vmatprep.subr.bf16.mxu1 %v22669_v15  ;;  %8333 = vmatprep.mubr.bf16.mxu0 %v25509_v53  ;;  %v22679_v15 = vld [vmem:[#allocation8 + $0xb50] ss:$72 sps:$4 sm:$0xff]  }
 0x33d   : > { %v25697_v51 = vadd.f32 %v5156_v62, %v5113_v55  ;;  %8376 = vmatprep.mubr.bf16.mxu1 %v25515_v58  ;;  %v5115_v7 = vpop.f32.mrf.mxu0  ;;  %v22687_v55 = vld [vmem:[#allocation8 + $0xac4] ss:$72 sps:$4 sm:$0xff]   ;;  %v22682_v62 = vld [vmem:[#allocation8 + $0x1c0] ss:$72 sps:$4 sm:$0xff]  }
 0x33e   : > { %v5158_v6 = vpop.f32.mrf.mxu1  ;;  %8304 = vmatpush1.bf16.msra.mxu0 %v22664_v27  ;;  %v22688_v27 = vld [vmem:[#allocation8 + $0x130] ss:$72 sps:$4 sm:$0xff]  }
 0x33f   : > { %v25701_v40 = vadd.f32 %v5158_v6, %v5115_v7  ;;  %8347 = vmatpush1.bf16.msra.mxu1 %v22667_v38  ;;  %8305 = vmatprep.subr.bf16.mxu0 %v22672_v9  ;;  %v22690_v6 = vld [vmem:[#allocation8 + $0x134] ss:$72 sps:$4 sm:$0xff]   ;;  %v22691_v38 = vld [vmem:[#allocation8 + $0xa30] ss:$72 sps:$4 sm:$0xff]   ;;  %v22694_v9 = vld [vmem:[#allocation8 + $0xa0] ss:$72 sps:$4 sm:$0xff]  }
 0x340   : > { %8348 = vmatprep.subr.bf16.mxu1 %v22675_v25  ;;  %v22693_v7 = vld [vmem:[#allocation8 + $0xa34] ss:$72 sps:$4 sm:$0xff]   ;;  %v22697_v25 = vld [vmem:[#allocation8 + $0x9a0] ss:$72 sps:$4 sm:$0xff]  }
 0x342   : > { %8306 = vmatpush1.bf16.msra.mxu0 %v22670_v33  ;;  %v22699_v33 = vld [vmem:[#allocation8 + $0x9a4] ss:$72 sps:$4 sm:$0xff]  }
 0x343   : > { %8349 = vmatpush1.bf16.msra.mxu1 %v22673_v8  ;;  %8307 = vmatprep.subr.bf16.mxu0 %v22678_v21  ;;  %v22696_v8 = vld [vmem:[#allocation8 + $0xa4] ss:$72 sps:$4 sm:$0xff]   ;;  %v22702_v21 = vld [vmem:[#allocation8 + $0x14] ss:$72 sps:$4 sm:$0xff]  }
 0x344   : > { %8350 = vmatprep.subr.bf16.mxu1 %v22681_v35  ;;  %v22705_v35 = vld [vmem:[#allocation8 + $0x914] ss:$72 sps:$4 sm:$0xff]  }
 0x346   : > { %8308 = vmatpush1.bf16.msra.mxu0 %v22676_v12  ;;  %v22700_v12 = vld [vmem:[#allocation8 + $0x10] ss:$72 sps:$4 sm:$0xff]  }
 0x347   : > { %8351 = vmatpush1.bf16.msra.mxu1 %v22679_v15  ;;  %8309 = vmatprep.subr.bf16.mxu0 %v22684_v24  ;;  %v22703_v15 = vld [vmem:[#allocation8 + $0x910] ss:$72 sps:$4 sm:$0xff]   ;;  %v22711_v24 = vld [vmem:[#allocation8 + $0x1184] ss:$72 sps:$4 sm:$0xff]  }
 0x348   : > { %8352 = vmatprep.subr.bf16.mxu1 %v22687_v55  ;;  %v22706_v55 = vld [vmem:[#allocation8 + $0x880] ss:$72 sps:$4 sm:$0xff]  }
 0x34a   : > { %8310 = vmatpush1.bf16.msra.mxu0 %v22682_v62  ;;  %v22709_v62 = vld [vmem:[#allocation8 + $0x1180] ss:$72 sps:$4 sm:$0xff]  }
 0x34b   : > { %8353 = vmatpush1.bf16.msra.mxu1 %v22685_v2  ;;  %8311 = vmatprep.subr.bf16.mxu0 %v22690_v6  ;;  %v22708_v2 = vld [vmem:[#allocation8 + $0x884] ss:$72 sps:$4 sm:$0xff]   ;;  %v22714_v6 = vld [vmem:[#allocation8 + $0x7f4] ss:$72 sps:$4 sm:$0xff]  }
 0x34c   : > { %8354 = vmatprep.subr.bf16.mxu1 %v22693_v7  ;;  %v22717_v7 = vld [vmem:[#allocation8 + $0x10f4] ss:$72 sps:$4 sm:$0xff]  }
 0x34e   : > { %8312 = vmatpush1.bf16.msra.mxu0 %v22688_v27  ;;  %v22712_v27 = vld [vmem:[#allocation8 + $0x7f0] ss:$72 sps:$4 sm:$0xff]  }
 0x34f   : > { %8355 = vmatpush1.bf16.msra.mxu1 %v22691_v38  ;;  %8313 = vmatprep.subr.bf16.mxu0 %v22696_v8  ;;  %v22715_v38 = vld [vmem:[#allocation8 + $0x10f0] ss:$72 sps:$4 sm:$0xff]   ;;  %v22720_v8 = vld [vmem:[#allocation8 + $0x764] ss:$72 sps:$4 sm:$0xff]  }
 0x350   : > { %8356 = vmatprep.subr.bf16.mxu1 %v22699_v33  ;;  %v22723_v33 = vld [vmem:[#allocation8 + $0x1064] ss:$72 sps:$4 sm:$0xff]  }
 0x352   : > { %8314 = vmatpush1.bf16.msra.mxu0 %v22694_v9  ;;  %v22718_v9 = vld [vmem:[#allocation8 + $0x760] ss:$72 sps:$4 sm:$0xff]  }
 0x353   : > { %8357 = vmatpush1.bf16.msra.mxu1 %v22697_v25  ;;  %8315 = vmatprep.subr.bf16.mxu0 %v22702_v21  ;;  %v22721_v25 = vld [vmem:[#allocation8 + $0x1060] ss:$72 sps:$4 sm:$0xff]   ;;  %v22726_v21 = vld [vmem:[#allocation8 + $0x6d4] ss:$72 sps:$4 sm:$0xff]  }
 0x354   : > { %8358 = vmatprep.subr.bf16.mxu1 %v22705_v35  ;;  %v22729_v35 = vld [vmem:[#allocation8 + $0xfd4] ss:$72 sps:$4 sm:$0xff]  }
 0x356   : > { %8316 = vmatpush1.bf16.msra.mxu0 %v22700_v12  ;;  %v22724_v12 = vld [vmem:[#allocation8 + $0x6d0] ss:$72 sps:$4 sm:$0xff]  }
 0x357   : > { %8359 = vmatpush1.bf16.msra.mxu1 %v22703_v15  ;;  %8317 = vmatprep.subr.bf16.mxu0 %v22708_v2  ;;  %v22727_v15 = vld [vmem:[#allocation8 + $0xfd0] ss:$72 sps:$4 sm:$0xff]   ;;  %v22732_v2 = vld [vmem:[#allocation8 + $0x644] ss:$72 sps:$4 sm:$0xff]  }
 0x358   : > { %8360 = vmatprep.subr.bf16.mxu1 %v22711_v24  ;;  %v22735_v24 = vld [vmem:[#allocation8 + $0xf44] ss:$72 sps:$4 sm:$0xff]  }
 0x35a   : > { %8318 = vmatpush2.bf16.msra.mxu0 %v22706_v55  ;;  %v22730_v55 = vld [vmem:[#allocation8 + $0x640] ss:$72 sps:$4 sm:$0xff]  }
 0x35b   : > { %8361 = vmatpush2.bf16.msra.mxu1 %v22709_v62  ;;  %8319 = vmatprep.subr.bf16.mxu0 %v22714_v6  ;;  %v22733_v62 = vld [vmem:[#allocation8 + $0xf40] ss:$72 sps:$4 sm:$0xff]   ;;  %v22738_v6 = vld [vmem:[#allocation8 + $0x5b4] ss:$72 sps:$4 sm:$0xff]  }
 0x35c   : > { %8362 = vmatprep.subr.bf16.mxu1 %v22717_v7  ;;  %v22741_v7 = vld [vmem:[#allocation8 + $0xeb4] ss:$72 sps:$4 sm:$0xff]  }
 0x35e   : > { %8320 = vmatpush2.bf16.msra.mxu0 %v22712_v27  ;;  %v22736_v27 = vld [vmem:[#allocation8 + $0x5b0] ss:$72 sps:$4 sm:$0xff]  }
 0x35f   : > { %8363 = vmatpush2.bf16.msra.mxu1 %v22715_v38  ;;  %8321 = vmatprep.subr.bf16.mxu0 %v22720_v8  ;;  %v22739_v38 = vld [vmem:[#allocation8 + $0xeb0] ss:$72 sps:$4 sm:$0xff]   ;;  %v22744_v8 = vld [vmem:[#allocation8 + $0x524] ss:$72 sps:$4 sm:$0xff]  }
 0x360   : > { %8364 = vmatprep.subr.bf16.mxu1 %v22723_v33  ;;  %v22747_v33 = vld [vmem:[#allocation8 + $0xe24] ss:$72 sps:$4 sm:$0xff]  }
 0x362   : > { %8322 = vmatpush2.bf16.msra.mxu0 %v22718_v9  ;;  %v22742_v9 = vld [vmem:[#allocation8 + $0x520] ss:$72 sps:$4 sm:$0xff]  }
 0x363   : > { %8365 = vmatpush2.bf16.msra.mxu1 %v22721_v25  ;;  %8323 = vmatprep.subr.bf16.mxu0 %v22726_v21  ;;  %v22745_v25 = vld [vmem:[#allocation8 + $0xe20] ss:$72 sps:$4 sm:$0xff]   ;;  %v22750_v21 = vld [vmem:[#allocation8 + $0x494] ss:$72 sps:$4 sm:$0xff]  }
 0x364   : > { %8366 = vmatprep.subr.bf16.mxu1 %v22729_v35  ;;  %v22753_v35 = vld [vmem:[#allocation8 + $0xd94] ss:$72 sps:$4 sm:$0xff]  }
 0x366   : > { %8324 = vmatpush2.bf16.msra.mxu0 %v22724_v12  ;;  %v22748_v12 = vld [vmem:[#allocation8 + $0x490] ss:$72 sps:$4 sm:$0xff]  }
 0x367   : > { %8367 = vmatpush2.bf16.msra.mxu1 %v22727_v15  ;;  %8325 = vmatprep.subr.bf16.mxu0 %v22732_v2  ;;  %v22751_v15 = vld [vmem:[#allocation8 + $0xd90] ss:$72 sps:$4 sm:$0xff]   ;;  %v22756_v2 = vld [vmem:[#allocation8 + $0x40c] ss:$72 sps:$4 sm:$0xff]  }
 0x368   : > { %8368 = vmatprep.subr.bf16.mxu1 %v22735_v24  ;;  %v22759_v24 = vld [vmem:[#allocation8 + $0xd0c] ss:$72 sps:$4 sm:$0xff]  }
 0x36a   : > { %8326 = vmatpush2.bf16.msra.mxu0 %v22730_v55  ;;  %v22754_v55 = vld [vmem:[#allocation8 + $0x408] ss:$72 sps:$4 sm:$0xff]  }
 0x36b   : > { %8369 = vmatpush2.bf16.msra.mxu1 %v22733_v62  ;;  %8327 = vmatprep.subr.bf16.mxu0 %v22738_v6  ;;  %v22757_v62 = vld [vmem:[#allocation8 + $0xd08] ss:$72 sps:$4 sm:$0xff]   ;;  %v25703_v6 = vpop.f32.mrf.mxu0 }
 0x36c   : > { %8370 = vmatprep.subr.bf16.mxu1 %v22741_v7  ;;  %v25705_v7 = vpop.f32.mrf.mxu1 }
 0x36e   : > { %8328 = vmatpush2.bf16.msra.mxu0 %v22736_v27  ;;  %v22762_v27 = vld [vmem:[#allocation8 + $0x37c] ss:$72 sps:$4 sm:$0xff]  }
 0x36f   : > { %8371 = vmatpush2.bf16.msra.mxu1 %v22739_v38  ;;  %8329 = vmatprep.subr.bf16.mxu0 %v22744_v8  ;;  %v22765_v38 = vld [vmem:[#allocation8 + $0xc7c] ss:$72 sps:$4 sm:$0xff]   ;;  %v22760_v8 = vld [vmem:[#allocation8 + $0x378] ss:$72 sps:$4 sm:$0xff]  }
 0x370   : > { %8372 = vmatprep.subr.bf16.mxu1 %v22747_v33  ;;  %v22763_v33 = vld [vmem:[#allocation8 + $0xc78] ss:$72 sps:$4 sm:$0xff]  }
 0x372   : > { %8330 = vmatpush2.bf16.msra.mxu0 %v22742_v9 }
 0x373   : > { %8373 = vmatpush2.bf16.msra.mxu1 %v22745_v25  ;;  %8331 = vmatprep.subr.bf16.mxu0 %v22750_v21 }
 0x374   : > { %8374 = vmatprep.subr.bf16.mxu1 %v22753_v35 }
 0x376   : > { %8332 = vmatpush2.bf16.msra.mxu0 %v22748_v12 }
 0x377   : > { %8375 = vmatpush2.bf16.msra.mxu1 %v22751_v15  ;;  %8387 = vmatprep.subr.bf16.mxu0 %v22756_v2  ;;  %v22768_v15 = vld [vmem:[#allocation8 + $0x2ec] ss:$72 sps:$4 sm:$0xff]  }
 0x378   : > { %8430 = vmatprep.subr.bf16.mxu1 %v22759_v24  ;;  %v22771_v2 = vld [vmem:[#allocation8 + $0xbec] ss:$72 sps:$4 sm:$0xff]   ;;  %v22766_v24 = vld [vmem:[#allocation8 + $0x2e8] ss:$72 sps:$4 sm:$0xff]  }
 0x379   : > { %v5197_v9 = vpop.f32.mrf.mxu0  ;;  %8334 = vmatmul.mubr.bf16.vlgmr.msra.gmra.mxu0 %v25534_v13 }
 0x37a   : > { %v5240_v25 = vpop.f32.mrf.mxu1  ;;  %8377 = vmatmul.mubr.bf16.vlgmr.msra.gmra.mxu1 %v25541_v17  ;;  %8388 = vmatpush1.bf16.msra.mxu0 %v22754_v55  ;;  %v22774_v55 = vld [vmem:[#allocation8 + $0x25c] ss:$72 sps:$4 sm:$0xff]  }
 0x37b   : > { %v25709_v21 = vadd.f32 %v5240_v25, %v5197_v9  ;;  %8431 = vmatpush1.bf16.msra.mxu1 %v22757_v62  ;;  %v25711_v35 = vpop.f32.mrf.mxu0  ;;  %8389 = vmatprep.subr.bf16.mxu0 %v22762_v27  ;;  %v22777_v62 = vld [vmem:[#allocation8 + $0xb5c] ss:$72 sps:$4 sm:$0xff]   ;;  %v22772_v27 = vld [vmem:[#allocation8 + $0x258] ss:$72 sps:$4 sm:$0xff]   ;;  %v22780_v25 = vld [vmem:[#allocation8 + $0x1cc] ss:$72 sps:$4 sm:$0xff]  }
 0x37c   : > { %v25713_v12 = vpop.f32.mrf.mxu1  ;;  %8432 = vmatprep.subr.bf16.mxu1 %v22765_v38  ;;  %8419 = vmatprep.mubr.bf16.mxu0 %v25509_v53  ;;  %v22775_v38 = vld [vmem:[#allocation8 + $0xb58] ss:$72 sps:$4 sm:$0xff]  }
 0x37d   : > { %8462 = vmatprep.mubr.bf16.mxu1 %v25515_v58  ;;  %v5201_v0 = vpop.f32.mrf.mxu0 }
 0x37e   : > { %v5244_v30 = vpop.f32.mrf.mxu1  ;;  %8390 = vmatpush1.bf16.msra.mxu0 %v22760_v8  ;;  %v22784_v8 = vld [vmem:[#allocation8 + $0x138] ss:$72 sps:$4 sm:$0xff]  }
 0x37f   : > { %v25717_v9 = vadd.f32 %v5244_v30, %v5201_v0  ;;  %8433 = vmatpush1.bf16.msra.mxu1 %v22763_v33  ;;  %8391 = vmatprep.subr.bf16.mxu0 %v22768_v15  ;;  %v22786_v0 = vld [vmem:[#allocation8 + $0x13c] ss:$72 sps:$4 sm:$0xff]   ;;  %v22787_v33 = vld [vmem:[#allocation8 + $0xa38] ss:$72 sps:$4 sm:$0xff]   ;;  %v22795_v15 = vld [vmem:[#allocation8 + $0x9ac] ss:$72 sps:$4 sm:$0xff]  }
 0x380   : > { %8434 = vmatprep.subr.bf16.mxu1 %v22771_v2  ;;  %v22789_v30 = vld [vmem:[#allocation8 + $0xa3c] ss:$72 sps:$4 sm:$0xff]   ;;  %v22790_v2 = vld [vmem:[#allocation8 + $0xa8] ss:$72 sps:$4 sm:$0xff]  }
 0x382   : > { %8392 = vmatpush1.bf16.msra.mxu0 %v22766_v24  ;;  %v22793_v24 = vld [vmem:[#allocation8 + $0x9a8] ss:$72 sps:$4 sm:$0xff]  }
 0x383   : > { %8435 = vmatpush1.bf16.msra.mxu1 %v22769_v1  ;;  %8393 = vmatprep.subr.bf16.mxu0 %v22774_v55  ;;  %v22792_v1 = vld [vmem:[#allocation8 + $0xac] ss:$72 sps:$4 sm:$0xff]   ;;  %v22798_v55 = vld [vmem:[#allocation8 + $0x1c] ss:$72 sps:$4 sm:$0xff]  }
 0x384   : > { %8436 = vmatprep.subr.bf16.mxu1 %v22777_v62  ;;  %v22801_v62 = vld [vmem:[#allocation8 + $0x91c] ss:$72 sps:$4 sm:$0xff]  }
 0x386   : > { %8394 = vmatpush1.bf16.msra.mxu0 %v22772_v27  ;;  %v22799_v27 = vld [vmem:[#allocation8 + $0x918] ss:$72 sps:$4 sm:$0xff]  }
 0x387   : > { %8437 = vmatpush1.bf16.msra.mxu1 %v22775_v38  ;;  %8395 = vmatprep.subr.bf16.mxu0 %v22780_v25  ;;  %v22802_v38 = vld [vmem:[#allocation8 + $0x888] ss:$72 sps:$4 sm:$0xff]  }
 0x388   : > { %8438 = vmatprep.subr.bf16.mxu1 %v22783_v28  ;;  %v22796_v28 = vld [vmem:[#allocation8 + $0x18] ss:$72 sps:$4 sm:$0xff]   ;;  %v22805_v25 = vld [vmem:[#allocation8 + $0x1188] ss:$72 sps:$4 sm:$0xff]  }
 0x38a   : > { %8396 = vmatpush1.bf16.msra.mxu0 %v22778_v49  ;;  %v22807_v49 = vld [vmem:[#allocation8 + $0x118c] ss:$72 sps:$4 sm:$0xff]  }
 0x38b   : > { %8439 = vmatpush1.bf16.msra.mxu1 %v22781_v47  ;;  %8397 = vmatprep.subr.bf16.mxu0 %v22786_v0  ;;  %v22804_v47 = vld [vmem:[#allocation8 + $0x88c] ss:$72 sps:$4 sm:$0xff]   ;;  %v22810_v0 = vld [vmem:[#allocation8 + $0x7fc] ss:$72 sps:$4 sm:$0xff]  }
 0x38c   : > { %8440 = vmatprep.subr.bf16.mxu1 %v22789_v30  ;;  %v22813_v30 = vld [vmem:[#allocation8 + $0x10fc] ss:$72 sps:$4 sm:$0xff]  }
 0x38e   : > { %8398 = vmatpush1.bf16.msra.mxu0 %v22784_v8  ;;  %v22808_v8 = vld [vmem:[#allocation8 + $0x7f8] ss:$72 sps:$4 sm:$0xff]  }
 0x38f   : > { %8441 = vmatpush1.bf16.msra.mxu1 %v22787_v33  ;;  %8399 = vmatprep.subr.bf16.mxu0 %v22792_v1  ;;  %v22811_v33 = vld [vmem:[#allocation8 + $0x10f8] ss:$72 sps:$4 sm:$0xff]   ;;  %v22816_v1 = vld [vmem:[#allocation8 + $0x76c] ss:$72 sps:$4 sm:$0xff]  }
 0x390   : > { %8442 = vmatprep.subr.bf16.mxu1 %v22795_v15  ;;  %v22819_v15 = vld [vmem:[#allocation8 + $0x106c] ss:$72 sps:$4 sm:$0xff]  }
 0x392   : > { %8400 = vmatpush1.bf16.msra.mxu0 %v22790_v2  ;;  %v22814_v2 = vld [vmem:[#allocation8 + $0x768] ss:$72 sps:$4 sm:$0xff]  }
 0x393   : > { %8443 = vmatpush1.bf16.msra.mxu1 %v22793_v24  ;;  %8401 = vmatprep.subr.bf16.mxu0 %v22798_v55  ;;  %v22817_v24 = vld [vmem:[#allocation8 + $0x1068] ss:$72 sps:$4 sm:$0xff]   ;;  %v22822_v55 = vld [vmem:[#allocation8 + $0x6dc] ss:$72 sps:$4 sm:$0xff]  }
 0x394   : > { %8444 = vmatprep.subr.bf16.mxu1 %v22801_v62  ;;  %v22825_v62 = vld [vmem:[#allocation8 + $0xfdc] ss:$72 sps:$4 sm:$0xff]  }
 0x396   : > { %8402 = vmatpush1.bf16.msra.mxu0 %v22796_v28  ;;  %v22820_v28 = vld [vmem:[#allocation8 + $0x6d8] ss:$72 sps:$4 sm:$0xff]  }
 0x397   : > { %8445 = vmatpush1.bf16.msra.mxu1 %v22799_v27  ;;  %8403 = vmatprep.subr.bf16.mxu0 %v22804_v47  ;;  %v22823_v27 = vld [vmem:[#allocation8 + $0xfd8] ss:$72 sps:$4 sm:$0xff]   ;;  %v22828_v47 = vld [vmem:[#allocation8 + $0x64c] ss:$72 sps:$4 sm:$0xff]  }
 0x398   : > { %8446 = vmatprep.subr.bf16.mxu1 %v22807_v49  ;;  %v22831_v49 = vld [vmem:[#allocation8 + $0xf4c] ss:$72 sps:$4 sm:$0xff]  }
 0x39a   : > { %8404 = vmatpush2.bf16.msra.mxu0 %v22802_v38  ;;  %v22826_v38 = vld [vmem:[#allocation8 + $0x648] ss:$72 sps:$4 sm:$0xff]  }
 0x39b   : > { %8447 = vmatpush2.bf16.msra.mxu1 %v22805_v25  ;;  %8405 = vmatprep.subr.bf16.mxu0 %v22810_v0  ;;  %v22829_v25 = vld [vmem:[#allocation8 + $0xf48] ss:$72 sps:$4 sm:$0xff]   ;;  %v22834_v0 = vld [vmem:[#allocation8 + $0x5bc] ss:$72 sps:$4 sm:$0xff]  }
 0x39c   : > { %8448 = vmatprep.subr.bf16.mxu1 %v22813_v30  ;;  %v22837_v30 = vld [vmem:[#allocation8 + $0xebc] ss:$72 sps:$4 sm:$0xff]  }
 0x39e   : > { %8406 = vmatpush2.bf16.msra.mxu0 %v22808_v8  ;;  %v22832_v8 = vld [vmem:[#allocation8 + $0x5b8] ss:$72 sps:$4 sm:$0xff]  }
 0x39f   : > { %8449 = vmatpush2.bf16.msra.mxu1 %v22811_v33  ;;  %8407 = vmatprep.subr.bf16.mxu0 %v22816_v1  ;;  %v22835_v33 = vld [vmem:[#allocation8 + $0xeb8] ss:$72 sps:$4 sm:$0xff]   ;;  %v22840_v1 = vld [vmem:[#allocation8 + $0x52c] ss:$72 sps:$4 sm:$0xff]  }
 0x3a0   : > { %8450 = vmatprep.subr.bf16.mxu1 %v22819_v15  ;;  %v22843_v15 = vld [vmem:[#allocation8 + $0xe2c] ss:$72 sps:$4 sm:$0xff]  }
 0x3a2   : > { %8408 = vmatpush2.bf16.msra.mxu0 %v22814_v2  ;;  %v22838_v2 = vld [vmem:[#allocation8 + $0x528] ss:$72 sps:$4 sm:$0xff]  }
 0x3a3   : > { %8451 = vmatpush2.bf16.msra.mxu1 %v22817_v24  ;;  %8409 = vmatprep.subr.bf16.mxu0 %v22822_v55  ;;  %v22841_v24 = vld [vmem:[#allocation8 + $0xe28] ss:$72 sps:$4 sm:$0xff]   ;;  %v22846_v55 = vld [vmem:[#allocation8 + $0x49c] ss:$72 sps:$4 sm:$0xff]  }
 0x3a4   : > { %8452 = vmatprep.subr.bf16.mxu1 %v22825_v62  ;;  %v22849_v62 = vld [vmem:[#allocation8 + $0xd9c] ss:$72 sps:$4 sm:$0xff]  }
 0x3a6   : > { %8410 = vmatpush2.bf16.msra.mxu0 %v22820_v28  ;;  %v22844_v28 = vld [vmem:[#allocation8 + $0x498] ss:$72 sps:$4 sm:$0xff]  }
 0x3a7   : > { %8453 = vmatpush2.bf16.msra.mxu1 %v22823_v27  ;;  %8411 = vmatprep.subr.bf16.mxu0 %v22828_v47  ;;  %v22847_v27 = vld [vmem:[#allocation8 + $0xd98] ss:$72 sps:$4 sm:$0xff]   ;;  %v22852_v47 = vld [vmem:[#allocation8 + $0x414] ss:$72 sps:$4 sm:$0xff]  }
 0x3a8   : > { %8454 = vmatprep.subr.bf16.mxu1 %v22831_v49  ;;  %v22855_v49 = vld [vmem:[#allocation8 + $0xd14] ss:$72 sps:$4 sm:$0xff]  }
 0x3aa   : > { %8412 = vmatpush2.bf16.msra.mxu0 %v22826_v38  ;;  %v22850_v38 = vld [vmem:[#allocation8 + $0x410] ss:$72 sps:$4 sm:$0xff]  }
 0x3ab   : > { %8455 = vmatpush2.bf16.msra.mxu1 %v22829_v25  ;;  %8413 = vmatprep.subr.bf16.mxu0 %v22834_v0  ;;  %v22853_v25 = vld [vmem:[#allocation8 + $0xd10] ss:$72 sps:$4 sm:$0xff]   ;;  %v25719_v0 = vpop.f32.mrf.mxu0 }
 0x3ac   : > { %8456 = vmatprep.subr.bf16.mxu1 %v22837_v30  ;;  %v25721_v30 = vpop.f32.mrf.mxu1 }
 0x3ae   : > { %8414 = vmatpush2.bf16.msra.mxu0 %v22832_v8  ;;  %v22858_v8 = vld [vmem:[#allocation8 + $0x384] ss:$72 sps:$4 sm:$0xff]  }
 0x3af   : > { %8457 = vmatpush2.bf16.msra.mxu1 %v22835_v33  ;;  %8415 = vmatprep.subr.bf16.mxu0 %v22840_v1  ;;  %v22861_v33 = vld [vmem:[#allocation8 + $0xc84] ss:$72 sps:$4 sm:$0xff]   ;;  %v22856_v1 = vld [vmem:[#allocation8 + $0x380] ss:$72 sps:$4 sm:$0xff]  }
 0x3b0   : > { %8458 = vmatprep.subr.bf16.mxu1 %v22843_v15  ;;  %v22859_v15 = vld [vmem:[#allocation8 + $0xc80] ss:$72 sps:$4 sm:$0xff]  }
 0x3b2   : > { %8416 = vmatpush2.bf16.msra.mxu0 %v22838_v2 }
 0x3b3   : > { %8459 = vmatpush2.bf16.msra.mxu1 %v22841_v24  ;;  %8417 = vmatprep.subr.bf16.mxu0 %v22846_v55 }
 0x3b4   : > { %8460 = vmatprep.subr.bf16.mxu1 %v22849_v62 }
 0x3b6   : > { %8418 = vmatpush2.bf16.msra.mxu0 %v22844_v28 }
 0x3b7   : > { %8461 = vmatpush2.bf16.msra.mxu1 %v22847_v27  ;;  %8473 = vmatprep.subr.bf16.mxu0 %v22852_v47  ;;  %v22864_v27 = vld [vmem:[#allocation8 + $0x2f4] ss:$72 sps:$4 sm:$0xff]  }
 0x3b8   : > { %8516 = vmatprep.subr.bf16.mxu1 %v22855_v49  ;;  %v22867_v47 = vld [vmem:[#allocation8 + $0xbf4] ss:$72 sps:$4 sm:$0xff]  }
 0x3b9   : > { %v8163_v2 = vpop.f32.mrf.mxu0  ;;  %8420 = vmatmul.mubr.bf16.vlgmr.msra.gmra.mxu0 %v25534_v13 }
 0x3ba   : > { %v8206_v24 = vpop.f32.mrf.mxu1  ;;  %8463 = vmatmul.mubr.bf16.vlgmr.msra.gmra.mxu1 %v25541_v17  ;;  %v8164_v55 = vadd.f32 %v8163_v2, %v25597_v48  ;;  %8474 = vmatpush1.bf16.msra.mxu0 %v22850_v38  ;;  %v22868_v2 = vld [vmem:[#allocation8 + $0x260] ss:$72 sps:$4 sm:$0xff]  }
 0x3bb   : > { %8517 = vmatpush1.bf16.msra.mxu1 %v22853_v25  ;;  %v25726_v62 = vpop.f32.mrf.mxu0  ;;  %8475 = vmatprep.subr.bf16.mxu0 %v22858_v8  ;;  %v22870_v25 = vld [vmem:[#allocation8 + $0x264] ss:$72 sps:$4 sm:$0xff]  }
 0x3bc   : > { %v25728_v28 = vpop.f32.mrf.mxu1  ;;  %8518 = vmatprep.subr.bf16.mxu1 %v22861_v33  ;;  %v25730_v49 = vadd.f32 %v8206_v24, %v8164_v55  ;;  %8505 = vmatprep.mubr.bf16.mxu0 %v25509_v53  ;;  %v22873_v8 = vld [vmem:[#allocation8 + $0xb64] ss:$72 sps:$4 sm:$0xff]   ;;  %v22871_v24 = vld [vmem:[#allocation8 + $0xb60] ss:$72 sps:$4 sm:$0xff]   ;;  %v22876_v55 = vld [vmem:[#allocation8 + $0x1d4] ss:$72 sps:$4 sm:$0xff]  }
 0x3bd   : > { %8548 = vmatprep.mubr.bf16.mxu1 %v25515_v58  ;;  %v8167_v42 = vpop.f32.mrf.mxu0 }
 0x3be   : > { %v8168_v48 = vadd.f32 %v8167_v42, %v25603_v3  ;;  %8476 = vmatpush1.bf16.msra.mxu0 %v22856_v1  ;;  %v8210_v38 = vpop.f32.mrf.mxu1  ;;  %v22874_v3 = vld [vmem:[#allocation8 + $0x1d0] ss:$72 sps:$4 sm:$0xff]   ;;  %v22882_v1 = vld [vmem:[#allocation8 + $0x144] ss:$72 sps:$4 sm:$0xff]  }
 0x3bf   : > { %8519 = vmatpush1.bf16.msra.mxu1 %v22859_v15  ;;  %8477 = vmatprep.subr.bf16.mxu0 %v22864_v27  ;;  %v22877_v42 = vld [vmem:[#allocation8 + $0xad0] ss:$72 sps:$4 sm:$0xff]   ;;  %v22885_v15 = vld [vmem:[#allocation8 + $0xa44] ss:$72 sps:$4 sm:$0xff]   ;;  %v22880_v27 = vld [vmem:[#allocation8 + $0x140] ss:$72 sps:$4 sm:$0xff]  }
 0x3c0   : > { %8520 = vmatprep.subr.bf16.mxu1 %v22867_v47  ;;  %v25735_v33 = vadd.f32 %v8210_v38, %v8168_v48  ;;  %v22883_v47 = vld [vmem:[#allocation8 + $0xa40] ss:$72 sps:$4 sm:$0xff]   ;;  %v22886_v48 = vld [vmem:[#allocation8 + $0xb0] ss:$72 sps:$4 sm:$0xff]  }
 0x3c1   : > { %v22889_v38 = vld [vmem:[#allocation8 + $0x9b0] ss:$72 sps:$4 sm:$0xff]  }
 0x3c2   : > { %8478 = vmatpush1.bf16.msra.mxu0 %v22862_v39  ;;  %v22891_v39 = vld [vmem:[#allocation8 + $0x9b4] ss:$72 sps:$4 sm:$0xff]  }
 0x3c3   : > { %8521 = vmatpush1.bf16.msra.mxu1 %v22865_v37  ;;  %8479 = vmatprep.subr.bf16.mxu0 %v22870_v25  ;;  %v22888_v37 = vld [vmem:[#allocation8 + $0xb4] ss:$72 sps:$4 sm:$0xff]   ;;  %v22894_v25 = vld [vmem:[#allocation8 + $0x24] ss:$72 sps:$4 sm:$0xff]  }
 0x3c4   : > { %8522 = vmatprep.subr.bf16.mxu1 %v22873_v8  ;;  %v22897_v8 = vld [vmem:[#allocation8 + $0x924] ss:$72 sps:$4 sm:$0xff]  }
 0x3c6   : > { %8480 = vmatpush1.bf16.msra.mxu0 %v22868_v2  ;;  %v22895_v2 = vld [vmem:[#allocation8 + $0x920] ss:$72 sps:$4 sm:$0xff]  }
 0x3c7   : > { %8523 = vmatpush1.bf16.msra.mxu1 %v22871_v24  ;;  %8481 = vmatprep.subr.bf16.mxu0 %v22876_v55  ;;  %v22900_v24 = vld [vmem:[#allocation8 + $0x894] ss:$72 sps:$4 sm:$0xff]  }
 0x3c8   : > { %8524 = vmatprep.subr.bf16.mxu1 %v22879_v41  ;;  %v22892_v41 = vld [vmem:[#allocation8 + $0x20] ss:$72 sps:$4 sm:$0xff]   ;;  %v22903_v55 = vld [vmem:[#allocation8 + $0x1194] ss:$72 sps:$4 sm:$0xff]  }
 0x3ca   : > { %8482 = vmatpush1.bf16.msra.mxu0 %v22874_v3  ;;  %v22898_v3 = vld [vmem:[#allocation8 + $0x890] ss:$72 sps:$4 sm:$0xff]  }
 0x3cb   : > { %8525 = vmatpush1.bf16.msra.mxu1 %v22877_v42  ;;  %8483 = vmatprep.subr.bf16.mxu0 %v22882_v1  ;;  %v22901_v42 = vld [vmem:[#allocation8 + $0x1190] ss:$72 sps:$4 sm:$0xff]   ;;  %v22906_v1 = vld [vmem:[#allocation8 + $0x804] ss:$72 sps:$4 sm:$0xff]  }
 0x3cc   : > { %8526 = vmatprep.subr.bf16.mxu1 %v22885_v15  ;;  %v22909_v15 = vld [vmem:[#allocation8 + $0x1104] ss:$72 sps:$4 sm:$0xff]  }
 0x3ce   : > { %8484 = vmatpush1.bf16.msra.mxu0 %v22880_v27  ;;  %v22904_v27 = vld [vmem:[#allocation8 + $0x800] ss:$72 sps:$4 sm:$0xff]  }
 0x3cf   : > { %8527 = vmatpush1.bf16.msra.mxu1 %v22883_v47  ;;  %8485 = vmatprep.subr.bf16.mxu0 %v22888_v37  ;;  %v22907_v47 = vld [vmem:[#allocation8 + $0x1100] ss:$72 sps:$4 sm:$0xff]   ;;  %v22912_v37 = vld [vmem:[#allocation8 + $0x774] ss:$72 sps:$4 sm:$0xff]  }
 0x3d0   : > { %8528 = vmatprep.subr.bf16.mxu1 %v22891_v39  ;;  %v22915_v39 = vld [vmem:[#allocation8 + $0x1074] ss:$72 sps:$4 sm:$0xff]  }
 0x3d2   : > { %8486 = vmatpush1.bf16.msra.mxu0 %v22886_v48  ;;  %v22910_v48 = vld [vmem:[#allocation8 + $0x770] ss:$72 sps:$4 sm:$0xff]  }
 0x3d3   : > { %8529 = vmatpush1.bf16.msra.mxu1 %v22889_v38  ;;  %8487 = vmatprep.subr.bf16.mxu0 %v22894_v25  ;;  %v22913_v38 = vld [vmem:[#allocation8 + $0x1070] ss:$72 sps:$4 sm:$0xff]   ;;  %v22918_v25 = vld [vmem:[#allocation8 + $0x6e4] ss:$72 sps:$4 sm:$0xff]  }
 0x3d4   : > { %8530 = vmatprep.subr.bf16.mxu1 %v22897_v8  ;;  %v22921_v8 = vld [vmem:[#allocation8 + $0xfe4] ss:$72 sps:$4 sm:$0xff]  }
 0x3d6   : > { %8488 = vmatpush1.bf16.msra.mxu0 %v22892_v41  ;;  %v22916_v41 = vld [vmem:[#allocation8 + $0x6e0] ss:$72 sps:$4 sm:$0xff]  }
 0x3d7   : > { %8531 = vmatpush1.bf16.msra.mxu1 %v22895_v2  ;;  %8489 = vmatprep.subr.bf16.mxu0 %v22900_v24  ;;  %v22919_v2 = vld [vmem:[#allocation8 + $0xfe0] ss:$72 sps:$4 sm:$0xff]   ;;  %v22924_v24 = vld [vmem:[#allocation8 + $0x654] ss:$72 sps:$4 sm:$0xff]  }
 0x3d8   : > { %8532 = vmatprep.subr.bf16.mxu1 %v22903_v55  ;;  %v22927_v55 = vld [vmem:[#allocation8 + $0xf54] ss:$72 sps:$4 sm:$0xff]  }
 0x3da   : > { %8490 = vmatpush2.bf16.msra.mxu0 %v22898_v3  ;;  %v22922_v3 = vld [vmem:[#allocation8 + $0x650] ss:$72 sps:$4 sm:$0xff]  }
 0x3db   : > { %8533 = vmatpush2.bf16.msra.mxu1 %v22901_v42  ;;  %8491 = vmatprep.subr.bf16.mxu0 %v22906_v1  ;;  %v22925_v42 = vld [vmem:[#allocation8 + $0xf50] ss:$72 sps:$4 sm:$0xff]   ;;  %v22930_v1 = vld [vmem:[#allocation8 + $0x5c4] ss:$72 sps:$4 sm:$0xff]  }
 0x3dc   : > { %8534 = vmatprep.subr.bf16.mxu1 %v22909_v15  ;;  %v22933_v15 = vld [vmem:[#allocation8 + $0xec4] ss:$72 sps:$4 sm:$0xff]  }
 0x3de   : > { %8492 = vmatpush2.bf16.msra.mxu0 %v22904_v27  ;;  %v22928_v27 = vld [vmem:[#allocation8 + $0x5c0] ss:$72 sps:$4 sm:$0xff]  }
 0x3df   : > { %8535 = vmatpush2.bf16.msra.mxu1 %v22907_v47  ;;  %8493 = vmatprep.subr.bf16.mxu0 %v22912_v37  ;;  %v22931_v47 = vld [vmem:[#allocation8 + $0xec0] ss:$72 sps:$4 sm:$0xff]   ;;  %v22936_v37 = vld [vmem:[#allocation8 + $0x534] ss:$72 sps:$4 sm:$0xff]  }
 0x3e0   : > { %8536 = vmatprep.subr.bf16.mxu1 %v22915_v39  ;;  %v22939_v39 = vld [vmem:[#allocation8 + $0xe34] ss:$72 sps:$4 sm:$0xff]  }
 0x3e2   : > { %8494 = vmatpush2.bf16.msra.mxu0 %v22910_v48  ;;  %v22934_v48 = vld [vmem:[#allocation8 + $0x530] ss:$72 sps:$4 sm:$0xff]  }
 0x3e3   : > { %8537 = vmatpush2.bf16.msra.mxu1 %v22913_v38  ;;  %8495 = vmatprep.subr.bf16.mxu0 %v22918_v25  ;;  %v22937_v38 = vld [vmem:[#allocation8 + $0xe30] ss:$72 sps:$4 sm:$0xff]   ;;  %v22942_v25 = vld [vmem:[#allocation8 + $0x4a4] ss:$72 sps:$4 sm:$0xff]  }
 0x3e4   : > { %8538 = vmatprep.subr.bf16.mxu1 %v22921_v8  ;;  %v22945_v8 = vld [vmem:[#allocation8 + $0xda4] ss:$72 sps:$4 sm:$0xff]  }
 0x3e6   : > { %8496 = vmatpush2.bf16.msra.mxu0 %v22916_v41  ;;  %v22940_v41 = vld [vmem:[#allocation8 + $0x4a0] ss:$72 sps:$4 sm:$0xff]  }
 0x3e7   : > { %8539 = vmatpush2.bf16.msra.mxu1 %v22919_v2  ;;  %8497 = vmatprep.subr.bf16.mxu0 %v22924_v24  ;;  %v22943_v2 = vld [vmem:[#allocation8 + $0xda0] ss:$72 sps:$4 sm:$0xff]   ;;  %v22948_v24 = vld [vmem:[#allocation8 + $0x41c] ss:$72 sps:$4 sm:$0xff]  }
 0x3e8   : > { %8540 = vmatprep.subr.bf16.mxu1 %v22927_v55  ;;  %v22951_v55 = vld [vmem:[#allocation8 + $0xd1c] ss:$72 sps:$4 sm:$0xff]  }
 0x3ea   : > { %8498 = vmatpush2.bf16.msra.mxu0 %v22922_v3  ;;  %v22946_v3 = vld [vmem:[#allocation8 + $0x418] ss:$72 sps:$4 sm:$0xff]  }
 0x3eb   : > { %8541 = vmatpush2.bf16.msra.mxu1 %v22925_v42  ;;  %8499 = vmatprep.subr.bf16.mxu0 %v22930_v1  ;;  %v22949_v42 = vld [vmem:[#allocation8 + $0xd18] ss:$72 sps:$4 sm:$0xff]   ;;  %v25737_v1 = vpop.f32.mrf.mxu0 }
 0x3ec   : > { %8542 = vmatprep.subr.bf16.mxu1 %v22933_v15  ;;  %26382 = vst [vmem:[#allocation34_spill] sm:$0xff] %v25737_v1  ;;  %v25739_v15 = vpop.f32.mrf.mxu1  ;;  %v22961_v1 = vld [vmem:[#allocation8 + $0xbf8] ss:$72 sps:$4 sm:$0xff]  }
 0x3ed   : > { %26383 = vst [vmem:[#allocation35_spill] sm:$0xff] %v25739_v15  ;;  %v22958_v15 = vld [vmem:[#allocation8 + $0x2f8] ss:$72 sps:$4 sm:$0xff]  }
 0x3ee   : > { %8500 = vmatpush2.bf16.msra.mxu0 %v22928_v27  ;;  %v22954_v27 = vld [vmem:[#allocation8 + $0x38c] ss:$72 sps:$4 sm:$0xff]  }
 0x3ef   : > { %8543 = vmatpush2.bf16.msra.mxu1 %v22931_v47  ;;  %8501 = vmatprep.subr.bf16.mxu0 %v22936_v37  ;;  %v22957_v47 = vld [vmem:[#allocation8 + $0xc8c] ss:$72 sps:$4 sm:$0xff]   ;;  %v22952_v37 = vld [vmem:[#allocation8 + $0x388] ss:$72 sps:$4 sm:$0xff]  }
 0x3f0   : > { %8544 = vmatprep.subr.bf16.mxu1 %v22939_v39  ;;  %v22955_v39 = vld [vmem:[#allocation8 + $0xc88] ss:$72 sps:$4 sm:$0xff]  }
 0x3f2   : > { %8502 = vmatpush2.bf16.msra.mxu0 %v22934_v48 }
 0x3f3   : > { %8545 = vmatpush2.bf16.msra.mxu1 %v22937_v38  ;;  %8503 = vmatprep.subr.bf16.mxu0 %v22942_v25 }
 0x3f4   : > { %8546 = vmatprep.subr.bf16.mxu1 %v22945_v8 }
 0x3f6   : > { %8504 = vmatpush2.bf16.msra.mxu0 %v22940_v41 }
 0x3f7   : > { %8547 = vmatpush2.bf16.msra.mxu1 %v22943_v2  ;;  %8559 = vmatprep.subr.bf16.mxu0 %v22948_v24  ;;  %v22960_v2 = vld [vmem:[#allocation8 + $0x2fc] ss:$72 sps:$4 sm:$0xff]  }
 0x3f8   : > { %8602 = vmatprep.subr.bf16.mxu1 %v22951_v55  ;;  %v22963_v24 = vld [vmem:[#allocation8 + $0xbfc] ss:$72 sps:$4 sm:$0xff]  }
 0x3f9   : > { %v8249_v48 = vpop.f32.mrf.mxu0  ;;  %8506 = vmatmul.mubr.bf16.vlgmr.msra.gmra.mxu0 %v25534_v13 }
 0x3fa   : > { %v8292_v38 = vpop.f32.mrf.mxu1  ;;  %8549 = vmatmul.mubr.bf16.vlgmr.msra.gmra.mxu1 %v25541_v17  ;;  %v8250_v25 = vadd.f32 %v8249_v48, %v25611_v46  ;;  %8560 = vmatpush1.bf16.msra.mxu0 %v22946_v3  ;;  %v22964_v48 = vld [vmem:[#allocation8 + $0x268] ss:$72 sps:$4 sm:$0xff]  }
 0x3fb   : > { %8603 = vmatpush1.bf16.msra.mxu1 %v22949_v42  ;;  %v25744_v8 = vpop.f32.mrf.mxu0  ;;  %8561 = vmatprep.subr.bf16.mxu0 %v22954_v27  ;;  %v22966_v42 = vld [vmem:[#allocation8 + $0x26c] ss:$72 sps:$4 sm:$0xff]  }
 0x3fc   : > { %v25746_v41 = vpop.f32.mrf.mxu1  ;;  %8604 = vmatprep.subr.bf16.mxu1 %v22957_v47  ;;  %v25748_v55 = vadd.f32 %v8292_v38, %v8250_v25  ;;  %8591 = vmatprep.mubr.bf16.mxu0 %v25509_v53  ;;  %v22969_v27 = vld [vmem:[#allocation8 + $0xb6c] ss:$72 sps:$4 sm:$0xff]   ;;  %v22967_v38 = vld [vmem:[#allocation8 + $0xb68] ss:$72 sps:$4 sm:$0xff]   ;;  %v22972_v25 = vld [vmem:[#allocation8 + $0x1dc] ss:$72 sps:$4 sm:$0xff]  }
 0x3fd   : > { %8634 = vmatprep.mubr.bf16.mxu1 %v25515_v58  ;;  %v8253_v60 = vpop.f32.mrf.mxu0 }
 0x3fe   : > { %v8254_v46 = vadd.f32 %v8253_v60, %v25617_v4  ;;  %8562 = vmatpush1.bf16.msra.mxu0 %v22952_v37  ;;  %v8296_v3 = vpop.f32.mrf.mxu1  ;;  %v22970_v4 = vld [vmem:[#allocation8 + $0x1d8] ss:$72 sps:$4 sm:$0xff]   ;;  %v22978_v37 = vld [vmem:[#allocation8 + $0x14c] ss:$72 sps:$4 sm:$0xff]  }
 0x3ff   : > { %8605 = vmatpush1.bf16.msra.mxu1 %v22955_v39  ;;  %8563 = vmatprep.subr.bf16.mxu0 %v22960_v2  ;;  %v22973_v60 = vld [vmem:[#allocation8 + $0xad8] ss:$72 sps:$4 sm:$0xff]   ;;  %v22981_v39 = vld [vmem:[#allocation8 + $0xa4c] ss:$72 sps:$4 sm:$0xff]   ;;  %v22976_v2 = vld [vmem:[#allocation8 + $0x148] ss:$72 sps:$4 sm:$0xff]  }
 0x400   : > { %8606 = vmatprep.subr.bf16.mxu1 %v22963_v24  ;;  %v25753_v47 = vadd.f32 %v8296_v3, %v8254_v46  ;;  %v22979_v24 = vld [vmem:[#allocation8 + $0xa48] ss:$72 sps:$4 sm:$0xff]   ;;  %v22982_v46 = vld [vmem:[#allocation8 + $0xb8] ss:$72 sps:$4 sm:$0xff]  }
 0x401   : > { %v22985_v3 = vld [vmem:[#allocation8 + $0x9b8] ss:$72 sps:$4 sm:$0xff]  }
 0x402   : > { %26384 = vst [vmem:[#allocation36_spill] sm:$0xff] %v25753_v47  ;;  %8564 = vmatpush1.bf16.msra.mxu0 %v22958_v15  ;;  %v22987_v15 = vld [vmem:[#allocation8 + $0x9bc] ss:$72 sps:$4 sm:$0xff]  }
 0x403   : > { %8607 = vmatpush1.bf16.msra.mxu1 %v22961_v1  ;;  %8565 = vmatprep.subr.bf16.mxu0 %v22966_v42  ;;  %v22984_v1 = vld [vmem:[#allocation8 + $0xbc] ss:$72 sps:$4 sm:$0xff]   ;;  %v22990_v42 = vld [vmem:[#allocation8 + $0x2c] ss:$72 sps:$4 sm:$0xff]  }
 0x404   : > { %8608 = vmatprep.subr.bf16.mxu1 %v22969_v27  ;;  %v22993_v27 = vld [vmem:[#allocation8 + $0x92c] ss:$72 sps:$4 sm:$0xff]  }
 0x406   : > { %8566 = vmatpush1.bf16.msra.mxu0 %v22964_v48  ;;  %v22991_v48 = vld [vmem:[#allocation8 + $0x928] ss:$72 sps:$4 sm:$0xff]  }
 0x407   : > { %8609 = vmatpush1.bf16.msra.mxu1 %v22967_v38  ;;  %8567 = vmatprep.subr.bf16.mxu0 %v22972_v25  ;;  %v22996_v38 = vld [vmem:[#allocation8 + $0x89c] ss:$72 sps:$4 sm:$0xff]  }
 0x408   : > { %8610 = vmatprep.subr.bf16.mxu1 %v22975_v14  ;;  %v22988_v14 = vld [vmem:[#allocation8 + $0x28] ss:$72 sps:$4 sm:$0xff]   ;;  %v22999_v25 = vld [vmem:[#allocation8 + $0x119c] ss:$72 sps:$4 sm:$0xff]  }
 0x40a   : > { %8568 = vmatpush1.bf16.msra.mxu0 %v22970_v4  ;;  %v22994_v4 = vld [vmem:[#allocation8 + $0x898] ss:$72 sps:$4 sm:$0xff]  }
 0x40b   : > { %8611 = vmatpush1.bf16.msra.mxu1 %v22973_v60  ;;  %8569 = vmatprep.subr.bf16.mxu0 %v22978_v37  ;;  %v22997_v60 = vld [vmem:[#allocation8 + $0x1198] ss:$72 sps:$4 sm:$0xff]   ;;  %v23002_v37 = vld [vmem:[#allocation8 + $0x80c] ss:$72 sps:$4 sm:$0xff]  }
 0x40c   : > { %8612 = vmatprep.subr.bf16.mxu1 %v22981_v39  ;;  %v23005_v39 = vld [vmem:[#allocation8 + $0x110c] ss:$72 sps:$4 sm:$0xff]  }
 0x40e   : > { %8570 = vmatpush1.bf16.msra.mxu0 %v22976_v2  ;;  %v23000_v2 = vld [vmem:[#allocation8 + $0x808] ss:$72 sps:$4 sm:$0xff]  }
 0x40f   : > { %8613 = vmatpush1.bf16.msra.mxu1 %v22979_v24  ;;  %8571 = vmatprep.subr.bf16.mxu0 %v22984_v1  ;;  %v23003_v24 = vld [vmem:[#allocation8 + $0x1108] ss:$72 sps:$4 sm:$0xff]   ;;  %v23008_v1 = vld [vmem:[#allocation8 + $0x77c] ss:$72 sps:$4 sm:$0xff]  }
 0x410   : > { %8614 = vmatprep.subr.bf16.mxu1 %v22987_v15  ;;  %v23011_v15 = vld [vmem:[#allocation8 + $0x107c] ss:$72 sps:$4 sm:$0xff]  }
 0x412   : > { %8572 = vmatpush1.bf16.msra.mxu0 %v22982_v46  ;;  %v23006_v46 = vld [vmem:[#allocation8 + $0x778] ss:$72 sps:$4 sm:$0xff]  }
 0x413   : > { %8615 = vmatpush1.bf16.msra.mxu1 %v22985_v3  ;;  %8573 = vmatprep.subr.bf16.mxu0 %v22990_v42  ;;  %v23009_v3 = vld [vmem:[#allocation8 + $0x1078] ss:$72 sps:$4 sm:$0xff]   ;;  %v23014_v42 = vld [vmem:[#allocation8 + $0x6ec] ss:$72 sps:$4 sm:$0xff]  }
 0x414   : > { %8616 = vmatprep.subr.bf16.mxu1 %v22993_v27  ;;  %v23017_v27 = vld [vmem:[#allocation8 + $0xfec] ss:$72 sps:$4 sm:$0xff]  }
 0x416   : > { %8574 = vmatpush1.bf16.msra.mxu0 %v22988_v14  ;;  %v23012_v14 = vld [vmem:[#allocation8 + $0x6e8] ss:$72 sps:$4 sm:$0xff]  }
 0x417   : > { %8617 = vmatpush1.bf16.msra.mxu1 %v22991_v48  ;;  %8575 = vmatprep.subr.bf16.mxu0 %v22996_v38  ;;  %v23015_v48 = vld [vmem:[#allocation8 + $0xfe8] ss:$72 sps:$4 sm:$0xff]   ;;  %v23020_v38 = vld [vmem:[#allocation8 + $0x65c] ss:$72 sps:$4 sm:$0xff]  }
 0x418   : > { %8618 = vmatprep.subr.bf16.mxu1 %v22999_v25  ;;  %v23023_v25 = vld [vmem:[#allocation8 + $0xf5c] ss:$72 sps:$4 sm:$0xff]  }
 0x41a   : > { %8576 = vmatpush2.bf16.msra.mxu0 %v22994_v4  ;;  %v23018_v4 = vld [vmem:[#allocation8 + $0x658] ss:$72 sps:$4 sm:$0xff]  }
 0x41b   : > { %8619 = vmatpush2.bf16.msra.mxu1 %v22997_v60  ;;  %8577 = vmatprep.subr.bf16.mxu0 %v23002_v37  ;;  %v23021_v60 = vld [vmem:[#allocation8 + $0xf58] ss:$72 sps:$4 sm:$0xff]   ;;  %v23026_v37 = vld [vmem:[#allocation8 + $0x5cc] ss:$72 sps:$4 sm:$0xff]  }
 0x41c   : > { %8620 = vmatprep.subr.bf16.mxu1 %v23005_v39  ;;  %v23029_v39 = vld [vmem:[#allocation8 + $0xecc] ss:$72 sps:$4 sm:$0xff]  }
 0x41e   : > { %8578 = vmatpush2.bf16.msra.mxu0 %v23000_v2  ;;  %v23024_v2 = vld [vmem:[#allocation8 + $0x5c8] ss:$72 sps:$4 sm:$0xff]  }
 0x41f   : > { %8621 = vmatpush2.bf16.msra.mxu1 %v23003_v24  ;;  %8579 = vmatprep.subr.bf16.mxu0 %v23008_v1  ;;  %v23027_v24 = vld [vmem:[#allocation8 + $0xec8] ss:$72 sps:$4 sm:$0xff]   ;;  %v23032_v1 = vld [vmem:[#allocation8 + $0x53c] ss:$72 sps:$4 sm:$0xff]  }
 0x420   : > { %8622 = vmatprep.subr.bf16.mxu1 %v23011_v15  ;;  %v23035_v15 = vld [vmem:[#allocation8 + $0xe3c] ss:$72 sps:$4 sm:$0xff]  }
 0x422   : > { %8580 = vmatpush2.bf16.msra.mxu0 %v23006_v46  ;;  %v23030_v46 = vld [vmem:[#allocation8 + $0x538] ss:$72 sps:$4 sm:$0xff]  }
 0x423   : > { %8623 = vmatpush2.bf16.msra.mxu1 %v23009_v3  ;;  %8581 = vmatprep.subr.bf16.mxu0 %v23014_v42  ;;  %v23033_v3 = vld [vmem:[#allocation8 + $0xe38] ss:$72 sps:$4 sm:$0xff]   ;;  %v23038_v42 = vld [vmem:[#allocation8 + $0x4ac] ss:$72 sps:$4 sm:$0xff]  }
 0x424   : > { %8624 = vmatprep.subr.bf16.mxu1 %v23017_v27  ;;  %v23041_v27 = vld [vmem:[#allocation8 + $0xdac] ss:$72 sps:$4 sm:$0xff]  }
 0x426   : > { %8582 = vmatpush2.bf16.msra.mxu0 %v23012_v14  ;;  %v23036_v14 = vld [vmem:[#allocation8 + $0x4a8] ss:$72 sps:$4 sm:$0xff]  }
 0x427   : > { %8625 = vmatpush2.bf16.msra.mxu1 %v23015_v48  ;;  %8583 = vmatprep.subr.bf16.mxu0 %v23020_v38  ;;  %v23039_v48 = vld [vmem:[#allocation8 + $0xda8] ss:$72 sps:$4 sm:$0xff]   ;;  %v23044_v38 = vld [vmem:[#allocation8 + $0x424] ss:$72 sps:$4 sm:$0xff]  }
 0x428   : > { %8626 = vmatprep.subr.bf16.mxu1 %v23023_v25  ;;  %v23047_v25 = vld [vmem:[#allocation8 + $0xd24] ss:$72 sps:$4 sm:$0xff]  }
 0x42a   : > { %8584 = vmatpush2.bf16.msra.mxu0 %v23018_v4  ;;  %v23042_v4 = vld [vmem:[#allocation8 + $0x420] ss:$72 sps:$4 sm:$0xff]  }
 0x42b   : > { %8627 = vmatpush2.bf16.msra.mxu1 %v23021_v60  ;;  %8585 = vmatprep.subr.bf16.mxu0 %v23026_v37  ;;  %v23045_v60 = vld [vmem:[#allocation8 + $0xd20] ss:$72 sps:$4 sm:$0xff]   ;;  %v25755_v37 = vpop.f32.mrf.mxu0 }
 0x42c   : > { %8628 = vmatprep.subr.bf16.mxu1 %v23029_v39  ;;  %26385 = vst [vmem:[#allocation37_spill] sm:$0xff] %v25755_v37  ;;  %v25757_v39 = vpop.f32.mrf.mxu1  ;;  %v23057_v37 = vld [vmem:[#allocation8 + $0xc00] ss:$72 sps:$4 sm:$0xff]  }
 0x42d   : > { %26386 = vst [vmem:[#allocation38_spill] sm:$0xff] %v25757_v39  ;;  %v23054_v39 = vld [vmem:[#allocation8 + $0x300] ss:$72 sps:$4 sm:$0xff]  }
 0x42e   : > { %8586 = vmatpush2.bf16.msra.mxu0 %v23024_v2  ;;  %v23050_v2 = vld [vmem:[#allocation8 + $0x394] ss:$72 sps:$4 sm:$0xff]  }
 0x42f   : > { %8629 = vmatpush2.bf16.msra.mxu1 %v23027_v24  ;;  %8587 = vmatprep.subr.bf16.mxu0 %v23032_v1  ;;  %v23053_v24 = vld [vmem:[#allocation8 + $0xc94] ss:$72 sps:$4 sm:$0xff]   ;;  %v23048_v1 = vld [vmem:[#allocation8 + $0x390] ss:$72 sps:$4 sm:$0xff]  }
 0x430   : > { %8630 = vmatprep.subr.bf16.mxu1 %v23035_v15  ;;  %v23051_v15 = vld [vmem:[#allocation8 + $0xc90] ss:$72 sps:$4 sm:$0xff]  }
 0x432   : > { %8588 = vmatpush2.bf16.msra.mxu0 %v23030_v46 }
 0x433   : > { %8631 = vmatpush2.bf16.msra.mxu1 %v23033_v3  ;;  %8589 = vmatprep.subr.bf16.mxu0 %v23038_v42 }
 0x434   : > { %8632 = vmatprep.subr.bf16.mxu1 %v23041_v27 }
 0x436   : > { %8590 = vmatpush2.bf16.msra.mxu0 %v23036_v14 }
 0x437   : > { %8633 = vmatpush2.bf16.msra.mxu1 %v23039_v48  ;;  %8645 = vmatprep.subr.bf16.mxu0 %v23044_v38  ;;  %v23056_v48 = vld [vmem:[#allocation8 + $0x304] ss:$72 sps:$4 sm:$0xff]  }
 0x438   : > { %8688 = vmatprep.subr.bf16.mxu1 %v23047_v25  ;;  %v23059_v38 = vld [vmem:[#allocation8 + $0xc04] ss:$72 sps:$4 sm:$0xff]  }
 0x439   : > { %v8335_v46 = vpop.f32.mrf.mxu0  ;;  %8592 = vmatmul.mubr.bf16.vlgmr.msra.gmra.mxu0 %v25534_v13 }
 0x43a   : > { %v8378_v3 = vpop.f32.mrf.mxu1  ;;  %8635 = vmatmul.mubr.bf16.vlgmr.msra.gmra.mxu1 %v25541_v17  ;;  %v8336_v42 = vadd.f32 %v8335_v46, %v25625_v5  ;;  %8646 = vmatpush1.bf16.msra.mxu0 %v23042_v4  ;;  %v23060_v46 = vld [vmem:[#allocation8 + $0x270] ss:$72 sps:$4 sm:$0xff]  }
 0x43b   : > { %8689 = vmatpush1.bf16.msra.mxu1 %v23045_v60  ;;  %v25762_v27 = vpop.f32.mrf.mxu0  ;;  %8647 = vmatprep.subr.bf16.mxu0 %v23050_v2  ;;  %v23062_v60 = vld [vmem:[#allocation8 + $0x274] ss:$72 sps:$4 sm:$0xff]  }
 0x43c   : > { %v25764_v14 = vpop.f32.mrf.mxu1  ;;  %8690 = vmatprep.subr.bf16.mxu1 %v23053_v24  ;;  %v25766_v25 = vadd.f32 %v8378_v3, %v8336_v42  ;;  %8677 = vmatprep.mubr.bf16.mxu0 %v25509_v53  ;;  %v23065_v2 = vld [vmem:[#allocation8 + $0xb74] ss:$72 sps:$4 sm:$0xff]   ;;  %v23063_v3 = vld [vmem:[#allocation8 + $0xb70] ss:$72 sps:$4 sm:$0xff]   ;;  %v23068_v42 = vld [vmem:[#allocation8 + $0x1e4] ss:$72 sps:$4 sm:$0xff]  }
 0x43d   : > { %8720 = vmatprep.mubr.bf16.mxu1 %v25515_v58  ;;  %v8339_v47 = vpop.f32.mrf.mxu0 }
 0x43e   : > { %26387 = vst [vmem:[#allocation39_spill] sm:$0xff] %v25766_v25  ;;  %v8340_v5 = vadd.f32 %v8339_v47, %v25631_v20  ;;  %8648 = vmatpush1.bf16.msra.mxu0 %v23048_v1  ;;  %v8382_v4 = vpop.f32.mrf.mxu1  ;;  %v23071_v25 = vld [vmem:[#allocation8 + $0xae4] ss:$72 sps:$4 sm:$0xff]   ;;  %v23066_v20 = vld [vmem:[#allocation8 + $0x1e0] ss:$72 sps:$4 sm:$0xff]  }
 0x43f   : > { %8691 = vmatpush1.bf16.msra.mxu1 %v23051_v15  ;;  %8649 = vmatprep.subr.bf16.mxu0 %v23056_v48  ;;  %v23069_v47 = vld [vmem:[#allocation8 + $0xae0] ss:$72 sps:$4 sm:$0xff]   ;;  %v23074_v1 = vld [vmem:[#allocation8 + $0x154] ss:$72 sps:$4 sm:$0xff]   ;;  %v23072_v48 = vld [vmem:[#allocation8 + $0x150] ss:$72 sps:$4 sm:$0xff]  }
 0x440   : > { %8692 = vmatprep.subr.bf16.mxu1 %v23059_v38  ;;  %v25771_v24 = vadd.f32 %v8382_v4, %v8340_v5  ;;  %v23077_v15 = vld [vmem:[#allocation8 + $0xa54] ss:$72 sps:$4 sm:$0xff]   ;;  %v23075_v38 = vld [vmem:[#allocation8 + $0xa50] ss:$72 sps:$4 sm:$0xff]   ;;  %v23078_v5 = vld [vmem:[#allocation8 + $0xc0] ss:$72 sps:$4 sm:$0xff]  }
 0x441   : > { %v23081_v4 = vld [vmem:[#allocation8 + $0x9c0] ss:$72 sps:$4 sm:$0xff]  }
 0x442   : > { %26388 = vst [vmem:[#allocation40_spill] sm:$0xff] %v25771_v24  ;;  %8650 = vmatpush1.bf16.msra.mxu0 %v23054_v39  ;;  %v23083_v39 = vld [vmem:[#allocation8 + $0x9c4] ss:$72 sps:$4 sm:$0xff]  }
 0x443   : > { %8693 = vmatpush1.bf16.msra.mxu1 %v23057_v37  ;;  %8651 = vmatprep.subr.bf16.mxu0 %v23062_v60  ;;  %v23080_v37 = vld [vmem:[#allocation8 + $0xc4] ss:$72 sps:$4 sm:$0xff]   ;;  %v23086_v60 = vld [vmem:[#allocation8 + $0x34] ss:$72 sps:$4 sm:$0xff]  }
 0x444   : > { %8694 = vmatprep.subr.bf16.mxu1 %v23065_v2  ;;  %v23089_v2 = vld [vmem:[#allocation8 + $0x934] ss:$72 sps:$4 sm:$0xff]  }
 0x446   : > { %8652 = vmatpush1.bf16.msra.mxu0 %v23060_v46  ;;  %v23087_v46 = vld [vmem:[#allocation8 + $0x930] ss:$72 sps:$4 sm:$0xff]  }
 0x447   : > { %8695 = vmatpush1.bf16.msra.mxu1 %v23063_v3  ;;  %8653 = vmatprep.subr.bf16.mxu0 %v23068_v42  ;;  %v23092_v3 = vld [vmem:[#allocation8 + $0x8a4] ss:$72 sps:$4 sm:$0xff]  }
 0x448   : > { %8696 = vmatprep.subr.bf16.mxu1 %v23071_v25  ;;  %v23084_v25 = vld [vmem:[#allocation8 + $0x30] ss:$72 sps:$4 sm:$0xff]   ;;  %v23095_v42 = vld [vmem:[#allocation8 + $0x11a4] ss:$72 sps:$4 sm:$0xff]  }
 0x44a   : > { %8654 = vmatpush1.bf16.msra.mxu0 %v23066_v20  ;;  %v23090_v20 = vld [vmem:[#allocation8 + $0x8a0] ss:$72 sps:$4 sm:$0xff]  }
 0x44b   : > { %8697 = vmatpush1.bf16.msra.mxu1 %v23069_v47  ;;  %8655 = vmatprep.subr.bf16.mxu0 %v23074_v1  ;;  %v23093_v47 = vld [vmem:[#allocation8 + $0x11a0] ss:$72 sps:$4 sm:$0xff]   ;;  %v23098_v1 = vld [vmem:[#allocation8 + $0x814] ss:$72 sps:$4 sm:$0xff]  }
 0x44c   : > { %8698 = vmatprep.subr.bf16.mxu1 %v23077_v15  ;;  %v23101_v15 = vld [vmem:[#allocation8 + $0x1114] ss:$72 sps:$4 sm:$0xff]  }
 0x44e   : > { %8656 = vmatpush1.bf16.msra.mxu0 %v23072_v48  ;;  %v23096_v48 = vld [vmem:[#allocation8 + $0x810] ss:$72 sps:$4 sm:$0xff]  }
 0x44f   : > { %8699 = vmatpush1.bf16.msra.mxu1 %v23075_v38  ;;  %8657 = vmatprep.subr.bf16.mxu0 %v23080_v37  ;;  %v23099_v38 = vld [vmem:[#allocation8 + $0x1110] ss:$72 sps:$4 sm:$0xff]   ;;  %v23104_v37 = vld [vmem:[#allocation8 + $0x784] ss:$72 sps:$4 sm:$0xff]  }
 0x450   : > { %8700 = vmatprep.subr.bf16.mxu1 %v23083_v39  ;;  %v23107_v39 = vld [vmem:[#allocation8 + $0x1084] ss:$72 sps:$4 sm:$0xff]  }
 0x452   : > { %8658 = vmatpush1.bf16.msra.mxu0 %v23078_v5  ;;  %v23102_v5 = vld [vmem:[#allocation8 + $0x780] ss:$72 sps:$4 sm:$0xff]  }
 0x453   : > { %8701 = vmatpush1.bf16.msra.mxu1 %v23081_v4  ;;  %8659 = vmatprep.subr.bf16.mxu0 %v23086_v60  ;;  %v23105_v4 = vld [vmem:[#allocation8 + $0x1080] ss:$72 sps:$4 sm:$0xff]   ;;  %v23110_v60 = vld [vmem:[#allocation8 + $0x6f4] ss:$72 sps:$4 sm:$0xff]  }
 0x454   : > { %8702 = vmatprep.subr.bf16.mxu1 %v23089_v2  ;;  %v23113_v2 = vld [vmem:[#allocation8 + $0xff4] ss:$72 sps:$4 sm:$0xff]  }
 0x456   : > { %8660 = vmatpush1.bf16.msra.mxu0 %v23084_v25  ;;  %v23108_v25 = vld [vmem:[#allocation8 + $0x6f0] ss:$72 sps:$4 sm:$0xff]  }
 0x457   : > { %8703 = vmatpush1.bf16.msra.mxu1 %v23087_v46  ;;  %8661 = vmatprep.subr.bf16.mxu0 %v23092_v3  ;;  %v23111_v46 = vld [vmem:[#allocation8 + $0xff0] ss:$72 sps:$4 sm:$0xff]   ;;  %v23116_v3 = vld [vmem:[#allocation8 + $0x664] ss:$72 sps:$4 sm:$0xff]  }
 0x458   : > { %8704 = vmatprep.subr.bf16.mxu1 %v23095_v42  ;;  %v23119_v42 = vld [vmem:[#allocation8 + $0xf64] ss:$72 sps:$4 sm:$0xff]  }
 0x45a   : > { %8662 = vmatpush2.bf16.msra.mxu0 %v23090_v20  ;;  %v23114_v20 = vld [vmem:[#allocation8 + $0x660] ss:$72 sps:$4 sm:$0xff]  }
 0x45b   : > { %8705 = vmatpush2.bf16.msra.mxu1 %v23093_v47  ;;  %8663 = vmatprep.subr.bf16.mxu0 %v23098_v1  ;;  %v23117_v47 = vld [vmem:[#allocation8 + $0xf60] ss:$72 sps:$4 sm:$0xff]   ;;  %v23122_v1 = vld [vmem:[#allocation8 + $0x5d4] ss:$72 sps:$4 sm:$0xff]  }
 0x45c   : > { %8706 = vmatprep.subr.bf16.mxu1 %v23101_v15  ;;  %v23125_v15 = vld [vmem:[#allocation8 + $0xed4] ss:$72 sps:$4 sm:$0xff]  }
 0x45e   : > { %8664 = vmatpush2.bf16.msra.mxu0 %v23096_v48  ;;  %v23120_v48 = vld [vmem:[#allocation8 + $0x5d0] ss:$72 sps:$4 sm:$0xff]  }
 0x45f   : > { %8707 = vmatpush2.bf16.msra.mxu1 %v23099_v38  ;;  %8665 = vmatprep.subr.bf16.mxu0 %v23104_v37  ;;  %v23123_v38 = vld [vmem:[#allocation8 + $0xed0] ss:$72 sps:$4 sm:$0xff]   ;;  %v23128_v37 = vld [vmem:[#allocation8 + $0x544] ss:$72 sps:$4 sm:$0xff]  }
 0x460   : > { %8708 = vmatprep.subr.bf16.mxu1 %v23107_v39  ;;  %v23131_v39 = vld [vmem:[#allocation8 + $0xe44] ss:$72 sps:$4 sm:$0xff]  }
 0x462   : > { %8666 = vmatpush2.bf16.msra.mxu0 %v23102_v5  ;;  %v23126_v5 = vld [vmem:[#allocation8 + $0x540] ss:$72 sps:$4 sm:$0xff]  }
 0x463   : > { %8709 = vmatpush2.bf16.msra.mxu1 %v23105_v4  ;;  %8667 = vmatprep.subr.bf16.mxu0 %v23110_v60  ;;  %v23129_v4 = vld [vmem:[#allocation8 + $0xe40] ss:$72 sps:$4 sm:$0xff]   ;;  %v23134_v60 = vld [vmem:[#allocation8 + $0x4b4] ss:$72 sps:$4 sm:$0xff]  }
 0x464   : > { %8710 = vmatprep.subr.bf16.mxu1 %v23113_v2  ;;  %v23137_v2 = vld [vmem:[#allocation8 + $0xdb4] ss:$72 sps:$4 sm:$0xff]  }
 0x466   : > { %8668 = vmatpush2.bf16.msra.mxu0 %v23108_v25  ;;  %v23132_v25 = vld [vmem:[#allocation8 + $0x4b0] ss:$72 sps:$4 sm:$0xff]  }
 0x467   : > { %8711 = vmatpush2.bf16.msra.mxu1 %v23111_v46  ;;  %8669 = vmatprep.subr.bf16.mxu0 %v23116_v3  ;;  %v23135_v46 = vld [vmem:[#allocation8 + $0xdb0] ss:$72 sps:$4 sm:$0xff]   ;;  %v23140_v3 = vld [vmem:[#allocation8 + $0x42c] ss:$72 sps:$4 sm:$0xff]  }
 0x468   : > { %8712 = vmatprep.subr.bf16.mxu1 %v23119_v42  ;;  %v23143_v42 = vld [vmem:[#allocation8 + $0xd2c] ss:$72 sps:$4 sm:$0xff]  }
 0x46a   : > { %8670 = vmatpush2.bf16.msra.mxu0 %v23114_v20  ;;  %v23138_v20 = vld [vmem:[#allocation8 + $0x428] ss:$72 sps:$4 sm:$0xff]  }
 0x46b   : > { %8713 = vmatpush2.bf16.msra.mxu1 %v23117_v47  ;;  %8671 = vmatprep.subr.bf16.mxu0 %v23122_v1  ;;  %v23141_v47 = vld [vmem:[#allocation8 + $0xd28] ss:$72 sps:$4 sm:$0xff]   ;;  %v25773_v1 = vpop.f32.mrf.mxu0 }
 0x46c   : > { %8714 = vmatprep.subr.bf16.mxu1 %v23125_v15  ;;  %26389 = vst [vmem:[#allocation41_spill] sm:$0xff] %v25773_v1  ;;  %v25775_v15 = vpop.f32.mrf.mxu1  ;;  %v23153_v1 = vld [vmem:[#allocation8 + $0xc08] ss:$72 sps:$4 sm:$0xff]  }
 0x46d   : > { %26390 = vst [vmem:[#allocation42_spill] sm:$0xff] %v25775_v15  ;;  %v23150_v15 = vld [vmem:[#allocation8 + $0x308] ss:$72 sps:$4 sm:$0xff]  }
 0x46e   : > { %8672 = vmatpush2.bf16.msra.mxu0 %v23120_v48  ;;  %v23146_v48 = vld [vmem:[#allocation8 + $0x39c] ss:$72 sps:$4 sm:$0xff]  }
 0x46f   : > { %8715 = vmatpush2.bf16.msra.mxu1 %v23123_v38  ;;  %8673 = vmatprep.subr.bf16.mxu0 %v23128_v37  ;;  %v23149_v38 = vld [vmem:[#allocation8 + $0xc9c] ss:$72 sps:$4 sm:$0xff]   ;;  %v23144_v37 = vld [vmem:[#allocation8 + $0x398] ss:$72 sps:$4 sm:$0xff]  }
 0x470   : > { %8716 = vmatprep.subr.bf16.mxu1 %v23131_v39  ;;  %v23147_v39 = vld [vmem:[#allocation8 + $0xc98] ss:$72 sps:$4 sm:$0xff]  }
 0x472   : > { %8674 = vmatpush2.bf16.msra.mxu0 %v23126_v5 }
 0x473   : > { %8717 = vmatpush2.bf16.msra.mxu1 %v23129_v4  ;;  %8675 = vmatprep.subr.bf16.mxu0 %v23134_v60 }
 0x474   : > { %8718 = vmatprep.subr.bf16.mxu1 %v23137_v2 }
 0x476   : > { %8676 = vmatpush2.bf16.msra.mxu0 %v23132_v25 }
 0x477   : > { %8719 = vmatpush2.bf16.msra.mxu1 %v23135_v46  ;;  %8731 = vmatprep.subr.bf16.mxu0 %v23140_v3  ;;  %v23152_v46 = vld [vmem:[#allocation8 + $0x30c] ss:$72 sps:$4 sm:$0xff]  }
 0x478   : > { %8774 = vmatprep.subr.bf16.mxu1 %v23143_v42  ;;  %v23155_v3 = vld [vmem:[#allocation8 + $0xc0c] ss:$72 sps:$4 sm:$0xff]  }
 0x479   : > { %v8421_v5 = vpop.f32.mrf.mxu0  ;;  %8678 = vmatmul.mubr.bf16.vlgmr.msra.gmra.mxu0 %v25534_v13 }
 0x47a   : > { %v8464_v4 = vpop.f32.mrf.mxu1  ;;  %8721 = vmatmul.mubr.bf16.vlgmr.msra.gmra.mxu1 %v25541_v17  ;;  %v8422_v60 = vadd.f32 %v8421_v5, %v25639_v43  ;;  %8732 = vmatpush1.bf16.msra.mxu0 %v23138_v20  ;;  %v23156_v5 = vld [vmem:[#allocation8 + $0x278] ss:$72 sps:$4 sm:$0xff]  }
 0x47b   : > { %8775 = vmatpush1.bf16.msra.mxu1 %v23141_v47  ;;  %v25780_v2 = vpop.f32.mrf.mxu0  ;;  %8733 = vmatprep.subr.bf16.mxu0 %v23146_v48  ;;  %v23158_v47 = vld [vmem:[#allocation8 + $0x27c] ss:$72 sps:$4 sm:$0xff]  }
 0x47c   : > { %v25782_v25 = vpop.f32.mrf.mxu1  ;;  %8776 = vmatprep.subr.bf16.mxu1 %v23149_v38  ;;  %v25784_v42 = vadd.f32 %v8464_v4, %v8422_v60  ;;  %8763 = vmatprep.mubr.bf16.mxu0 %v25509_v53  ;;  %v23161_v48 = vld [vmem:[#allocation8 + $0xb7c] ss:$72 sps:$4 sm:$0xff]   ;;  %v23159_v4 = vld [vmem:[#allocation8 + $0xb78] ss:$72 sps:$4 sm:$0xff]   ;;  %v23164_v60 = vld [vmem:[#allocation8 + $0x1ec] ss:$72 sps:$4 sm:$0xff]  }
 0x47d   : > { %26391 = vst [vmem:[#allocation43_spill] sm:$0xff] %v25782_v25  ;;  %8806 = vmatprep.mubr.bf16.mxu1 %v25515_v58  ;;  %v8425_v24 = vpop.f32.mrf.mxu0 }
 0x47e   : > { %26392 = vst [vmem:[#allocation44_spill] sm:$0xff] %v25784_v42  ;;  %v8426_v43 = vadd.f32 %v8425_v24, %v25645_v10  ;;  %8734 = vmatpush1.bf16.msra.mxu0 %v23144_v37  ;;  %v8468_v20 = vpop.f32.mrf.mxu1  ;;  %v23167_v42 = vld [vmem:[#allocation8 + $0xaec] ss:$72 sps:$4 sm:$0xff]   ;;  %v23162_v10 = vld [vmem:[#allocation8 + $0x1e8] ss:$72 sps:$4 sm:$0xff]  }
 0x47f   : > { %8777 = vmatpush1.bf16.msra.mxu1 %v23147_v39  ;;  %8735 = vmatprep.subr.bf16.mxu0 %v23152_v46  ;;  %v23165_v24 = vld [vmem:[#allocation8 + $0xae8] ss:$72 sps:$4 sm:$0xff]   ;;  %v23170_v37 = vld [vmem:[#allocation8 + $0x15c] ss:$72 sps:$4 sm:$0xff]   ;;  %v23168_v46 = vld [vmem:[#allocation8 + $0x158] ss:$72 sps:$4 sm:$0xff]  }
 0x480   : > { %8778 = vmatprep.subr.bf16.mxu1 %v23155_v3  ;;  %v25789_v38 = vadd.f32 %v8468_v20, %v8426_v43  ;;  %v23173_v39 = vld [vmem:[#allocation8 + $0xa5c] ss:$72 sps:$4 sm:$0xff]   ;;  %v23171_v3 = vld [vmem:[#allocation8 + $0xa58] ss:$72 sps:$4 sm:$0xff]   ;;  %v23174_v43 = vld [vmem:[#allocation8 + $0xc8] ss:$72 sps:$4 sm:$0xff]  }
 0x481   : > { %v23177_v20 = vld [vmem:[#allocation8 + $0x9c8] ss:$72 sps:$4 sm:$0xff]  }
 0x482   : > { %26393 = vst [vmem:[#allocation45_spill] sm:$0xff] %v25789_v38  ;;  %8736 = vmatpush1.bf16.msra.mxu0 %v23150_v15  ;;  %v23179_v15 = vld [vmem:[#allocation8 + $0x9cc] ss:$72 sps:$4 sm:$0xff]  }
 0x483   : > { %8779 = vmatpush1.bf16.msra.mxu1 %v23153_v1  ;;  %8737 = vmatprep.subr.bf16.mxu0 %v23158_v47  ;;  %v23176_v1 = vld [vmem:[#allocation8 + $0xcc] ss:$72 sps:$4 sm:$0xff]   ;;  %v23182_v47 = vld [vmem:[#allocation8 + $0x3c] ss:$72 sps:$4 sm:$0xff]  }
 0x484   : > { %8780 = vmatprep.subr.bf16.mxu1 %v23161_v48  ;;  %v23185_v48 = vld [vmem:[#allocation8 + $0x93c] ss:$72 sps:$4 sm:$0xff]  }
 0x486   : > { %8738 = vmatpush1.bf16.msra.mxu0 %v23156_v5  ;;  %v23183_v5 = vld [vmem:[#allocation8 + $0x938] ss:$72 sps:$4 sm:$0xff]  }
 0x487   : > { %8781 = vmatpush1.bf16.msra.mxu1 %v23159_v4  ;;  %8739 = vmatprep.subr.bf16.mxu0 %v23164_v60  ;;  %v23188_v4 = vld [vmem:[#allocation8 + $0x8ac] ss:$72 sps:$4 sm:$0xff]  }
 0x488   : > { %8782 = vmatprep.subr.bf16.mxu1 %v23167_v42  ;;  %v23180_v42 = vld [vmem:[#allocation8 + $0x38] ss:$72 sps:$4 sm:$0xff]   ;;  %v23191_v60 = vld [vmem:[#allocation8 + $0x11ac] ss:$72 sps:$4 sm:$0xff]  }
 0x48a   : > { %8740 = vmatpush1.bf16.msra.mxu0 %v23162_v10  ;;  %v23186_v10 = vld [vmem:[#allocation8 + $0x8a8] ss:$72 sps:$4 sm:$0xff]  }
 0x48b   : > { %8783 = vmatpush1.bf16.msra.mxu1 %v23165_v24  ;;  %8741 = vmatprep.subr.bf16.mxu0 %v23170_v37  ;;  %v23189_v24 = vld [vmem:[#allocation8 + $0x11a8] ss:$72 sps:$4 sm:$0xff]   ;;  %v23194_v37 = vld [vmem:[#allocation8 + $0x81c] ss:$72 sps:$4 sm:$0xff]  }
 0x48c   : > { %8784 = vmatprep.subr.bf16.mxu1 %v23173_v39  ;;  %v23197_v39 = vld [vmem:[#allocation8 + $0x111c] ss:$72 sps:$4 sm:$0xff]  }
 0x48e   : > { %8742 = vmatpush1.bf16.msra.mxu0 %v23168_v46  ;;  %v23192_v46 = vld [vmem:[#allocation8 + $0x818] ss:$72 sps:$4 sm:$0xff]  }
 0x48f   : > { %8785 = vmatpush1.bf16.msra.mxu1 %v23171_v3  ;;  %8743 = vmatprep.subr.bf16.mxu0 %v23176_v1  ;;  %v23195_v3 = vld [vmem:[#allocation8 + $0x1118] ss:$72 sps:$4 sm:$0xff]   ;;  %v23200_v1 = vld [vmem:[#allocation8 + $0x78c] ss:$72 sps:$4 sm:$0xff]  }
 0x490   : > { %8786 = vmatprep.subr.bf16.mxu1 %v23179_v15  ;;  %v23203_v15 = vld [vmem:[#allocation8 + $0x108c] ss:$72 sps:$4 sm:$0xff]  }
 0x492   : > { %8744 = vmatpush1.bf16.msra.mxu0 %v23174_v43  ;;  %v23198_v43 = vld [vmem:[#allocation8 + $0x788] ss:$72 sps:$4 sm:$0xff]  }
 0x493   : > { %8787 = vmatpush1.bf16.msra.mxu1 %v23177_v20  ;;  %8745 = vmatprep.subr.bf16.mxu0 %v23182_v47  ;;  %v23201_v20 = vld [vmem:[#allocation8 + $0x1088] ss:$72 sps:$4 sm:$0xff]   ;;  %v23206_v47 = vld [vmem:[#allocation8 + $0x6fc] ss:$72 sps:$4 sm:$0xff]  }
 0x494   : > { %8788 = vmatprep.subr.bf16.mxu1 %v23185_v48  ;;  %v23209_v48 = vld [vmem:[#allocation8 + $0xffc] ss:$72 sps:$4 sm:$0xff]  }
 0x496   : > { %8746 = vmatpush1.bf16.msra.mxu0 %v23180_v42  ;;  %v23204_v42 = vld [vmem:[#allocation8 + $0x6f8] ss:$72 sps:$4 sm:$0xff]  }
 0x497   : > { %8789 = vmatpush1.bf16.msra.mxu1 %v23183_v5  ;;  %8747 = vmatprep.subr.bf16.mxu0 %v23188_v4  ;;  %v23207_v5 = vld [vmem:[#allocation8 + $0xff8] ss:$72 sps:$4 sm:$0xff]   ;;  %v23212_v4 = vld [vmem:[#allocation8 + $0x66c] ss:$72 sps:$4 sm:$0xff]  }
 0x498   : > { %8790 = vmatprep.subr.bf16.mxu1 %v23191_v60  ;;  %v23215_v60 = vld [vmem:[#allocation8 + $0xf6c] ss:$72 sps:$4 sm:$0xff]  }
 0x49a   : > { %8748 = vmatpush2.bf16.msra.mxu0 %v23186_v10  ;;  %v23210_v10 = vld [vmem:[#allocation8 + $0x668] ss:$72 sps:$4 sm:$0xff]  }
 0x49b   : > { %8791 = vmatpush2.bf16.msra.mxu1 %v23189_v24  ;;  %8749 = vmatprep.subr.bf16.mxu0 %v23194_v37  ;;  %v23213_v24 = vld [vmem:[#allocation8 + $0xf68] ss:$72 sps:$4 sm:$0xff]   ;;  %v23218_v37 = vld [vmem:[#allocation8 + $0x5dc] ss:$72 sps:$4 sm:$0xff]  }
 0x49c   : > { %8792 = vmatprep.subr.bf16.mxu1 %v23197_v39  ;;  %v23221_v39 = vld [vmem:[#allocation8 + $0xedc] ss:$72 sps:$4 sm:$0xff]  }
 0x49e   : > { %8750 = vmatpush2.bf16.msra.mxu0 %v23192_v46  ;;  %v23216_v46 = vld [vmem:[#allocation8 + $0x5d8] ss:$72 sps:$4 sm:$0xff]  }
 0x49f   : > { %8793 = vmatpush2.bf16.msra.mxu1 %v23195_v3  ;;  %8751 = vmatprep.subr.bf16.mxu0 %v23200_v1  ;;  %v23219_v3 = vld [vmem:[#allocation8 + $0xed8] ss:$72 sps:$4 sm:$0xff]   ;;  %v23224_v1 = vld [vmem:[#allocation8 + $0x54c] ss:$72 sps:$4 sm:$0xff]  }
 0x4a0   : > { %8794 = vmatprep.subr.bf16.mxu1 %v23203_v15  ;;  %v23227_v15 = vld [vmem:[#allocation8 + $0xe4c] ss:$72 sps:$4 sm:$0xff]  }
 0x4a2   : > { %8752 = vmatpush2.bf16.msra.mxu0 %v23198_v43  ;;  %v23222_v43 = vld [vmem:[#allocation8 + $0x548] ss:$72 sps:$4 sm:$0xff]  }
 0x4a3   : > { %8795 = vmatpush2.bf16.msra.mxu1 %v23201_v20  ;;  %8753 = vmatprep.subr.bf16.mxu0 %v23206_v47  ;;  %v23225_v20 = vld [vmem:[#allocation8 + $0xe48] ss:$72 sps:$4 sm:$0xff]   ;;  %v23230_v47 = vld [vmem:[#allocation8 + $0x4bc] ss:$72 sps:$4 sm:$0xff]  }
 0x4a4   : > { %8796 = vmatprep.subr.bf16.mxu1 %v23209_v48  ;;  %v23233_v48 = vld [vmem:[#allocation8 + $0xdbc] ss:$72 sps:$4 sm:$0xff]  }
 0x4a6   : > { %8754 = vmatpush2.bf16.msra.mxu0 %v23204_v42  ;;  %v23228_v42 = vld [vmem:[#allocation8 + $0x4b8] ss:$72 sps:$4 sm:$0xff]  }
 0x4a7   : > { %8797 = vmatpush2.bf16.msra.mxu1 %v23207_v5  ;;  %8755 = vmatprep.subr.bf16.mxu0 %v23212_v4  ;;  %v23231_v5 = vld [vmem:[#allocation8 + $0xdb8] ss:$72 sps:$4 sm:$0xff]   ;;  %v23236_v4 = vld [vmem:[#allocation8 + $0x434] ss:$72 sps:$4 sm:$0xff]  }
 0x4a8   : > { %8798 = vmatprep.subr.bf16.mxu1 %v23215_v60  ;;  %v23239_v60 = vld [vmem:[#allocation8 + $0xd34] ss:$72 sps:$4 sm:$0xff]  }
 0x4aa   : > { %8756 = vmatpush2.bf16.msra.mxu0 %v23210_v10  ;;  %v23234_v10 = vld [vmem:[#allocation8 + $0x430] ss:$72 sps:$4 sm:$0xff]  }
 0x4ab   : > { %8799 = vmatpush2.bf16.msra.mxu1 %v23213_v24  ;;  %8757 = vmatprep.subr.bf16.mxu0 %v23218_v37  ;;  %v23237_v24 = vld [vmem:[#allocation8 + $0xd30] ss:$72 sps:$4 sm:$0xff]   ;;  %v25791_v37 = vpop.f32.mrf.mxu0 }
 0x4ac   : > { %8800 = vmatprep.subr.bf16.mxu1 %v23221_v39  ;;  %26394 = vst [vmem:[#allocation46_spill] sm:$0xff] %v25791_v37  ;;  %v25793_v39 = vpop.f32.mrf.mxu1  ;;  %v23249_v37 = vld [vmem:[#allocation8 + $0xc10] ss:$72 sps:$4 sm:$0xff]  }
 0x4ad   : > { %26395 = vst [vmem:[#allocation47_spill] sm:$0xff] %v25793_v39  ;;  %v23246_v39 = vld [vmem:[#allocation8 + $0x310] ss:$72 sps:$4 sm:$0xff]  }
 0x4ae   : > { %8758 = vmatpush2.bf16.msra.mxu0 %v23216_v46  ;;  %v23242_v46 = vld [vmem:[#allocation8 + $0x3a4] ss:$72 sps:$4 sm:$0xff]  }
 0x4af   : > { %8801 = vmatpush2.bf16.msra.mxu1 %v23219_v3  ;;  %8759 = vmatprep.subr.bf16.mxu0 %v23224_v1  ;;  %v23245_v3 = vld [vmem:[#allocation8 + $0xca4] ss:$72 sps:$4 sm:$0xff]   ;;  %v23240_v1 = vld [vmem:[#allocation8 + $0x3a0] ss:$72 sps:$4 sm:$0xff]  }
 0x4b0   : > { %8802 = vmatprep.subr.bf16.mxu1 %v23227_v15  ;;  %v23243_v15 = vld [vmem:[#allocation8 + $0xca0] ss:$72 sps:$4 sm:$0xff]  }
 0x4b2   : > { %8760 = vmatpush2.bf16.msra.mxu0 %v23222_v43 }
 0x4b3   : > { %8803 = vmatpush2.bf16.msra.mxu1 %v23225_v20  ;;  %8761 = vmatprep.subr.bf16.mxu0 %v23230_v47 }
 0x4b4   : > { %8804 = vmatprep.subr.bf16.mxu1 %v23233_v48 }
 0x4b6   : > { %8762 = vmatpush2.bf16.msra.mxu0 %v23228_v42 }
 0x4b7   : > { %8805 = vmatpush2.bf16.msra.mxu1 %v23231_v5  ;;  %8817 = vmatprep.subr.bf16.mxu0 %v23236_v4  ;;  %v23248_v5 = vld [vmem:[#allocation8 + $0x314] ss:$72 sps:$4 sm:$0xff]  }
 0x4b8   : > { %8860 = vmatprep.subr.bf16.mxu1 %v23239_v60  ;;  %v23251_v4 = vld [vmem:[#allocation8 + $0xc14] ss:$72 sps:$4 sm:$0xff]  }
 0x4b9   : > { %v8507_v43 = vpop.f32.mrf.mxu0  ;;  %8764 = vmatmul.mubr.bf16.vlgmr.msra.gmra.mxu0 %v25534_v13 }
 0x4ba   : > { %v8550_v20 = vpop.f32.mrf.mxu1  ;;  %8807 = vmatmul.mubr.bf16.vlgmr.msra.gmra.mxu1 %v25541_v17  ;;  %v8508_v47 = vadd.f32 %v8507_v43, %v25653_v63  ;;  %8818 = vmatpush1.bf16.msra.mxu0 %v23234_v10  ;;  %v4903_v10 = vadd.f32 %v25663_v32, %v25661_v23  ;;  %v23257_v43 = vld [vmem:[#allocation8 + $0xb84] ss:$72 sps:$4 sm:$0xff]   ;;  %v23252_v23 = vld [vmem:[#allocation8 + $0x280] ss:$72 sps:$4 sm:$0xff]  }
 0x4bb   : > { %8861 = vmatpush1.bf16.msra.mxu1 %v23237_v24  ;;  %v8509_v48 = vpop.f32.mrf.mxu0  ;;  %8819 = vmatprep.subr.bf16.mxu0 %v23242_v46  ;;  %v23255_v32 = vld [vmem:[#allocation8 + $0xb80] ss:$72 sps:$4 sm:$0xff]  }
 0x4bc   : > { %v8552_v42 = vpop.f32.mrf.mxu1  ;;  %8862 = vmatprep.subr.bf16.mxu1 %v23245_v3  ;;  %v25798_v60 = vadd.f32 %v8550_v20, %v8508_v47  ;;  %v8510_v38 = vadd.f32 %v8509_v48, %v25655_v16  ;;  %8849 = vmatprep.mubr.bf16.mxu0 %v25509_v53  ;;  %v23254_v16 = vld [vmem:[#allocation8 + $0x284] ss:$72 sps:$4 sm:$0xff]  }
 0x4bd   : > { %8892 = vmatprep.mubr.bf16.mxu1 %v25515_v58  ;;  %v8511_v25 = vpop.f32.mrf.mxu0 }
 0x4be   : > { %26396 = vst [vmem:[#allocation48_spill] sm:$0xff] %v25798_v60  ;;  %v8554_v63 = vpop.f32.mrf.mxu1  ;;  %v25805_v24 = vadd.f32 %v8552_v42, %v8510_v38  ;;  %v8512_v46 = vadd.f32 %v8511_v25, %v25659_v31  ;;  %8820 = vmatpush1.bf16.msra.mxu0 %v23240_v1  ;;  %v23260_v31 = vld [vmem:[#allocation8 + $0x1f4] ss:$72 sps:$4 sm:$0xff]   ;;  %v23258_v38 = vld [vmem:[#allocation8 + $0x1f0] ss:$72 sps:$4 sm:$0xff]  }
 0x4bf   : > { %8863 = vmatpush1.bf16.msra.mxu1 %v23243_v15  ;;  %v8513_v3 = vpop.f32.mrf.mxu0  ;;  %8821 = vmatprep.subr.bf16.mxu0 %v23248_v5  ;;  %v23263_v25 = vld [vmem:[#allocation8 + $0xaf4] ss:$72 sps:$4 sm:$0xff]   ;;  %v23261_v1 = vld [vmem:[#allocation8 + $0xaf0] ss:$72 sps:$4 sm:$0xff]   ;;  %v23266_v15 = vld [vmem:[#allocation8 + $0x164] ss:$72 sps:$4 sm:$0xff]  }
 0x4c0   : > { %8864 = vmatprep.subr.bf16.mxu1 %v23251_v4  ;;  %v25808_v20 = vadd.f32 %v8554_v63, %v8512_v46  ;;  %v8514_v47 = vadd.f32 %v8513_v3, %v4903_v10  ;;  %v8556_v48 = vpop.f32.mrf.mxu1  ;;  %v23269_v42 = vld [vmem:[#allocation8 + $0xa64] ss:$72 sps:$4 sm:$0xff]   ;;  %v23264_v5 = vld [vmem:[#allocation8 + $0x160] ss:$72 sps:$4 sm:$0xff]   ;;  %v23270_v63 = vld [vmem:[#allocation8 + $0xd0] ss:$72 sps:$4 sm:$0xff]  }
 0x4c1   : > { %v23267_v4 = vld [vmem:[#allocation8 + $0xa60] ss:$72 sps:$4 sm:$0xff]   ;;  %v23273_v10 = vld [vmem:[#allocation8 + $0x9d0] ss:$72 sps:$4 sm:$0xff]   ;;  %v23278_v46 = vld [vmem:[#allocation8 + $0x44] ss:$72 sps:$4 sm:$0xff]  }
 0x4c2   : > { %v25810_v60 = vadd.f32 %v8556_v48, %v8514_v47  ;;  %8822 = vmatpush1.bf16.msra.mxu0 %v23246_v39  ;;  %v23275_v39 = vld [vmem:[#allocation8 + $0x9d4] ss:$72 sps:$4 sm:$0xff]   ;;  %v23281_v3 = vld [vmem:[#allocation8 + $0x944] ss:$72 sps:$4 sm:$0xff]  }
 0x4c3   : > { %8865 = vmatpush1.bf16.msra.mxu1 %v23249_v37  ;;  %8823 = vmatprep.subr.bf16.mxu0 %v23254_v16  ;;  %v23272_v37 = vld [vmem:[#allocation8 + $0xd4] ss:$72 sps:$4 sm:$0xff]   ;;  %v23276_v16 = vld [vmem:[#allocation8 + $0x40] ss:$72 sps:$4 sm:$0xff]  }
 0x4c4   : > { %8866 = vmatprep.subr.bf16.mxu1 %v23257_v43  ;;  %v23279_v43 = vld [vmem:[#allocation8 + $0x940] ss:$72 sps:$4 sm:$0xff]   ;;  %v23284_v47 = vld [vmem:[#allocation8 + $0x8b4] ss:$72 sps:$4 sm:$0xff]  }
 0x4c5   : > { %v23287_v48 = vld [vmem:[#allocation8 + $0x11b4] ss:$72 sps:$4 sm:$0xff]  }
 0x4c6   : > { %8824 = vmatpush1.bf16.msra.mxu0 %v23252_v23  ;;  %v23282_v23 = vld [vmem:[#allocation8 + $0x8b0] ss:$72 sps:$4 sm:$0xff]  }
 0x4c7   : > { %8867 = vmatpush1.bf16.msra.mxu1 %v23255_v32  ;;  %8825 = vmatprep.subr.bf16.mxu0 %v23260_v31  ;;  %v23285_v32 = vld [vmem:[#allocation8 + $0x11b0] ss:$72 sps:$4 sm:$0xff]   ;;  %v23290_v31 = vld [vmem:[#allocation8 + $0x824] ss:$72 sps:$4 sm:$0xff]  }
 0x4c8   : > { %8868 = vmatprep.subr.bf16.mxu1 %v23263_v25  ;;  %v23293_v25 = vld [vmem:[#allocation8 + $0x1124] ss:$72 sps:$4 sm:$0xff]  }
 0x4ca   : > { %8826 = vmatpush1.bf16.msra.mxu0 %v23258_v38  ;;  %v23288_v38 = vld [vmem:[#allocation8 + $0x820] ss:$72 sps:$4 sm:$0xff]  }
 0x4cb   : > { %8869 = vmatpush1.bf16.msra.mxu1 %v23261_v1  ;;  %8827 = vmatprep.subr.bf16.mxu0 %v23266_v15  ;;  %v23291_v1 = vld [vmem:[#allocation8 + $0x1120] ss:$72 sps:$4 sm:$0xff]   ;;  %v23296_v15 = vld [vmem:[#allocation8 + $0x794] ss:$72 sps:$4 sm:$0xff]  }
 0x4cc   : > { %8870 = vmatprep.subr.bf16.mxu1 %v23269_v42  ;;  %v23299_v42 = vld [vmem:[#allocation8 + $0x1094] ss:$72 sps:$4 sm:$0xff]  }
 0x4ce   : > { %8828 = vmatpush1.bf16.msra.mxu0 %v23264_v5  ;;  %v23294_v5 = vld [vmem:[#allocation8 + $0x790] ss:$72 sps:$4 sm:$0xff]  }
 0x4cf   : > { %8871 = vmatpush1.bf16.msra.mxu1 %v23267_v4  ;;  %8829 = vmatprep.subr.bf16.mxu0 %v23272_v37  ;;  %v23297_v4 = vld [vmem:[#allocation8 + $0x1090] ss:$72 sps:$4 sm:$0xff]   ;;  %v23302_v37 = vld [vmem:[#allocation8 + $0x704] ss:$72 sps:$4 sm:$0xff]  }
 0x4d0   : > { %8872 = vmatprep.subr.bf16.mxu1 %v23275_v39  ;;  %v23305_v39 = vld [vmem:[#allocation8 + $0x1004] ss:$72 sps:$4 sm:$0xff]  }
 0x4d2   : > { %8830 = vmatpush1.bf16.msra.mxu0 %v23270_v63  ;;  %v23300_v63 = vld [vmem:[#allocation8 + $0x700] ss:$72 sps:$4 sm:$0xff]  }
 0x4d3   : > { %8873 = vmatpush1.bf16.msra.mxu1 %v23273_v10  ;;  %8831 = vmatprep.subr.bf16.mxu0 %v23278_v46  ;;  %v23303_v10 = vld [vmem:[#allocation8 + $0x1000] ss:$72 sps:$4 sm:$0xff]   ;;  %v23308_v46 = vld [vmem:[#allocation8 + $0x674] ss:$72 sps:$4 sm:$0xff]  }
 0x4d4   : > { %8874 = vmatprep.subr.bf16.mxu1 %v23281_v3  ;;  %v23311_v3 = vld [vmem:[#allocation8 + $0xf74] ss:$72 sps:$4 sm:$0xff]  }
 0x4d6   : > { %8832 = vmatpush1.bf16.msra.mxu0 %v23276_v16  ;;  %v23306_v16 = vld [vmem:[#allocation8 + $0x670] ss:$72 sps:$4 sm:$0xff]  }
 0x4d7   : > { %8875 = vmatpush1.bf16.msra.mxu1 %v23279_v43  ;;  %8833 = vmatprep.subr.bf16.mxu0 %v23284_v47  ;;  %v23309_v43 = vld [vmem:[#allocation8 + $0xf70] ss:$72 sps:$4 sm:$0xff]   ;;  %v23314_v47 = vld [vmem:[#allocation8 + $0x5e4] ss:$72 sps:$4 sm:$0xff]  }
 0x4d8   : > { %8876 = vmatprep.subr.bf16.mxu1 %v23287_v48  ;;  %v23317_v48 = vld [vmem:[#allocation8 + $0xee4] ss:$72 sps:$4 sm:$0xff]  }
 0x4da   : > { %8834 = vmatpush2.bf16.msra.mxu0 %v23282_v23  ;;  %v23312_v23 = vld [vmem:[#allocation8 + $0x5e0] ss:$72 sps:$4 sm:$0xff]  }
 0x4db   : > { %8877 = vmatpush2.bf16.msra.mxu1 %v23285_v32  ;;  %8835 = vmatprep.subr.bf16.mxu0 %v23290_v31  ;;  %v23315_v32 = vld [vmem:[#allocation8 + $0xee0] ss:$72 sps:$4 sm:$0xff]   ;;  %v23320_v31 = vld [vmem:[#allocation8 + $0x554] ss:$72 sps:$4 sm:$0xff]  }
 0x4dc   : > { %8878 = vmatprep.subr.bf16.mxu1 %v23293_v25  ;;  %v23323_v25 = vld [vmem:[#allocation8 + $0xe54] ss:$72 sps:$4 sm:$0xff]  }
 0x4de   : > { %8836 = vmatpush2.bf16.msra.mxu0 %v23288_v38  ;;  %v23318_v38 = vld [vmem:[#allocation8 + $0x550] ss:$72 sps:$4 sm:$0xff]  }
 0x4df   : > { %8879 = vmatpush2.bf16.msra.mxu1 %v23291_v1  ;;  %8837 = vmatprep.subr.bf16.mxu0 %v23296_v15  ;;  %v23321_v1 = vld [vmem:[#allocation8 + $0xe50] ss:$72 sps:$4 sm:$0xff]   ;;  %v23326_v15 = vld [vmem:[#allocation8 + $0x4c4] ss:$72 sps:$4 sm:$0xff]  }
 0x4e0   : > { %8880 = vmatprep.subr.bf16.mxu1 %v23299_v42  ;;  %v23329_v42 = vld [vmem:[#allocation8 + $0xdc4] ss:$72 sps:$4 sm:$0xff]  }
 0x4e2   : > { %8838 = vmatpush2.bf16.msra.mxu0 %v23294_v5  ;;  %v23324_v5 = vld [vmem:[#allocation8 + $0x4c0] ss:$72 sps:$4 sm:$0xff]  }
 0x4e3   : > { %8881 = vmatpush2.bf16.msra.mxu1 %v23297_v4  ;;  %8839 = vmatprep.subr.bf16.mxu0 %v23302_v37  ;;  %v23327_v4 = vld [vmem:[#allocation8 + $0xdc0] ss:$72 sps:$4 sm:$0xff]   ;;  %v23332_v37 = vld [vmem:[#allocation8 + $0x27f4] ss:$72 sps:$4 sm:$0xff]  }
 0x4e4   : > { %8882 = vmatprep.subr.bf16.mxu1 %v23305_v39  ;;  %v23335_v39 = vld [vmem:[#allocation8 + $0x30f4] ss:$72 sps:$4 sm:$0xff]  }
 0x4e6   : > { %8840 = vmatpush2.bf16.msra.mxu0 %v23300_v63  ;;  %v23330_v63 = vld [vmem:[#allocation8 + $0x27f0] ss:$72 sps:$4 sm:$0xff]  }
 0x4e7   : > { %8883 = vmatpush2.bf16.msra.mxu1 %v23303_v10  ;;  %8841 = vmatprep.subr.bf16.mxu0 %v23308_v46  ;;  %v23333_v10 = vld [vmem:[#allocation8 + $0x30f0] ss:$72 sps:$4 sm:$0xff]   ;;  %v9491_v46 = vrot.slane %v25509_v53, 1 }
 0x4e8   : > { %8884 = vmatprep.subr.bf16.mxu1 %v23311_v3  ;;  %v9492_v3 = vrot.slane %v25511_v54, 1  ;;  %v23342_v53 = vld [vmem:[#allocation8 + $0x26d0] ss:$72 sps:$4 sm:$0xff]  }
 0x4ea   : > { %8842 = vmatpush2.bf16.msra.mxu0 %v23306_v16  ;;  %v9497_v16 = vrot.slane %v25515_v58, 1 }
 0x4eb   : > { %8885 = vmatpush2.bf16.msra.mxu1 %v23309_v43  ;;  %8843 = vmatprep.subr.bf16.mxu0 %v23314_v47  ;;  %v9498_v43 = vrot.slane %v25517_v59, 1  ;;  %v23338_v47 = vld [vmem:[#allocation8 + $0x2764] ss:$72 sps:$4 sm:$0xff]  }
 0x4ec   : > { %8886 = vmatprep.subr.bf16.mxu1 %v23317_v48  ;;  %v23341_v48 = vld [vmem:[#allocation8 + $0x3064] ss:$72 sps:$4 sm:$0xff]  }
 0x4ee   : > { %8844 = vmatpush2.bf16.msra.mxu0 %v23312_v23  ;;  %v23336_v23 = vld [vmem:[#allocation8 + $0x2760] ss:$72 sps:$4 sm:$0xff]  }
 0x4ef   : > { %8887 = vmatpush2.bf16.msra.mxu1 %v23315_v32  ;;  %8845 = vmatprep.subr.bf16.mxu0 %v23320_v31  ;;  %v23339_v32 = vld [vmem:[#allocation8 + $0x3060] ss:$72 sps:$4 sm:$0xff]  }
 0x4f0   : > { %8888 = vmatprep.subr.bf16.mxu1 %v23323_v25 }
 0x4f2   : > { %8846 = vmatpush2.bf16.msra.mxu0 %v23318_v38  ;;  %v25819_v38 = vsel %vm9487_vm1, %v9491_v46, %v9492_v3  ;;  %v23345_v46 = vld [vmem:[#allocation8 + $0x2fd0] ss:$72 sps:$4 sm:$0xff]  }
 0x4f3   : > { %8889 = vmatpush2.bf16.msra.mxu1 %v23321_v1  ;;  %8847 = vmatprep.subr.bf16.mxu0 %v23326_v15  ;;  %v25822_v1 = vsel %vm9487_vm1, %v9497_v16, %v9498_v43 }
 0x4f4   : > { %8890 = vmatprep.subr.bf16.mxu1 %v23329_v42 }
 0x4f6   : > { %8848 = vmatpush2.bf16.msra.mxu0 %v23324_v5 }
 0x4f7   : > { %8891 = vmatpush2.bf16.msra.mxu1 %v23327_v4  ;;  %12384 = vmatprep.subr.bf16.mxu0 %v23332_v37  ;;  %v23344_v4 = vld [vmem:[#allocation8 + $0x26d4] ss:$72 sps:$4 sm:$0xff]  }
 0x4f8   : > { %12427 = vmatprep.subr.bf16.mxu1 %v23335_v39  ;;  %v23347_v37 = vld [vmem:[#allocation8 + $0x2fd4] ss:$72 sps:$4 sm:$0xff]  }
 0x4f9   : > { %v8593_v31 = vpop.f32.mrf.mxu0  ;;  %8850 = vmatmul.mubr.bf16.vlgmr.msra.gmra.mxu0 %v25534_v13 }
 0x4fa   : > { %v8636_v25 = vpop.f32.mrf.mxu1  ;;  %8893 = vmatmul.mubr.bf16.vlgmr.msra.gmra.mxu1 %v25541_v17  ;;  %v8594_v15 = vadd.f32 %v8593_v31, %v25667_v61  ;;  %12385 = vmatpush1.bf16.msra.mxu0 %v23330_v63  ;;  %v4989_v63 = vadd.f32 %v25677_v45, %v25675_v44  ;;  %v23348_v44 = vld [vmem:[#allocation8 + $0x2640] ss:$72 sps:$4 sm:$0xff]   ;;  %v23359_v45 = vld [vmem:[#allocation8 + $0x2eb4] ss:$72 sps:$4 sm:$0xff]  }
 0x4fb   : > { %12428 = vmatpush1.bf16.msra.mxu1 %v23333_v10  ;;  %v8595_v42 = vpop.f32.mrf.mxu0  ;;  %12386 = vmatprep.subr.bf16.mxu0 %v23338_v47  ;;  %v23353_v47 = vld [vmem:[#allocation8 + $0x2f44] ss:$72 sps:$4 sm:$0xff]  }
 0x4fc   : > { %v8638_v5 = vpop.f32.mrf.mxu1  ;;  %12429 = vmatprep.subr.bf16.mxu1 %v23341_v48  ;;  %v25825_v39 = vadd.f32 %v8636_v25, %v8594_v15  ;;  %v8596_v58 = vadd.f32 %v8595_v42, %v25669_v11  ;;  %12416 = vmatprep.mubr.bf16.mxu0 %v25819_v38  ;;  %v23350_v11 = vld [vmem:[#allocation8 + $0x2644] ss:$72 sps:$4 sm:$0xff]  }
 0x4fd   : > { %12459 = vmatprep.mubr.bf16.mxu1 %v25822_v1  ;;  %v8597_v3 = vpop.f32.mrf.mxu0  ;;  %v23362_v42 = vld [vmem:[#allocation8 + $0x2524] ss:$72 sps:$4 sm:$0xff]  }
 0x4fe   : > { %v8640_v61 = vpop.f32.mrf.mxu1  ;;  %v25832_v10 = vadd.f32 %v8638_v5, %v8596_v58  ;;  %v8598_v16 = vadd.f32 %v8597_v3, %v25673_v18  ;;  %12387 = vmatpush1.bf16.msra.mxu0 %v23336_v23  ;;  %v23351_v58 = vld [vmem:[#allocation8 + $0x2f40] ss:$72 sps:$4 sm:$0xff]   ;;  %v23356_v18 = vld [vmem:[#allocation8 + $0x25b4] ss:$72 sps:$4 sm:$0xff]   ;;  %v23354_v23 = vld [vmem:[#allocation8 + $0x25b0] ss:$72 sps:$4 sm:$0xff]  }
 0x4ff   : > { %12430 = vmatpush1.bf16.msra.mxu1 %v23339_v32  ;;  %v8599_v43 = vpop.f32.mrf.mxu0  ;;  %12388 = vmatprep.subr.bf16.mxu0 %v23344_v4  ;;  %v23357_v32 = vld [vmem:[#allocation8 + $0x2eb0] ss:$72 sps:$4 sm:$0xff]   ;;  %v23365_v5 = vld [vmem:[#allocation8 + $0x2e24] ss:$72 sps:$4 sm:$0xff]   ;;  %v23360_v4 = vld [vmem:[#allocation8 + $0x2520] ss:$72 sps:$4 sm:$0xff]  }
 0x500   : > { %12431 = vmatprep.subr.bf16.mxu1 %v23347_v37  ;;  %v25835_v48 = vadd.f32 %v8640_v61, %v8598_v16  ;;  %v8600_v31 = vadd.f32 %v8599_v43, %v4989_v63  ;;  %v8642_v25 = vpop.f32.mrf.mxu1  ;;  %v23363_v37 = vld [vmem:[#allocation8 + $0x2e20] ss:$72 sps:$4 sm:$0xff]   ;;  %v23366_v3 = vld [vmem:[#allocation8 + $0x2490] ss:$72 sps:$4 sm:$0xff]   ;;  %v23374_v63 = vld [vmem:[#allocation8 + $0x2404] ss:$72 sps:$4 sm:$0xff]  }
 0x501   : > { %v23369_v61 = vld [vmem:[#allocation8 + $0x2d90] ss:$72 sps:$4 sm:$0xff]   ;;  %v23377_v16 = vld [vmem:[#allocation8 + $0x2d04] ss:$72 sps:$4 sm:$0xff]   ;;  %v23372_v43 = vld [vmem:[#allocation8 + $0x2400] ss:$72 sps:$4 sm:$0xff]  }
 0x502   : > { %v25837_v15 = vadd.f32 %v8642_v25, %v8600_v31  ;;  %12389 = vmatpush1.bf16.msra.mxu0 %v23342_v53  ;;  %v23368_v53 = vld [vmem:[#allocation8 + $0x2494] ss:$72 sps:$4 sm:$0xff]   ;;  %v23378_v25 = vld [vmem:[#allocation8 + $0x2c70] ss:$72 sps:$4 sm:$0xff]  }
 0x503   : > { %12432 = vmatpush1.bf16.msra.mxu1 %v23345_v46  ;;  %12390 = vmatprep.subr.bf16.mxu0 %v23350_v11  ;;  %v23371_v46 = vld [vmem:[#allocation8 + $0x2d94] ss:$72 sps:$4 sm:$0xff]   ;;  %v23375_v11 = vld [vmem:[#allocation8 + $0x2d00] ss:$72 sps:$4 sm:$0xff]  }
 0x504   : > { %12433 = vmatprep.subr.bf16.mxu1 %v23353_v47  ;;  %v23380_v47 = vld [vmem:[#allocation8 + $0x2c74] ss:$72 sps:$4 sm:$0xff]  }
 0x505   : > { %v23383_v31 = vld [vmem:[#allocation8 + $0x3574] ss:$72 sps:$4 sm:$0xff]  }
 0x506   : > { %12391 = vmatpush1.bf16.msra.mxu0 %v23348_v44  ;;  %v23381_v44 = vld [vmem:[#allocation8 + $0x3570] ss:$72 sps:$4 sm:$0xff]  }
 0x507   : > { %12434 = vmatpush1.bf16.msra.mxu1 %v23351_v58  ;;  %12392 = vmatprep.subr.bf16.mxu0 %v23356_v18  ;;  %v23386_v58 = vld [vmem:[#allocation8 + $0x2be4] ss:$72 sps:$4 sm:$0xff]  }
 0x508   : > { %12435 = vmatprep.subr.bf16.mxu1 %v23359_v45  ;;  %v23389_v18 = vld [vmem:[#allocation8 + $0x34e4] ss:$72 sps:$4 sm:$0xff]   ;;  %v23384_v45 = vld [vmem:[#allocation8 + $0x2be0] ss:$72 sps:$4 sm:$0xff]  }
 0x50a   : > { %12393 = vmatpush1.bf16.msra.mxu0 %v23354_v23  ;;  %v23387_v23 = vld [vmem:[#allocation8 + $0x34e0] ss:$72 sps:$4 sm:$0xff]  }
 0x50b   : > { %12436 = vmatpush1.bf16.msra.mxu1 %v23357_v32  ;;  %12394 = vmatprep.subr.bf16.mxu0 %v23362_v42  ;;  %v23392_v32 = vld [vmem:[#allocation8 + $0x2b54] ss:$72 sps:$4 sm:$0xff]  }
 0x50c   : > { %12437 = vmatprep.subr.bf16.mxu1 %v23365_v5  ;;  %v23395_v42 = vld [vmem:[#allocation8 + $0x3454] ss:$72 sps:$4 sm:$0xff]   ;;  %v23390_v5 = vld [vmem:[#allocation8 + $0x2b50] ss:$72 sps:$4 sm:$0xff]  }
 0x50e   : > { %12395 = vmatpush1.bf16.msra.mxu0 %v23360_v4  ;;  %v23393_v4 = vld [vmem:[#allocation8 + $0x3450] ss:$72 sps:$4 sm:$0xff]  }
 0x50f   : > { %12438 = vmatpush1.bf16.msra.mxu1 %v23363_v37  ;;  %12396 = vmatprep.subr.bf16.mxu0 %v23368_v53  ;;  %v23398_v37 = vld [vmem:[#allocation8 + $0x2ac4] ss:$72 sps:$4 sm:$0xff]  }
 0x510   : > { %12439 = vmatprep.subr.bf16.mxu1 %v23371_v46  ;;  %v23401_v53 = vld [vmem:[#allocation8 + $0x33c4] ss:$72 sps:$4 sm:$0xff]   ;;  %v23396_v46 = vld [vmem:[#allocation8 + $0x2ac0] ss:$72 sps:$4 sm:$0xff]  }
 0x512   : > { %12397 = vmatpush1.bf16.msra.mxu0 %v23366_v3  ;;  %v23399_v3 = vld [vmem:[#allocation8 + $0x33c0] ss:$72 sps:$4 sm:$0xff]  }
 0x513   : > { %12440 = vmatpush1.bf16.msra.mxu1 %v23369_v61  ;;  %12398 = vmatprep.subr.bf16.mxu0 %v23374_v63  ;;  %v23404_v61 = vld [vmem:[#allocation8 + $0x2a34] ss:$72 sps:$4 sm:$0xff]  }
 0x514   : > { %12441 = vmatprep.subr.bf16.mxu1 %v23377_v16  ;;  %v23407_v63 = vld [vmem:[#allocation8 + $0x3334] ss:$72 sps:$4 sm:$0xff]   ;;  %v23402_v16 = vld [vmem:[#allocation8 + $0x2a30] ss:$72 sps:$4 sm:$0xff]  }
 0x516   : > { %12399 = vmatpush1.bf16.msra.mxu0 %v23372_v43  ;;  %v23405_v43 = vld [vmem:[#allocation8 + $0x3330] ss:$72 sps:$4 sm:$0xff]  }
 0x517   : > { %12442 = vmatpush1.bf16.msra.mxu1 %v23375_v11  ;;  %12400 = vmatprep.subr.bf16.mxu0 %v23380_v47  ;;  %v23410_v11 = vld [vmem:[#allocation8 + $0x29a4] ss:$72 sps:$4 sm:$0xff]  }
 0x518   : > { %12443 = vmatprep.subr.bf16.mxu1 %v23383_v31  ;;  %v23413_v47 = vld [vmem:[#allocation8 + $0x32a4] ss:$72 sps:$4 sm:$0xff]   ;;  %v23408_v31 = vld [vmem:[#allocation8 + $0x29a0] ss:$72 sps:$4 sm:$0xff]  }
 0x51a   : > { %12401 = vmatpush2.bf16.msra.mxu0 %v23378_v25  ;;  %v23411_v25 = vld [vmem:[#allocation8 + $0x32a0] ss:$72 sps:$4 sm:$0xff]  }
 0x51b   : > { %12444 = vmatpush2.bf16.msra.mxu1 %v23381_v44  ;;  %12402 = vmatprep.subr.bf16.mxu0 %v23386_v58  ;;  %v23416_v44 = vld [vmem:[#allocation8 + $0x2914] ss:$72 sps:$4 sm:$0xff]  }
 0x51c   : > { %12445 = vmatprep.subr.bf16.mxu1 %v23389_v18  ;;  %v23419_v58 = vld [vmem:[#allocation8 + $0x3214] ss:$72 sps:$4 sm:$0xff]   ;;  %v23414_v18 = vld [vmem:[#allocation8 + $0x2910] ss:$72 sps:$4 sm:$0xff]  }
 0x51e   : > { %12403 = vmatpush2.bf16.msra.mxu0 %v23384_v45  ;;  %v23417_v45 = vld [vmem:[#allocation8 + $0x3210] ss:$72 sps:$4 sm:$0xff]  }
 0x51f   : > { %12446 = vmatpush2.bf16.msra.mxu1 %v23387_v23  ;;  %12404 = vmatprep.subr.bf16.mxu0 %v23392_v32  ;;  %v23422_v23 = vld [vmem:[#allocation8 + $0x2884] ss:$72 sps:$4 sm:$0xff]  }
 0x520   : > { %12447 = vmatprep.subr.bf16.mxu1 %v23395_v42  ;;  %v23425_v32 = vld [vmem:[#allocation8 + $0x3184] ss:$72 sps:$4 sm:$0xff]   ;;  %v23420_v42 = vld [vmem:[#allocation8 + $0x2880] ss:$72 sps:$4 sm:$0xff]  }
 0x522   : > { %12405 = vmatpush2.bf16.msra.mxu0 %v23390_v5  ;;  %v23423_v5 = vld [vmem:[#allocation8 + $0x3180] ss:$72 sps:$4 sm:$0xff]  }
 0x523   : > { %12448 = vmatpush2.bf16.msra.mxu1 %v23393_v4  ;;  %12406 = vmatprep.subr.bf16.mxu0 %v23398_v37  ;;  %v9488_v4 = vrot.slane %v25534_v13, 1  ;;  %v9489_v37 = vrot.slane %v25547_v22, 1 }
 0x524   : > { %12449 = vmatprep.subr.bf16.mxu1 %v23401_v53  ;;  %v9494_v53 = vrot.slane %v25541_v17, 1 }
 0x526   : > { %12407 = vmatpush2.bf16.msra.mxu0 %v23396_v46  ;;  %v9495_v46 = vrot.slane %v25553_v26, 1 }
 0x527   : > { %12450 = vmatpush2.bf16.msra.mxu1 %v23399_v3  ;;  %12408 = vmatprep.subr.bf16.mxu0 %v23404_v61  ;;  %v23428_v3 = vld [vmem:[#allocation8 + $0x27fc] ss:$72 sps:$4 sm:$0xff]  }
 0x528   : > { %12451 = vmatprep.subr.bf16.mxu1 %v23407_v63  ;;  %v23431_v61 = vld [vmem:[#allocation8 + $0x30fc] ss:$72 sps:$4 sm:$0xff]   ;;  %v23426_v63 = vld [vmem:[#allocation8 + $0x27f8] ss:$72 sps:$4 sm:$0xff]  }
 0x52a   : > { %12409 = vmatpush2.bf16.msra.mxu0 %v23402_v16  ;;  %v23429_v16 = vld [vmem:[#allocation8 + $0x30f8] ss:$72 sps:$4 sm:$0xff]  }
 0x52b   : > { %12452 = vmatpush2.bf16.msra.mxu1 %v23405_v43  ;;  %12410 = vmatprep.subr.bf16.mxu0 %v23410_v11  ;;  %v25844_v43 = vsel %vm9487_vm1, %v9488_v4, %v9489_v37  ;;  %v25847_v11 = vsel %vm9487_vm1, %v9494_v53, %v9495_v46  ;;  %v23438_v53 = vld [vmem:[#allocation8 + $0x26d8] ss:$72 sps:$4 sm:$0xff]  }
 0x52c   : > { %12453 = vmatprep.subr.bf16.mxu1 %v23413_v47  ;;  %v23434_v47 = vld [vmem:[#allocation8 + $0x276c] ss:$72 sps:$4 sm:$0xff]  }
 0x52e   : > { %12411 = vmatpush2.bf16.msra.mxu0 %v23408_v31  ;;  %v23437_v31 = vld [vmem:[#allocation8 + $0x306c] ss:$72 sps:$4 sm:$0xff]  }
 0x52f   : > { %12454 = vmatpush2.bf16.msra.mxu1 %v23411_v25  ;;  %12412 = vmatprep.subr.bf16.mxu0 %v23416_v44  ;;  %v23432_v25 = vld [vmem:[#allocation8 + $0x2768] ss:$72 sps:$4 sm:$0xff]  }
 0x530   : > { %12455 = vmatprep.subr.bf16.mxu1 %v23419_v58  ;;  %v23435_v44 = vld [vmem:[#allocation8 + $0x3068] ss:$72 sps:$4 sm:$0xff]  }
 0x532   : > { %12413 = vmatpush2.bf16.msra.mxu0 %v23414_v18 }
 0x533   : > { %12456 = vmatpush2.bf16.msra.mxu1 %v23417_v45  ;;  %12414 = vmatprep.subr.bf16.mxu0 %v23422_v23 }
 0x534   : > { %12457 = vmatprep.subr.bf16.mxu1 %v23425_v32 }
 0x536   : > { %12415 = vmatpush2.bf16.msra.mxu0 %v23420_v42  ;;  %v23440_v42 = vld [vmem:[#allocation8 + $0x26dc] ss:$72 sps:$4 sm:$0xff]  }
 0x537   : > { %12458 = vmatpush2.bf16.msra.mxu1 %v23423_v5  ;;  %12470 = vmatprep.subr.bf16.mxu0 %v23428_v3  ;;  %v23443_v5 = vld [vmem:[#allocation8 + $0x2fdc] ss:$72 sps:$4 sm:$0xff]  }
 0x538   : > { %12513 = vmatprep.subr.bf16.mxu1 %v23431_v61 }
 0x539   : > { %v8679_v58 = vpop.f32.mrf.mxu0  ;;  %12417 = vmatmul.mubr.bf16.vlgmr.msra.gmra.mxu0 %v25844_v43 }
 0x53a   : > { %v8722_v18 = vpop.f32.mrf.mxu1  ;;  %12460 = vmatmul.mubr.bf16.vlgmr.msra.gmra.mxu1 %v25847_v11  ;;  %v8680_v45 = vadd.f32 %v8679_v58, %v25681_v19  ;;  %12471 = vmatpush1.bf16.msra.mxu0 %v23426_v63  ;;  %v5075_v19 = vadd.f32 %v25691_v36, %v25689_v34  ;;  %v23444_v34 = vld [vmem:[#allocation8 + $0x2648] ss:$72 sps:$4 sm:$0xff]  }
 0x53b   : > { %12514 = vmatpush1.bf16.msra.mxu1 %v23429_v16  ;;  %v8681_v23 = vpop.f32.mrf.mxu0  ;;  %12472 = vmatprep.subr.bf16.mxu0 %v23434_v47  ;;  %v23441_v16 = vld [vmem:[#allocation8 + $0x2fd8] ss:$72 sps:$4 sm:$0xff]   ;;  %v23447_v36 = vld [vmem:[#allocation8 + $0x2f48] ss:$72 sps:$4 sm:$0xff]  }
 0x53c   : > { %v8724_v32 = vpop.f32.mrf.mxu1  ;;  %12515 = vmatprep.subr.bf16.mxu1 %v23437_v31  ;;  %v25852_v4 = vadd.f32 %v8722_v18, %v8680_v45  ;;  %v8682_v37 = vadd.f32 %v8681_v23, %v25683_v29  ;;  %12502 = vmatprep.mubr.bf16.mxu0 %v25819_v38  ;;  %v23446_v29 = vld [vmem:[#allocation8 + $0x264c] ss:$72 sps:$4 sm:$0xff]  }
 0x53d   : > { %12545 = vmatprep.mubr.bf16.mxu1 %v25822_v1  ;;  %v8683_v46 = vpop.f32.mrf.mxu0  ;;  %v23449_v31 = vld [vmem:[#allocation8 + $0x2f4c] ss:$72 sps:$4 sm:$0xff]  }
 0x53e   : > { %v8726_v3 = vpop.f32.mrf.mxu1  ;;  %v25859_v61 = vadd.f32 %v8724_v32, %v8682_v37  ;;  %v8684_v63 = vadd.f32 %v8683_v46, %v25687_v50  ;;  %12473 = vmatpush1.bf16.msra.mxu0 %v23432_v25  ;;  %v23452_v50 = vld [vmem:[#allocation8 + $0x25bc] ss:$72 sps:$4 sm:$0xff]   ;;  %v23453_v32 = vld [vmem:[#allocation8 + $0x2eb8] ss:$72 sps:$4 sm:$0xff]   ;;  %v23456_v37 = vld [vmem:[#allocation8 + $0x2528] ss:$72 sps:$4 sm:$0xff]  }
 0x53f   : > { %12516 = vmatpush1.bf16.msra.mxu1 %v23435_v44  ;;  %v8685_v47 = vpop.f32.mrf.mxu0  ;;  %12474 = vmatprep.subr.bf16.mxu0 %v23440_v42  ;;  %v23455_v25 = vld [vmem:[#allocation8 + $0x2ebc] ss:$72 sps:$4 sm:$0xff]   ;;  %v23450_v44 = vld [vmem:[#allocation8 + $0x25b8] ss:$72 sps:$4 sm:$0xff]   ;;  %v23458_v42 = vld [vmem:[#allocation8 + $0x252c] ss:$72 sps:$4 sm:$0xff]  }
 0x540   : > { %12517 = vmatprep.subr.bf16.mxu1 %v23443_v5  ;;  %v25862_v58 = vadd.f32 %v8726_v3, %v8684_v63  ;;  %v8686_v18 = vadd.f32 %v8685_v47, %v5075_v19  ;;  %v8728_v45 = vpop.f32.mrf.mxu1  ;;  %v23461_v5 = vld [vmem:[#allocation8 + $0x2e2c] ss:$72 sps:$4 sm:$0xff]   ;;  %v23459_v46 = vld [vmem:[#allocation8 + $0x2e28] ss:$72 sps:$4 sm:$0xff]   ;;  %v23467_v3 = vld [vmem:[#allocation8 + $0x2d9c] ss:$72 sps:$4 sm:$0xff]  }
 0x541   : > { %v23462_v19 = vld [vmem:[#allocation8 + $0x2498] ss:$72 sps:$4 sm:$0xff]   ;;  %v23473_v47 = vld [vmem:[#allocation8 + $0x2d0c] ss:$72 sps:$4 sm:$0xff]  }
 0x542   : > { %v25864_v23 = vadd.f32 %v8728_v45, %v8686_v18  ;;  %12475 = vmatpush1.bf16.msra.mxu0 %v23438_v53  ;;  %v23464_v53 = vld [vmem:[#allocation8 + $0x249c] ss:$72 sps:$4 sm:$0xff]   ;;  %v23465_v63 = vld [vmem:[#allocation8 + $0x2d98] ss:$72 sps:$4 sm:$0xff]  }
 0x543   : > { %12518 = vmatpush1.bf16.msra.mxu1 %v23441_v16  ;;  %12476 = vmatprep.subr.bf16.mxu0 %v23446_v29  ;;  %v23470_v16 = vld [vmem:[#allocation8 + $0x240c] ss:$72 sps:$4 sm:$0xff]   ;;  %v23468_v29 = vld [vmem:[#allocation8 + $0x2408] ss:$72 sps:$4 sm:$0xff]   ;;  %v23476_v18 = vld [vmem:[#allocation8 + $0x2c7c] ss:$72 sps:$4 sm:$0xff]  }
 0x544   : > { %12519 = vmatprep.subr.bf16.mxu1 %v23449_v31  ;;  %v23471_v31 = vld [vmem:[#allocation8 + $0x2d08] ss:$72 sps:$4 sm:$0xff]   ;;  %v23479_v45 = vld [vmem:[#allocation8 + $0x357c] ss:$72 sps:$4 sm:$0xff]  }
 0x546   : > { %12477 = vmatpush1.bf16.msra.mxu0 %v23444_v34  ;;  %v23474_v34 = vld [vmem:[#allocation8 + $0x2c78] ss:$72 sps:$4 sm:$0xff]  }
 0x547   : > { %12520 = vmatpush1.bf16.msra.mxu1 %v23447_v36  ;;  %12478 = vmatprep.subr.bf16.mxu0 %v23452_v50  ;;  %v23477_v36 = vld [vmem:[#allocation8 + $0x3578] ss:$72 sps:$4 sm:$0xff]   ;;  %v23482_v50 = vld [vmem:[#allocation8 + $0x2bec] ss:$72 sps:$4 sm:$0xff]  }
 0x548   : > { %12521 = vmatprep.subr.bf16.mxu1 %v23455_v25  ;;  %v23485_v25 = vld [vmem:[#allocation8 + $0x34ec] ss:$72 sps:$4 sm:$0xff]  }
 0x54a   : > { %12479 = vmatpush1.bf16.msra.mxu0 %v23450_v44  ;;  %v23480_v44 = vld [vmem:[#allocation8 + $0x2be8] ss:$72 sps:$4 sm:$0xff]  }
 0x54b   : > { %12522 = vmatpush1.bf16.msra.mxu1 %v23453_v32  ;;  %12480 = vmatprep.subr.bf16.mxu0 %v23458_v42  ;;  %v23483_v32 = vld [vmem:[#allocation8 + $0x34e8] ss:$72 sps:$4 sm:$0xff]   ;;  %v23488_v42 = vld [vmem:[#allocation8 + $0x2b5c] ss:$72 sps:$4 sm:$0xff]  }
 0x54c   : > { %12523 = vmatprep.subr.bf16.mxu1 %v23461_v5  ;;  %v23491_v5 = vld [vmem:[#allocation8 + $0x345c] ss:$72 sps:$4 sm:$0xff]  }
 0x54e   : > { %12481 = vmatpush1.bf16.msra.mxu0 %v23456_v37  ;;  %v23486_v37 = vld [vmem:[#allocation8 + $0x2b58] ss:$72 sps:$4 sm:$0xff]  }
 0x54f   : > { %12524 = vmatpush1.bf16.msra.mxu1 %v23459_v46  ;;  %12482 = vmatprep.subr.bf16.mxu0 %v23464_v53  ;;  %v23489_v46 = vld [vmem:[#allocation8 + $0x3458] ss:$72 sps:$4 sm:$0xff]   ;;  %v23494_v53 = vld [vmem:[#allocation8 + $0x2acc] ss:$72 sps:$4 sm:$0xff]  }
 0x550   : > { %12525 = vmatprep.subr.bf16.mxu1 %v23467_v3  ;;  %v23497_v3 = vld [vmem:[#allocation8 + $0x33cc] ss:$72 sps:$4 sm:$0xff]  }
 0x552   : > { %12483 = vmatpush1.bf16.msra.mxu0 %v23462_v19  ;;  %v23492_v19 = vld [vmem:[#allocation8 + $0x2ac8] ss:$72 sps:$4 sm:$0xff]  }
 0x553   : > { %12526 = vmatpush1.bf16.msra.mxu1 %v23465_v63  ;;  %12484 = vmatprep.subr.bf16.mxu0 %v23470_v16  ;;  %v23495_v63 = vld [vmem:[#allocation8 + $0x33c8] ss:$72 sps:$4 sm:$0xff]   ;;  %v23500_v16 = vld [vmem:[#allocation8 + $0x2a3c] ss:$72 sps:$4 sm:$0xff]  }
 0x554   : > { %12527 = vmatprep.subr.bf16.mxu1 %v23473_v47  ;;  %v23503_v47 = vld [vmem:[#allocation8 + $0x333c] ss:$72 sps:$4 sm:$0xff]  }
 0x556   : > { %12485 = vmatpush1.bf16.msra.mxu0 %v23468_v29  ;;  %v23498_v29 = vld [vmem:[#allocation8 + $0x2a38] ss:$72 sps:$4 sm:$0xff]  }
 0x557   : > { %12528 = vmatpush1.bf16.msra.mxu1 %v23471_v31  ;;  %12486 = vmatprep.subr.bf16.mxu0 %v23476_v18  ;;  %v23501_v31 = vld [vmem:[#allocation8 + $0x3338] ss:$72 sps:$4 sm:$0xff]   ;;  %v23506_v18 = vld [vmem:[#allocation8 + $0x29ac] ss:$72 sps:$4 sm:$0xff]  }
 0x558   : > { %12529 = vmatprep.subr.bf16.mxu1 %v23479_v45  ;;  %v23509_v45 = vld [vmem:[#allocation8 + $0x32ac] ss:$72 sps:$4 sm:$0xff]  }
 0x55a   : > { %12487 = vmatpush2.bf16.msra.mxu0 %v23474_v34  ;;  %v23504_v34 = vld [vmem:[#allocation8 + $0x29a8] ss:$72 sps:$4 sm:$0xff]  }
 0x55b   : > { %12530 = vmatpush2.bf16.msra.mxu1 %v23477_v36  ;;  %12488 = vmatprep.subr.bf16.mxu0 %v23482_v50  ;;  %v23507_v36 = vld [vmem:[#allocation8 + $0x32a8] ss:$72 sps:$4 sm:$0xff]   ;;  %v23512_v50 = vld [vmem:[#allocation8 + $0x291c] ss:$72 sps:$4 sm:$0xff]  }
 0x55c   : > { %12531 = vmatprep.subr.bf16.mxu1 %v23485_v25  ;;  %v23515_v25 = vld [vmem:[#allocation8 + $0x321c] ss:$72 sps:$4 sm:$0xff]  }
 0x55e   : > { %12489 = vmatpush2.bf16.msra.mxu0 %v23480_v44  ;;  %v23510_v44 = vld [vmem:[#allocation8 + $0x2918] ss:$72 sps:$4 sm:$0xff]  }
 0x55f   : > { %12532 = vmatpush2.bf16.msra.mxu1 %v23483_v32  ;;  %12490 = vmatprep.subr.bf16.mxu0 %v23488_v42  ;;  %v23513_v32 = vld [vmem:[#allocation8 + $0x3218] ss:$72 sps:$4 sm:$0xff]   ;;  %v23518_v42 = vld [vmem:[#allocation8 + $0x288c] ss:$72 sps:$4 sm:$0xff]  }
 0x560   : > { %12533 = vmatprep.subr.bf16.mxu1 %v23491_v5  ;;  %v23521_v5 = vld [vmem:[#allocation8 + $0x318c] ss:$72 sps:$4 sm:$0xff]  }
 0x562   : > { %12491 = vmatpush2.bf16.msra.mxu0 %v23486_v37  ;;  %v23516_v37 = vld [vmem:[#allocation8 + $0x2888] ss:$72 sps:$4 sm:$0xff]  }
 0x563   : > { %12534 = vmatpush2.bf16.msra.mxu1 %v23489_v46  ;;  %12492 = vmatprep.subr.bf16.mxu0 %v23494_v53  ;;  %v23519_v46 = vld [vmem:[#allocation8 + $0x3188] ss:$72 sps:$4 sm:$0xff]   ;;  %v23524_v53 = vld [vmem:[#allocation8 + $0x2804] ss:$72 sps:$4 sm:$0xff]  }
 0x564   : > { %12535 = vmatprep.subr.bf16.mxu1 %v23497_v3  ;;  %v23527_v3 = vld [vmem:[#allocation8 + $0x3104] ss:$72 sps:$4 sm:$0xff]  }
 0x566   : > { %12493 = vmatpush2.bf16.msra.mxu0 %v23492_v19  ;;  %v23522_v19 = vld [vmem:[#allocation8 + $0x2800] ss:$72 sps:$4 sm:$0xff]  }
 0x567   : > { %12536 = vmatpush2.bf16.msra.mxu1 %v23495_v63  ;;  %12494 = vmatprep.subr.bf16.mxu0 %v23500_v16  ;;  %v23525_v63 = vld [vmem:[#allocation8 + $0x3100] ss:$72 sps:$4 sm:$0xff]   ;;  %v23530_v16 = vld [vmem:[#allocation8 + $0x2774] ss:$72 sps:$4 sm:$0xff]  }
 0x568   : > { %12537 = vmatprep.subr.bf16.mxu1 %v23503_v47  ;;  %v23533_v47 = vld [vmem:[#allocation8 + $0x3074] ss:$72 sps:$4 sm:$0xff]  }
 0x56a   : > { %12495 = vmatpush2.bf16.msra.mxu0 %v23498_v29 }
 0x56b   : > { %12538 = vmatpush2.bf16.msra.mxu1 %v23501_v31  ;;  %12496 = vmatprep.subr.bf16.mxu0 %v23506_v18 }
 0x56c   : > { %12539 = vmatprep.subr.bf16.mxu1 %v23509_v45  ;;  %v23528_v45 = vld [vmem:[#allocation8 + $0x2770] ss:$72 sps:$4 sm:$0xff]  }
 0x56e   : > { %12497 = vmatpush2.bf16.msra.mxu0 %v23504_v34  ;;  %v23531_v34 = vld [vmem:[#allocation8 + $0x3070] ss:$72 sps:$4 sm:$0xff]  }
 0x56f   : > { %12540 = vmatpush2.bf16.msra.mxu1 %v23507_v36  ;;  %12498 = vmatprep.subr.bf16.mxu0 %v23512_v50 }
 0x570   : > { %12541 = vmatprep.subr.bf16.mxu1 %v23515_v25  ;;  %v23536_v25 = vld [vmem:[#allocation8 + $0x26e4] ss:$72 sps:$4 sm:$0xff]  }
 0x572   : > { %12499 = vmatpush2.bf16.msra.mxu0 %v23510_v44  ;;  %v23539_v44 = vld [vmem:[#allocation8 + $0x2fe4] ss:$72 sps:$4 sm:$0xff]  }
 0x573   : > { %12542 = vmatpush2.bf16.msra.mxu1 %v23513_v32  ;;  %12500 = vmatprep.subr.bf16.mxu0 %v23518_v42 }
 0x574   : > { %12543 = vmatprep.subr.bf16.mxu1 %v23521_v5 }
 0x576   : > { %12501 = vmatpush2.bf16.msra.mxu0 %v23516_v37  ;;  %v5161_v37 = vadd.f32 %v25705_v7, %v25703_v6  ;;  %v23540_v6 = vld [vmem:[#allocation8 + $0x2650] ss:$72 sps:$4 sm:$0xff]  }
 0x577   : > { %12544 = vmatpush2.bf16.msra.mxu1 %v23519_v46  ;;  %12556 = vmatprep.subr.bf16.mxu0 %v23524_v53  ;;  %v23543_v7 = vld [vmem:[#allocation8 + $0x2f50] ss:$72 sps:$4 sm:$0xff]  }
 0x578   : > { %12599 = vmatprep.subr.bf16.mxu1 %v23527_v3  ;;  %v23534_v3 = vld [vmem:[#allocation8 + $0x26e0] ss:$72 sps:$4 sm:$0xff]  }
 0x579   : > { %v8765_v29 = vpop.f32.mrf.mxu0  ;;  %12503 = vmatmul.mubr.bf16.vlgmr.msra.gmra.mxu0 %v25844_v43 }
 0x57a   : > { %v8808_v31 = vpop.f32.mrf.mxu1  ;;  %12546 = vmatmul.mubr.bf16.vlgmr.msra.gmra.mxu1 %v25847_v11  ;;  %v8766_v18 = vadd.f32 %v8765_v29, %v25695_v52  ;;  %12557 = vmatpush1.bf16.msra.mxu0 %v23522_v19  ;;  %v23537_v19 = vld [vmem:[#allocation8 + $0x2fe0] ss:$72 sps:$4 sm:$0xff]  }
 0x57b   : > { %12600 = vmatpush1.bf16.msra.mxu1 %v23525_v63  ;;  %v8767_v36 = vpop.f32.mrf.mxu0  ;;  %12558 = vmatprep.subr.bf16.mxu0 %v23530_v16  ;;  %v23545_v16 = vld [vmem:[#allocation8 + $0x2f54] ss:$72 sps:$4 sm:$0xff]  }
 0x57c   : > { %v8810_v50 = vpop.f32.mrf.mxu1  ;;  %12601 = vmatprep.subr.bf16.mxu1 %v23533_v47  ;;  %v25869_v32 = vadd.f32 %v8808_v31, %v8766_v18  ;;  %v8768_v42 = vadd.f32 %v8767_v36, %v25697_v51  ;;  %12588 = vmatprep.mubr.bf16.mxu0 %v25819_v38  ;;  %v23542_v51 = vld [vmem:[#allocation8 + $0x2654] ss:$72 sps:$4 sm:$0xff]   ;;  %v23549_v36 = vld [vmem:[#allocation8 + $0x2ec0] ss:$72 sps:$4 sm:$0xff]  }
 0x57d   : > { %12631 = vmatprep.mubr.bf16.mxu1 %v25822_v1  ;;  %v8769_v5 = vpop.f32.mrf.mxu0 }
 0x57e   : > { %v8812_v52 = vpop.f32.mrf.mxu1  ;;  %v25876_v46 = vadd.f32 %v8810_v50, %v8768_v42  ;;  %v8770_v53 = vadd.f32 %v8769_v5, %v25701_v40  ;;  %12559 = vmatpush1.bf16.msra.mxu0 %v23528_v45  ;;  %v23548_v40 = vld [vmem:[#allocation8 + $0x25c4] ss:$72 sps:$4 sm:$0xff]   ;;  %v23554_v50 = vld [vmem:[#allocation8 + $0x2534] ss:$72 sps:$4 sm:$0xff]   ;;  %v23555_v42 = vld [vmem:[#allocation8 + $0x2e30] ss:$72 sps:$4 sm:$0xff]  }
 0x57f   : > { %12602 = vmatpush1.bf16.msra.mxu1 %v23531_v34  ;;  %v8771_v63 = vpop.f32.mrf.mxu0  ;;  %12560 = vmatprep.subr.bf16.mxu0 %v23536_v25  ;;  %v23551_v45 = vld [vmem:[#allocation8 + $0x2ec4] ss:$72 sps:$4 sm:$0xff]   ;;  %v23546_v34 = vld [vmem:[#allocation8 + $0x25c0] ss:$72 sps:$4 sm:$0xff]   ;;  %v23557_v25 = vld [vmem:[#allocation8 + $0x2e34] ss:$72 sps:$4 sm:$0xff]  }
 0x580   : > { %12603 = vmatprep.subr.bf16.mxu1 %v23539_v44  ;;  %v25879_v47 = vadd.f32 %v8812_v52, %v8770_v53  ;;  %v8772_v29 = vadd.f32 %v8771_v63, %v5161_v37  ;;  %v8814_v31 = vpop.f32.mrf.mxu1  ;;  %v23552_v44 = vld [vmem:[#allocation8 + $0x2530] ss:$72 sps:$4 sm:$0xff]   ;;  %v23560_v5 = vld [vmem:[#allocation8 + $0x24a4] ss:$72 sps:$4 sm:$0xff]   ;;  %v23558_v37 = vld [vmem:[#allocation8 + $0x24a0] ss:$72 sps:$4 sm:$0xff]  }
 0x581   : > { %v23563_v52 = vld [vmem:[#allocation8 + $0x2da4] ss:$72 sps:$4 sm:$0xff]   ;;  %v23561_v53 = vld [vmem:[#allocation8 + $0x2da0] ss:$72 sps:$4 sm:$0xff]   ;;  %v23564_v63 = vld [vmem:[#allocation8 + $0x2410] ss:$72 sps:$4 sm:$0xff]  }
 0x582   : > { %v25881_v18 = vadd.f32 %v8814_v31, %v8772_v29  ;;  %12561 = vmatpush1.bf16.msra.mxu0 %v23534_v3  ;;  %v23566_v3 = vld [vmem:[#allocation8 + $0x2414] ss:$72 sps:$4 sm:$0xff]   ;;  %v23575_v29 = vld [vmem:[#allocation8 + $0x3584] ss:$72 sps:$4 sm:$0xff]   ;;  %v23570_v31 = vld [vmem:[#allocation8 + $0x2c80] ss:$72 sps:$4 sm:$0xff]  }
 0x583   : > { %12604 = vmatpush1.bf16.msra.mxu1 %v23537_v19  ;;  %12562 = vmatprep.subr.bf16.mxu0 %v23542_v51  ;;  %v23569_v19 = vld [vmem:[#allocation8 + $0x2d14] ss:$72 sps:$4 sm:$0xff]   ;;  %v23567_v51 = vld [vmem:[#allocation8 + $0x2d10] ss:$72 sps:$4 sm:$0xff]  }
 0x584   : > { %12605 = vmatprep.subr.bf16.mxu1 %v23545_v16  ;;  %v23572_v16 = vld [vmem:[#allocation8 + $0x2c84] ss:$72 sps:$4 sm:$0xff]  }
 0x586   : > { %12563 = vmatpush1.bf16.msra.mxu0 %v23540_v6  ;;  %v23573_v6 = vld [vmem:[#allocation8 + $0x3580] ss:$72 sps:$4 sm:$0xff]  }
 0x587   : > { %12606 = vmatpush1.bf16.msra.mxu1 %v23543_v7  ;;  %12564 = vmatprep.subr.bf16.mxu0 %v23548_v40  ;;  %v23578_v7 = vld [vmem:[#allocation8 + $0x2bf4] ss:$72 sps:$4 sm:$0xff]  }
 0x588   : > { %12607 = vmatprep.subr.bf16.mxu1 %v23551_v45  ;;  %v23581_v40 = vld [vmem:[#allocation8 + $0x34f4] ss:$72 sps:$4 sm:$0xff]   ;;  %v23576_v45 = vld [vmem:[#allocation8 + $0x2bf0] ss:$72 sps:$4 sm:$0xff]  }
 0x58a   : > { %12565 = vmatpush1.bf16.msra.mxu0 %v23546_v34  ;;  %v23579_v34 = vld [vmem:[#allocation8 + $0x34f0] ss:$72 sps:$4 sm:$0xff]  }
 0x58b   : > { %12608 = vmatpush1.bf16.msra.mxu1 %v23549_v36  ;;  %12566 = vmatprep.subr.bf16.mxu0 %v23554_v50  ;;  %v23584_v36 = vld [vmem:[#allocation8 + $0x2b64] ss:$72 sps:$4 sm:$0xff]  }
 0x58c   : > { %12609 = vmatprep.subr.bf16.mxu1 %v23557_v25  ;;  %v23587_v50 = vld [vmem:[#allocation8 + $0x3464] ss:$72 sps:$4 sm:$0xff]   ;;  %v23582_v25 = vld [vmem:[#allocation8 + $0x2b60] ss:$72 sps:$4 sm:$0xff]  }
 0x58e   : > { %12567 = vmatpush1.bf16.msra.mxu0 %v23552_v44  ;;  %v23585_v44 = vld [vmem:[#allocation8 + $0x3460] ss:$72 sps:$4 sm:$0xff]  }
 0x58f   : > { %12610 = vmatpush1.bf16.msra.mxu1 %v23555_v42  ;;  %12568 = vmatprep.subr.bf16.mxu0 %v23560_v5  ;;  %v23590_v42 = vld [vmem:[#allocation8 + $0x2ad4] ss:$72 sps:$4 sm:$0xff]  }
 0x590   : > { %12611 = vmatprep.subr.bf16.mxu1 %v23563_v52  ;;  %v23593_v5 = vld [vmem:[#allocation8 + $0x33d4] ss:$72 sps:$4 sm:$0xff]   ;;  %v23588_v52 = vld [vmem:[#allocation8 + $0x2ad0] ss:$72 sps:$4 sm:$0xff]  }
 0x592   : > { %12569 = vmatpush1.bf16.msra.mxu0 %v23558_v37  ;;  %v23591_v37 = vld [vmem:[#allocation8 + $0x33d0] ss:$72 sps:$4 sm:$0xff]  }
 0x593   : > { %12612 = vmatpush1.bf16.msra.mxu1 %v23561_v53  ;;  %12570 = vmatprep.subr.bf16.mxu0 %v23566_v3  ;;  %v23596_v53 = vld [vmem:[#allocation8 + $0x2a44] ss:$72 sps:$4 sm:$0xff]  }
 0x594   : > { %12613 = vmatprep.subr.bf16.mxu1 %v23569_v19  ;;  %v23599_v3 = vld [vmem:[#allocation8 + $0x3344] ss:$72 sps:$4 sm:$0xff]   ;;  %v23594_v19 = vld [vmem:[#allocation8 + $0x2a40] ss:$72 sps:$4 sm:$0xff]  }
 0x596   : > { %12571 = vmatpush1.bf16.msra.mxu0 %v23564_v63  ;;  %v23597_v63 = vld [vmem:[#allocation8 + $0x3340] ss:$72 sps:$4 sm:$0xff]  }
 0x597   : > { %12614 = vmatpush1.bf16.msra.mxu1 %v23567_v51  ;;  %12572 = vmatprep.subr.bf16.mxu0 %v23572_v16  ;;  %v23602_v51 = vld [vmem:[#allocation8 + $0x29b4] ss:$72 sps:$4 sm:$0xff]  }
 0x598   : > { %12615 = vmatprep.subr.bf16.mxu1 %v23575_v29  ;;  %v23605_v16 = vld [vmem:[#allocation8 + $0x32b4] ss:$72 sps:$4 sm:$0xff]   ;;  %v23600_v29 = vld [vmem:[#allocation8 + $0x29b0] ss:$72 sps:$4 sm:$0xff]  }
 0x59a   : > { %12573 = vmatpush2.bf16.msra.mxu0 %v23570_v31  ;;  %v23603_v31 = vld [vmem:[#allocation8 + $0x32b0] ss:$72 sps:$4 sm:$0xff]  }
 0x59b   : > { %12616 = vmatpush2.bf16.msra.mxu1 %v23573_v6  ;;  %12574 = vmatprep.subr.bf16.mxu0 %v23578_v7  ;;  %v23608_v6 = vld [vmem:[#allocation8 + $0x2924] ss:$72 sps:$4 sm:$0xff]  }
 0x59c   : > { %12617 = vmatprep.subr.bf16.mxu1 %v23581_v40  ;;  %v23611_v7 = vld [vmem:[#allocation8 + $0x3224] ss:$72 sps:$4 sm:$0xff]   ;;  %v23606_v40 = vld [vmem:[#allocation8 + $0x2920] ss:$72 sps:$4 sm:$0xff]  }
 0x59e   : > { %12575 = vmatpush2.bf16.msra.mxu0 %v23576_v45  ;;  %v23609_v45 = vld [vmem:[#allocation8 + $0x3220] ss:$72 sps:$4 sm:$0xff]  }
 0x59f   : > { %12618 = vmatpush2.bf16.msra.mxu1 %v23579_v34  ;;  %12576 = vmatprep.subr.bf16.mxu0 %v23584_v36  ;;  %v23614_v34 = vld [vmem:[#allocation8 + $0x2894] ss:$72 sps:$4 sm:$0xff]  }
 0x5a0   : > { %12619 = vmatprep.subr.bf16.mxu1 %v23587_v50  ;;  %v23617_v36 = vld [vmem:[#allocation8 + $0x3194] ss:$72 sps:$4 sm:$0xff]   ;;  %v23612_v50 = vld [vmem:[#allocation8 + $0x2890] ss:$72 sps:$4 sm:$0xff]  }
 0x5a2   : > { %12577 = vmatpush2.bf16.msra.mxu0 %v23582_v25  ;;  %v23615_v25 = vld [vmem:[#allocation8 + $0x3190] ss:$72 sps:$4 sm:$0xff]  }
 0x5a3   : > { %12620 = vmatpush2.bf16.msra.mxu1 %v23585_v44  ;;  %12578 = vmatprep.subr.bf16.mxu0 %v23590_v42  ;;  %v23620_v44 = vld [vmem:[#allocation8 + $0x280c] ss:$72 sps:$4 sm:$0xff]  }
 0x5a4   : > { %12621 = vmatprep.subr.bf16.mxu1 %v23593_v5  ;;  %v23623_v42 = vld [vmem:[#allocation8 + $0x310c] ss:$72 sps:$4 sm:$0xff]   ;;  %v23618_v5 = vld [vmem:[#allocation8 + $0x2808] ss:$72 sps:$4 sm:$0xff]  }
 0x5a6   : > { %12579 = vmatpush2.bf16.msra.mxu0 %v23588_v52  ;;  %v23621_v52 = vld [vmem:[#allocation8 + $0x3108] ss:$72 sps:$4 sm:$0xff]  }
 0x5a7   : > { %12622 = vmatpush2.bf16.msra.mxu1 %v23591_v37  ;;  %12580 = vmatprep.subr.bf16.mxu0 %v23596_v53  ;;  %v23626_v37 = vld [vmem:[#allocation8 + $0x277c] ss:$72 sps:$4 sm:$0xff]  }
 0x5a8   : > { %12623 = vmatprep.subr.bf16.mxu1 %v23599_v3  ;;  %v23629_v53 = vld [vmem:[#allocation8 + $0x307c] ss:$72 sps:$4 sm:$0xff]  }
 0x5aa   : > { %12581 = vmatpush2.bf16.msra.mxu0 %v23594_v19 }
 0x5ab   : > { %12624 = vmatpush2.bf16.msra.mxu1 %v23597_v63  ;;  %12582 = vmatprep.subr.bf16.mxu0 %v23602_v51  ;;  %v5243_v63 = vadd.f32 %v25713_v12, %v25711_v35 }
 0x5ac   : > { %12625 = vmatprep.subr.bf16.mxu1 %v23605_v16  ;;  %v23624_v16 = vld [vmem:[#allocation8 + $0x2778] ss:$72 sps:$4 sm:$0xff]  }
 0x5ae   : > { %12583 = vmatpush2.bf16.msra.mxu0 %v23600_v29  ;;  %v23627_v29 = vld [vmem:[#allocation8 + $0x3078] ss:$72 sps:$4 sm:$0xff]  }
 0x5af   : > { %12626 = vmatpush2.bf16.msra.mxu1 %v23603_v31  ;;  %12584 = vmatprep.subr.bf16.mxu0 %v23608_v6 }
 0x5b0   : > { %12627 = vmatprep.subr.bf16.mxu1 %v23611_v7  ;;  %v23632_v7 = vld [vmem:[#allocation8 + $0x26ec] ss:$72 sps:$4 sm:$0xff]  }
 0x5b2   : > { %12585 = vmatpush2.bf16.msra.mxu0 %v23606_v40  ;;  %v23635_v40 = vld [vmem:[#allocation8 + $0x2fec] ss:$72 sps:$4 sm:$0xff]  }
 0x5b3   : > { %12628 = vmatpush2.bf16.msra.mxu1 %v23609_v45  ;;  %12586 = vmatprep.subr.bf16.mxu0 %v23614_v34 }
 0x5b4   : > { %12629 = vmatprep.subr.bf16.mxu1 %v23617_v36 }
 0x5b6   : > { %12587 = vmatpush2.bf16.msra.mxu0 %v23612_v50 }
 0x5b7   : > { %12630 = vmatpush2.bf16.msra.mxu1 %v23615_v25  ;;  %12642 = vmatprep.subr.bf16.mxu0 %v23620_v44  ;;  %v23630_v25 = vld [vmem:[#allocation8 + $0x26e8] ss:$72 sps:$4 sm:$0xff]  }
 0x5b8   : > { %12685 = vmatprep.subr.bf16.mxu1 %v23623_v42  ;;  %v23633_v44 = vld [vmem:[#allocation8 + $0x2fe8] ss:$72 sps:$4 sm:$0xff]  }
 0x5b9   : > { %v8851_v3 = vpop.f32.mrf.mxu0  ;;  %12589 = vmatmul.mubr.bf16.vlgmr.msra.gmra.mxu0 %v25844_v43 }
 0x5ba   : > { %v8894_v19 = vpop.f32.mrf.mxu1  ;;  %12632 = vmatmul.mubr.bf16.vlgmr.msra.gmra.mxu1 %v25847_v11  ;;  %v8852_v51 = vadd.f32 %v8851_v3, %v25709_v21  ;;  %12643 = vmatpush1.bf16.msra.mxu0 %v23618_v5  ;;  %v5247_v21 = vadd.f32 %v25721_v30, %v25719_v0  ;;  %v23638_v5 = vld [vmem:[#allocation8 + $0x265c] ss:$72 sps:$4 sm:$0xff]   ;;  %v23636_v0 = vld [vmem:[#allocation8 + $0x2658] ss:$72 sps:$4 sm:$0xff]  }
 0x5bb   : > { %12686 = vmatpush1.bf16.msra.mxu1 %v23621_v52  ;;  %v8853_v31 = vpop.f32.mrf.mxu0  ;;  %12644 = vmatprep.subr.bf16.mxu0 %v23626_v37  ;;  %v23641_v52 = vld [vmem:[#allocation8 + $0x2f5c] ss:$72 sps:$4 sm:$0xff]   ;;  %v23639_v30 = vld [vmem:[#allocation8 + $0x2f58] ss:$72 sps:$4 sm:$0xff]  }
 0x5bc   : > { %v8896_v6 = vpop.f32.mrf.mxu1  ;;  %12687 = vmatprep.subr.bf16.mxu1 %v23629_v53  ;;  %v25888_v45 = vadd.f32 %v8894_v19, %v8852_v51  ;;  %v8854_v34 = vadd.f32 %v8853_v31, %v5243_v63  ;;  %12674 = vmatprep.mubr.bf16.mxu0 %v25819_v38  ;;  %v23647_v63 = vld [vmem:[#allocation8 + $0x2ecc] ss:$72 sps:$4 sm:$0xff]   ;;  %v23642_v51 = vld [vmem:[#allocation8 + $0x25c8] ss:$72 sps:$4 sm:$0xff]   ;;  %v23653_v31 = vld [vmem:[#allocation8 + $0x2e3c] ss:$72 sps:$4 sm:$0xff]  }
 0x5bd   : > { %12717 = vmatprep.mubr.bf16.mxu1 %v25822_v1  ;;  %v8855_v35 = vpop.f32.mrf.mxu0 }
 0x5be   : > { %v8898_v12 = vpop.f32.mrf.mxu1  ;;  %v25894_v36 = vadd.f32 %v8896_v6, %v8854_v34  ;;  %v8856_v50 = vadd.f32 %v8855_v35, %v25717_v9  ;;  %12645 = vmatpush1.bf16.msra.mxu0 %v23624_v16  ;;  %v23644_v9 = vld [vmem:[#allocation8 + $0x25cc] ss:$72 sps:$4 sm:$0xff]   ;;  %v23645_v16 = vld [vmem:[#allocation8 + $0x2ec8] ss:$72 sps:$4 sm:$0xff]   ;;  %v23648_v6 = vld [vmem:[#allocation8 + $0x2538] ss:$72 sps:$4 sm:$0xff]  }
 0x5bf   : > { %12688 = vmatpush1.bf16.msra.mxu1 %v23627_v29  ;;  %v8857_v42 = vpop.f32.mrf.mxu0  ;;  %12646 = vmatprep.subr.bf16.mxu0 %v23632_v7  ;;  %v23650_v29 = vld [vmem:[#allocation8 + $0x253c] ss:$72 sps:$4 sm:$0xff]   ;;  %v23651_v7 = vld [vmem:[#allocation8 + $0x2e38] ss:$72 sps:$4 sm:$0xff]   ;;  %v23659_v34 = vld [vmem:[#allocation8 + $0x2dac] ss:$72 sps:$4 sm:$0xff]  }
 0x5c0   : > { %12689 = vmatprep.subr.bf16.mxu1 %v23635_v40  ;;  %v25897_v37 = vadd.f32 %v8898_v12, %v8856_v50  ;;  %v8858_v53 = vadd.f32 %v8857_v42, %v5247_v21  ;;  %v8900_v3 = vpop.f32.mrf.mxu1  ;;  %v23656_v40 = vld [vmem:[#allocation8 + $0x24ac] ss:$72 sps:$4 sm:$0xff]   ;;  %v23654_v35 = vld [vmem:[#allocation8 + $0x24a8] ss:$72 sps:$4 sm:$0xff]   ;;  %v23662_v21 = vld [vmem:[#allocation8 + $0x241c] ss:$72 sps:$4 sm:$0xff]  }
 0x5c1   : > { %v23657_v12 = vld [vmem:[#allocation8 + $0x2da8] ss:$72 sps:$4 sm:$0xff]   ;;  %v23665_v50 = vld [vmem:[#allocation8 + $0x2d1c] ss:$72 sps:$4 sm:$0xff]   ;;  %v23668_v42 = vld [vmem:[#allocation8 + $0x2c8c] ss:$72 sps:$4 sm:$0xff]  }
 0x5c2   : > { %v25899_v19 = vadd.f32 %v8900_v3, %v8858_v53  ;;  %12647 = vmatpush1.bf16.msra.mxu0 %v23630_v25  ;;  %v23660_v25 = vld [vmem:[#allocation8 + $0x2418] ss:$72 sps:$4 sm:$0xff]   ;;  %v23669_v53 = vld [vmem:[#allocation8 + $0x3588] ss:$72 sps:$4 sm:$0xff]   ;;  %v23674_v3 = vld [vmem:[#allocation8 + $0x2bfc] ss:$72 sps:$4 sm:$0xff]  }
 0x5c3   : > { %12690 = vmatpush1.bf16.msra.mxu1 %v23633_v44  ;;  %12648 = vmatprep.subr.bf16.mxu0 %v23638_v5  ;;  %v23663_v44 = vld [vmem:[#allocation8 + $0x2d18] ss:$72 sps:$4 sm:$0xff]   ;;  %v23671_v5 = vld [vmem:[#allocation8 + $0x358c] ss:$72 sps:$4 sm:$0xff]  }
 0x5c4   : > { %12691 = vmatprep.subr.bf16.mxu1 %v23641_v52  ;;  %v23666_v52 = vld [vmem:[#allocation8 + $0x2c88] ss:$72 sps:$4 sm:$0xff]  }
 0x5c6   : > { %12649 = vmatpush1.bf16.msra.mxu0 %v23636_v0  ;;  %v23677_v0 = vld [vmem:[#allocation8 + $0x34fc] ss:$72 sps:$4 sm:$0xff]  }
 0x5c7   : > { %12692 = vmatpush1.bf16.msra.mxu1 %v23639_v30  ;;  %12650 = vmatprep.subr.bf16.mxu0 %v23644_v9  ;;  %v23672_v30 = vld [vmem:[#allocation8 + $0x2bf8] ss:$72 sps:$4 sm:$0xff]  }
 0x5c8   : > { %12693 = vmatprep.subr.bf16.mxu1 %v23647_v63  ;;  %v23675_v9 = vld [vmem:[#allocation8 + $0x34f8] ss:$72 sps:$4 sm:$0xff]   ;;  %v23680_v63 = vld [vmem:[#allocation8 + $0x2b6c] ss:$72 sps:$4 sm:$0xff]  }
 0x5ca   : > { %12651 = vmatpush1.bf16.msra.mxu0 %v23642_v51  ;;  %v23683_v51 = vld [vmem:[#allocation8 + $0x346c] ss:$72 sps:$4 sm:$0xff]  }
 0x5cb   : > { %12694 = vmatpush1.bf16.msra.mxu1 %v23645_v16  ;;  %12652 = vmatprep.subr.bf16.mxu0 %v23650_v29  ;;  %v23678_v16 = vld [vmem:[#allocation8 + $0x2b68] ss:$72 sps:$4 sm:$0xff]  }
 0x5cc   : > { %12695 = vmatprep.subr.bf16.mxu1 %v23653_v31  ;;  %v23681_v29 = vld [vmem:[#allocation8 + $0x3468] ss:$72 sps:$4 sm:$0xff]   ;;  %v23686_v31 = vld [vmem:[#allocation8 + $0x2adc] ss:$72 sps:$4 sm:$0xff]  }
 0x5ce   : > { %12653 = vmatpush1.bf16.msra.mxu0 %v23648_v6  ;;  %v23689_v6 = vld [vmem:[#allocation8 + $0x33dc] ss:$72 sps:$4 sm:$0xff]  }
 0x5cf   : > { %12696 = vmatpush1.bf16.msra.mxu1 %v23651_v7  ;;  %12654 = vmatprep.subr.bf16.mxu0 %v23656_v40  ;;  %v23684_v7 = vld [vmem:[#allocation8 + $0x2ad8] ss:$72 sps:$4 sm:$0xff]  }
 0x5d0   : > { %12697 = vmatprep.subr.bf16.mxu1 %v23659_v34  ;;  %v23687_v40 = vld [vmem:[#allocation8 + $0x33d8] ss:$72 sps:$4 sm:$0xff]   ;;  %v23692_v34 = vld [vmem:[#allocation8 + $0x2a4c] ss:$72 sps:$4 sm:$0xff]  }
 0x5d2   : > { %12655 = vmatpush1.bf16.msra.mxu0 %v23654_v35  ;;  %v23695_v35 = vld [vmem:[#allocation8 + $0x334c] ss:$72 sps:$4 sm:$0xff]  }
 0x5d3   : > { %12698 = vmatpush1.bf16.msra.mxu1 %v23657_v12  ;;  %12656 = vmatprep.subr.bf16.mxu0 %v23662_v21  ;;  %v23690_v12 = vld [vmem:[#allocation8 + $0x2a48] ss:$72 sps:$4 sm:$0xff]  }
 0x5d4   : > { %12699 = vmatprep.subr.bf16.mxu1 %v23665_v50  ;;  %v23693_v21 = vld [vmem:[#allocation8 + $0x3348] ss:$72 sps:$4 sm:$0xff]   ;;  %v23698_v50 = vld [vmem:[#allocation8 + $0x29bc] ss:$72 sps:$4 sm:$0xff]  }
 0x5d6   : > { %12657 = vmatpush1.bf16.msra.mxu0 %v23660_v25  ;;  %v23701_v25 = vld [vmem:[#allocation8 + $0x32bc] ss:$72 sps:$4 sm:$0xff]  }
 0x5d7   : > { %12700 = vmatpush1.bf16.msra.mxu1 %v23663_v44  ;;  %12658 = vmatprep.subr.bf16.mxu0 %v23668_v42  ;;  %v23696_v44 = vld [vmem:[#allocation8 + $0x29b8] ss:$72 sps:$4 sm:$0xff]  }
 0x5d8   : > { %12701 = vmatprep.subr.bf16.mxu1 %v23671_v5  ;;  %v23699_v42 = vld [vmem:[#allocation8 + $0x32b8] ss:$72 sps:$4 sm:$0xff]   ;;  %v23704_v5 = vld [vmem:[#allocation8 + $0x292c] ss:$72 sps:$4 sm:$0xff]  }
 0x5da   : > { %12659 = vmatpush2.bf16.msra.mxu0 %v23666_v52  ;;  %v23707_v52 = vld [vmem:[#allocation8 + $0x322c] ss:$72 sps:$4 sm:$0xff]  }
 0x5db   : > { %12702 = vmatpush2.bf16.msra.mxu1 %v23669_v53  ;;  %12660 = vmatprep.subr.bf16.mxu0 %v23674_v3  ;;  %v23702_v53 = vld [vmem:[#allocation8 + $0x2928] ss:$72 sps:$4 sm:$0xff]  }
 0x5dc   : > { %12703 = vmatprep.subr.bf16.mxu1 %v23677_v0  ;;  %v23705_v3 = vld [vmem:[#allocation8 + $0x3228] ss:$72 sps:$4 sm:$0xff]   ;;  %v23710_v0 = vld [vmem:[#allocation8 + $0x289c] ss:$72 sps:$4 sm:$0xff]  }
 0x5de   : > { %12661 = vmatpush2.bf16.msra.mxu0 %v23672_v30  ;;  %v23713_v30 = vld [vmem:[#allocation8 + $0x319c] ss:$72 sps:$4 sm:$0xff]  }
 0x5df   : > { %12704 = vmatpush2.bf16.msra.mxu1 %v23675_v9  ;;  %12662 = vmatprep.subr.bf16.mxu0 %v23680_v63  ;;  %v23708_v9 = vld [vmem:[#allocation8 + $0x2898] ss:$72 sps:$4 sm:$0xff]  }
 0x5e0   : > { %12705 = vmatprep.subr.bf16.mxu1 %v23683_v51  ;;  %v23711_v63 = vld [vmem:[#allocation8 + $0x3198] ss:$72 sps:$4 sm:$0xff]   ;;  %v23716_v51 = vld [vmem:[#allocation8 + $0x2814] ss:$72 sps:$4 sm:$0xff]  }
 0x5e2   : > { %12663 = vmatpush2.bf16.msra.mxu0 %v23678_v16  ;;  %v23719_v16 = vld [vmem:[#allocation8 + $0x3114] ss:$72 sps:$4 sm:$0xff]  }
 0x5e3   : > { %12706 = vmatpush2.bf16.msra.mxu1 %v23681_v29  ;;  %12664 = vmatprep.subr.bf16.mxu0 %v23686_v31  ;;  %v23714_v29 = vld [vmem:[#allocation8 + $0x2810] ss:$72 sps:$4 sm:$0xff]  }
 0x5e4   : > { %12707 = vmatprep.subr.bf16.mxu1 %v23689_v6  ;;  %v23717_v31 = vld [vmem:[#allocation8 + $0x3110] ss:$72 sps:$4 sm:$0xff]   ;;  %v23722_v6 = vld [vmem:[#allocation8 + $0x2784] ss:$72 sps:$4 sm:$0xff]  }
 0x5e6   : > { %12665 = vmatpush2.bf16.msra.mxu0 %v23684_v7  ;;  %v23725_v7 = vld [vmem:[#allocation8 + $0x3084] ss:$72 sps:$4 sm:$0xff]  }
 0x5e7   : > { %12708 = vmatpush2.bf16.msra.mxu1 %v23687_v40  ;;  %12666 = vmatprep.subr.bf16.mxu0 %v23692_v34  ;;  %v8166_v40 = vadd.f32 %v25726_v62, %v25599_v57 }
 0x5e8   : > { %12709 = vmatprep.subr.bf16.mxu1 %v23695_v35 }
 0x5ea   : > { %12667 = vmatpush2.bf16.msra.mxu0 %v23690_v12 }
 0x5eb   : > { %12710 = vmatpush2.bf16.msra.mxu1 %v23693_v21  ;;  %12668 = vmatprep.subr.bf16.mxu0 %v23698_v50  ;;  %v23720_v21 = vld [vmem:[#allocation8 + $0x2780] ss:$72 sps:$4 sm:$0xff]  }
 0x5ec   : > { %12711 = vmatprep.subr.bf16.mxu1 %v23701_v25  ;;  %v23723_v50 = vld [vmem:[#allocation8 + $0x3080] ss:$72 sps:$4 sm:$0xff]  }
 0x5ee   : > { %12669 = vmatpush2.bf16.msra.mxu0 %v23696_v44 }
 0x5ef   : > { %12712 = vmatpush2.bf16.msra.mxu1 %v23699_v42  ;;  %12670 = vmatprep.subr.bf16.mxu0 %v23704_v5  ;;  %v23728_v42 = vld [vmem:[#allocation8 + $0x26f4] ss:$72 sps:$4 sm:$0xff]  }
 0x5f0   : > { %12713 = vmatprep.subr.bf16.mxu1 %v23707_v52  ;;  %v23731_v5 = vld [vmem:[#allocation8 + $0x2ff4] ss:$72 sps:$4 sm:$0xff]   ;;  %v8209_v52 = vadd.f32 %v25728_v28, %v8166_v40  ;;  %v23734_v28 = vld [vmem:[#allocation8 + $0x2664] ss:$72 sps:$4 sm:$0xff]  }
 0x5f1   : > { %v23740_v40 = vld [vmem:[#allocation8 + $0x25d4] ss:$72 sps:$4 sm:$0xff]  }
 0x5f2   : > { %12671 = vmatpush2.bf16.msra.mxu0 %v23702_v53 }
 0x5f3   : > { %12714 = vmatpush2.bf16.msra.mxu1 %v23705_v3  ;;  %12672 = vmatprep.subr.bf16.mxu0 %v23710_v0 }
 0x5f4   : > { %12715 = vmatprep.subr.bf16.mxu1 %v23713_v30 }
 0x5f6   : > { %12673 = vmatpush2.bf16.msra.mxu0 %v23708_v9  ;;  %v23726_v9 = vld [vmem:[#allocation8 + $0x26f0] ss:$72 sps:$4 sm:$0xff]  }
 0x5f7   : > { %12716 = vmatpush2.bf16.msra.mxu1 %v23711_v63  ;;  %12728 = vmatprep.subr.bf16.mxu0 %v23716_v51  ;;  %v23729_v63 = vld [vmem:[#allocation8 + $0x2ff0] ss:$72 sps:$4 sm:$0xff]  }
 0x5f8   : > { %12771 = vmatprep.subr.bf16.mxu1 %v23719_v16 }
 0x5f9   : > { %v12418_v34 = vpop.f32.mrf.mxu0  ;;  %12675 = vmatmul.mubr.bf16.vlgmr.msra.gmra.mxu0 %v25844_v43 }
 0x5fa   : > { %v12461_v35 = vpop.f32.mrf.mxu1  ;;  %12718 = vmatmul.mubr.bf16.vlgmr.msra.gmra.mxu1 %v25847_v11  ;;  %12729 = vmatpush1.bf16.msra.mxu0 %v23714_v29 }
 0x5fb   : > { %v12462_v12 = vadd.f32 %v12461_v35, %v12418_v34  ;;  %12772 = vmatpush1.bf16.msra.mxu1 %v23717_v31  ;;  %v12420_v25 = vpop.f32.mrf.mxu0  ;;  %12730 = vmatprep.subr.bf16.mxu0 %v23722_v6  ;;  %v23732_v6 = vld [vmem:[#allocation8 + $0x2660] ss:$72 sps:$4 sm:$0xff]   ;;  %v23743_v34 = vld [vmem:[#allocation8 + $0x2ed4] ss:$72 sps:$4 sm:$0xff]   ;;  %v23738_v35 = vld [vmem:[#allocation8 + $0x25d0] ss:$72 sps:$4 sm:$0xff]  }
 0x5fc   : > { %v12463_v44 = vpop.f32.mrf.mxu1  ;;  %12773 = vmatprep.subr.bf16.mxu1 %v23725_v7  ;;  %12760 = vmatprep.mubr.bf16.mxu0 %v25819_v38  ;;  %v23735_v7 = vld [vmem:[#allocation8 + $0x2f60] ss:$72 sps:$4 sm:$0xff]  }
 0x5fd   : > { %v25907_v57 = vadd.f32 %v12462_v12, %v25730_v49  ;;  %v12464_v62 = vadd.f32 %v12463_v44, %v12420_v25  ;;  %12803 = vmatprep.mubr.bf16.mxu1 %v25822_v1  ;;  %v12422_v53 = vpop.f32.mrf.mxu0  ;;  %v23737_v49 = vld [vmem:[#allocation8 + $0x2f64] ss:$72 sps:$4 sm:$0xff]   ;;  %v23741_v12 = vld [vmem:[#allocation8 + $0x2ed0] ss:$72 sps:$4 sm:$0xff]   ;;  %v23747_v25 = vld [vmem:[#allocation8 + $0x2e40] ss:$72 sps:$4 sm:$0xff]  }
 0x5fe   : > { %v12465_v3 = vpop.f32.mrf.mxu1  ;;  %12731 = vmatpush1.bf16.msra.mxu0 %v23720_v21  ;;  %v23746_v21 = vld [vmem:[#allocation8 + $0x2544] ss:$72 sps:$4 sm:$0xff]   ;;  %v23752_v44 = vld [vmem:[#allocation8 + $0x24b4] ss:$72 sps:$4 sm:$0xff]  }
 0x5ff   : > { %v25911_v0 = vadd.f32 %v12464_v62, %v8209_v52  ;;  %v12466_v30 = vadd.f32 %v12465_v3, %v12422_v53  ;;  %12774 = vmatpush1.bf16.msra.mxu1 %v23723_v50  ;;  %v12424_v51 = vpop.f32.mrf.mxu0  ;;  %12732 = vmatprep.subr.bf16.mxu0 %v23728_v42  ;;  %v23749_v50 = vld [vmem:[#allocation8 + $0x2e44] ss:$72 sps:$4 sm:$0xff]   ;;  %v23755_v42 = vld [vmem:[#allocation8 + $0x2db4] ss:$72 sps:$4 sm:$0xff]   ;;  %v23753_v52 = vld [vmem:[#allocation8 + $0x2db0] ss:$72 sps:$4 sm:$0xff]  }
 0x600   : > { %v12467_v16 = vpop.f32.mrf.mxu1  ;;  %12775 = vmatprep.subr.bf16.mxu1 %v23731_v5  ;;  %v23750_v5 = vld [vmem:[#allocation8 + $0x24b0] ss:$72 sps:$4 sm:$0xff]   ;;  %v23758_v62 = vld [vmem:[#allocation8 + $0x2424] ss:$72 sps:$4 sm:$0xff]   ;;  %v23756_v3 = vld [vmem:[#allocation8 + $0x2420] ss:$72 sps:$4 sm:$0xff]  }
 0x601   : > { %v25914_v29 = vadd.f32 %v12466_v30, %v25735_v33  ;;  %v25916_v31 = vadd.f32 %v12467_v16, %v12424_v51  ;;  %v23744_v33 = vld [vmem:[#allocation8 + $0x2540] ss:$72 sps:$4 sm:$0xff]   ;;  %v23761_v53 = vld [vmem:[#allocation8 + $0x2d24] ss:$72 sps:$4 sm:$0xff]   ;;  %v23762_v51 = vld [vmem:[#allocation8 + $0x2c90] ss:$72 sps:$4 sm:$0xff]  }
 0x602   : > { %12733 = vmatpush1.bf16.msra.mxu0 %v23726_v9  ;;  %v23759_v30 = vld [vmem:[#allocation8 + $0x2d20] ss:$72 sps:$4 sm:$0xff]   ;;  %v23764_v9 = vld [vmem:[#allocation8 + $0x2c94] ss:$72 sps:$4 sm:$0xff]   ;;  %v23765_v16 = vld [vmem:[#allocation8 + $0x3590] ss:$72 sps:$4 sm:$0xff]  }
 0x603   : > { %12776 = vmatpush1.bf16.msra.mxu1 %v23729_v63  ;;  %12734 = vmatprep.subr.bf16.mxu0 %v23734_v28  ;;  %v23767_v63 = vld [vmem:[#allocation8 + $0x3594] ss:$72 sps:$4 sm:$0xff]   ;;  %v23770_v28 = vld [vmem:[#allocation8 + $0x2c04] ss:$72 sps:$4 sm:$0xff]  }
 0x604   : > { %12777 = vmatprep.subr.bf16.mxu1 %v23737_v49  ;;  %v23773_v49 = vld [vmem:[#allocation8 + $0x3504] ss:$72 sps:$4 sm:$0xff]  }
 0x606   : > { %12735 = vmatpush1.bf16.msra.mxu0 %v23732_v6  ;;  %v23768_v6 = vld [vmem:[#allocation8 + $0x2c00] ss:$72 sps:$4 sm:$0xff]  }
 0x607   : > { %12778 = vmatpush1.bf16.msra.mxu1 %v23735_v7  ;;  %12736 = vmatprep.subr.bf16.mxu0 %v23740_v40  ;;  %v23771_v7 = vld [vmem:[#allocation8 + $0x3500] ss:$72 sps:$4 sm:$0xff]   ;;  %v23776_v40 = vld [vmem:[#allocation8 + $0x2b74] ss:$72 sps:$4 sm:$0xff]  }
 0x608   : > { %12779 = vmatprep.subr.bf16.mxu1 %v23743_v34  ;;  %v23779_v34 = vld [vmem:[#allocation8 + $0x3474] ss:$72 sps:$4 sm:$0xff]  }
 0x60a   : > { %12737 = vmatpush1.bf16.msra.mxu0 %v23738_v35  ;;  %v23774_v35 = vld [vmem:[#allocation8 + $0x2b70] ss:$72 sps:$4 sm:$0xff]  }
 0x60b   : > { %12780 = vmatpush1.bf16.msra.mxu1 %v23741_v12  ;;  %12738 = vmatprep.subr.bf16.mxu0 %v23746_v21  ;;  %v23777_v12 = vld [vmem:[#allocation8 + $0x3470] ss:$72 sps:$4 sm:$0xff]   ;;  %v23782_v21 = vld [vmem:[#allocation8 + $0x2ae4] ss:$72 sps:$4 sm:$0xff]  }
 0x60c   : > { %12781 = vmatprep.subr.bf16.mxu1 %v23749_v50  ;;  %v23785_v50 = vld [vmem:[#allocation8 + $0x33e4] ss:$72 sps:$4 sm:$0xff]  }
 0x60e   : > { %12739 = vmatpush1.bf16.msra.mxu0 %v23744_v33  ;;  %v23780_v33 = vld [vmem:[#allocation8 + $0x2ae0] ss:$72 sps:$4 sm:$0xff]  }
 0x60f   : > { %12782 = vmatpush1.bf16.msra.mxu1 %v23747_v25  ;;  %12740 = vmatprep.subr.bf16.mxu0 %v23752_v44  ;;  %v23783_v25 = vld [vmem:[#allocation8 + $0x33e0] ss:$72 sps:$4 sm:$0xff]   ;;  %v23788_v44 = vld [vmem:[#allocation8 + $0x2a54] ss:$72 sps:$4 sm:$0xff]  }
 0x610   : > { %12783 = vmatprep.subr.bf16.mxu1 %v23755_v42  ;;  %v23791_v42 = vld [vmem:[#allocation8 + $0x3354] ss:$72 sps:$4 sm:$0xff]  }
 0x612   : > { %12741 = vmatpush1.bf16.msra.mxu0 %v23750_v5  ;;  %v23786_v5 = vld [vmem:[#allocation8 + $0x2a50] ss:$72 sps:$4 sm:$0xff]  }
 0x613   : > { %12784 = vmatpush1.bf16.msra.mxu1 %v23753_v52  ;;  %12742 = vmatprep.subr.bf16.mxu0 %v23758_v62  ;;  %v23789_v52 = vld [vmem:[#allocation8 + $0x3350] ss:$72 sps:$4 sm:$0xff]   ;;  %v23794_v62 = vld [vmem:[#allocation8 + $0x29c4] ss:$72 sps:$4 sm:$0xff]  }
 0x614   : > { %12785 = vmatprep.subr.bf16.mxu1 %v23761_v53  ;;  %v23797_v53 = vld [vmem:[#allocation8 + $0x32c4] ss:$72 sps:$4 sm:$0xff]  }
 0x616   : > { %12743 = vmatpush1.bf16.msra.mxu0 %v23756_v3  ;;  %v23792_v3 = vld [vmem:[#allocation8 + $0x29c0] ss:$72 sps:$4 sm:$0xff]  }
 0x617   : > { %12786 = vmatpush1.bf16.msra.mxu1 %v23759_v30  ;;  %12744 = vmatprep.subr.bf16.mxu0 %v23764_v9  ;;  %v23795_v30 = vld [vmem:[#allocation8 + $0x32c0] ss:$72 sps:$4 sm:$0xff]   ;;  %v23800_v9 = vld [vmem:[#allocation8 + $0x2934] ss:$72 sps:$4 sm:$0xff]  }
 0x618   : > { %12787 = vmatprep.subr.bf16.mxu1 %v23767_v63  ;;  %v23803_v63 = vld [vmem:[#allocation8 + $0x3234] ss:$72 sps:$4 sm:$0xff]  }
 0x61a   : > { %12745 = vmatpush2.bf16.msra.mxu0 %v23762_v51  ;;  %v23798_v51 = vld [vmem:[#allocation8 + $0x2930] ss:$72 sps:$4 sm:$0xff]  }
 0x61b   : > { %12788 = vmatpush2.bf16.msra.mxu1 %v23765_v16  ;;  %12746 = vmatprep.subr.bf16.mxu0 %v23770_v28  ;;  %v23801_v16 = vld [vmem:[#allocation8 + $0x3230] ss:$72 sps:$4 sm:$0xff]   ;;  %v23806_v28 = vld [vmem:[#allocation8 + $0x28a4] ss:$72 sps:$4 sm:$0xff]  }
 0x61c   : > { %12789 = vmatprep.subr.bf16.mxu1 %v23773_v49  ;;  %v23809_v49 = vld [vmem:[#allocation8 + $0x31a4] ss:$72 sps:$4 sm:$0xff]  }
 0x61e   : > { %12747 = vmatpush2.bf16.msra.mxu0 %v23768_v6  ;;  %v23804_v6 = vld [vmem:[#allocation8 + $0x28a0] ss:$72 sps:$4 sm:$0xff]  }
 0x61f   : > { %12790 = vmatpush2.bf16.msra.mxu1 %v23771_v7  ;;  %12748 = vmatprep.subr.bf16.mxu0 %v23776_v40  ;;  %v23807_v7 = vld [vmem:[#allocation8 + $0x31a0] ss:$72 sps:$4 sm:$0xff]   ;;  %v23812_v40 = vld [vmem:[#allocation8 + $0x281c] ss:$72 sps:$4 sm:$0xff]  }
 0x620   : > { %12791 = vmatprep.subr.bf16.mxu1 %v23779_v34  ;;  %v23815_v34 = vld [vmem:[#allocation8 + $0x311c] ss:$72 sps:$4 sm:$0xff]  }
 0x622   : > { %12749 = vmatpush2.bf16.msra.mxu0 %v23774_v35  ;;  %v23810_v35 = vld [vmem:[#allocation8 + $0x2818] ss:$72 sps:$4 sm:$0xff]  }
 0x623   : > { %12792 = vmatpush2.bf16.msra.mxu1 %v23777_v12  ;;  %12750 = vmatprep.subr.bf16.mxu0 %v23782_v21  ;;  %v23813_v12 = vld [vmem:[#allocation8 + $0x3118] ss:$72 sps:$4 sm:$0xff]   ;;  %v23818_v21 = vld [vmem:[#allocation8 + $0x278c] ss:$72 sps:$4 sm:$0xff]  }
 0x624   : > { %12793 = vmatprep.subr.bf16.mxu1 %v23785_v50  ;;  %v23821_v50 = vld [vmem:[#allocation8 + $0x308c] ss:$72 sps:$4 sm:$0xff]  }
 0x626   : > { %12751 = vmatpush2.bf16.msra.mxu0 %v23780_v33  ;;  %v8252_v33 = vadd.f32 %v25744_v8, %v25613_v56 }
 0x627   : > { %12794 = vmatpush2.bf16.msra.mxu1 %v23783_v25  ;;  %12752 = vmatprep.subr.bf16.mxu0 %v23788_v44 }
 0x628   : > { %12795 = vmatprep.subr.bf16.mxu1 %v23791_v42 }
 0x62a   : > { %12753 = vmatpush2.bf16.msra.mxu0 %v23786_v5  ;;  %v23816_v5 = vld [vmem:[#allocation8 + $0x2788] ss:$72 sps:$4 sm:$0xff]  }
 0x62b   : > { %12796 = vmatpush2.bf16.msra.mxu1 %v23789_v52  ;;  %12754 = vmatprep.subr.bf16.mxu0 %v23794_v62  ;;  %v23819_v52 = vld [vmem:[#allocation8 + $0x3088] ss:$72 sps:$4 sm:$0xff]  }
 0x62c   : > { %12797 = vmatprep.subr.bf16.mxu1 %v23797_v53 }
 0x62e   : > { %12755 = vmatpush2.bf16.msra.mxu0 %v23792_v3  ;;  %v23824_v3 = vld [vmem:[#allocation8 + $0x26fc] ss:$72 sps:$4 sm:$0xff]  }
 0x62f   : > { %12798 = vmatpush2.bf16.msra.mxu1 %v23795_v30  ;;  %12756 = vmatprep.subr.bf16.mxu0 %v23800_v9  ;;  %v23827_v30 = vld [vmem:[#allocation8 + $0x2ffc] ss:$72 sps:$4 sm:$0xff]   ;;  %v8295_v9 = vadd.f32 %v25746_v41, %v8252_v33  ;;  %v23830_v41 = vld [vmem:[#allocation8 + $0x266c] ss:$72 sps:$4 sm:$0xff]  }
 0x630   : > { %12799 = vmatprep.subr.bf16.mxu1 %v23803_v63  ;;  %v23836_v33 = vld [vmem:[#allocation8 + $0x25dc] ss:$72 sps:$4 sm:$0xff]  }
 0x632   : > { %12757 = vmatpush2.bf16.msra.mxu0 %v23798_v51 }
 0x633   : > { %12800 = vmatpush2.bf16.msra.mxu1 %v23801_v16  ;;  %12758 = vmatprep.subr.bf16.mxu0 %v23806_v28 }
 0x634   : > { %12801 = vmatprep.subr.bf16.mxu1 %v23809_v49  ;;  %v23822_v49 = vld [vmem:[#allocation8 + $0x26f8] ss:$72 sps:$4 sm:$0xff]  }
 0x636   : > { %12759 = vmatpush2.bf16.msra.mxu0 %v23804_v6  ;;  %v23825_v6 = vld [vmem:[#allocation8 + $0x2ff8] ss:$72 sps:$4 sm:$0xff]  }
 0x637   : > { %12802 = vmatpush2.bf16.msra.mxu1 %v23807_v7  ;;  %12814 = vmatprep.subr.bf16.mxu0 %v23812_v40 }
 0x638   : > { %12857 = vmatprep.subr.bf16.mxu1 %v23815_v34  ;;  %v26397_v34 = vld [vmem:[#allocation36_spill] sm:$0xff] }
 0x639   : > { %v12504_v25 = vpop.f32.mrf.mxu0  ;;  %12761 = vmatmul.mubr.bf16.vlgmr.msra.gmra.mxu0 %v25844_v43 }
 0x63a   : > { %v12547_v44 = vpop.f32.mrf.mxu1  ;;  %12804 = vmatmul.mubr.bf16.vlgmr.msra.gmra.mxu1 %v25847_v11  ;;  %12815 = vmatpush1.bf16.msra.mxu0 %v23810_v35 }
 0x63b   : > { %v12548_v42 = vadd.f32 %v12547_v44, %v12504_v25  ;;  %12858 = vmatpush1.bf16.msra.mxu1 %v23813_v12  ;;  %v12506_v62 = vpop.f32.mrf.mxu0  ;;  %12816 = vmatprep.subr.bf16.mxu0 %v23818_v21  ;;  %v23828_v21 = vld [vmem:[#allocation8 + $0x2668] ss:$72 sps:$4 sm:$0xff]   ;;  %v23839_v25 = vld [vmem:[#allocation8 + $0x2edc] ss:$72 sps:$4 sm:$0xff]   ;;  %v23834_v44 = vld [vmem:[#allocation8 + $0x25d8] ss:$72 sps:$4 sm:$0xff]  }
 0x63c   : > { %v12549_v53 = vpop.f32.mrf.mxu1  ;;  %12859 = vmatprep.subr.bf16.mxu1 %v23821_v50  ;;  %12846 = vmatprep.mubr.bf16.mxu0 %v25819_v38  ;;  %v23831_v50 = vld [vmem:[#allocation8 + $0x2f68] ss:$72 sps:$4 sm:$0xff]  }
 0x63d   : > { %v25924_v56 = vadd.f32 %v12548_v42, %v25748_v55  ;;  %v12550_v8 = vadd.f32 %v12549_v53, %v12506_v62  ;;  %12889 = vmatprep.mubr.bf16.mxu1 %v25822_v1  ;;  %v12508_v63 = vpop.f32.mrf.mxu0  ;;  %v23833_v55 = vld [vmem:[#allocation8 + $0x2f6c] ss:$72 sps:$4 sm:$0xff]   ;;  %v23837_v42 = vld [vmem:[#allocation8 + $0x2ed8] ss:$72 sps:$4 sm:$0xff]   ;;  %v23840_v62 = vld [vmem:[#allocation8 + $0x2548] ss:$72 sps:$4 sm:$0xff]  }
 0x63e   : > { %v12551_v51 = vpop.f32.mrf.mxu1  ;;  %12817 = vmatpush1.bf16.msra.mxu0 %v23816_v5  ;;  %v23842_v5 = vld [vmem:[#allocation8 + $0x254c] ss:$72 sps:$4 sm:$0xff]   ;;  %v23843_v53 = vld [vmem:[#allocation8 + $0x2e48] ss:$72 sps:$4 sm:$0xff]  }
 0x63f   : > { %v25928_v16 = vadd.f32 %v12550_v8, %v8295_v9  ;;  %v12552_v28 = vadd.f32 %v12551_v51, %v12508_v63  ;;  %12860 = vmatpush1.bf16.msra.mxu1 %v23819_v52  ;;  %v12510_v7 = vpop.f32.mrf.mxu0  ;;  %12818 = vmatprep.subr.bf16.mxu0 %v23824_v3  ;;  %v23845_v52 = vld [vmem:[#allocation8 + $0x2e4c] ss:$72 sps:$4 sm:$0xff]   ;;  %v23848_v3 = vld [vmem:[#allocation8 + $0x24bc] ss:$72 sps:$4 sm:$0xff]   ;;  %v23846_v9 = vld [vmem:[#allocation8 + $0x24b8] ss:$72 sps:$4 sm:$0xff]  }
 0x640   : > { %v12553_v40 = vpop.f32.mrf.mxu1  ;;  %12861 = vmatprep.subr.bf16.mxu1 %v23827_v30  ;;  %v23851_v30 = vld [vmem:[#allocation8 + $0x2dbc] ss:$72 sps:$4 sm:$0xff]   ;;  %v23849_v8 = vld [vmem:[#allocation8 + $0x2db8] ss:$72 sps:$4 sm:$0xff]   ;;  %v23854_v63 = vld [vmem:[#allocation8 + $0x242c] ss:$72 sps:$4 sm:$0xff]  }
 0x641   : > { %v25931_v35 = vadd.f32 %v12552_v28, %v26397_v34  ;;  %v25933_v12 = vadd.f32 %v12553_v40, %v12510_v7  ;;  %v23857_v51 = vld [vmem:[#allocation8 + $0x2d2c] ss:$72 sps:$4 sm:$0xff]   ;;  %v23852_v28 = vld [vmem:[#allocation8 + $0x2428] ss:$72 sps:$4 sm:$0xff]   ;;  %v23863_v7 = vld [vmem:[#allocation8 + $0x359c] ss:$72 sps:$4 sm:$0xff]  }
 0x642   : > { %12819 = vmatpush1.bf16.msra.mxu0 %v23822_v49  ;;  %v23855_v49 = vld [vmem:[#allocation8 + $0x2d28] ss:$72 sps:$4 sm:$0xff]   ;;  %v23858_v40 = vld [vmem:[#allocation8 + $0x2c98] ss:$72 sps:$4 sm:$0xff]   ;;  %v23869_v34 = vld [vmem:[#allocation8 + $0x350c] ss:$72 sps:$4 sm:$0xff]  }
 0x643   : > { %12862 = vmatpush1.bf16.msra.mxu1 %v23825_v6  ;;  %12820 = vmatprep.subr.bf16.mxu0 %v23830_v41  ;;  %v23860_v6 = vld [vmem:[#allocation8 + $0x2c9c] ss:$72 sps:$4 sm:$0xff]   ;;  %v23861_v41 = vld [vmem:[#allocation8 + $0x3598] ss:$72 sps:$4 sm:$0xff]  }
 0x644   : > { %12863 = vmatprep.subr.bf16.mxu1 %v23833_v55  ;;  %v23866_v55 = vld [vmem:[#allocation8 + $0x2c0c] ss:$72 sps:$4 sm:$0xff]  }
 0x646   : > { %12821 = vmatpush1.bf16.msra.mxu0 %v23828_v21  ;;  %v23864_v21 = vld [vmem:[#allocation8 + $0x2c08] ss:$72 sps:$4 sm:$0xff]  }
 0x647   : > { %12864 = vmatpush1.bf16.msra.mxu1 %v23831_v50  ;;  %12822 = vmatprep.subr.bf16.mxu0 %v23836_v33  ;;  %v23867_v50 = vld [vmem:[#allocation8 + $0x3508] ss:$72 sps:$4 sm:$0xff]   ;;  %v23872_v33 = vld [vmem:[#allocation8 + $0x2b7c] ss:$72 sps:$4 sm:$0xff]  }
 0x648   : > { %12865 = vmatprep.subr.bf16.mxu1 %v23839_v25  ;;  %v23875_v25 = vld [vmem:[#allocation8 + $0x347c] ss:$72 sps:$4 sm:$0xff]  }
 0x64a   : > { %12823 = vmatpush1.bf16.msra.mxu0 %v23834_v44  ;;  %v23870_v44 = vld [vmem:[#allocation8 + $0x2b78] ss:$72 sps:$4 sm:$0xff]  }
 0x64b   : > { %12866 = vmatpush1.bf16.msra.mxu1 %v23837_v42  ;;  %12824 = vmatprep.subr.bf16.mxu0 %v23842_v5  ;;  %v23873_v42 = vld [vmem:[#allocation8 + $0x3478] ss:$72 sps:$4 sm:$0xff]   ;;  %v23878_v5 = vld [vmem:[#allocation8 + $0x2aec] ss:$72 sps:$4 sm:$0xff]  }
 0x64c   : > { %12867 = vmatprep.subr.bf16.mxu1 %v23845_v52  ;;  %v23881_v52 = vld [vmem:[#allocation8 + $0x33ec] ss:$72 sps:$4 sm:$0xff]  }
 0x64e   : > { %12825 = vmatpush1.bf16.msra.mxu0 %v23840_v62  ;;  %v23876_v62 = vld [vmem:[#allocation8 + $0x2ae8] ss:$72 sps:$4 sm:$0xff]  }
 0x64f   : > { %12868 = vmatpush1.bf16.msra.mxu1 %v23843_v53  ;;  %12826 = vmatprep.subr.bf16.mxu0 %v23848_v3  ;;  %v23879_v53 = vld [vmem:[#allocation8 + $0x33e8] ss:$72 sps:$4 sm:$0xff]   ;;  %v23884_v3 = vld [vmem:[#allocation8 + $0x2a5c] ss:$72 sps:$4 sm:$0xff]  }
 0x650   : > { %12869 = vmatprep.subr.bf16.mxu1 %v23851_v30  ;;  %v23887_v30 = vld [vmem:[#allocation8 + $0x335c] ss:$72 sps:$4 sm:$0xff]  }
 0x652   : > { %12827 = vmatpush1.bf16.msra.mxu0 %v23846_v9  ;;  %v23882_v9 = vld [vmem:[#allocation8 + $0x2a58] ss:$72 sps:$4 sm:$0xff]  }
 0x653   : > { %12870 = vmatpush1.bf16.msra.mxu1 %v23849_v8  ;;  %12828 = vmatprep.subr.bf16.mxu0 %v23854_v63  ;;  %v23885_v8 = vld [vmem:[#allocation8 + $0x3358] ss:$72 sps:$4 sm:$0xff]   ;;  %v23890_v63 = vld [vmem:[#allocation8 + $0x29cc] ss:$72 sps:$4 sm:$0xff]  }
 0x654   : > { %12871 = vmatprep.subr.bf16.mxu1 %v23857_v51  ;;  %v23893_v51 = vld [vmem:[#allocation8 + $0x32cc] ss:$72 sps:$4 sm:$0xff]  }
 0x656   : > { %12829 = vmatpush1.bf16.msra.mxu0 %v23852_v28  ;;  %v23888_v28 = vld [vmem:[#allocation8 + $0x29c8] ss:$72 sps:$4 sm:$0xff]  }
 0x657   : > { %12872 = vmatpush1.bf16.msra.mxu1 %v23855_v49  ;;  %12830 = vmatprep.subr.bf16.mxu0 %v23860_v6  ;;  %v23891_v49 = vld [vmem:[#allocation8 + $0x32c8] ss:$72 sps:$4 sm:$0xff]   ;;  %v23896_v6 = vld [vmem:[#allocation8 + $0x293c] ss:$72 sps:$4 sm:$0xff]  }
 0x658   : > { %12873 = vmatprep.subr.bf16.mxu1 %v23863_v7  ;;  %v23899_v7 = vld [vmem:[#allocation8 + $0x323c] ss:$72 sps:$4 sm:$0xff]  }
 0x65a   : > { %12831 = vmatpush2.bf16.msra.mxu0 %v23858_v40  ;;  %v23894_v40 = vld [vmem:[#allocation8 + $0x2938] ss:$72 sps:$4 sm:$0xff]  }
 0x65b   : > { %12874 = vmatpush2.bf16.msra.mxu1 %v23861_v41  ;;  %12832 = vmatprep.subr.bf16.mxu0 %v23866_v55  ;;  %v23897_v41 = vld [vmem:[#allocation8 + $0x3238] ss:$72 sps:$4 sm:$0xff]   ;;  %v23902_v55 = vld [vmem:[#allocation8 + $0x28ac] ss:$72 sps:$4 sm:$0xff]  }
 0x65c   : > { %12875 = vmatprep.subr.bf16.mxu1 %v23869_v34  ;;  %v23905_v34 = vld [vmem:[#allocation8 + $0x31ac] ss:$72 sps:$4 sm:$0xff]  }
 0x65e   : > { %12833 = vmatpush2.bf16.msra.mxu0 %v23864_v21  ;;  %v23900_v21 = vld [vmem:[#allocation8 + $0x28a8] ss:$72 sps:$4 sm:$0xff]  }
 0x65f   : > { %12876 = vmatpush2.bf16.msra.mxu1 %v23867_v50  ;;  %12834 = vmatprep.subr.bf16.mxu0 %v23872_v33  ;;  %v23903_v50 = vld [vmem:[#allocation8 + $0x31a8] ss:$72 sps:$4 sm:$0xff]   ;;  %v23908_v33 = vld [vmem:[#allocation8 + $0x2824] ss:$72 sps:$4 sm:$0xff]  }
 0x660   : > { %12877 = vmatprep.subr.bf16.mxu1 %v23875_v25  ;;  %v23911_v25 = vld [vmem:[#allocation8 + $0x3124] ss:$72 sps:$4 sm:$0xff]  }
 0x662   : > { %12835 = vmatpush2.bf16.msra.mxu0 %v23870_v44  ;;  %v23906_v44 = vld [vmem:[#allocation8 + $0x2820] ss:$72 sps:$4 sm:$0xff]  }
 0x663   : > { %12878 = vmatpush2.bf16.msra.mxu1 %v23873_v42  ;;  %12836 = vmatprep.subr.bf16.mxu0 %v23878_v5  ;;  %v23909_v42 = vld [vmem:[#allocation8 + $0x3120] ss:$72 sps:$4 sm:$0xff]   ;;  %v23914_v5 = vld [vmem:[#allocation8 + $0x2794] ss:$72 sps:$4 sm:$0xff]  }
 0x664   : > { %12879 = vmatprep.subr.bf16.mxu1 %v23881_v52  ;;  %v23917_v52 = vld [vmem:[#allocation8 + $0x3094] ss:$72 sps:$4 sm:$0xff]  }
 0x666   : > { %12837 = vmatpush2.bf16.msra.mxu0 %v23876_v62  ;;  %v26398_v62 = vld [vmem:[#allocation28_spill] sm:$0xff] }
 0x667   : > { %12880 = vmatpush2.bf16.msra.mxu1 %v23879_v53  ;;  %12838 = vmatprep.subr.bf16.mxu0 %v23884_v3  ;;  %v8338_v53 = vadd.f32 %v25762_v27, %v26398_v62  ;;  %v26399_v27 = vld [vmem:[#allocation39_spill] sm:$0xff] }
 0x668   : > { %12881 = vmatprep.subr.bf16.mxu1 %v23887_v30 }
 0x66a   : > { %12839 = vmatpush2.bf16.msra.mxu0 %v23882_v9 }
 0x66b   : > { %12882 = vmatpush2.bf16.msra.mxu1 %v23885_v8  ;;  %12840 = vmatprep.subr.bf16.mxu0 %v23890_v63  ;;  %v23912_v8 = vld [vmem:[#allocation8 + $0x2790] ss:$72 sps:$4 sm:$0xff]  }
 0x66c   : > { %12883 = vmatprep.subr.bf16.mxu1 %v23893_v51  ;;  %v23915_v63 = vld [vmem:[#allocation8 + $0x3090] ss:$72 sps:$4 sm:$0xff]  }
 0x66e   : > { %12841 = vmatpush2.bf16.msra.mxu0 %v23888_v28 }
 0x66f   : > { %12884 = vmatpush2.bf16.msra.mxu1 %v23891_v49  ;;  %12842 = vmatprep.subr.bf16.mxu0 %v23896_v6  ;;  %v23920_v49 = vld [vmem:[#allocation8 + $0x2704] ss:$72 sps:$4 sm:$0xff]  }
 0x670   : > { %12885 = vmatprep.subr.bf16.mxu1 %v23899_v7  ;;  %v23923_v6 = vld [vmem:[#allocation8 + $0x3004] ss:$72 sps:$4 sm:$0xff]   ;;  %v8381_v7 = vadd.f32 %v25764_v14, %v8338_v53  ;;  %v23926_v14 = vld [vmem:[#allocation8 + $0x2674] ss:$72 sps:$4 sm:$0xff]  }
 0x672   : > { %12843 = vmatpush2.bf16.msra.mxu0 %v23894_v40 }
 0x673   : > { %12886 = vmatpush2.bf16.msra.mxu1 %v23897_v41  ;;  %12844 = vmatprep.subr.bf16.mxu0 %v23902_v55 }
 0x674   : > { %12887 = vmatprep.subr.bf16.mxu1 %v23905_v34 }
 0x676   : > { %12845 = vmatpush2.bf16.msra.mxu0 %v23900_v21 }
 0x677   : > { %12888 = vmatpush2.bf16.msra.mxu1 %v23903_v50  ;;  %12900 = vmatprep.subr.bf16.mxu0 %v23908_v33  ;;  %v23918_v33 = vld [vmem:[#allocation8 + $0x2700] ss:$72 sps:$4 sm:$0xff]  }
 0x678   : > { %12943 = vmatprep.subr.bf16.mxu1 %v23911_v25  ;;  %v23921_v25 = vld [vmem:[#allocation8 + $0x3000] ss:$72 sps:$4 sm:$0xff]  }
 0x679   : > { %v12590_v3 = vpop.f32.mrf.mxu0  ;;  %12847 = vmatmul.mubr.bf16.vlgmr.msra.gmra.mxu0 %v25844_v43 }
 0x67a   : > { %v12633_v30 = vpop.f32.mrf.mxu1  ;;  %12890 = vmatmul.mubr.bf16.vlgmr.msra.gmra.mxu1 %v25847_v11  ;;  %12901 = vmatpush1.bf16.msra.mxu0 %v23906_v44 }
 0x67b   : > { %v12634_v9 = vadd.f32 %v12633_v30, %v12590_v3  ;;  %12944 = vmatpush1.bf16.msra.mxu1 %v23909_v42  ;;  %v12592_v51 = vpop.f32.mrf.mxu0  ;;  %12902 = vmatprep.subr.bf16.mxu0 %v23914_v5  ;;  %v23929_v5 = vld [vmem:[#allocation8 + $0x2f74] ss:$72 sps:$4 sm:$0xff]   ;;  %v23924_v3 = vld [vmem:[#allocation8 + $0x2670] ss:$72 sps:$4 sm:$0xff]  }
 0x67c   : > { %v12635_v28 = vpop.f32.mrf.mxu1  ;;  %12945 = vmatprep.subr.bf16.mxu1 %v23917_v52  ;;  %12932 = vmatprep.mubr.bf16.mxu0 %v25819_v38  ;;  %v26400_v52 = vld [vmem:[#allocation40_spill] sm:$0xff] }
 0x67d   : > { %v25941_v40 = vadd.f32 %v12634_v9, %v26399_v27  ;;  %v12636_v41 = vadd.f32 %v12635_v28, %v12592_v51  ;;  %12975 = vmatprep.mubr.bf16.mxu1 %v25822_v1  ;;  %v12594_v55 = vpop.f32.mrf.mxu0  ;;  %v23927_v30 = vld [vmem:[#allocation8 + $0x2f70] ss:$72 sps:$4 sm:$0xff]   ;;  %v23932_v9 = vld [vmem:[#allocation8 + $0x25e4] ss:$72 sps:$4 sm:$0xff]   ;;  %v23933_v51 = vld [vmem:[#allocation8 + $0x2ee0] ss:$72 sps:$4 sm:$0xff]  }
 0x67e   : > { %v12637_v34 = vpop.f32.mrf.mxu1  ;;  %12903 = vmatpush1.bf16.msra.mxu0 %v23912_v8  ;;  %v23935_v8 = vld [vmem:[#allocation8 + $0x2ee4] ss:$72 sps:$4 sm:$0xff]   ;;  %v23938_v28 = vld [vmem:[#allocation8 + $0x2554] ss:$72 sps:$4 sm:$0xff]  }
 0x67f   : > { %v25945_v21 = vadd.f32 %v12636_v41, %v8381_v7  ;;  %v12638_v50 = vadd.f32 %v12637_v34, %v12594_v55  ;;  %12946 = vmatpush1.bf16.msra.mxu1 %v23915_v63  ;;  %v12596_v44 = vpop.f32.mrf.mxu0  ;;  %12904 = vmatprep.subr.bf16.mxu0 %v23920_v49  ;;  %v23930_v63 = vld [vmem:[#allocation8 + $0x25e0] ss:$72 sps:$4 sm:$0xff]   ;;  %v23941_v49 = vld [vmem:[#allocation8 + $0x2e54] ss:$72 sps:$4 sm:$0xff]   ;;  %v23939_v7 = vld [vmem:[#allocation8 + $0x2e50] ss:$72 sps:$4 sm:$0xff]  }
 0x680   : > { %v12639_v42 = vpop.f32.mrf.mxu1  ;;  %12947 = vmatprep.subr.bf16.mxu1 %v23923_v6  ;;  %v23936_v6 = vld [vmem:[#allocation8 + $0x2550] ss:$72 sps:$4 sm:$0xff]   ;;  %v23944_v27 = vld [vmem:[#allocation8 + $0x24c4] ss:$72 sps:$4 sm:$0xff]   ;;  %v23942_v55 = vld [vmem:[#allocation8 + $0x24c0] ss:$72 sps:$4 sm:$0xff]  }
 0x681   : > { %v25948_v62 = vadd.f32 %v12638_v50, %v26400_v52  ;;  %v25950_v53 = vadd.f32 %v12639_v42, %v12596_v44  ;;  %v23947_v41 = vld [vmem:[#allocation8 + $0x2dc4] ss:$72 sps:$4 sm:$0xff]   ;;  %v23945_v34 = vld [vmem:[#allocation8 + $0x2dc0] ss:$72 sps:$4 sm:$0xff]   ;;  %v23950_v50 = vld [vmem:[#allocation8 + $0x2434] ss:$72 sps:$4 sm:$0xff]  }
 0x682   : > { %12905 = vmatpush1.bf16.msra.mxu0 %v23918_v33  ;;  %v23953_v33 = vld [vmem:[#allocation8 + $0x2d34] ss:$72 sps:$4 sm:$0xff]   ;;  %v23951_v44 = vld [vmem:[#allocation8 + $0x2d30] ss:$72 sps:$4 sm:$0xff]   ;;  %v23956_v42 = vld [vmem:[#allocation8 + $0x2ca4] ss:$72 sps:$4 sm:$0xff]  }
 0x683   : > { %26401 = vst [vmem:[#allocation36_spill] sm:$0xff] %v25948_v62  ;;  %12948 = vmatpush1.bf16.msra.mxu1 %v23921_v25  ;;  %12906 = vmatprep.subr.bf16.mxu0 %v23926_v14  ;;  %v23948_v25 = vld [vmem:[#allocation8 + $0x2430] ss:$72 sps:$4 sm:$0xff]   ;;  %v23959_v14 = vld [vmem:[#allocation8 + $0x35a4] ss:$72 sps:$4 sm:$0xff]  }
 0x684   : > { %12949 = vmatprep.subr.bf16.mxu1 %v23929_v5  ;;  %v23954_v5 = vld [vmem:[#allocation8 + $0x2ca0] ss:$72 sps:$4 sm:$0xff]  }
 0x685   : > { %v23957_v52 = vld [vmem:[#allocation8 + $0x35a0] ss:$72 sps:$4 sm:$0xff]  }
 0x686   : > { %12907 = vmatpush1.bf16.msra.mxu0 %v23924_v3  ;;  %v23962_v3 = vld [vmem:[#allocation8 + $0x2c14] ss:$72 sps:$4 sm:$0xff]  }
 0x687   : > { %12950 = vmatpush1.bf16.msra.mxu1 %v23927_v30  ;;  %12908 = vmatprep.subr.bf16.mxu0 %v23932_v9  ;;  %v23965_v30 = vld [vmem:[#allocation8 + $0x3514] ss:$72 sps:$4 sm:$0xff]   ;;  %v23960_v9 = vld [vmem:[#allocation8 + $0x2c10] ss:$72 sps:$4 sm:$0xff]  }
 0x688   : > { %12951 = vmatprep.subr.bf16.mxu1 %v23935_v8  ;;  %v23963_v8 = vld [vmem:[#allocation8 + $0x3510] ss:$72 sps:$4 sm:$0xff]  }
 0x68a   : > { %12909 = vmatpush1.bf16.msra.mxu0 %v23930_v63  ;;  %v23968_v63 = vld [vmem:[#allocation8 + $0x2b84] ss:$72 sps:$4 sm:$0xff]  }
 0x68b   : > { %12952 = vmatpush1.bf16.msra.mxu1 %v23933_v51  ;;  %12910 = vmatprep.subr.bf16.mxu0 %v23938_v28  ;;  %v23971_v51 = vld [vmem:[#allocation8 + $0x3484] ss:$72 sps:$4 sm:$0xff]   ;;  %v23966_v28 = vld [vmem:[#allocation8 + $0x2b80] ss:$72 sps:$4 sm:$0xff]  }
 0x68c   : > { %12953 = vmatprep.subr.bf16.mxu1 %v23941_v49  ;;  %v23969_v49 = vld [vmem:[#allocation8 + $0x3480] ss:$72 sps:$4 sm:$0xff]  }
 0x68e   : > { %12911 = vmatpush1.bf16.msra.mxu0 %v23936_v6  ;;  %v23974_v6 = vld [vmem:[#allocation8 + $0x2af4] ss:$72 sps:$4 sm:$0xff]  }
 0x68f   : > { %12954 = vmatpush1.bf16.msra.mxu1 %v23939_v7  ;;  %12912 = vmatprep.subr.bf16.mxu0 %v23944_v27  ;;  %v23977_v7 = vld [vmem:[#allocation8 + $0x33f4] ss:$72 sps:$4 sm:$0xff]   ;;  %v23972_v27 = vld [vmem:[#allocation8 + $0x2af0] ss:$72 sps:$4 sm:$0xff]  }
 0x690   : > { %12955 = vmatprep.subr.bf16.mxu1 %v23947_v41  ;;  %v23975_v41 = vld [vmem:[#allocation8 + $0x33f0] ss:$72 sps:$4 sm:$0xff]  }
 0x692   : > { %12913 = vmatpush1.bf16.msra.mxu0 %v23942_v55  ;;  %v23980_v55 = vld [vmem:[#allocation8 + $0x2a64] ss:$72 sps:$4 sm:$0xff]  }
 0x693   : > { %12956 = vmatpush1.bf16.msra.mxu1 %v23945_v34  ;;  %12914 = vmatprep.subr.bf16.mxu0 %v23950_v50  ;;  %v23983_v34 = vld [vmem:[#allocation8 + $0x3364] ss:$72 sps:$4 sm:$0xff]   ;;  %v23978_v50 = vld [vmem:[#allocation8 + $0x2a60] ss:$72 sps:$4 sm:$0xff]  }
 0x694   : > { %12957 = vmatprep.subr.bf16.mxu1 %v23953_v33  ;;  %v23981_v33 = vld [vmem:[#allocation8 + $0x3360] ss:$72 sps:$4 sm:$0xff]  }
 0x696   : > { %12915 = vmatpush1.bf16.msra.mxu0 %v23948_v25  ;;  %v23986_v25 = vld [vmem:[#allocation8 + $0x29d4] ss:$72 sps:$4 sm:$0xff]  }
 0x697   : > { %12958 = vmatpush1.bf16.msra.mxu1 %v23951_v44  ;;  %12916 = vmatprep.subr.bf16.mxu0 %v23956_v42  ;;  %v23989_v44 = vld [vmem:[#allocation8 + $0x32d4] ss:$72 sps:$4 sm:$0xff]   ;;  %v23984_v42 = vld [vmem:[#allocation8 + $0x29d0] ss:$72 sps:$4 sm:$0xff]  }
 0x698   : > { %12959 = vmatprep.subr.bf16.mxu1 %v23959_v14  ;;  %v23987_v14 = vld [vmem:[#allocation8 + $0x32d0] ss:$72 sps:$4 sm:$0xff]  }
 0x69a   : > { %12917 = vmatpush2.bf16.msra.mxu0 %v23954_v5  ;;  %v23992_v5 = vld [vmem:[#allocation8 + $0x2944] ss:$72 sps:$4 sm:$0xff]  }
 0x69b   : > { %12960 = vmatpush2.bf16.msra.mxu1 %v23957_v52  ;;  %12918 = vmatprep.subr.bf16.mxu0 %v23962_v3  ;;  %v23995_v52 = vld [vmem:[#allocation8 + $0x3244] ss:$72 sps:$4 sm:$0xff]   ;;  %v23990_v3 = vld [vmem:[#allocation8 + $0x2940] ss:$72 sps:$4 sm:$0xff]  }
 0x69c   : > { %12961 = vmatprep.subr.bf16.mxu1 %v23965_v30  ;;  %v23993_v30 = vld [vmem:[#allocation8 + $0x3240] ss:$72 sps:$4 sm:$0xff]  }
 0x69e   : > { %12919 = vmatpush2.bf16.msra.mxu0 %v23960_v9  ;;  %v23998_v9 = vld [vmem:[#allocation8 + $0x28b4] ss:$72 sps:$4 sm:$0xff]  }
 0x69f   : > { %12962 = vmatpush2.bf16.msra.mxu1 %v23963_v8  ;;  %12920 = vmatprep.subr.bf16.mxu0 %v23968_v63  ;;  %v24001_v8 = vld [vmem:[#allocation8 + $0x31b4] ss:$72 sps:$4 sm:$0xff]   ;;  %v23996_v63 = vld [vmem:[#allocation8 + $0x28b0] ss:$72 sps:$4 sm:$0xff]  }
 0x6a0   : > { %12963 = vmatprep.subr.bf16.mxu1 %v23971_v51  ;;  %v23999_v51 = vld [vmem:[#allocation8 + $0x31b0] ss:$72 sps:$4 sm:$0xff]  }
 0x6a2   : > { %12921 = vmatpush2.bf16.msra.mxu0 %v23966_v28  ;;  %v24004_v28 = vld [vmem:[#allocation8 + $0x282c] ss:$72 sps:$4 sm:$0xff]  }
 0x6a3   : > { %12964 = vmatpush2.bf16.msra.mxu1 %v23969_v49  ;;  %12922 = vmatprep.subr.bf16.mxu0 %v23974_v6  ;;  %v24007_v49 = vld [vmem:[#allocation8 + $0x312c] ss:$72 sps:$4 sm:$0xff]   ;;  %v24002_v6 = vld [vmem:[#allocation8 + $0x2828] ss:$72 sps:$4 sm:$0xff]  }
 0x6a4   : > { %12965 = vmatprep.subr.bf16.mxu1 %v23977_v7  ;;  %v24005_v7 = vld [vmem:[#allocation8 + $0x3128] ss:$72 sps:$4 sm:$0xff]  }
 0x6a6   : > { %12923 = vmatpush2.bf16.msra.mxu0 %v23972_v27  ;;  %v26402_v27 = vld [vmem:[#allocation31_spill] sm:$0xff] }
 0x6a7   : > { %12966 = vmatpush2.bf16.msra.mxu1 %v23975_v41  ;;  %12924 = vmatprep.subr.bf16.mxu0 %v23980_v55  ;;  %v8424_v41 = vadd.f32 %v25780_v2, %v26402_v27  ;;  %v24010_v55 = vld [vmem:[#allocation8 + $0x279c] ss:$72 sps:$4 sm:$0xff]  }
 0x6a8   : > { %12967 = vmatprep.subr.bf16.mxu1 %v23983_v34  ;;  %v24013_v34 = vld [vmem:[#allocation8 + $0x309c] ss:$72 sps:$4 sm:$0xff]  }
 0x6aa   : > { %12925 = vmatpush2.bf16.msra.mxu0 %v23978_v50 }
 0x6ab   : > { %12968 = vmatpush2.bf16.msra.mxu1 %v23981_v33  ;;  %12926 = vmatprep.subr.bf16.mxu0 %v23986_v25  ;;  %v26403_v25 = vld [vmem:[#allocation32_spill] sm:$0xff] }
 0x6ac   : > { %12969 = vmatprep.subr.bf16.mxu1 %v23989_v44  ;;  %v26404_v44 = vld [vmem:[#allocation33_spill] sm:$0xff] }
 0x6ae   : > { %12927 = vmatpush2.bf16.msra.mxu0 %v23984_v42  ;;  %v4817_v42 = vadd.f32 %v26404_v44, %v26403_v25  ;;  %v24022_v44 = vld [vmem:[#allocation8 + $0x267c] ss:$72 sps:$4 sm:$0xff]  }
 0x6af   : > { %12970 = vmatpush2.bf16.msra.mxu1 %v23987_v14  ;;  %12928 = vmatprep.subr.bf16.mxu0 %v23992_v5  ;;  %v24008_v5 = vld [vmem:[#allocation8 + $0x2798] ss:$72 sps:$4 sm:$0xff]  }
 0x6b0   : > { %12971 = vmatprep.subr.bf16.mxu1 %v23995_v52  ;;  %v24011_v52 = vld [vmem:[#allocation8 + $0x3098] ss:$72 sps:$4 sm:$0xff]  }
 0x6b2   : > { %12929 = vmatpush2.bf16.msra.mxu0 %v23990_v3  ;;  %v26405_v3 = vld [vmem:[#allocation43_spill] sm:$0xff] }
 0x6b3   : > { %12972 = vmatpush2.bf16.msra.mxu1 %v23993_v30  ;;  %12930 = vmatprep.subr.bf16.mxu0 %v23998_v9  ;;  %v8467_v2 = vadd.f32 %v26405_v3, %v8424_v41 }
 0x6b4   : > { %12973 = vmatprep.subr.bf16.mxu1 %v24001_v8  ;;  %v24016_v8 = vld [vmem:[#allocation8 + $0x270c] ss:$72 sps:$4 sm:$0xff]  }
 0x6b6   : > { %12931 = vmatpush2.bf16.msra.mxu0 %v23996_v63  ;;  %v24019_v63 = vld [vmem:[#allocation8 + $0x300c] ss:$72 sps:$4 sm:$0xff]  }
 0x6b7   : > { %12974 = vmatpush2.bf16.msra.mxu1 %v23999_v51  ;;  %12986 = vmatprep.subr.bf16.mxu0 %v24004_v28  ;;  %v26406_v51 = vld [vmem:[#allocation46_spill] sm:$0xff] }
 0x6b8   : > { %13029 = vmatprep.subr.bf16.mxu1 %v24007_v49  ;;  %v8428_v28 = vadd.f32 %v26406_v51, %v4817_v42  ;;  %v26407_v49 = vld [vmem:[#allocation44_spill] sm:$0xff]  ;;  %v24025_v42 = vld [vmem:[#allocation8 + $0x2f7c] ss:$72 sps:$4 sm:$0xff]  }
 0x6b9   : > { %v12676_v50 = vpop.f32.mrf.mxu0  ;;  %12933 = vmatmul.mubr.bf16.vlgmr.msra.gmra.mxu0 %v25844_v43 }
 0x6ba   : > { %v12719_v33 = vpop.f32.mrf.mxu1  ;;  %12976 = vmatmul.mubr.bf16.vlgmr.msra.gmra.mxu1 %v25847_v11  ;;  %12987 = vmatpush1.bf16.msra.mxu0 %v24002_v6 }
 0x6bb   : > { %v12720_v14 = vadd.f32 %v12719_v33, %v12676_v50  ;;  %13030 = vmatpush1.bf16.msra.mxu1 %v24005_v7  ;;  %v12678_v30 = vpop.f32.mrf.mxu0  ;;  %12988 = vmatprep.subr.bf16.mxu0 %v24010_v55  ;;  %v24014_v55 = vld [vmem:[#allocation8 + $0x2708] ss:$72 sps:$4 sm:$0xff]  }
 0x6bc   : > { %v12721_v9 = vpop.f32.mrf.mxu1  ;;  %13031 = vmatprep.subr.bf16.mxu1 %v24013_v34  ;;  %13018 = vmatprep.mubr.bf16.mxu0 %v25819_v38  ;;  %v24017_v34 = vld [vmem:[#allocation8 + $0x3008] ss:$72 sps:$4 sm:$0xff]  }
 0x6bd   : > { %v25961_v27 = vadd.f32 %v12720_v14, %v26407_v49  ;;  %v12722_v62 = vadd.f32 %v12721_v9, %v12678_v30  ;;  %13061 = vmatprep.mubr.bf16.mxu1 %v25822_v1  ;;  %v12680_v6 = vpop.f32.mrf.mxu0  ;;  %v26408_v14 = vld [vmem:[#allocation47_spill] sm:$0xff]  ;;  %v26409_v30 = vld [vmem:[#allocation45_spill] sm:$0xff] }
 0x6be   : > { %v12723_v7 = vpop.f32.mrf.mxu1  ;;  %12989 = vmatpush1.bf16.msra.mxu0 %v24008_v5  ;;  %v8471_v3 = vadd.f32 %v26408_v14, %v8428_v28  ;;  %v24023_v5 = vld [vmem:[#allocation8 + $0x2f78] ss:$72 sps:$4 sm:$0xff]   ;;  %v24034_v28 = vld [vmem:[#allocation8 + $0x255c] ss:$72 sps:$4 sm:$0xff]  }
 0x6bf   : > { %v25965_v50 = vadd.f32 %v12722_v62, %v8467_v2  ;;  %v12724_v41 = vadd.f32 %v12723_v7, %v12680_v6  ;;  %13032 = vmatpush1.bf16.msra.mxu1 %v24011_v52  ;;  %v12682_v33 = vpop.f32.mrf.mxu0  ;;  %12990 = vmatprep.subr.bf16.mxu0 %v24016_v8  ;;  %v24020_v62 = vld [vmem:[#allocation8 + $0x2678] ss:$72 sps:$4 sm:$0xff]   ;;  %v24028_v52 = vld [vmem:[#allocation8 + $0x25ec] ss:$72 sps:$4 sm:$0xff]   ;;  %v24026_v8 = vld [vmem:[#allocation8 + $0x25e8] ss:$72 sps:$4 sm:$0xff]  }
 0x6c0   : > { %v12725_v25 = vpop.f32.mrf.mxu1  ;;  %13033 = vmatprep.subr.bf16.mxu1 %v24019_v63  ;;  %v24031_v2 = vld [vmem:[#allocation8 + $0x2eec] ss:$72 sps:$4 sm:$0xff]   ;;  %v24029_v63 = vld [vmem:[#allocation8 + $0x2ee8] ss:$72 sps:$4 sm:$0xff]   ;;  %v24037_v6 = vld [vmem:[#allocation8 + $0x2e5c] ss:$72 sps:$4 sm:$0xff]  }
 0x6c1   : > { %v25969_v9 = vadd.f32 %v12724_v41, %v26409_v30  ;;  %v12726_v51 = vadd.f32 %v12725_v25, %v12682_v33  ;;  %v24032_v7 = vld [vmem:[#allocation8 + $0x2558] ss:$72 sps:$4 sm:$0xff]   ;;  %v24038_v33 = vld [vmem:[#allocation8 + $0x24c8] ss:$72 sps:$4 sm:$0xff]   ;;  %v24052_v30 = vld [vmem:[#allocation8 + $0x2cac] ss:$72 sps:$4 sm:$0xff]  }
 0x6c2   : > { %12991 = vmatpush1.bf16.msra.mxu0 %v24014_v55  ;;  %v24035_v41 = vld [vmem:[#allocation8 + $0x2e58] ss:$72 sps:$4 sm:$0xff]   ;;  %v24040_v55 = vld [vmem:[#allocation8 + $0x24cc] ss:$72 sps:$4 sm:$0xff]   ;;  %v24041_v25 = vld [vmem:[#allocation8 + $0x2dc8] ss:$72 sps:$4 sm:$0xff]  }
 0x6c3   : > { %v25971_v49 = vadd.f32 %v12726_v51, %v8471_v3  ;;  %13034 = vmatpush1.bf16.msra.mxu1 %v24017_v34  ;;  %12992 = vmatprep.subr.bf16.mxu0 %v24022_v44  ;;  %v24043_v34 = vld [vmem:[#allocation8 + $0x2dcc] ss:$72 sps:$4 sm:$0xff]   ;;  %v24046_v44 = vld [vmem:[#allocation8 + $0x243c] ss:$72 sps:$4 sm:$0xff]   ;;  %v24044_v14 = vld [vmem:[#allocation8 + $0x2438] ss:$72 sps:$4 sm:$0xff]  }
 0x6c4   : > { %13035 = vmatprep.subr.bf16.mxu1 %v24025_v42  ;;  %v24049_v42 = vld [vmem:[#allocation8 + $0x2d3c] ss:$72 sps:$4 sm:$0xff]   ;;  %v24047_v3 = vld [vmem:[#allocation8 + $0x2d38] ss:$72 sps:$4 sm:$0xff]   ;;  %v24055_v51 = vld [vmem:[#allocation8 + $0x35ac] ss:$72 sps:$4 sm:$0xff]  }
 0x6c6   : > { %12993 = vmatpush1.bf16.msra.mxu0 %v24020_v62  ;;  %v24050_v62 = vld [vmem:[#allocation8 + $0x2ca8] ss:$72 sps:$4 sm:$0xff]  }
 0x6c7   : > { %13036 = vmatpush1.bf16.msra.mxu1 %v24023_v5  ;;  %12994 = vmatprep.subr.bf16.mxu0 %v24028_v52  ;;  %v24053_v5 = vld [vmem:[#allocation8 + $0x35a8] ss:$72 sps:$4 sm:$0xff]   ;;  %v24058_v52 = vld [vmem:[#allocation8 + $0x2c1c] ss:$72 sps:$4 sm:$0xff]  }
 0x6c8   : > { %13037 = vmatprep.subr.bf16.mxu1 %v24031_v2  ;;  %v24061_v2 = vld [vmem:[#allocation8 + $0x351c] ss:$72 sps:$4 sm:$0xff]  }
 0x6ca   : > { %12995 = vmatpush1.bf16.msra.mxu0 %v24026_v8  ;;  %v24056_v8 = vld [vmem:[#allocation8 + $0x2c18] ss:$72 sps:$4 sm:$0xff]  }
 0x6cb   : > { %13038 = vmatpush1.bf16.msra.mxu1 %v24029_v63  ;;  %12996 = vmatprep.subr.bf16.mxu0 %v24034_v28  ;;  %v24059_v63 = vld [vmem:[#allocation8 + $0x3518] ss:$72 sps:$4 sm:$0xff]   ;;  %v24064_v28 = vld [vmem:[#allocation8 + $0x2b8c] ss:$72 sps:$4 sm:$0xff]  }
 0x6cc   : > { %13039 = vmatprep.subr.bf16.mxu1 %v24037_v6  ;;  %v24067_v6 = vld [vmem:[#allocation8 + $0x348c] ss:$72 sps:$4 sm:$0xff]  }
 0x6ce   : > { %12997 = vmatpush1.bf16.msra.mxu0 %v24032_v7  ;;  %v24062_v7 = vld [vmem:[#allocation8 + $0x2b88] ss:$72 sps:$4 sm:$0xff]  }
 0x6cf   : > { %13040 = vmatpush1.bf16.msra.mxu1 %v24035_v41  ;;  %12998 = vmatprep.subr.bf16.mxu0 %v24040_v55  ;;  %v24065_v41 = vld [vmem:[#allocation8 + $0x3488] ss:$72 sps:$4 sm:$0xff]   ;;  %v24070_v55 = vld [vmem:[#allocation8 + $0x2afc] ss:$72 sps:$4 sm:$0xff]  }
 0x6d0   : > { %13041 = vmatprep.subr.bf16.mxu1 %v24043_v34  ;;  %v24073_v34 = vld [vmem:[#allocation8 + $0x33fc] ss:$72 sps:$4 sm:$0xff]  }
 0x6d2   : > { %12999 = vmatpush1.bf16.msra.mxu0 %v24038_v33  ;;  %v24068_v33 = vld [vmem:[#allocation8 + $0x2af8] ss:$72 sps:$4 sm:$0xff]  }
 0x6d3   : > { %13042 = vmatpush1.bf16.msra.mxu1 %v24041_v25  ;;  %13000 = vmatprep.subr.bf16.mxu0 %v24046_v44  ;;  %v24071_v25 = vld [vmem:[#allocation8 + $0x33f8] ss:$72 sps:$4 sm:$0xff]   ;;  %v24076_v44 = vld [vmem:[#allocation8 + $0x2a6c] ss:$72 sps:$4 sm:$0xff]  }
 0x6d4   : > { %13043 = vmatprep.subr.bf16.mxu1 %v24049_v42  ;;  %v24079_v42 = vld [vmem:[#allocation8 + $0x336c] ss:$72 sps:$4 sm:$0xff]  }
 0x6d6   : > { %13001 = vmatpush1.bf16.msra.mxu0 %v24044_v14  ;;  %v24074_v14 = vld [vmem:[#allocation8 + $0x2a68] ss:$72 sps:$4 sm:$0xff]  }
 0x6d7   : > { %13044 = vmatpush1.bf16.msra.mxu1 %v24047_v3  ;;  %13002 = vmatprep.subr.bf16.mxu0 %v24052_v30  ;;  %v24077_v3 = vld [vmem:[#allocation8 + $0x3368] ss:$72 sps:$4 sm:$0xff]   ;;  %v24082_v30 = vld [vmem:[#allocation8 + $0x29dc] ss:$72 sps:$4 sm:$0xff]  }
 0x6d8   : > { %13045 = vmatprep.subr.bf16.mxu1 %v24055_v51  ;;  %v24085_v51 = vld [vmem:[#allocation8 + $0x32dc] ss:$72 sps:$4 sm:$0xff]  }
 0x6da   : > { %13003 = vmatpush2.bf16.msra.mxu0 %v24050_v62  ;;  %v24080_v62 = vld [vmem:[#allocation8 + $0x29d8] ss:$72 sps:$4 sm:$0xff]  }
 0x6db   : > { %13046 = vmatpush2.bf16.msra.mxu1 %v24053_v5  ;;  %13004 = vmatprep.subr.bf16.mxu0 %v24058_v52  ;;  %v24083_v5 = vld [vmem:[#allocation8 + $0x32d8] ss:$72 sps:$4 sm:$0xff]   ;;  %v24088_v52 = vld [vmem:[#allocation8 + $0x294c] ss:$72 sps:$4 sm:$0xff]  }
 0x6dc   : > { %13047 = vmatprep.subr.bf16.mxu1 %v24061_v2  ;;  %v24091_v2 = vld [vmem:[#allocation8 + $0x324c] ss:$72 sps:$4 sm:$0xff]  }
 0x6de   : > { %13005 = vmatpush2.bf16.msra.mxu0 %v24056_v8  ;;  %v24086_v8 = vld [vmem:[#allocation8 + $0x2948] ss:$72 sps:$4 sm:$0xff]  }
 0x6df   : > { %13048 = vmatpush2.bf16.msra.mxu1 %v24059_v63  ;;  %13006 = vmatprep.subr.bf16.mxu0 %v24064_v28  ;;  %v24089_v63 = vld [vmem:[#allocation8 + $0x3248] ss:$72 sps:$4 sm:$0xff]   ;;  %v24094_v28 = vld [vmem:[#allocation8 + $0x28bc] ss:$72 sps:$4 sm:$0xff]  }
 0x6e0   : > { %13049 = vmatprep.subr.bf16.mxu1 %v24067_v6  ;;  %v24097_v6 = vld [vmem:[#allocation8 + $0x31bc] ss:$72 sps:$4 sm:$0xff]  }
 0x6e2   : > { %13007 = vmatpush2.bf16.msra.mxu0 %v24062_v7  ;;  %v24092_v7 = vld [vmem:[#allocation8 + $0x28b8] ss:$72 sps:$4 sm:$0xff]  }
 0x6e3   : > { %13050 = vmatpush2.bf16.msra.mxu1 %v24065_v41  ;;  %13008 = vmatprep.subr.bf16.mxu0 %v24070_v55  ;;  %v24095_v41 = vld [vmem:[#allocation8 + $0x31b8] ss:$72 sps:$4 sm:$0xff]   ;;  %v24100_v55 = vld [vmem:[#allocation8 + $0x2834] ss:$72 sps:$4 sm:$0xff]  }
 0x6e4   : > { %13051 = vmatprep.subr.bf16.mxu1 %v24073_v34  ;;  %v24103_v34 = vld [vmem:[#allocation8 + $0x3134] ss:$72 sps:$4 sm:$0xff]  }
 0x6e6   : > { %13009 = vmatpush2.bf16.msra.mxu0 %v24068_v33  ;;  %v24098_v33 = vld [vmem:[#allocation8 + $0x2830] ss:$72 sps:$4 sm:$0xff]  }
 0x6e7   : > { %13052 = vmatpush2.bf16.msra.mxu1 %v24071_v25  ;;  %13010 = vmatprep.subr.bf16.mxu0 %v24076_v44  ;;  %v24101_v25 = vld [vmem:[#allocation8 + $0x3130] ss:$72 sps:$4 sm:$0xff]   ;;  %v24106_v44 = vld [vmem:[#allocation8 + $0x27a4] ss:$72 sps:$4 sm:$0xff]  }
 0x6e8   : > { %13053 = vmatprep.subr.bf16.mxu1 %v24079_v42  ;;  %v24109_v42 = vld [vmem:[#allocation8 + $0x30a4] ss:$72 sps:$4 sm:$0xff]  }
 0x6ea   : > { %13011 = vmatpush2.bf16.msra.mxu0 %v24074_v14 }
 0x6eb   : > { %13054 = vmatpush2.bf16.msra.mxu1 %v24077_v3  ;;  %13012 = vmatprep.subr.bf16.mxu0 %v24082_v30 }
 0x6ec   : > { %13055 = vmatprep.subr.bf16.mxu1 %v24085_v51  ;;  %v24104_v51 = vld [vmem:[#allocation8 + $0x27a0] ss:$72 sps:$4 sm:$0xff]  }
 0x6ee   : > { %13013 = vmatpush2.bf16.msra.mxu0 %v24080_v62  ;;  %v24107_v62 = vld [vmem:[#allocation8 + $0x30a0] ss:$72 sps:$4 sm:$0xff]  }
 0x6ef   : > { %13056 = vmatpush2.bf16.msra.mxu1 %v24083_v5  ;;  %13014 = vmatprep.subr.bf16.mxu0 %v24088_v52 }
 0x6f0   : > { %13057 = vmatprep.subr.bf16.mxu1 %v24091_v2  ;;  %v24112_v2 = vld [vmem:[#allocation8 + $0x2714] ss:$72 sps:$4 sm:$0xff]  }
 0x6f2   : > { %13015 = vmatpush2.bf16.msra.mxu0 %v24086_v8  ;;  %v24115_v8 = vld [vmem:[#allocation8 + $0x3014] ss:$72 sps:$4 sm:$0xff]  }
 0x6f3   : > { %13058 = vmatpush2.bf16.msra.mxu1 %v24089_v63  ;;  %13016 = vmatprep.subr.bf16.mxu0 %v24094_v28  ;;  %v26410_v63 = vld [vmem:[#allocation48_spill] sm:$0xff] }
 0x6f4   : > { %13059 = vmatprep.subr.bf16.mxu1 %v24097_v6 }
 0x6f6   : > { %13017 = vmatpush2.bf16.msra.mxu0 %v24092_v7 }
 0x6f7   : > { %13060 = vmatpush2.bf16.msra.mxu1 %v24095_v41  ;;  %13072 = vmatprep.subr.bf16.mxu0 %v24100_v55 }
 0x6f8   : > { %13115 = vmatprep.subr.bf16.mxu1 %v24103_v34 }
 0x6f9   : > { %v12762_v14 = vpop.f32.mrf.mxu0  ;;  %13019 = vmatmul.mubr.bf16.vlgmr.msra.gmra.mxu0 %v25844_v43 }
 0x6fa   : > { %v12805_v3 = vpop.f32.mrf.mxu1  ;;  %13062 = vmatmul.mubr.bf16.vlgmr.msra.gmra.mxu1 %v25847_v11  ;;  %13073 = vmatpush1.bf16.msra.mxu0 %v24098_v33  ;;  %v24110_v33 = vld [vmem:[#allocation8 + $0x2710] ss:$72 sps:$4 sm:$0xff]  }
 0x6fb   : > { %v12806_v30 = vadd.f32 %v12805_v3, %v12762_v14  ;;  %13116 = vmatpush1.bf16.msra.mxu1 %v24101_v25  ;;  %v12764_v5 = vpop.f32.mrf.mxu0  ;;  %13074 = vmatprep.subr.bf16.mxu0 %v24106_v44  ;;  %v24113_v25 = vld [vmem:[#allocation8 + $0x3010] ss:$72 sps:$4 sm:$0xff]   ;;  %v24118_v14 = vld [vmem:[#allocation8 + $0x2684] ss:$72 sps:$4 sm:$0xff]  }
 0x6fc   : > { %v12807_v52 = vpop.f32.mrf.mxu1  ;;  %13117 = vmatprep.subr.bf16.mxu1 %v24109_v42  ;;  %13104 = vmatprep.mubr.bf16.mxu0 %v25819_v38  ;;  %v24121_v3 = vld [vmem:[#allocation8 + $0x2f84] ss:$72 sps:$4 sm:$0xff]  }
 0x6fd   : > { %v25976_v28 = vadd.f32 %v12806_v30, %v26410_v63  ;;  %v12808_v6 = vadd.f32 %v12807_v52, %v12764_v5  ;;  %13147 = vmatprep.mubr.bf16.mxu1 %v25822_v1  ;;  %v12766_v7 = vpop.f32.mrf.mxu0  ;;  %v24127_v5 = vld [vmem:[#allocation8 + $0x2ef4] ss:$72 sps:$4 sm:$0xff]   ;;  %v24122_v52 = vld [vmem:[#allocation8 + $0x25f0] ss:$72 sps:$4 sm:$0xff]   ;;  %v24131_v63 = vld [vmem:[#allocation8 + $0x2e60] ss:$72 sps:$4 sm:$0xff]  }
 0x6fe   : > { %v12809_v41 = vpop.f32.mrf.mxu1  ;;  %13075 = vmatpush1.bf16.msra.mxu0 %v24104_v51  ;;  %v24119_v51 = vld [vmem:[#allocation8 + $0x2f80] ss:$72 sps:$4 sm:$0xff]  }
 0x6ff   : > { %26411 = vst [vmem:[#allocation28_spill] sm:$0xff] %v25976_v28  ;;  %v25981_v55 = vadd.f32 %v12808_v6, %v25805_v24  ;;  %v12810_v34 = vadd.f32 %v12809_v41, %v12766_v7  ;;  %13118 = vmatpush1.bf16.msra.mxu1 %v24107_v62  ;;  %v12768_v44 = vpop.f32.mrf.mxu0  ;;  %13076 = vmatprep.subr.bf16.mxu0 %v24112_v2  ;;  %v24116_v24 = vld [vmem:[#allocation8 + $0x2680] ss:$72 sps:$4 sm:$0xff]   ;;  %v24124_v62 = vld [vmem:[#allocation8 + $0x25f4] ss:$72 sps:$4 sm:$0xff]  }
 0x700   : > { %v12811_v42 = vpop.f32.mrf.mxu1  ;;  %13119 = vmatprep.subr.bf16.mxu1 %v24115_v8  ;;  %v24125_v2 = vld [vmem:[#allocation8 + $0x2ef0] ss:$72 sps:$4 sm:$0xff]   ;;  %v24133_v8 = vld [vmem:[#allocation8 + $0x2e64] ss:$72 sps:$4 sm:$0xff]   ;;  %v24136_v6 = vld [vmem:[#allocation8 + $0x24d4] ss:$72 sps:$4 sm:$0xff]  }
 0x701   : > { %v25984_v38 = vadd.f32 %v12810_v34, %v25808_v20  ;;  %v12812_v1 = vadd.f32 %v12811_v42, %v12768_v44  ;;  %v24130_v20 = vld [vmem:[#allocation8 + $0x2564] ss:$72 sps:$4 sm:$0xff]   ;;  %v24139_v7 = vld [vmem:[#allocation8 + $0x2dd4] ss:$72 sps:$4 sm:$0xff]   ;;  %v24134_v41 = vld [vmem:[#allocation8 + $0x24d0] ss:$72 sps:$4 sm:$0xff]  }
 0x702   : > { %13077 = vmatpush1.bf16.msra.mxu0 %v24110_v33  ;;  %v24137_v34 = vld [vmem:[#allocation8 + $0x2dd0] ss:$72 sps:$4 sm:$0xff]   ;;  %v24142_v33 = vld [vmem:[#allocation8 + $0x2444] ss:$72 sps:$4 sm:$0xff]   ;;  %v24140_v44 = vld [vmem:[#allocation8 + $0x2440] ss:$72 sps:$4 sm:$0xff]  }
 0x703   : > { %26412 = vst [vmem:[#allocation39_spill] sm:$0xff] %v25984_v38  ;;  %v25987_v30 = vadd.f32 %v12812_v1, %v25810_v60  ;;  %13120 = vmatpush1.bf16.msra.mxu1 %v24113_v25  ;;  %13078 = vmatprep.subr.bf16.mxu0 %v24118_v14  ;;  %v24128_v60 = vld [vmem:[#allocation8 + $0x2560] ss:$72 sps:$4 sm:$0xff]   ;;  %v24145_v25 = vld [vmem:[#allocation8 + $0x2d44] ss:$72 sps:$4 sm:$0xff]  }
 0x704   : > { %13121 = vmatprep.subr.bf16.mxu1 %v24121_v3  ;;  %v24143_v42 = vld [vmem:[#allocation8 + $0x2d40] ss:$72 sps:$4 sm:$0xff]   ;;  %v24148_v14 = vld [vmem:[#allocation8 + $0x2cb4] ss:$72 sps:$4 sm:$0xff]   ;;  %v24146_v1 = vld [vmem:[#allocation8 + $0x2cb0] ss:$72 sps:$4 sm:$0xff]  }
 0x705   : > { %26413 = vst [vmem:[#allocation40_spill] sm:$0xff] %v25987_v30  ;;  %v24151_v3 = vld [vmem:[#allocation8 + $0x35b4] ss:$72 sps:$4 sm:$0xff]   ;;  %v24191_v30 = vld [vmem:[#allocation8 + $0x31c0] ss:$72 sps:$4 sm:$0xff]  }
 0x706   : > { %13079 = vmatpush1.bf16.msra.mxu0 %v24116_v24  ;;  %v24149_v24 = vld [vmem:[#allocation8 + $0x35b0] ss:$72 sps:$4 sm:$0xff]  }
 0x707   : > { %13122 = vmatpush1.bf16.msra.mxu1 %v24119_v51  ;;  %13080 = vmatprep.subr.bf16.mxu0 %v24124_v62  ;;  %v24154_v51 = vld [vmem:[#allocation8 + $0x2c24] ss:$72 sps:$4 sm:$0xff]  }
 0x708   : > { %13123 = vmatprep.subr.bf16.mxu1 %v24127_v5  ;;  %v24157_v62 = vld [vmem:[#allocation8 + $0x3524] ss:$72 sps:$4 sm:$0xff]   ;;  %v24152_v5 = vld [vmem:[#allocation8 + $0x2c20] ss:$72 sps:$4 sm:$0xff]  }
 0x70a   : > { %13081 = vmatpush1.bf16.msra.mxu0 %v24122_v52  ;;  %v24155_v52 = vld [vmem:[#allocation8 + $0x3520] ss:$72 sps:$4 sm:$0xff]  }
 0x70b   : > { %13124 = vmatpush1.bf16.msra.mxu1 %v24125_v2  ;;  %13082 = vmatprep.subr.bf16.mxu0 %v24130_v20  ;;  %v24160_v2 = vld [vmem:[#allocation8 + $0x2b94] ss:$72 sps:$4 sm:$0xff]  }
 0x70c   : > { %13125 = vmatprep.subr.bf16.mxu1 %v24133_v8  ;;  %v24163_v20 = vld [vmem:[#allocation8 + $0x3494] ss:$72 sps:$4 sm:$0xff]   ;;  %v24158_v8 = vld [vmem:[#allocation8 + $0x2b90] ss:$72 sps:$4 sm:$0xff]  }
 0x70e   : > { %13083 = vmatpush1.bf16.msra.mxu0 %v24128_v60  ;;  %v24161_v60 = vld [vmem:[#allocation8 + $0x3490] ss:$72 sps:$4 sm:$0xff]  }
 0x70f   : > { %13126 = vmatpush1.bf16.msra.mxu1 %v24131_v63  ;;  %13084 = vmatprep.subr.bf16.mxu0 %v24136_v6  ;;  %v24166_v63 = vld [vmem:[#allocation8 + $0x2b04] ss:$72 sps:$4 sm:$0xff]  }
 0x710   : > { %13127 = vmatprep.subr.bf16.mxu1 %v24139_v7  ;;  %v24169_v6 = vld [vmem:[#allocation8 + $0x3404] ss:$72 sps:$4 sm:$0xff]   ;;  %v24164_v7 = vld [vmem:[#allocation8 + $0x2b00] ss:$72 sps:$4 sm:$0xff]  }
 0x712   : > { %13085 = vmatpush1.bf16.msra.mxu0 %v24134_v41  ;;  %v24167_v41 = vld [vmem:[#allocation8 + $0x3400] ss:$72 sps:$4 sm:$0xff]  }
 0x713   : > { %13128 = vmatpush1.bf16.msra.mxu1 %v24137_v34  ;;  %13086 = vmatprep.subr.bf16.mxu0 %v24142_v33  ;;  %v24172_v34 = vld [vmem:[#allocation8 + $0x2a74] ss:$72 sps:$4 sm:$0xff]  }
 0x714   : > { %13129 = vmatprep.subr.bf16.mxu1 %v24145_v25  ;;  %v24175_v33 = vld [vmem:[#allocation8 + $0x3374] ss:$72 sps:$4 sm:$0xff]   ;;  %v24170_v25 = vld [vmem:[#allocation8 + $0x2a70] ss:$72 sps:$4 sm:$0xff]  }
 0x716   : > { %13087 = vmatpush1.bf16.msra.mxu0 %v24140_v44  ;;  %v24173_v44 = vld [vmem:[#allocation8 + $0x3370] ss:$72 sps:$4 sm:$0xff]  }
 0x717   : > { %13130 = vmatpush1.bf16.msra.mxu1 %v24143_v42  ;;  %13088 = vmatprep.subr.bf16.mxu0 %v24148_v14  ;;  %v24178_v42 = vld [vmem:[#allocation8 + $0x29e4] ss:$72 sps:$4 sm:$0xff]  }
 0x718   : > { %13131 = vmatprep.subr.bf16.mxu1 %v24151_v3  ;;  %v24181_v14 = vld [vmem:[#allocation8 + $0x32e4] ss:$72 sps:$4 sm:$0xff]   ;;  %v24176_v3 = vld [vmem:[#allocation8 + $0x29e0] ss:$72 sps:$4 sm:$0xff]  }
 0x71a   : > { %13089 = vmatpush2.bf16.msra.mxu0 %v24146_v1  ;;  %v24179_v1 = vld [vmem:[#allocation8 + $0x32e0] ss:$72 sps:$4 sm:$0xff]  }
 0x71b   : > { %13132 = vmatpush2.bf16.msra.mxu1 %v24149_v24  ;;  %13090 = vmatprep.subr.bf16.mxu0 %v24154_v51  ;;  %v24184_v24 = vld [vmem:[#allocation8 + $0x2954] ss:$72 sps:$4 sm:$0xff]  }
 0x71c   : > { %13133 = vmatprep.subr.bf16.mxu1 %v24157_v62  ;;  %v24187_v51 = vld [vmem:[#allocation8 + $0x3254] ss:$72 sps:$4 sm:$0xff]   ;;  %v13783_v62 = vshrl.u32 %v25511_v54, 16 }
 0x71e   : > { %13091 = vmatpush2.bf16.msra.mxu0 %v24152_v5  ;;  %v13801_v5 = vshrl.u32 %v25517_v59, 16 }
 0x71f   : > { %13134 = vmatpush2.bf16.msra.mxu1 %v24155_v52  ;;  %13092 = vmatprep.subr.bf16.mxu0 %v24160_v2  ;;  %v24182_v52 = vld [vmem:[#allocation8 + $0x2950] ss:$72 sps:$4 sm:$0xff]  }
 0x720   : > { %13135 = vmatprep.subr.bf16.mxu1 %v24163_v20  ;;  %v24185_v2 = vld [vmem:[#allocation8 + $0x3250] ss:$72 sps:$4 sm:$0xff]   ;;  %v24190_v20 = vld [vmem:[#allocation8 + $0x28c4] ss:$72 sps:$4 sm:$0xff]  }
 0x722   : > { %13093 = vmatpush2.bf16.msra.mxu0 %v24158_v8  ;;  %v24193_v8 = vld [vmem:[#allocation8 + $0x31c4] ss:$72 sps:$4 sm:$0xff]  }
 0x723   : > { %13136 = vmatpush2.bf16.msra.mxu1 %v24161_v60  ;;  %13094 = vmatprep.subr.bf16.mxu0 %v24166_v63  ;;  %v26414_v60 = vld [vmem:[#allocation22_spill] sm:$0xff] }
 0x724   : > { %13137 = vmatprep.subr.bf16.mxu1 %v24169_v6  ;;  %v26415_v63 = vshrl.u32 %v26414_v60, 16 }
 0x726   : > { %13095 = vmatpush2.bf16.msra.mxu0 %v24164_v7  ;;  %v13780_v6 = vrot.slane %v26415_v63, 1  ;;  %v26416_v7 = vshll.u32 %v26414_v60, 16  ;;  %v24188_v63 = vld [vmem:[#allocation8 + $0x28c0] ss:$72 sps:$4 sm:$0xff]   ;;  %v24199_v60 = vld [vmem:[#allocation8 + $0x42f4] ss:$72 sps:$4 sm:$0xff]  }
 0x727   : > { %13138 = vmatpush2.bf16.msra.mxu1 %v24167_v41  ;;  %13096 = vmatprep.subr.bf16.mxu0 %v24172_v34  ;;  %v13785_v34 = vrot.slane %v13783_v62, 1  ;;  %v24196_v62 = vld [vmem:[#allocation8 + $0x39f4] ss:$72 sps:$4 sm:$0xff]  }
 0x728   : > { %13139 = vmatprep.subr.bf16.mxu1 %v24175_v33  ;;  %v13781_v41 = vrot.slane %v26416_v7, 2  ;;  %v26417_v33 = vshll.u32 %v25511_v54, 16 }
 0x72a   : > { %13097 = vmatpush2.bf16.msra.mxu0 %v24170_v25  ;;  %v13786_v25 = vrot.slane %v26417_v33, 2  ;;  %v13782_v54 = vor.u32 %v13781_v41, %v13780_v6  ;;  %v24203_v6 = vld [vmem:[#allocation8 + $0x4260] ss:$72 sps:$4 sm:$0xff]  }
 0x72b   : > { %13140 = vmatpush2.bf16.msra.mxu1 %v24173_v44  ;;  %13098 = vmatprep.subr.bf16.mxu0 %v24178_v42  ;;  %v26418_v44 = vld [vmem:[#allocation23_spill] sm:$0xff] }
 0x72c   : > { %13141 = vmatprep.subr.bf16.mxu1 %v24181_v14  ;;  %v26419_v42 = vshrl.u32 %v26418_v44, 16  ;;  %v13787_v7 = vor.u32 %v13786_v25, %v13785_v34  ;;  %v24208_v25 = vld [vmem:[#allocation8 + $0x38d4] ss:$72 sps:$4 sm:$0xff]  }
 0x72e   : > { %13099 = vmatpush2.bf16.msra.mxu0 %v24176_v3  ;;  %v13798_v14 = vrot.slane %v26419_v42, 1  ;;  %v26420_v3 = vshll.u32 %v26418_v44, 16  ;;  %v24194_v44 = vld [vmem:[#allocation8 + $0x39f0] ss:$72 sps:$4 sm:$0xff]  }
 0x72f   : > { %13142 = vmatpush2.bf16.msra.mxu1 %v24179_v1  ;;  %13100 = vmatprep.subr.bf16.mxu0 %v24184_v24  ;;  %v13803_v24 = vrot.slane %v13801_v5, 1  ;;  %v24197_v42 = vld [vmem:[#allocation8 + $0x42f0] ss:$72 sps:$4 sm:$0xff]   ;;  %v24205_v5 = vld [vmem:[#allocation8 + $0x4264] ss:$72 sps:$4 sm:$0xff]  }
 0x730   : > { %13143 = vmatprep.subr.bf16.mxu1 %v24187_v51  ;;  %v13799_v1 = vrot.slane %v26420_v3, 2  ;;  %v26421_v51 = vshll.u32 %v25517_v59, 16  ;;  %v24202_v59 = vld [vmem:[#allocation8 + $0x3964] ss:$72 sps:$4 sm:$0xff]  }
 0x732   : > { %v13804_v38 = vrot.slane %v26421_v51, 2  ;;  %13101 = vmatpush2.bf16.msra.mxu0 %v24182_v52  ;;  %v13800_v33 = vor.u32 %v13799_v1, %v13798_v14  ;;  %v24211_v14 = vld [vmem:[#allocation8 + $0x41d4] ss:$72 sps:$4 sm:$0xff]   ;;  %v24206_v51 = vld [vmem:[#allocation8 + $0x38d0] ss:$72 sps:$4 sm:$0xff]  }
 0x733   : > { %13144 = vmatpush2.bf16.msra.mxu1 %v24185_v2  ;;  %13102 = vmatprep.subr.bf16.mxu0 %v24190_v20  ;;  %v26006_v20 = vsel %vm13770_vm2, %v13782_v54, %v13787_v7  ;;  %v24217_v54 = vld [vmem:[#allocation8 + $0x4144] ss:$72 sps:$4 sm:$0xff]  }
 0x734   : > { %13145 = vmatprep.subr.bf16.mxu1 %v24193_v8  ;;  %v13805_v28 = vor.u32 %v13804_v38, %v13803_v24  ;;  %v24200_v8 = vld [vmem:[#allocation8 + $0x3960] ss:$72 sps:$4 sm:$0xff]  }
 0x736   : > { %13103 = vmatpush2.bf16.msra.mxu0 %v24188_v63  ;;  %v26009_v38 = vsel %vm13770_vm2, %v13800_v33, %v13805_v28  ;;  %v24209_v63 = vld [vmem:[#allocation8 + $0x41d0] ss:$72 sps:$4 sm:$0xff]  }
 0x737   : > { %13146 = vmatpush2.bf16.msra.mxu1 %v24191_v30  ;;  %16691 = vmatprep.subr.bf16.mxu0 %v24196_v62 }
 0x738   : > { %16734 = vmatprep.subr.bf16.mxu1 %v24199_v60 }
 0x739   : > { %v12848_v52 = vpop.f32.mrf.mxu0  ;;  %13105 = vmatmul.mubr.bf16.vlgmr.msra.gmra.mxu0 %v25844_v43 }
 0x73a   : > { %v12891_v2 = vpop.f32.mrf.mxu1  ;;  %13148 = vmatmul.mubr.bf16.vlgmr.msra.gmra.mxu1 %v25847_v11  ;;  %16692 = vmatpush1.bf16.msra.mxu0 %v24194_v44 }
 0x73b   : > { %v12892_v30 = vadd.f32 %v12891_v2, %v12848_v52  ;;  %16735 = vmatpush1.bf16.msra.mxu1 %v24197_v42  ;;  %v12850_v41 = vpop.f32.mrf.mxu0  ;;  %16693 = vmatprep.subr.bf16.mxu0 %v24202_v59  ;;  %v24215_v42 = vld [vmem:[#allocation8 + $0x4140] ss:$72 sps:$4 sm:$0xff]   ;;  %v24220_v59 = vld [vmem:[#allocation8 + $0x37b4] ss:$72 sps:$4 sm:$0xff]   ;;  %v24218_v52 = vld [vmem:[#allocation8 + $0x37b0] ss:$72 sps:$4 sm:$0xff]  }
 0x73c   : > { %v12893_v34 = vpop.f32.mrf.mxu1  ;;  %16736 = vmatprep.subr.bf16.mxu1 %v24205_v5  ;;  %16723 = vmatprep.mubr.bf16.mxu0 %v26006_v20  ;;  %v24223_v5 = vld [vmem:[#allocation8 + $0x40b4] ss:$72 sps:$4 sm:$0xff]   ;;  %v24221_v2 = vld [vmem:[#allocation8 + $0x40b0] ss:$72 sps:$4 sm:$0xff]  }
 0x73d   : > { %v26012_v43 = vadd.f32 %v12892_v30, %v25825_v39  ;;  %v12894_v11 = vadd.f32 %v12893_v34, %v12850_v41  ;;  %16766 = vmatprep.mubr.bf16.mxu1 %v26009_v38  ;;  %v12852_v28 = vpop.f32.mrf.mxu0  ;;  %v24214_v39 = vld [vmem:[#allocation8 + $0x3844] ss:$72 sps:$4 sm:$0xff]   ;;  %v24235_v41 = vld [vmem:[#allocation8 + $0x3f94] ss:$72 sps:$4 sm:$0xff]   ;;  %v24230_v34 = vld [vmem:[#allocation8 + $0x3690] ss:$72 sps:$4 sm:$0xff]  }
 0x73e   : > { %v12895_v3 = vpop.f32.mrf.mxu1  ;;  %16694 = vmatpush1.bf16.msra.mxu0 %v24200_v8  ;;  %v24229_v30 = vld [vmem:[#allocation8 + $0x4024] ss:$72 sps:$4 sm:$0xff]   ;;  %v24227_v8 = vld [vmem:[#allocation8 + $0x4020] ss:$72 sps:$4 sm:$0xff]  }
 0x73f   : > { %v26017_v1 = vadd.f32 %v12894_v11, %v25832_v10  ;;  %v12896_v24 = vadd.f32 %v12895_v3, %v12852_v28  ;;  %16737 = vmatpush1.bf16.msra.mxu1 %v24203_v6  ;;  %v12854_v62 = vpop.f32.mrf.mxu0  ;;  %16695 = vmatprep.subr.bf16.mxu0 %v24208_v25  ;;  %v24212_v10 = vld [vmem:[#allocation8 + $0x3840] ss:$72 sps:$4 sm:$0xff]   ;;  %v24232_v6 = vld [vmem:[#allocation8 + $0x3694] ss:$72 sps:$4 sm:$0xff]   ;;  %v24233_v25 = vld [vmem:[#allocation8 + $0x3f90] ss:$72 sps:$4 sm:$0xff]  }
 0x740   : > { %v12897_v60 = vpop.f32.mrf.mxu1  ;;  %16738 = vmatprep.subr.bf16.mxu1 %v24211_v14  ;;  %v24238_v14 = vld [vmem:[#allocation8 + $0x3604] ss:$72 sps:$4 sm:$0xff]   ;;  %v24236_v28 = vld [vmem:[#allocation8 + $0x3600] ss:$72 sps:$4 sm:$0xff]  }
 0x741   : > { %v26020_v7 = vadd.f32 %v12896_v24, %v25835_v48  ;;  %v12898_v33 = vadd.f32 %v12897_v60, %v12854_v62  ;;  %v24226_v48 = vld [vmem:[#allocation8 + $0x3724] ss:$72 sps:$4 sm:$0xff]   ;;  %v24239_v3 = vld [vmem:[#allocation8 + $0x3f00] ss:$72 sps:$4 sm:$0xff]   ;;  %v24244_v24 = vld [vmem:[#allocation8 + $0x3e74] ss:$72 sps:$4 sm:$0xff]  }
 0x742   : > { %16696 = vmatpush1.bf16.msra.mxu0 %v24206_v51  ;;  %v24241_v11 = vld [vmem:[#allocation8 + $0x3f04] ss:$72 sps:$4 sm:$0xff]   ;;  %v24247_v51 = vld [vmem:[#allocation8 + $0x4774] ss:$72 sps:$4 sm:$0xff]   ;;  %v24245_v62 = vld [vmem:[#allocation8 + $0x4770] ss:$72 sps:$4 sm:$0xff]  }
 0x743   : > { %v26023_v44 = vadd.f32 %v12898_v33, %v25837_v15  ;;  %16739 = vmatpush1.bf16.msra.mxu1 %v24209_v63  ;;  %16697 = vmatprep.subr.bf16.mxu0 %v24214_v39  ;;  %v24224_v15 = vld [vmem:[#allocation8 + $0x3720] ss:$72 sps:$4 sm:$0xff]   ;;  %v24242_v63 = vld [vmem:[#allocation8 + $0x3e70] ss:$72 sps:$4 sm:$0xff]   ;;  %v24250_v60 = vld [vmem:[#allocation8 + $0x3de4] ss:$72 sps:$4 sm:$0xff]  }
 0x744   : > { %16740 = vmatprep.subr.bf16.mxu1 %v24217_v54  ;;  %v24253_v39 = vld [vmem:[#allocation8 + $0x46e4] ss:$72 sps:$4 sm:$0xff]   ;;  %v24248_v54 = vld [vmem:[#allocation8 + $0x3de0] ss:$72 sps:$4 sm:$0xff]  }
 0x745   : > { %v24251_v33 = vld [vmem:[#allocation8 + $0x46e0] ss:$72 sps:$4 sm:$0xff]  }
 0x746   : > { %16698 = vmatpush1.bf16.msra.mxu0 %v24212_v10  ;;  %v24256_v10 = vld [vmem:[#allocation8 + $0x3d54] ss:$72 sps:$4 sm:$0xff]  }
 0x747   : > { %16741 = vmatpush1.bf16.msra.mxu1 %v24215_v42  ;;  %16699 = vmatprep.subr.bf16.mxu0 %v24220_v59  ;;  %v24259_v42 = vld [vmem:[#allocation8 + $0x4654] ss:$72 sps:$4 sm:$0xff]   ;;  %v24254_v59 = vld [vmem:[#allocation8 + $0x3d50] ss:$72 sps:$4 sm:$0xff]  }
 0x748   : > { %16742 = vmatprep.subr.bf16.mxu1 %v24223_v5  ;;  %v24257_v5 = vld [vmem:[#allocation8 + $0x4650] ss:$72 sps:$4 sm:$0xff]  }
 0x74a   : > { %16700 = vmatpush1.bf16.msra.mxu0 %v24218_v52  ;;  %v24262_v52 = vld [vmem:[#allocation8 + $0x3cc4] ss:$72 sps:$4 sm:$0xff]  }
 0x74b   : > { %16743 = vmatpush1.bf16.msra.mxu1 %v24221_v2  ;;  %16701 = vmatprep.subr.bf16.mxu0 %v24226_v48  ;;  %v24265_v2 = vld [vmem:[#allocation8 + $0x45c4] ss:$72 sps:$4 sm:$0xff]   ;;  %v24260_v48 = vld [vmem:[#allocation8 + $0x3cc0] ss:$72 sps:$4 sm:$0xff]  }
 0x74c   : > { %16744 = vmatprep.subr.bf16.mxu1 %v24229_v30  ;;  %v24263_v30 = vld [vmem:[#allocation8 + $0x45c0] ss:$72 sps:$4 sm:$0xff]  }
 0x74e   : > { %16702 = vmatpush1.bf16.msra.mxu0 %v24224_v15  ;;  %v24268_v15 = vld [vmem:[#allocation8 + $0x3c34] ss:$72 sps:$4 sm:$0xff]  }
 0x74f   : > { %16745 = vmatpush1.bf16.msra.mxu1 %v24227_v8  ;;  %16703 = vmatprep.subr.bf16.mxu0 %v24232_v6  ;;  %v24271_v8 = vld [vmem:[#allocation8 + $0x4534] ss:$72 sps:$4 sm:$0xff]   ;;  %v24266_v6 = vld [vmem:[#allocation8 + $0x3c30] ss:$72 sps:$4 sm:$0xff]  }
 0x750   : > { %16746 = vmatprep.subr.bf16.mxu1 %v24235_v41  ;;  %v24269_v41 = vld [vmem:[#allocation8 + $0x4530] ss:$72 sps:$4 sm:$0xff]  }
 0x752   : > { %16704 = vmatpush1.bf16.msra.mxu0 %v24230_v34  ;;  %v24274_v34 = vld [vmem:[#allocation8 + $0x3ba4] ss:$72 sps:$4 sm:$0xff]  }
 0x753   : > { %16747 = vmatpush1.bf16.msra.mxu1 %v24233_v25  ;;  %16705 = vmatprep.subr.bf16.mxu0 %v24238_v14  ;;  %v24277_v25 = vld [vmem:[#allocation8 + $0x44a4] ss:$72 sps:$4 sm:$0xff]   ;;  %v13774_v14 = vshrl.u32 %v25547_v22, 16 }
 0x754   : > { %16748 = vmatprep.subr.bf16.mxu1 %v24241_v11  ;;  %v24272_v11 = vld [vmem:[#allocation8 + $0x3ba0] ss:$72 sps:$4 sm:$0xff]  }
 0x756   : > { %16706 = vmatpush1.bf16.msra.mxu0 %v24236_v28  ;;  %v24275_v28 = vld [vmem:[#allocation8 + $0x44a0] ss:$72 sps:$4 sm:$0xff]  }
 0x757   : > { %16749 = vmatpush1.bf16.msra.mxu1 %v24239_v3  ;;  %16707 = vmatprep.subr.bf16.mxu0 %v24244_v24  ;;  %v13792_v3 = vshrl.u32 %v25553_v26, 16  ;;  %v24280_v24 = vld [vmem:[#allocation8 + $0x3b14] ss:$72 sps:$4 sm:$0xff]  }
 0x758   : > { %16750 = vmatprep.subr.bf16.mxu1 %v24247_v51  ;;  %v24283_v51 = vld [vmem:[#allocation8 + $0x4414] ss:$72 sps:$4 sm:$0xff]  }
 0x75a   : > { %16708 = vmatpush2.bf16.msra.mxu0 %v24242_v63  ;;  %v24278_v63 = vld [vmem:[#allocation8 + $0x3b10] ss:$72 sps:$4 sm:$0xff]  }
 0x75b   : > { %16751 = vmatpush2.bf16.msra.mxu1 %v24245_v62  ;;  %16709 = vmatprep.subr.bf16.mxu0 %v24250_v60  ;;  %v26422_v62 = vshrl.u32 %v25534_v13, 16 }
 0x75c   : > { %16752 = vmatprep.subr.bf16.mxu1 %v24253_v39  ;;  %v26423_v39 = vshll.u32 %v25534_v13, 16  ;;  %v24286_v13 = vld [vmem:[#allocation8 + $0x3a84] ss:$72 sps:$4 sm:$0xff]  }
 0x75d   : > { %v13771_v60 = vrot.slane %v26422_v62, 1  ;;  %v24301_v62 = vld [vmem:[#allocation8 + $0x426c] ss:$72 sps:$4 sm:$0xff]  }
 0x75e   : > { %16710 = vmatpush2.bf16.msra.mxu0 %v24248_v54  ;;  %v13772_v54 = vrot.slane %v26423_v39, 2 }
 0x75f   : > { %16753 = vmatpush2.bf16.msra.mxu1 %v24251_v33  ;;  %16711 = vmatprep.subr.bf16.mxu0 %v24256_v10  ;;  %v13776_v33 = vrot.slane %v13774_v14, 1  ;;  %v26424_v10 = vshll.u32 %v25547_v22, 16  ;;  %v24284_v22 = vld [vmem:[#allocation8 + $0x3a80] ss:$72 sps:$4 sm:$0xff]  }
 0x760   : > { %16754 = vmatprep.subr.bf16.mxu1 %v24259_v42 }
 0x761   : > { %v13777_v42 = vrot.slane %v26424_v10, 2  ;;  %v24299_v10 = vld [vmem:[#allocation8 + $0x4268] ss:$72 sps:$4 sm:$0xff]  }
 0x762   : > { %16712 = vmatpush2.bf16.msra.mxu0 %v24254_v59  ;;  %v24281_v59 = vld [vmem:[#allocation8 + $0x4410] ss:$72 sps:$4 sm:$0xff]  }
 0x763   : > { %16755 = vmatpush2.bf16.msra.mxu1 %v24257_v5  ;;  %16713 = vmatprep.subr.bf16.mxu0 %v24262_v52  ;;  %v26425_v5 = vshrl.u32 %v25541_v17, 16 }
 0x764   : > { %16756 = vmatprep.subr.bf16.mxu1 %v24265_v2  ;;  %v26426_v2 = vshll.u32 %v25541_v17, 16  ;;  %v24292_v17 = vld [vmem:[#allocation8 + $0x39fc] ss:$72 sps:$4 sm:$0xff]  }
 0x765   : > { %v13789_v52 = vrot.slane %v26425_v5, 1  ;;  %v24304_v5 = vld [vmem:[#allocation8 + $0x38dc] ss:$72 sps:$4 sm:$0xff]  }
 0x766   : > { %16714 = vmatpush2.bf16.msra.mxu0 %v24260_v48  ;;  %v13790_v48 = vrot.slane %v26426_v2, 2 }
 0x767   : > { %16757 = vmatpush2.bf16.msra.mxu1 %v24263_v30  ;;  %16715 = vmatprep.subr.bf16.mxu0 %v24268_v15  ;;  %v13794_v30 = vrot.slane %v13792_v3, 1  ;;  %v26427_v15 = vshll.u32 %v25553_v26, 16 }
 0x768   : > { %16758 = vmatprep.subr.bf16.mxu1 %v24271_v8  ;;  %v13791_v14 = vor.u32 %v13790_v48, %v13789_v52  ;;  %v24307_v52 = vld [vmem:[#allocation8 + $0x41dc] ss:$72 sps:$4 sm:$0xff]  }
 0x769   : > { %v13795_v8 = vrot.slane %v26427_v15, 2 }
 0x76a   : > { %16716 = vmatpush2.bf16.msra.mxu0 %v24266_v6  ;;  %v24289_v6 = vld [vmem:[#allocation8 + $0x4384] ss:$72 sps:$4 sm:$0xff]  }
 0x76b   : > { %16759 = vmatpush2.bf16.msra.mxu1 %v24269_v41  ;;  %16717 = vmatprep.subr.bf16.mxu0 %v24274_v34  ;;  %v13773_v41 = vor.u32 %v13772_v54, %v13771_v60  ;;  %v24287_v34 = vld [vmem:[#allocation8 + $0x4380] ss:$72 sps:$4 sm:$0xff]  }
 0x76c   : > { %16760 = vmatprep.subr.bf16.mxu1 %v24277_v25  ;;  %v13778_v25 = vor.u32 %v13777_v42, %v13776_v33  ;;  %v24296_v33 = vld [vmem:[#allocation8 + $0x3968] ss:$72 sps:$4 sm:$0xff]  }
 0x76e   : > { %16718 = vmatpush2.bf16.msra.mxu0 %v24272_v11  ;;  %v13796_v11 = vor.u32 %v13795_v8, %v13794_v30  ;;  %v26040_v26 = vsel %vm13770_vm2, %v13773_v41, %v13778_v25  ;;  %v24305_v41 = vld [vmem:[#allocation8 + $0x41d8] ss:$72 sps:$4 sm:$0xff]   ;;  %v24313_v25 = vld [vmem:[#allocation8 + $0x414c] ss:$72 sps:$4 sm:$0xff]  }
 0x76f   : > { %16761 = vmatpush2.bf16.msra.mxu1 %v24275_v28  ;;  %16719 = vmatprep.subr.bf16.mxu0 %v24280_v24  ;;  %v24295_v28 = vld [vmem:[#allocation8 + $0x42fc] ss:$72 sps:$4 sm:$0xff]   ;;  %v24290_v24 = vld [vmem:[#allocation8 + $0x39f8] ss:$72 sps:$4 sm:$0xff]  }
 0x770   : > { %16762 = vmatprep.subr.bf16.mxu1 %v24283_v51  ;;  %v26043_v3 = vsel %vm13770_vm2, %v13791_v14, %v13796_v11  ;;  %v24293_v51 = vld [vmem:[#allocation8 + $0x42f8] ss:$72 sps:$4 sm:$0xff]  }
 0x772   : > { %16720 = vmatpush2.bf16.msra.mxu0 %v24278_v63  ;;  %v24298_v63 = vld [vmem:[#allocation8 + $0x396c] ss:$72 sps:$4 sm:$0xff]  }
 0x773   : > { %16763 = vmatpush2.bf16.msra.mxu1 %v24281_v59  ;;  %16721 = vmatprep.subr.bf16.mxu0 %v24286_v13 }
 0x774   : > { %16764 = vmatprep.subr.bf16.mxu1 %v24289_v6  ;;  %v24302_v6 = vld [vmem:[#allocation8 + $0x38d8] ss:$72 sps:$4 sm:$0xff]  }
 0x776   : > { %16722 = vmatpush2.bf16.msra.mxu0 %v24284_v22 }
 0x777   : > { %16765 = vmatpush2.bf16.msra.mxu1 %v24287_v34  ;;  %16777 = vmatprep.subr.bf16.mxu0 %v24292_v17 }
 0x778   : > { %16820 = vmatprep.subr.bf16.mxu1 %v24295_v28  ;;  %v24311_v28 = vld [vmem:[#allocation8 + $0x4148] ss:$72 sps:$4 sm:$0xff]  }
 0x779   : > { %v12934_v60 = vpop.f32.mrf.mxu0  ;;  %16724 = vmatmul.mubr.bf16.vlgmr.msra.gmra.mxu0 %v26040_v26 }
 0x77a   : > { %v12977_v39 = vpop.f32.mrf.mxu1  ;;  %16767 = vmatmul.mubr.bf16.vlgmr.msra.gmra.mxu1 %v26043_v3  ;;  %16778 = vmatpush1.bf16.msra.mxu0 %v24290_v24  ;;  %v24316_v24 = vld [vmem:[#allocation8 + $0x37bc] ss:$72 sps:$4 sm:$0xff]  }
 0x77b   : > { %v12978_v54 = vadd.f32 %v12977_v39, %v12934_v60  ;;  %16821 = vmatpush1.bf16.msra.mxu1 %v24293_v51  ;;  %v12936_v42 = vpop.f32.mrf.mxu0  ;;  %16779 = vmatprep.subr.bf16.mxu0 %v24298_v63  ;;  %v24319_v51 = vld [vmem:[#allocation8 + $0x40bc] ss:$72 sps:$4 sm:$0xff]   ;;  %v24314_v63 = vld [vmem:[#allocation8 + $0x37b8] ss:$72 sps:$4 sm:$0xff]   ;;  %v24325_v60 = vld [vmem:[#allocation8 + $0x402c] ss:$72 sps:$4 sm:$0xff]  }
 0x77c   : > { %v12979_v59 = vpop.f32.mrf.mxu1  ;;  %16822 = vmatprep.subr.bf16.mxu1 %v24301_v62  ;;  %16809 = vmatprep.mubr.bf16.mxu0 %v26006_v20  ;;  %v24317_v62 = vld [vmem:[#allocation8 + $0x40b8] ss:$72 sps:$4 sm:$0xff]   ;;  %v24323_v39 = vld [vmem:[#allocation8 + $0x4028] ss:$72 sps:$4 sm:$0xff]  }
 0x77d   : > { %v26048_v2 = vadd.f32 %v12978_v54, %v25852_v4  ;;  %v12980_v48 = vadd.f32 %v12979_v59, %v12936_v42  ;;  %16852 = vmatprep.mubr.bf16.mxu1 %v26009_v38  ;;  %v12938_v30 = vpop.f32.mrf.mxu0  ;;  %v24310_v4 = vld [vmem:[#allocation8 + $0x384c] ss:$72 sps:$4 sm:$0xff]   ;;  %v24328_v54 = vld [vmem:[#allocation8 + $0x369c] ss:$72 sps:$4 sm:$0xff]   ;;  %v24329_v42 = vld [vmem:[#allocation8 + $0x3f98] ss:$72 sps:$4 sm:$0xff]  }
 0x77e   : > { %v12981_v15 = vpop.f32.mrf.mxu1  ;;  %16780 = vmatpush1.bf16.msra.mxu0 %v24296_v33  ;;  %v24331_v33 = vld [vmem:[#allocation8 + $0x3f9c] ss:$72 sps:$4 sm:$0xff]   ;;  %v24334_v59 = vld [vmem:[#allocation8 + $0x360c] ss:$72 sps:$4 sm:$0xff]  }
 0x77f   : > { %v26053_v8 = vadd.f32 %v12980_v48, %v25859_v61  ;;  %v12982_v13 = vadd.f32 %v12981_v15, %v12938_v30  ;;  %16823 = vmatpush1.bf16.msra.mxu1 %v24299_v10  ;;  %v12940_v22 = vpop.f32.mrf.mxu0  ;;  %16781 = vmatprep.subr.bf16.mxu0 %v24304_v5  ;;  %v24308_v61 = vld [vmem:[#allocation8 + $0x3848] ss:$72 sps:$4 sm:$0xff]   ;;  %v24326_v10 = vld [vmem:[#allocation8 + $0x3698] ss:$72 sps:$4 sm:$0xff]   ;;  %v24337_v5 = vld [vmem:[#allocation8 + $0x3f0c] ss:$72 sps:$4 sm:$0xff]  }
 0x780   : > { %v12983_v34 = vpop.f32.mrf.mxu1  ;;  %16824 = vmatprep.subr.bf16.mxu1 %v24307_v52  ;;  %v24332_v52 = vld [vmem:[#allocation8 + $0x3608] ss:$72 sps:$4 sm:$0xff]   ;;  %v24340_v30 = vld [vmem:[#allocation8 + $0x3e7c] ss:$72 sps:$4 sm:$0xff]  }
 0x781   : > { %v26056_v14 = vadd.f32 %v12982_v13, %v25862_v58  ;;  %v12984_v11 = vadd.f32 %v12983_v34, %v12940_v22  ;;  %v24322_v58 = vld [vmem:[#allocation8 + $0x372c] ss:$72 sps:$4 sm:$0xff]   ;;  %v24335_v48 = vld [vmem:[#allocation8 + $0x3f08] ss:$72 sps:$4 sm:$0xff]   ;;  %v24343_v15 = vld [vmem:[#allocation8 + $0x477c] ss:$72 sps:$4 sm:$0xff]  }
 0x782   : > { %16782 = vmatpush1.bf16.msra.mxu0 %v24302_v6  ;;  %v24338_v13 = vld [vmem:[#allocation8 + $0x3e78] ss:$72 sps:$4 sm:$0xff]   ;;  %v24349_v22 = vld [vmem:[#allocation8 + $0x46ec] ss:$72 sps:$4 sm:$0xff]   ;;  %v24344_v34 = vld [vmem:[#allocation8 + $0x3de8] ss:$72 sps:$4 sm:$0xff]  }
 0x783   : > { %v26059_v17 = vadd.f32 %v12984_v11, %v25864_v23  ;;  %16825 = vmatpush1.bf16.msra.mxu1 %v24305_v41  ;;  %16783 = vmatprep.subr.bf16.mxu0 %v24310_v4  ;;  %v24320_v23 = vld [vmem:[#allocation8 + $0x3728] ss:$72 sps:$4 sm:$0xff]   ;;  %v24341_v6 = vld [vmem:[#allocation8 + $0x4778] ss:$72 sps:$4 sm:$0xff]   ;;  %v24346_v41 = vld [vmem:[#allocation8 + $0x3dec] ss:$72 sps:$4 sm:$0xff]  }
 0x784   : > { %16826 = vmatprep.subr.bf16.mxu1 %v24313_v25  ;;  %v24347_v4 = vld [vmem:[#allocation8 + $0x46e8] ss:$72 sps:$4 sm:$0xff]   ;;  %v24352_v25 = vld [vmem:[#allocation8 + $0x3d5c] ss:$72 sps:$4 sm:$0xff]  }
 0x785   : > { %v24355_v11 = vld [vmem:[#allocation8 + $0x465c] ss:$72 sps:$4 sm:$0xff]  }
 0x786   : > { %16784 = vmatpush1.bf16.msra.mxu0 %v24308_v61  ;;  %v24350_v61 = vld [vmem:[#allocation8 + $0x3d58] ss:$72 sps:$4 sm:$0xff]  }
 0x787   : > { %16827 = vmatpush1.bf16.msra.mxu1 %v24311_v28  ;;  %16785 = vmatprep.subr.bf16.mxu0 %v24316_v24  ;;  %v24353_v28 = vld [vmem:[#allocation8 + $0x4658] ss:$72 sps:$4 sm:$0xff]   ;;  %v24358_v24 = vld [vmem:[#allocation8 + $0x3ccc] ss:$72 sps:$4 sm:$0xff]  }
 0x788   : > { %16828 = vmatprep.subr.bf16.mxu1 %v24319_v51  ;;  %v24361_v51 = vld [vmem:[#allocation8 + $0x45cc] ss:$72 sps:$4 sm:$0xff]  }
 0x78a   : > { %16786 = vmatpush1.bf16.msra.mxu0 %v24314_v63  ;;  %v24356_v63 = vld [vmem:[#allocation8 + $0x3cc8] ss:$72 sps:$4 sm:$0xff]  }
 0x78b   : > { %16829 = vmatpush1.bf16.msra.mxu1 %v24317_v62  ;;  %16787 = vmatprep.subr.bf16.mxu0 %v24322_v58  ;;  %v24359_v62 = vld [vmem:[#allocation8 + $0x45c8] ss:$72 sps:$4 sm:$0xff]   ;;  %v24364_v58 = vld [vmem:[#allocation8 + $0x3c3c] ss:$72 sps:$4 sm:$0xff]  }
 0x78c   : > { %16830 = vmatprep.subr.bf16.mxu1 %v24325_v60  ;;  %v24367_v60 = vld [vmem:[#allocation8 + $0x453c] ss:$72 sps:$4 sm:$0xff]  }
 0x78e   : > { %16788 = vmatpush1.bf16.msra.mxu0 %v24320_v23  ;;  %v24362_v23 = vld [vmem:[#allocation8 + $0x3c38] ss:$72 sps:$4 sm:$0xff]  }
 0x78f   : > { %16831 = vmatpush1.bf16.msra.mxu1 %v24323_v39  ;;  %16789 = vmatprep.subr.bf16.mxu0 %v24328_v54  ;;  %v24365_v39 = vld [vmem:[#allocation8 + $0x4538] ss:$72 sps:$4 sm:$0xff]   ;;  %v24370_v54 = vld [vmem:[#allocation8 + $0x3bac] ss:$72 sps:$4 sm:$0xff]  }
 0x790   : > { %16832 = vmatprep.subr.bf16.mxu1 %v24331_v33  ;;  %v24373_v33 = vld [vmem:[#allocation8 + $0x44ac] ss:$72 sps:$4 sm:$0xff]  }
 0x792   : > { %16790 = vmatpush1.bf16.msra.mxu0 %v24326_v10  ;;  %v24368_v10 = vld [vmem:[#allocation8 + $0x3ba8] ss:$72 sps:$4 sm:$0xff]  }
 0x793   : > { %16833 = vmatpush1.bf16.msra.mxu1 %v24329_v42  ;;  %16791 = vmatprep.subr.bf16.mxu0 %v24334_v59  ;;  %v24371_v42 = vld [vmem:[#allocation8 + $0x44a8] ss:$72 sps:$4 sm:$0xff]   ;;  %v24376_v59 = vld [vmem:[#allocation8 + $0x3b1c] ss:$72 sps:$4 sm:$0xff]  }
 0x794   : > { %16834 = vmatprep.subr.bf16.mxu1 %v24337_v5  ;;  %v24379_v5 = vld [vmem:[#allocation8 + $0x441c] ss:$72 sps:$4 sm:$0xff]  }
 0x796   : > { %16792 = vmatpush1.bf16.msra.mxu0 %v24332_v52  ;;  %v24374_v52 = vld [vmem:[#allocation8 + $0x3b18] ss:$72 sps:$4 sm:$0xff]  }
 0x797   : > { %16835 = vmatpush1.bf16.msra.mxu1 %v24335_v48  ;;  %16793 = vmatprep.subr.bf16.mxu0 %v24340_v30  ;;  %v24377_v48 = vld [vmem:[#allocation8 + $0x4418] ss:$72 sps:$4 sm:$0xff]   ;;  %v24382_v30 = vld [vmem:[#allocation8 + $0x3a8c] ss:$72 sps:$4 sm:$0xff]  }
 0x798   : > { %16836 = vmatprep.subr.bf16.mxu1 %v24343_v15  ;;  %v24385_v15 = vld [vmem:[#allocation8 + $0x438c] ss:$72 sps:$4 sm:$0xff]  }
 0x79a   : > { %16794 = vmatpush2.bf16.msra.mxu0 %v24338_v13  ;;  %v24380_v13 = vld [vmem:[#allocation8 + $0x3a88] ss:$72 sps:$4 sm:$0xff]  }
 0x79b   : > { %16837 = vmatpush2.bf16.msra.mxu1 %v24341_v6  ;;  %16795 = vmatprep.subr.bf16.mxu0 %v24346_v41  ;;  %v24383_v6 = vld [vmem:[#allocation8 + $0x4388] ss:$72 sps:$4 sm:$0xff]   ;;  %v24388_v41 = vld [vmem:[#allocation8 + $0x3a04] ss:$72 sps:$4 sm:$0xff]  }
 0x79c   : > { %16838 = vmatprep.subr.bf16.mxu1 %v24349_v22  ;;  %v24391_v22 = vld [vmem:[#allocation8 + $0x4304] ss:$72 sps:$4 sm:$0xff]  }
 0x79e   : > { %16796 = vmatpush2.bf16.msra.mxu0 %v24344_v34  ;;  %v24386_v34 = vld [vmem:[#allocation8 + $0x3a00] ss:$72 sps:$4 sm:$0xff]  }
 0x79f   : > { %16839 = vmatpush2.bf16.msra.mxu1 %v24347_v4  ;;  %16797 = vmatprep.subr.bf16.mxu0 %v24352_v25  ;;  %v24389_v4 = vld [vmem:[#allocation8 + $0x4300] ss:$72 sps:$4 sm:$0xff]   ;;  %v24394_v25 = vld [vmem:[#allocation8 + $0x3974] ss:$72 sps:$4 sm:$0xff]  }
 0x7a0   : > { %16840 = vmatprep.subr.bf16.mxu1 %v24355_v11  ;;  %v24397_v11 = vld [vmem:[#allocation8 + $0x4274] ss:$72 sps:$4 sm:$0xff]  }
 0x7a2   : > { %16798 = vmatpush2.bf16.msra.mxu0 %v24350_v61 }
 0x7a3   : > { %16841 = vmatpush2.bf16.msra.mxu1 %v24353_v28  ;;  %16799 = vmatprep.subr.bf16.mxu0 %v24358_v24 }
 0x7a4   : > { %16842 = vmatprep.subr.bf16.mxu1 %v24361_v51  ;;  %v24392_v51 = vld [vmem:[#allocation8 + $0x3970] ss:$72 sps:$4 sm:$0xff]  }
 0x7a6   : > { %16800 = vmatpush2.bf16.msra.mxu0 %v24356_v63  ;;  %v24395_v63 = vld [vmem:[#allocation8 + $0x4270] ss:$72 sps:$4 sm:$0xff]  }
 0x7a7   : > { %16843 = vmatpush2.bf16.msra.mxu1 %v24359_v62  ;;  %16801 = vmatprep.subr.bf16.mxu0 %v24364_v58 }
 0x7a8   : > { %16844 = vmatprep.subr.bf16.mxu1 %v24367_v60  ;;  %v24400_v60 = vld [vmem:[#allocation8 + $0x38e4] ss:$72 sps:$4 sm:$0xff]  }
 0x7aa   : > { %16802 = vmatpush2.bf16.msra.mxu0 %v24362_v23  ;;  %v24403_v23 = vld [vmem:[#allocation8 + $0x41e4] ss:$72 sps:$4 sm:$0xff]  }
 0x7ab   : > { %16845 = vmatpush2.bf16.msra.mxu1 %v24365_v39  ;;  %16803 = vmatprep.subr.bf16.mxu0 %v24370_v54 }
 0x7ac   : > { %16846 = vmatprep.subr.bf16.mxu1 %v24373_v33 }
 0x7ae   : > { %16804 = vmatpush2.bf16.msra.mxu0 %v24368_v10 }
 0x7af   : > { %16847 = vmatpush2.bf16.msra.mxu1 %v24371_v42  ;;  %16805 = vmatprep.subr.bf16.mxu0 %v24376_v59 }
 0x7b0   : > { %16848 = vmatprep.subr.bf16.mxu1 %v24379_v5  ;;  %v24398_v5 = vld [vmem:[#allocation8 + $0x38e0] ss:$72 sps:$4 sm:$0xff]  }
 0x7b2   : > { %16806 = vmatpush2.bf16.msra.mxu0 %v24374_v52  ;;  %v24401_v52 = vld [vmem:[#allocation8 + $0x41e0] ss:$72 sps:$4 sm:$0xff]  }
 0x7b3   : > { %16849 = vmatpush2.bf16.msra.mxu1 %v24377_v48  ;;  %16807 = vmatprep.subr.bf16.mxu0 %v24382_v30 }
 0x7b4   : > { %16850 = vmatprep.subr.bf16.mxu1 %v24385_v15  ;;  %v24409_v15 = vld [vmem:[#allocation8 + $0x4154] ss:$72 sps:$4 sm:$0xff]  }
 0x7b6   : > { %16808 = vmatpush2.bf16.msra.mxu0 %v24380_v13 }
 0x7b7   : > { %16851 = vmatpush2.bf16.msra.mxu1 %v24383_v6  ;;  %16863 = vmatprep.subr.bf16.mxu0 %v24388_v41 }
 0x7b8   : > { %16906 = vmatprep.subr.bf16.mxu1 %v24391_v22  ;;  %v24407_v22 = vld [vmem:[#allocation8 + $0x4150] ss:$72 sps:$4 sm:$0xff]  }
 0x7b9   : > { %v13020_v61 = vpop.f32.mrf.mxu0  ;;  %16810 = vmatmul.mubr.bf16.vlgmr.msra.gmra.mxu0 %v26040_v26 }
 0x7ba   : > { %v13063_v28 = vpop.f32.mrf.mxu1  ;;  %16853 = vmatmul.mubr.bf16.vlgmr.msra.gmra.mxu1 %v26043_v3  ;;  %16864 = vmatpush1.bf16.msra.mxu0 %v24386_v34  ;;  %v24412_v34 = vld [vmem:[#allocation8 + $0x37c4] ss:$72 sps:$4 sm:$0xff]  }
 0x7bb   : > { %v13064_v24 = vadd.f32 %v13063_v28, %v13020_v61  ;;  %16907 = vmatpush1.bf16.msra.mxu1 %v24389_v4  ;;  %v13022_v62 = vpop.f32.mrf.mxu0  ;;  %16865 = vmatprep.subr.bf16.mxu0 %v24394_v25  ;;  %v24415_v4 = vld [vmem:[#allocation8 + $0x40c4] ss:$72 sps:$4 sm:$0xff]   ;;  %v24410_v25 = vld [vmem:[#allocation8 + $0x37c0] ss:$72 sps:$4 sm:$0xff]   ;;  %v24421_v61 = vld [vmem:[#allocation8 + $0x4034] ss:$72 sps:$4 sm:$0xff]  }
 0x7bc   : > { %v13065_v58 = vpop.f32.mrf.mxu1  ;;  %16908 = vmatprep.subr.bf16.mxu1 %v24397_v11  ;;  %16895 = vmatprep.mubr.bf16.mxu0 %v26006_v20  ;;  %v24413_v11 = vld [vmem:[#allocation8 + $0x40c0] ss:$72 sps:$4 sm:$0xff]   ;;  %v24419_v28 = vld [vmem:[#allocation8 + $0x4030] ss:$72 sps:$4 sm:$0xff]  }
 0x7bd   : > { %v26064_v39 = vadd.f32 %v13064_v24, %v25869_v32  ;;  %v13066_v54 = vadd.f32 %v13065_v58, %v13022_v62  ;;  %16938 = vmatprep.mubr.bf16.mxu1 %v26009_v38  ;;  %v13024_v33 = vpop.f32.mrf.mxu0  ;;  %v24406_v32 = vld [vmem:[#allocation8 + $0x3854] ss:$72 sps:$4 sm:$0xff]   ;;  %v24424_v24 = vld [vmem:[#allocation8 + $0x36a4] ss:$72 sps:$4 sm:$0xff]   ;;  %v24425_v62 = vld [vmem:[#allocation8 + $0x3fa0] ss:$72 sps:$4 sm:$0xff]  }
 0x7be   : > { %v13067_v10 = vpop.f32.mrf.mxu1  ;;  %16866 = vmatpush1.bf16.msra.mxu0 %v24392_v51  ;;  %v24427_v51 = vld [vmem:[#allocation8 + $0x3fa4] ss:$72 sps:$4 sm:$0xff]   ;;  %v24430_v58 = vld [vmem:[#allocation8 + $0x3614] ss:$72 sps:$4 sm:$0xff]  }
 0x7bf   : > { %v26069_v42 = vadd.f32 %v13066_v54, %v25876_v46  ;;  %v13068_v59 = vadd.f32 %v13067_v10, %v13024_v33  ;;  %16909 = vmatpush1.bf16.msra.mxu1 %v24395_v63  ;;  %v13026_v48 = vpop.f32.mrf.mxu0  ;;  %16867 = vmatprep.subr.bf16.mxu0 %v24400_v60  ;;  %v24404_v46 = vld [vmem:[#allocation8 + $0x3850] ss:$72 sps:$4 sm:$0xff]   ;;  %v24422_v63 = vld [vmem:[#allocation8 + $0x36a0] ss:$72 sps:$4 sm:$0xff]   ;;  %v24433_v60 = vld [vmem:[#allocation8 + $0x3f14] ss:$72 sps:$4 sm:$0xff]  }
 0x7c0   : > { %v13069_v30 = vpop.f32.mrf.mxu1  ;;  %16910 = vmatprep.subr.bf16.mxu1 %v24403_v23  ;;  %v24428_v23 = vld [vmem:[#allocation8 + $0x3610] ss:$72 sps:$4 sm:$0xff]   ;;  %v24436_v33 = vld [vmem:[#allocation8 + $0x3e84] ss:$72 sps:$4 sm:$0xff]  }
 0x7c1   : > { %v26072_v13 = vadd.f32 %v13068_v59, %v25879_v47  ;;  %v13070_v6 = vadd.f32 %v13069_v30, %v13026_v48  ;;  %v24418_v47 = vld [vmem:[#allocation8 + $0x3734] ss:$72 sps:$4 sm:$0xff]   ;;  %v24431_v54 = vld [vmem:[#allocation8 + $0x3f10] ss:$72 sps:$4 sm:$0xff]   ;;  %v24439_v10 = vld [vmem:[#allocation8 + $0x4784] ss:$72 sps:$4 sm:$0xff]  }
 0x7c2   : > { %16868 = vmatpush1.bf16.msra.mxu0 %v24398_v5  ;;  %v24434_v59 = vld [vmem:[#allocation8 + $0x3e80] ss:$72 sps:$4 sm:$0xff]   ;;  %v24445_v48 = vld [vmem:[#allocation8 + $0x46f4] ss:$72 sps:$4 sm:$0xff]   ;;  %v24440_v30 = vld [vmem:[#allocation8 + $0x3df0] ss:$72 sps:$4 sm:$0xff]  }
 0x7c3   : > { %v26075_v41 = vadd.f32 %v13070_v6, %v25881_v18  ;;  %16911 = vmatpush1.bf16.msra.mxu1 %v24401_v52  ;;  %16869 = vmatprep.subr.bf16.mxu0 %v24406_v32  ;;  %v24416_v18 = vld [vmem:[#allocation8 + $0x3730] ss:$72 sps:$4 sm:$0xff]   ;;  %v24437_v5 = vld [vmem:[#allocation8 + $0x4780] ss:$72 sps:$4 sm:$0xff]   ;;  %v24442_v52 = vld [vmem:[#allocation8 + $0x3df4] ss:$72 sps:$4 sm:$0xff]  }
 0x7c4   : > { %16912 = vmatprep.subr.bf16.mxu1 %v24409_v15  ;;  %v24443_v32 = vld [vmem:[#allocation8 + $0x46f0] ss:$72 sps:$4 sm:$0xff]   ;;  %v24448_v15 = vld [vmem:[#allocation8 + $0x3d64] ss:$72 sps:$4 sm:$0xff]  }
 0x7c5   : > { %v24451_v6 = vld [vmem:[#allocation8 + $0x4664] ss:$72 sps:$4 sm:$0xff]  }
 0x7c6   : > { %16870 = vmatpush1.bf16.msra.mxu0 %v24404_v46  ;;  %v24446_v46 = vld [vmem:[#allocation8 + $0x3d60] ss:$72 sps:$4 sm:$0xff]  }
 0x7c7   : > { %16913 = vmatpush1.bf16.msra.mxu1 %v24407_v22  ;;  %16871 = vmatprep.subr.bf16.mxu0 %v24412_v34  ;;  %v24449_v22 = vld [vmem:[#allocation8 + $0x4660] ss:$72 sps:$4 sm:$0xff]   ;;  %v24454_v34 = vld [vmem:[#allocation8 + $0x3cd4] ss:$72 sps:$4 sm:$0xff]  }
 0x7c8   : > { %16914 = vmatprep.subr.bf16.mxu1 %v24415_v4  ;;  %v24457_v4 = vld [vmem:[#allocation8 + $0x45d4] ss:$72 sps:$4 sm:$0xff]  }
 0x7ca   : > { %16872 = vmatpush1.bf16.msra.mxu0 %v24410_v25  ;;  %v24452_v25 = vld [vmem:[#allocation8 + $0x3cd0] ss:$72 sps:$4 sm:$0xff]  }
 0x7cb   : > { %16915 = vmatpush1.bf16.msra.mxu1 %v24413_v11  ;;  %16873 = vmatprep.subr.bf16.mxu0 %v24418_v47  ;;  %v24455_v11 = vld [vmem:[#allocation8 + $0x45d0] ss:$72 sps:$4 sm:$0xff]   ;;  %v24460_v47 = vld [vmem:[#allocation8 + $0x3c44] ss:$72 sps:$4 sm:$0xff]  }
 0x7cc   : > { %16916 = vmatprep.subr.bf16.mxu1 %v24421_v61  ;;  %v24463_v61 = vld [vmem:[#allocation8 + $0x4544] ss:$72 sps:$4 sm:$0xff]  }
 0x7ce   : > { %16874 = vmatpush1.bf16.msra.mxu0 %v24416_v18  ;;  %v24458_v18 = vld [vmem:[#allocation8 + $0x3c40] ss:$72 sps:$4 sm:$0xff]  }
 0x7cf   : > { %16917 = vmatpush1.bf16.msra.mxu1 %v24419_v28  ;;  %16875 = vmatprep.subr.bf16.mxu0 %v24424_v24  ;;  %v24461_v28 = vld [vmem:[#allocation8 + $0x4540] ss:$72 sps:$4 sm:$0xff]   ;;  %v24466_v24 = vld [vmem:[#allocation8 + $0x3bb4] ss:$72 sps:$4 sm:$0xff]  }
 0x7d0   : > { %16918 = vmatprep.subr.bf16.mxu1 %v24427_v51  ;;  %v24469_v51 = vld [vmem:[#allocation8 + $0x44b4] ss:$72 sps:$4 sm:$0xff]  }
 0x7d2   : > { %16876 = vmatpush1.bf16.msra.mxu0 %v24422_v63  ;;  %v24464_v63 = vld [vmem:[#allocation8 + $0x3bb0] ss:$72 sps:$4 sm:$0xff]  }
 0x7d3   : > { %16919 = vmatpush1.bf16.msra.mxu1 %v24425_v62  ;;  %16877 = vmatprep.subr.bf16.mxu0 %v24430_v58  ;;  %v24467_v62 = vld [vmem:[#allocation8 + $0x44b0] ss:$72 sps:$4 sm:$0xff]   ;;  %v24472_v58 = vld [vmem:[#allocation8 + $0x3b24] ss:$72 sps:$4 sm:$0xff]  }
 0x7d4   : > { %16920 = vmatprep.subr.bf16.mxu1 %v24433_v60  ;;  %v24475_v60 = vld [vmem:[#allocation8 + $0x4424] ss:$72 sps:$4 sm:$0xff]  }
 0x7d6   : > { %16878 = vmatpush1.bf16.msra.mxu0 %v24428_v23  ;;  %v24470_v23 = vld [vmem:[#allocation8 + $0x3b20] ss:$72 sps:$4 sm:$0xff]  }
 0x7d7   : > { %16921 = vmatpush1.bf16.msra.mxu1 %v24431_v54  ;;  %16879 = vmatprep.subr.bf16.mxu0 %v24436_v33  ;;  %v24473_v54 = vld [vmem:[#allocation8 + $0x4420] ss:$72 sps:$4 sm:$0xff]   ;;  %v24478_v33 = vld [vmem:[#allocation8 + $0x3a94] ss:$72 sps:$4 sm:$0xff]  }
 0x7d8   : > { %16922 = vmatprep.subr.bf16.mxu1 %v24439_v10  ;;  %v24481_v10 = vld [vmem:[#allocation8 + $0x4394] ss:$72 sps:$4 sm:$0xff]  }
 0x7da   : > { %16880 = vmatpush2.bf16.msra.mxu0 %v24434_v59  ;;  %v24476_v59 = vld [vmem:[#allocation8 + $0x3a90] ss:$72 sps:$4 sm:$0xff]  }
 0x7db   : > { %16923 = vmatpush2.bf16.msra.mxu1 %v24437_v5  ;;  %16881 = vmatprep.subr.bf16.mxu0 %v24442_v52  ;;  %v24479_v5 = vld [vmem:[#allocation8 + $0x4390] ss:$72 sps:$4 sm:$0xff]   ;;  %v24484_v52 = vld [vmem:[#allocation8 + $0x3a0c] ss:$72 sps:$4 sm:$0xff]  }
 0x7dc   : > { %16924 = vmatprep.subr.bf16.mxu1 %v24445_v48  ;;  %v24487_v48 = vld [vmem:[#allocation8 + $0x430c] ss:$72 sps:$4 sm:$0xff]  }
 0x7de   : > { %16882 = vmatpush2.bf16.msra.mxu0 %v24440_v30  ;;  %v24482_v30 = vld [vmem:[#allocation8 + $0x3a08] ss:$72 sps:$4 sm:$0xff]  }
 0x7df   : > { %16925 = vmatpush2.bf16.msra.mxu1 %v24443_v32  ;;  %16883 = vmatprep.subr.bf16.mxu0 %v24448_v15  ;;  %v24485_v32 = vld [vmem:[#allocation8 + $0x4308] ss:$72 sps:$4 sm:$0xff]   ;;  %v24490_v15 = vld [vmem:[#allocation8 + $0x397c] ss:$72 sps:$4 sm:$0xff]  }
 0x7e0   : > { %16926 = vmatprep.subr.bf16.mxu1 %v24451_v6  ;;  %v24493_v6 = vld [vmem:[#allocation8 + $0x427c] ss:$72 sps:$4 sm:$0xff]  }
 0x7e2   : > { %16884 = vmatpush2.bf16.msra.mxu0 %v24446_v46 }
 0x7e3   : > { %16927 = vmatpush2.bf16.msra.mxu1 %v24449_v22  ;;  %16885 = vmatprep.subr.bf16.mxu0 %v24454_v34 }
 0x7e4   : > { %16928 = vmatprep.subr.bf16.mxu1 %v24457_v4  ;;  %v24488_v4 = vld [vmem:[#allocation8 + $0x3978] ss:$72 sps:$4 sm:$0xff]  }
 0x7e6   : > { %16886 = vmatpush2.bf16.msra.mxu0 %v24452_v25  ;;  %v24491_v25 = vld [vmem:[#allocation8 + $0x4278] ss:$72 sps:$4 sm:$0xff]  }
 0x7e7   : > { %16929 = vmatpush2.bf16.msra.mxu1 %v24455_v11  ;;  %16887 = vmatprep.subr.bf16.mxu0 %v24460_v47 }
 0x7e8   : > { %16930 = vmatprep.subr.bf16.mxu1 %v24463_v61  ;;  %v24496_v61 = vld [vmem:[#allocation8 + $0x38ec] ss:$72 sps:$4 sm:$0xff]  }
 0x7ea   : > { %16888 = vmatpush2.bf16.msra.mxu0 %v24458_v18  ;;  %v24499_v18 = vld [vmem:[#allocation8 + $0x41ec] ss:$72 sps:$4 sm:$0xff]  }
 0x7eb   : > { %16931 = vmatpush2.bf16.msra.mxu1 %v24461_v28  ;;  %16889 = vmatprep.subr.bf16.mxu0 %v24466_v24 }
 0x7ec   : > { %16932 = vmatprep.subr.bf16.mxu1 %v24469_v51 }
 0x7ee   : > { %16890 = vmatpush2.bf16.msra.mxu0 %v24464_v63 }
 0x7ef   : > { %16933 = vmatpush2.bf16.msra.mxu1 %v24467_v62  ;;  %16891 = vmatprep.subr.bf16.mxu0 %v24472_v58 }
 0x7f0   : > { %16934 = vmatprep.subr.bf16.mxu1 %v24475_v60  ;;  %v24494_v60 = vld [vmem:[#allocation8 + $0x38e8] ss:$72 sps:$4 sm:$0xff]  }
 0x7f2   : > { %16892 = vmatpush2.bf16.msra.mxu0 %v24470_v23  ;;  %v24497_v23 = vld [vmem:[#allocation8 + $0x41e8] ss:$72 sps:$4 sm:$0xff]  }
 0x7f3   : > { %16935 = vmatpush2.bf16.msra.mxu1 %v24473_v54  ;;  %16893 = vmatprep.subr.bf16.mxu0 %v24478_v33 }
 0x7f4   : > { %16936 = vmatprep.subr.bf16.mxu1 %v24481_v10  ;;  %v24505_v10 = vld [vmem:[#allocation8 + $0x415c] ss:$72 sps:$4 sm:$0xff]  }
 0x7f6   : > { %16894 = vmatpush2.bf16.msra.mxu0 %v24476_v59 }
 0x7f7   : > { %16937 = vmatpush2.bf16.msra.mxu1 %v24479_v5  ;;  %16949 = vmatprep.subr.bf16.mxu0 %v24484_v52 }
 0x7f8   : > { %16992 = vmatprep.subr.bf16.mxu1 %v24487_v48  ;;  %v24503_v48 = vld [vmem:[#allocation8 + $0x4158] ss:$72 sps:$4 sm:$0xff]  }
 0x7f9   : > { %v13106_v46 = vpop.f32.mrf.mxu0  ;;  %16896 = vmatmul.mubr.bf16.vlgmr.msra.gmra.mxu0 %v26040_v26 }
 0x7fa   : > { %v13149_v22 = vpop.f32.mrf.mxu1  ;;  %16939 = vmatmul.mubr.bf16.vlgmr.msra.gmra.mxu1 %v26043_v3  ;;  %16950 = vmatpush1.bf16.msra.mxu0 %v24482_v30  ;;  %v24508_v30 = vld [vmem:[#allocation8 + $0x37cc] ss:$72 sps:$4 sm:$0xff]  }
 0x7fb   : > { %v13150_v34 = vadd.f32 %v13149_v22, %v13106_v46  ;;  %16993 = vmatpush1.bf16.msra.mxu1 %v24485_v32  ;;  %v13108_v11 = vpop.f32.mrf.mxu0  ;;  %16951 = vmatprep.subr.bf16.mxu0 %v24490_v15  ;;  %v24511_v32 = vld [vmem:[#allocation8 + $0x40cc] ss:$72 sps:$4 sm:$0xff]   ;;  %v24506_v15 = vld [vmem:[#allocation8 + $0x37c8] ss:$72 sps:$4 sm:$0xff]   ;;  %v24517_v46 = vld [vmem:[#allocation8 + $0x403c] ss:$72 sps:$4 sm:$0xff]  }
 0x7fc   : > { %v13151_v47 = vpop.f32.mrf.mxu1  ;;  %16994 = vmatprep.subr.bf16.mxu1 %v24493_v6  ;;  %16981 = vmatprep.mubr.bf16.mxu0 %v26006_v20  ;;  %v24509_v6 = vld [vmem:[#allocation8 + $0x40c8] ss:$72 sps:$4 sm:$0xff]   ;;  %v24515_v22 = vld [vmem:[#allocation8 + $0x4038] ss:$72 sps:$4 sm:$0xff]  }
 0x7fd   : > { %v26080_v28 = vadd.f32 %v13150_v34, %v25888_v45  ;;  %v13152_v24 = vadd.f32 %v13151_v47, %v13108_v11  ;;  %17024 = vmatprep.mubr.bf16.mxu1 %v26009_v38  ;;  %v13110_v51 = vpop.f32.mrf.mxu0  ;;  %v24502_v45 = vld [vmem:[#allocation8 + $0x385c] ss:$72 sps:$4 sm:$0xff]   ;;  %v24520_v34 = vld [vmem:[#allocation8 + $0x36ac] ss:$72 sps:$4 sm:$0xff]   ;;  %v24521_v11 = vld [vmem:[#allocation8 + $0x3fa8] ss:$72 sps:$4 sm:$0xff]  }
 0x7fe   : > { %v13153_v63 = vpop.f32.mrf.mxu1  ;;  %16952 = vmatpush1.bf16.msra.mxu0 %v24488_v4  ;;  %v24523_v4 = vld [vmem:[#allocation8 + $0x3fac] ss:$72 sps:$4 sm:$0xff]   ;;  %v24526_v47 = vld [vmem:[#allocation8 + $0x361c] ss:$72 sps:$4 sm:$0xff]  }
 0x7ff   : > { %26428 = vst [vmem:[#allocation31_spill] sm:$0xff] %v26080_v28  ;;  %v26085_v62 = vadd.f32 %v13152_v24, %v25894_v36  ;;  %v13154_v58 = vadd.f32 %v13153_v63, %v13110_v51  ;;  %16995 = vmatpush1.bf16.msra.mxu1 %v24491_v25  ;;  %v13112_v54 = vpop.f32.mrf.mxu0  ;;  %16953 = vmatprep.subr.bf16.mxu0 %v24496_v61  ;;  %v24500_v36 = vld [vmem:[#allocation8 + $0x3858] ss:$72 sps:$4 sm:$0xff]   ;;  %v24518_v25 = vld [vmem:[#allocation8 + $0x36a8] ss:$72 sps:$4 sm:$0xff]  }
 0x800   : > { %v13155_v33 = vpop.f32.mrf.mxu1  ;;  %16996 = vmatprep.subr.bf16.mxu1 %v24499_v18  ;;  %v24529_v61 = vld [vmem:[#allocation8 + $0x3f1c] ss:$72 sps:$4 sm:$0xff]   ;;  %v24524_v18 = vld [vmem:[#allocation8 + $0x3618] ss:$72 sps:$4 sm:$0xff]   ;;  %v24532_v51 = vld [vmem:[#allocation8 + $0x3e8c] ss:$72 sps:$4 sm:$0xff]  }
 0x801   : > { %26429 = vst [vmem:[#allocation32_spill] sm:$0xff] %v26085_v62  ;;  %v26088_v59 = vadd.f32 %v13154_v58, %v25897_v37  ;;  %v13156_v5 = vadd.f32 %v13155_v33, %v13112_v54  ;;  %v24514_v37 = vld [vmem:[#allocation8 + $0x373c] ss:$72 sps:$4 sm:$0xff]   ;;  %v24527_v24 = vld [vmem:[#allocation8 + $0x3f18] ss:$72 sps:$4 sm:$0xff]  }
 0x802   : > { %16954 = vmatpush1.bf16.msra.mxu0 %v24494_v60  ;;  %v24535_v63 = vld [vmem:[#allocation8 + $0x478c] ss:$72 sps:$4 sm:$0xff]   ;;  %v24530_v58 = vld [vmem:[#allocation8 + $0x3e88] ss:$72 sps:$4 sm:$0xff]   ;;  %v24541_v54 = vld [vmem:[#allocation8 + $0x46fc] ss:$72 sps:$4 sm:$0xff]  }
 0x803   : > { %26430 = vst [vmem:[#allocation33_spill] sm:$0xff] %v26088_v59  ;;  %v26091_v52 = vadd.f32 %v13156_v5, %v25899_v19  ;;  %16997 = vmatpush1.bf16.msra.mxu1 %v24497_v23  ;;  %16955 = vmatprep.subr.bf16.mxu0 %v24502_v45  ;;  %v24512_v19 = vld [vmem:[#allocation8 + $0x3738] ss:$72 sps:$4 sm:$0xff]   ;;  %v24533_v60 = vld [vmem:[#allocation8 + $0x4788] ss:$72 sps:$4 sm:$0xff]  }
 0x804   : > { %16998 = vmatprep.subr.bf16.mxu1 %v24505_v10  ;;  %v24538_v23 = vld [vmem:[#allocation8 + $0x3dfc] ss:$72 sps:$4 sm:$0xff]   ;;  %v24536_v33 = vld [vmem:[#allocation8 + $0x3df8] ss:$72 sps:$4 sm:$0xff]   ;;  %v24544_v10 = vld [vmem:[#allocation8 + $0x3d6c] ss:$72 sps:$4 sm:$0xff]  }
 0x805   : > { %26431 = vst [vmem:[#allocation43_spill] sm:$0xff] %v26091_v52  ;;  %v24539_v45 = vld [vmem:[#allocation8 + $0x46f8] ss:$72 sps:$4 sm:$0xff]   ;;  %v24547_v5 = vld [vmem:[#allocation8 + $0x466c] ss:$72 sps:$4 sm:$0xff]  }
 0x806   : > { %16956 = vmatpush1.bf16.msra.mxu0 %v24500_v36  ;;  %v24542_v36 = vld [vmem:[#allocation8 + $0x3d68] ss:$72 sps:$4 sm:$0xff]   ;;  %v17541_v62 = vld [vmem:[#allocation9 + $0x20] sm:$0xff]  ;;  %v17588_v28 = vld [vmem:[#allocation9 + $0x198] sm:$0xff] }
 0x807   : > { %16999 = vmatpush1.bf16.msra.mxu1 %v24503_v48  ;;  %16957 = vmatprep.subr.bf16.mxu0 %v24508_v30  ;;  %v24545_v48 = vld [vmem:[#allocation8 + $0x4668] ss:$72 sps:$4 sm:$0xff]   ;;  %v24550_v30 = vld [vmem:[#allocation8 + $0x3cdc] ss:$72 sps:$4 sm:$0xff]  }
 0x808   : > { %17000 = vmatprep.subr.bf16.mxu1 %v24511_v32  ;;  %v24553_v32 = vld [vmem:[#allocation8 + $0x45dc] ss:$72 sps:$4 sm:$0xff]  }
 0x80a   : > { %16958 = vmatpush1.bf16.msra.mxu0 %v24506_v15  ;;  %v24548_v15 = vld [vmem:[#allocation8 + $0x3cd8] ss:$72 sps:$4 sm:$0xff]  }
 0x80b   : > { %17001 = vmatpush1.bf16.msra.mxu1 %v24509_v6  ;;  %16959 = vmatprep.subr.bf16.mxu0 %v24514_v37  ;;  %v24551_v6 = vld [vmem:[#allocation8 + $0x45d8] ss:$72 sps:$4 sm:$0xff]   ;;  %v24556_v37 = vld [vmem:[#allocation8 + $0x3c4c] ss:$72 sps:$4 sm:$0xff]  }
 0x80c   : > { %17002 = vmatprep.subr.bf16.mxu1 %v24517_v46  ;;  %v24559_v46 = vld [vmem:[#allocation8 + $0x454c] ss:$72 sps:$4 sm:$0xff]  }
 0x80e   : > { %16960 = vmatpush1.bf16.msra.mxu0 %v24512_v19  ;;  %v24554_v19 = vld [vmem:[#allocation8 + $0x3c48] ss:$72 sps:$4 sm:$0xff]  }
 0x80f   : > { %17003 = vmatpush1.bf16.msra.mxu1 %v24515_v22  ;;  %16961 = vmatprep.subr.bf16.mxu0 %v24520_v34  ;;  %v24557_v22 = vld [vmem:[#allocation8 + $0x4548] ss:$72 sps:$4 sm:$0xff]   ;;  %v24562_v34 = vld [vmem:[#allocation8 + $0x3bbc] ss:$72 sps:$4 sm:$0xff]  }
 0x810   : > { %17004 = vmatprep.subr.bf16.mxu1 %v24523_v4  ;;  %v24565_v4 = vld [vmem:[#allocation8 + $0x44bc] ss:$72 sps:$4 sm:$0xff]  }
 0x812   : > { %16962 = vmatpush1.bf16.msra.mxu0 %v24518_v25  ;;  %v24560_v25 = vld [vmem:[#allocation8 + $0x3bb8] ss:$72 sps:$4 sm:$0xff]  }
 0x813   : > { %17005 = vmatpush1.bf16.msra.mxu1 %v24521_v11  ;;  %16963 = vmatprep.subr.bf16.mxu0 %v24526_v47  ;;  %v24563_v11 = vld [vmem:[#allocation8 + $0x44b8] ss:$72 sps:$4 sm:$0xff]   ;;  %v24568_v47 = vld [vmem:[#allocation8 + $0x3b2c] ss:$72 sps:$4 sm:$0xff]  }
 0x814   : > { %17006 = vmatprep.subr.bf16.mxu1 %v24529_v61  ;;  %v24571_v61 = vld [vmem:[#allocation8 + $0x442c] ss:$72 sps:$4 sm:$0xff]  }
 0x816   : > { %16964 = vmatpush1.bf16.msra.mxu0 %v24524_v18  ;;  %v24566_v18 = vld [vmem:[#allocation8 + $0x3b28] ss:$72 sps:$4 sm:$0xff]  }
 0x817   : > { %17007 = vmatpush1.bf16.msra.mxu1 %v24527_v24  ;;  %16965 = vmatprep.subr.bf16.mxu0 %v24532_v51  ;;  %v24569_v24 = vld [vmem:[#allocation8 + $0x4428] ss:$72 sps:$4 sm:$0xff]   ;;  %v24574_v51 = vld [vmem:[#allocation8 + $0x3a9c] ss:$72 sps:$4 sm:$0xff]  }
 0x818   : > { %17008 = vmatprep.subr.bf16.mxu1 %v24535_v63  ;;  %v24577_v63 = vld [vmem:[#allocation8 + $0x439c] ss:$72 sps:$4 sm:$0xff]  }
 0x81a   : > { %16966 = vmatpush2.bf16.msra.mxu0 %v24530_v58  ;;  %v24572_v58 = vld [vmem:[#allocation8 + $0x3a98] ss:$72 sps:$4 sm:$0xff]  }
 0x81b   : > { %17009 = vmatpush2.bf16.msra.mxu1 %v24533_v60  ;;  %16967 = vmatprep.subr.bf16.mxu0 %v24538_v23  ;;  %v24575_v60 = vld [vmem:[#allocation8 + $0x4398] ss:$72 sps:$4 sm:$0xff]   ;;  %v24580_v23 = vld [vmem:[#allocation8 + $0x3a14] ss:$72 sps:$4 sm:$0xff]  }
 0x81c   : > { %17010 = vmatprep.subr.bf16.mxu1 %v24541_v54  ;;  %v24583_v54 = vld [vmem:[#allocation8 + $0x4314] ss:$72 sps:$4 sm:$0xff]  }
 0x81e   : > { %16968 = vmatpush2.bf16.msra.mxu0 %v24536_v33  ;;  %v24578_v33 = vld [vmem:[#allocation8 + $0x3a10] ss:$72 sps:$4 sm:$0xff]  }
 0x81f   : > { %17011 = vmatpush2.bf16.msra.mxu1 %v24539_v45  ;;  %16969 = vmatprep.subr.bf16.mxu0 %v24544_v10  ;;  %v24581_v45 = vld [vmem:[#allocation8 + $0x4310] ss:$72 sps:$4 sm:$0xff]   ;;  %v24586_v10 = vld [vmem:[#allocation8 + $0x3984] ss:$72 sps:$4 sm:$0xff]  }
 0x820   : > { %17012 = vmatprep.subr.bf16.mxu1 %v24547_v5  ;;  %v24589_v5 = vld [vmem:[#allocation8 + $0x4284] ss:$72 sps:$4 sm:$0xff]  }
 0x822   : > { %16970 = vmatpush2.bf16.msra.mxu0 %v24542_v36  ;;  %v24584_v36 = vld [vmem:[#allocation8 + $0x3980] ss:$72 sps:$4 sm:$0xff]  }
 0x823   : > { %17013 = vmatpush2.bf16.msra.mxu1 %v24545_v48  ;;  %16971 = vmatprep.subr.bf16.mxu0 %v24550_v30  ;;  %v24587_v48 = vld [vmem:[#allocation8 + $0x4280] ss:$72 sps:$4 sm:$0xff]   ;;  %v24592_v30 = vld [vmem:[#allocation8 + $0x38f4] ss:$72 sps:$4 sm:$0xff]  }
 0x824   : > { %17014 = vmatprep.subr.bf16.mxu1 %v24553_v32  ;;  %v24595_v32 = vld [vmem:[#allocation8 + $0x41f4] ss:$72 sps:$4 sm:$0xff]  }
 0x826   : > { %16972 = vmatpush2.bf16.msra.mxu0 %v24548_v15  ;;  %v24590_v15 = vld [vmem:[#allocation8 + $0x38f0] ss:$72 sps:$4 sm:$0xff]  }
 0x827   : > { %17015 = vmatpush2.bf16.msra.mxu1 %v24551_v6  ;;  %16973 = vmatprep.subr.bf16.mxu0 %v24556_v37  ;;  %v24593_v6 = vld [vmem:[#allocation8 + $0x41f0] ss:$72 sps:$4 sm:$0xff]   ;;  %v24598_v37 = vld [vmem:[#allocation8 + $0x3864] ss:$72 sps:$4 sm:$0xff]  }
 0x828   : > { %17016 = vmatprep.subr.bf16.mxu1 %v24559_v46  ;;  %v24601_v46 = vld [vmem:[#allocation8 + $0x4164] ss:$72 sps:$4 sm:$0xff]  }
 0x82a   : > { %16974 = vmatpush2.bf16.msra.mxu0 %v24554_v19  ;;  %v24596_v19 = vld [vmem:[#allocation8 + $0x3860] ss:$72 sps:$4 sm:$0xff]  }
 0x82b   : > { %17017 = vmatpush2.bf16.msra.mxu1 %v24557_v22  ;;  %16975 = vmatprep.subr.bf16.mxu0 %v24562_v34  ;;  %v24599_v22 = vld [vmem:[#allocation8 + $0x4160] ss:$72 sps:$4 sm:$0xff]   ;;  %v24604_v34 = vld [vmem:[#allocation8 + $0x37d4] ss:$72 sps:$4 sm:$0xff]  }
 0x82c   : > { %17018 = vmatprep.subr.bf16.mxu1 %v24565_v4  ;;  %v24607_v4 = vld [vmem:[#allocation8 + $0x40d4] ss:$72 sps:$4 sm:$0xff]  }
 0x82e   : > { %16976 = vmatpush2.bf16.msra.mxu0 %v24560_v25  ;;  %v24602_v25 = vld [vmem:[#allocation8 + $0x37d0] ss:$72 sps:$4 sm:$0xff]  }
 0x82f   : > { %17019 = vmatpush2.bf16.msra.mxu1 %v24563_v11  ;;  %16977 = vmatprep.subr.bf16.mxu0 %v24568_v47  ;;  %v24605_v11 = vld [vmem:[#allocation8 + $0x40d0] ss:$72 sps:$4 sm:$0xff]   ;;  %v24610_v47 = vld [vmem:[#allocation8 + $0x3744] ss:$72 sps:$4 sm:$0xff]  }
 0x830   : > { %17020 = vmatprep.subr.bf16.mxu1 %v24571_v61  ;;  %v24613_v61 = vld [vmem:[#allocation8 + $0x4044] ss:$72 sps:$4 sm:$0xff]  }
 0x832   : > { %16978 = vmatpush2.bf16.msra.mxu0 %v24566_v18  ;;  %v24608_v18 = vld [vmem:[#allocation8 + $0x3740] ss:$72 sps:$4 sm:$0xff]  }
 0x833   : > { %17021 = vmatpush2.bf16.msra.mxu1 %v24569_v24  ;;  %16979 = vmatprep.subr.bf16.mxu0 %v24574_v51  ;;  %v24611_v24 = vld [vmem:[#allocation8 + $0x4040] ss:$72 sps:$4 sm:$0xff]   ;;  %v24616_v51 = vld [vmem:[#allocation8 + $0x36b4] ss:$72 sps:$4 sm:$0xff]  }
 0x834   : > { %17022 = vmatprep.subr.bf16.mxu1 %v24577_v63  ;;  %v24619_v63 = vld [vmem:[#allocation8 + $0x3fb4] ss:$72 sps:$4 sm:$0xff]  }
 0x836   : > { %16980 = vmatpush2.bf16.msra.mxu0 %v24572_v58  ;;  %v24614_v58 = vld [vmem:[#allocation8 + $0x36b0] ss:$72 sps:$4 sm:$0xff]  }
 0x837   : > { %17023 = vmatpush2.bf16.msra.mxu1 %v24575_v60  ;;  %17035 = vmatprep.subr.bf16.mxu0 %v24580_v23  ;;  %v24617_v60 = vld [vmem:[#allocation8 + $0x3fb0] ss:$72 sps:$4 sm:$0xff]   ;;  %v24622_v23 = vld [vmem:[#allocation8 + $0x3624] ss:$72 sps:$4 sm:$0xff]  }
 0x838   : > { %17078 = vmatprep.subr.bf16.mxu1 %v24583_v54  ;;  %v24625_v54 = vld [vmem:[#allocation8 + $0x3f24] ss:$72 sps:$4 sm:$0xff]  }
 0x839   : > { %16982 = vmatmul.mubr.bf16.vlgmr.msra.gmra.mxu0 %v26040_v26 }
 0x83a   : > { %17025 = vmatmul.mubr.bf16.vlgmr.msra.gmra.mxu1 %v26043_v3  ;;  %17036 = vmatpush1.bf16.msra.mxu0 %v24578_v33  ;;  %v24620_v33 = vld [vmem:[#allocation8 + $0x3620] ss:$72 sps:$4 sm:$0xff]  }
 0x83b   : > { %17079 = vmatpush1.bf16.msra.mxu1 %v24581_v45  ;;  %17037 = vmatprep.subr.bf16.mxu0 %v24586_v10  ;;  %v24623_v45 = vld [vmem:[#allocation8 + $0x3f20] ss:$72 sps:$4 sm:$0xff]   ;;  %v24628_v10 = vld [vmem:[#allocation8 + $0x3e94] ss:$72 sps:$4 sm:$0xff]  }
 0x83c   : > { %17080 = vmatprep.subr.bf16.mxu1 %v24589_v5  ;;  %17067 = vmatprep.mubr.bf16.mxu0 %v26006_v20  ;;  %v24631_v5 = vld [vmem:[#allocation8 + $0x4794] ss:$72 sps:$4 sm:$0xff]  }
 0x83d   : > { %17110 = vmatprep.mubr.bf16.mxu1 %v26009_v38 }
 0x83e   : > { %17038 = vmatpush1.bf16.msra.mxu0 %v24584_v36  ;;  %v24626_v36 = vld [vmem:[#allocation8 + $0x3e90] ss:$72 sps:$4 sm:$0xff]  }
 0x83f   : > { %17081 = vmatpush1.bf16.msra.mxu1 %v24587_v48  ;;  %17039 = vmatprep.subr.bf16.mxu0 %v24592_v30  ;;  %v24629_v48 = vld [vmem:[#allocation8 + $0x4790] ss:$72 sps:$4 sm:$0xff]   ;;  %v24634_v30 = vld [vmem:[#allocation8 + $0x3e04] ss:$72 sps:$4 sm:$0xff]  }
 0x840   : > { %17082 = vmatprep.subr.bf16.mxu1 %v24595_v32  ;;  %v24637_v32 = vld [vmem:[#allocation8 + $0x4704] ss:$72 sps:$4 sm:$0xff]  }
 0x842   : > { %17040 = vmatpush1.bf16.msra.mxu0 %v24590_v15  ;;  %v24632_v15 = vld [vmem:[#allocation8 + $0x3e00] ss:$72 sps:$4 sm:$0xff]  }
 0x843   : > { %17083 = vmatpush1.bf16.msra.mxu1 %v24593_v6  ;;  %17041 = vmatprep.subr.bf16.mxu0 %v24598_v37  ;;  %v24635_v6 = vld [vmem:[#allocation8 + $0x4700] ss:$72 sps:$4 sm:$0xff]   ;;  %v24640_v37 = vld [vmem:[#allocation8 + $0x3d74] ss:$72 sps:$4 sm:$0xff]  }
 0x844   : > { %17084 = vmatprep.subr.bf16.mxu1 %v24601_v46  ;;  %v24643_v46 = vld [vmem:[#allocation8 + $0x4674] ss:$72 sps:$4 sm:$0xff]  }
 0x846   : > { %17042 = vmatpush1.bf16.msra.mxu0 %v24596_v19  ;;  %v24638_v19 = vld [vmem:[#allocation8 + $0x3d70] ss:$72 sps:$4 sm:$0xff]  }
 0x847   : > { %17085 = vmatpush1.bf16.msra.mxu1 %v24599_v22  ;;  %17043 = vmatprep.subr.bf16.mxu0 %v24604_v34  ;;  %v24641_v22 = vld [vmem:[#allocation8 + $0x4670] ss:$72 sps:$4 sm:$0xff]   ;;  %v24646_v34 = vld [vmem:[#allocation8 + $0x3ce4] ss:$72 sps:$4 sm:$0xff]  }
 0x848   : > { %17086 = vmatprep.subr.bf16.mxu1 %v24607_v4  ;;  %v24649_v4 = vld [vmem:[#allocation8 + $0x45e4] ss:$72 sps:$4 sm:$0xff]  }
 0x84a   : > { %17044 = vmatpush1.bf16.msra.mxu0 %v24602_v25  ;;  %v24644_v25 = vld [vmem:[#allocation8 + $0x3ce0] ss:$72 sps:$4 sm:$0xff]  }
 0x84b   : > { %17087 = vmatpush1.bf16.msra.mxu1 %v24605_v11  ;;  %17045 = vmatprep.subr.bf16.mxu0 %v24610_v47  ;;  %v24647_v11 = vld [vmem:[#allocation8 + $0x45e0] ss:$72 sps:$4 sm:$0xff]   ;;  %v24652_v47 = vld [vmem:[#allocation8 + $0x3c54] ss:$72 sps:$4 sm:$0xff]  }
 0x84c   : > { %17088 = vmatprep.subr.bf16.mxu1 %v24613_v61  ;;  %v24655_v61 = vld [vmem:[#allocation8 + $0x4554] ss:$72 sps:$4 sm:$0xff]  }
 0x84e   : > { %17046 = vmatpush1.bf16.msra.mxu0 %v24608_v18  ;;  %v24650_v18 = vld [vmem:[#allocation8 + $0x3c50] ss:$72 sps:$4 sm:$0xff]  }
 0x84f   : > { %17089 = vmatpush1.bf16.msra.mxu1 %v24611_v24  ;;  %17047 = vmatprep.subr.bf16.mxu0 %v24616_v51  ;;  %v24653_v24 = vld [vmem:[#allocation8 + $0x4550] ss:$72 sps:$4 sm:$0xff]   ;;  %v24658_v51 = vld [vmem:[#allocation8 + $0x3bc4] ss:$72 sps:$4 sm:$0xff]  }
 0x850   : > { %17090 = vmatprep.subr.bf16.mxu1 %v24619_v63  ;;  %v24661_v63 = vld [vmem:[#allocation8 + $0x44c4] ss:$72 sps:$4 sm:$0xff]  }
 0x852   : > { %17048 = vmatpush1.bf16.msra.mxu0 %v24614_v58  ;;  %v24656_v58 = vld [vmem:[#allocation8 + $0x3bc0] ss:$72 sps:$4 sm:$0xff]  }
 0x853   : > { %17091 = vmatpush1.bf16.msra.mxu1 %v24617_v60  ;;  %17049 = vmatprep.subr.bf16.mxu0 %v24622_v23  ;;  %v24659_v60 = vld [vmem:[#allocation8 + $0x44c0] ss:$72 sps:$4 sm:$0xff]   ;;  %v24664_v23 = vld [vmem:[#allocation8 + $0x3b34] ss:$72 sps:$4 sm:$0xff]  }
 0x854   : > { %17092 = vmatprep.subr.bf16.mxu1 %v24625_v54  ;;  %v24667_v54 = vld [vmem:[#allocation8 + $0x4434] ss:$72 sps:$4 sm:$0xff]  }
 0x856   : > { %17050 = vmatpush1.bf16.msra.mxu0 %v24620_v33  ;;  %v24662_v33 = vld [vmem:[#allocation8 + $0x3b30] ss:$72 sps:$4 sm:$0xff]  }
 0x857   : > { %17093 = vmatpush1.bf16.msra.mxu1 %v24623_v45  ;;  %17051 = vmatprep.subr.bf16.mxu0 %v24628_v10  ;;  %v24665_v45 = vld [vmem:[#allocation8 + $0x4430] ss:$72 sps:$4 sm:$0xff]   ;;  %v24670_v10 = vld [vmem:[#allocation8 + $0x3aa4] ss:$72 sps:$4 sm:$0xff]  }
 0x858   : > { %17094 = vmatprep.subr.bf16.mxu1 %v24631_v5  ;;  %v24673_v5 = vld [vmem:[#allocation8 + $0x43a4] ss:$72 sps:$4 sm:$0xff]  }
 0x85a   : > { %17052 = vmatpush2.bf16.msra.mxu0 %v24626_v36  ;;  %v24668_v36 = vld [vmem:[#allocation8 + $0x3aa0] ss:$72 sps:$4 sm:$0xff]  }
 0x85b   : > { %17095 = vmatpush2.bf16.msra.mxu1 %v24629_v48  ;;  %17053 = vmatprep.subr.bf16.mxu0 %v24634_v30  ;;  %v24671_v48 = vld [vmem:[#allocation8 + $0x43a0] ss:$72 sps:$4 sm:$0xff]   ;;  %v24676_v30 = vld [vmem:[#allocation8 + $0x3a1c] ss:$72 sps:$4 sm:$0xff]  }
 0x85c   : > { %17096 = vmatprep.subr.bf16.mxu1 %v24637_v32  ;;  %v24679_v32 = vld [vmem:[#allocation8 + $0x431c] ss:$72 sps:$4 sm:$0xff]  }
 0x85e   : > { %17054 = vmatpush2.bf16.msra.mxu0 %v24632_v15  ;;  %v24674_v15 = vld [vmem:[#allocation8 + $0x3a18] ss:$72 sps:$4 sm:$0xff]  }
 0x85f   : > { %17097 = vmatpush2.bf16.msra.mxu1 %v24635_v6  ;;  %17055 = vmatprep.subr.bf16.mxu0 %v24640_v37  ;;  %v24677_v6 = vld [vmem:[#allocation8 + $0x4318] ss:$72 sps:$4 sm:$0xff]   ;;  %v24682_v37 = vld [vmem:[#allocation8 + $0x398c] ss:$72 sps:$4 sm:$0xff]  }
 0x860   : > { %17098 = vmatprep.subr.bf16.mxu1 %v24643_v46  ;;  %v24685_v46 = vld [vmem:[#allocation8 + $0x428c] ss:$72 sps:$4 sm:$0xff]  }
 0x862   : > { %17056 = vmatpush2.bf16.msra.mxu0 %v24638_v19  ;;  %v24680_v19 = vld [vmem:[#allocation8 + $0x3988] ss:$72 sps:$4 sm:$0xff]  }
 0x863   : > { %17099 = vmatpush2.bf16.msra.mxu1 %v24641_v22  ;;  %17057 = vmatprep.subr.bf16.mxu0 %v24646_v34  ;;  %v24683_v22 = vld [vmem:[#allocation8 + $0x4288] ss:$72 sps:$4 sm:$0xff]   ;;  %v24688_v34 = vld [vmem:[#allocation8 + $0x38fc] ss:$72 sps:$4 sm:$0xff]  }
 0x864   : > { %17100 = vmatprep.subr.bf16.mxu1 %v24649_v4  ;;  %v24691_v4 = vld [vmem:[#allocation8 + $0x41fc] ss:$72 sps:$4 sm:$0xff]  }
 0x866   : > { %17058 = vmatpush2.bf16.msra.mxu0 %v24644_v25  ;;  %v24686_v25 = vld [vmem:[#allocation8 + $0x38f8] ss:$72 sps:$4 sm:$0xff]  }
 0x867   : > { %17101 = vmatpush2.bf16.msra.mxu1 %v24647_v11  ;;  %17059 = vmatprep.subr.bf16.mxu0 %v24652_v47  ;;  %v24689_v11 = vld [vmem:[#allocation8 + $0x41f8] ss:$72 sps:$4 sm:$0xff]   ;;  %v24694_v47 = vld [vmem:[#allocation8 + $0x386c] ss:$72 sps:$4 sm:$0xff]  }
 0x868   : > { %17102 = vmatprep.subr.bf16.mxu1 %v24655_v61  ;;  %v24697_v61 = vld [vmem:[#allocation8 + $0x416c] ss:$72 sps:$4 sm:$0xff]  }
 0x86a   : > { %17060 = vmatpush2.bf16.msra.mxu0 %v24650_v18  ;;  %v24692_v18 = vld [vmem:[#allocation8 + $0x3868] ss:$72 sps:$4 sm:$0xff]  }
 0x86b   : > { %17103 = vmatpush2.bf16.msra.mxu1 %v24653_v24  ;;  %17061 = vmatprep.subr.bf16.mxu0 %v24658_v51  ;;  %v24695_v24 = vld [vmem:[#allocation8 + $0x4168] ss:$72 sps:$4 sm:$0xff]   ;;  %v24700_v51 = vld [vmem:[#allocation8 + $0x37dc] ss:$72 sps:$4 sm:$0xff]  }
 0x86c   : > { %17104 = vmatprep.subr.bf16.mxu1 %v24661_v63  ;;  %v24703_v63 = vld [vmem:[#allocation8 + $0x40dc] ss:$72 sps:$4 sm:$0xff]  }
 0x86e   : > { %17062 = vmatpush2.bf16.msra.mxu0 %v24656_v58  ;;  %v24698_v58 = vld [vmem:[#allocation8 + $0x37d8] ss:$72 sps:$4 sm:$0xff]  }
 0x86f   : > { %17105 = vmatpush2.bf16.msra.mxu1 %v24659_v60  ;;  %17063 = vmatprep.subr.bf16.mxu0 %v24664_v23  ;;  %v24701_v60 = vld [vmem:[#allocation8 + $0x40d8] ss:$72 sps:$4 sm:$0xff]   ;;  %v24706_v23 = vld [vmem:[#allocation8 + $0x374c] ss:$72 sps:$4 sm:$0xff]  }
 0x870   : > { %17106 = vmatprep.subr.bf16.mxu1 %v24667_v54  ;;  %v24709_v54 = vld [vmem:[#allocation8 + $0x404c] ss:$72 sps:$4 sm:$0xff]  }
 0x872   : > { %17064 = vmatpush2.bf16.msra.mxu0 %v24662_v33  ;;  %v24704_v33 = vld [vmem:[#allocation8 + $0x3748] ss:$72 sps:$4 sm:$0xff]  }
 0x873   : > { %17107 = vmatpush2.bf16.msra.mxu1 %v24665_v45  ;;  %17065 = vmatprep.subr.bf16.mxu0 %v24670_v10  ;;  %v24707_v45 = vld [vmem:[#allocation8 + $0x4048] ss:$72 sps:$4 sm:$0xff]   ;;  %v24712_v10 = vld [vmem:[#allocation8 + $0x36bc] ss:$72 sps:$4 sm:$0xff]  }
 0x874   : > { %17108 = vmatprep.subr.bf16.mxu1 %v24673_v5  ;;  %v24715_v5 = vld [vmem:[#allocation8 + $0x3fbc] ss:$72 sps:$4 sm:$0xff]  }
 0x876   : > { %17066 = vmatpush2.bf16.msra.mxu0 %v24668_v36  ;;  %v24710_v36 = vld [vmem:[#allocation8 + $0x36b8] ss:$72 sps:$4 sm:$0xff]  }
 0x877   : > { %17109 = vmatpush2.bf16.msra.mxu1 %v24671_v48  ;;  %17121 = vmatprep.subr.bf16.mxu0 %v24676_v30  ;;  %v24713_v48 = vld [vmem:[#allocation8 + $0x3fb8] ss:$72 sps:$4 sm:$0xff]   ;;  %v24718_v30 = vld [vmem:[#allocation8 + $0x362c] ss:$72 sps:$4 sm:$0xff]  }
 0x878   : > { %17164 = vmatprep.subr.bf16.mxu1 %v24679_v32  ;;  %v24721_v32 = vld [vmem:[#allocation8 + $0x3f2c] ss:$72 sps:$4 sm:$0xff]  }
 0x879   : > { %17068 = vmatmul.mubr.bf16.vlgmr.msra.gmra.mxu0 %v26040_v26 }
 0x87a   : > { %17111 = vmatmul.mubr.bf16.vlgmr.msra.gmra.mxu1 %v26043_v3  ;;  %17122 = vmatpush1.bf16.msra.mxu0 %v24674_v15  ;;  %v24716_v15 = vld [vmem:[#allocation8 + $0x3628] ss:$72 sps:$4 sm:$0xff]  }
 0x87b   : > { %17165 = vmatpush1.bf16.msra.mxu1 %v24677_v6  ;;  %17123 = vmatprep.subr.bf16.mxu0 %v24682_v37  ;;  %v24719_v6 = vld [vmem:[#allocation8 + $0x3f28] ss:$72 sps:$4 sm:$0xff]   ;;  %v24724_v37 = vld [vmem:[#allocation8 + $0x3e9c] ss:$72 sps:$4 sm:$0xff]  }
 0x87c   : > { %17166 = vmatprep.subr.bf16.mxu1 %v24685_v46  ;;  %17153 = vmatprep.mubr.bf16.mxu0 %v26006_v20  ;;  %v24727_v46 = vld [vmem:[#allocation8 + $0x479c] ss:$72 sps:$4 sm:$0xff]  }
 0x87d   : > { %17196 = vmatprep.mubr.bf16.mxu1 %v26009_v38 }
 0x87e   : > { %17124 = vmatpush1.bf16.msra.mxu0 %v24680_v19  ;;  %v24722_v19 = vld [vmem:[#allocation8 + $0x3e98] ss:$72 sps:$4 sm:$0xff]  }
 0x87f   : > { %17167 = vmatpush1.bf16.msra.mxu1 %v24683_v22  ;;  %17125 = vmatprep.subr.bf16.mxu0 %v24688_v34  ;;  %v24725_v22 = vld [vmem:[#allocation8 + $0x4798] ss:$72 sps:$4 sm:$0xff]   ;;  %v24730_v34 = vld [vmem:[#allocation8 + $0x3e0c] ss:$72 sps:$4 sm:$0xff]  }
 0x880   : > { %17168 = vmatprep.subr.bf16.mxu1 %v24691_v4  ;;  %v24733_v4 = vld [vmem:[#allocation8 + $0x470c] ss:$72 sps:$4 sm:$0xff]  }
 0x882   : > { %17126 = vmatpush1.bf16.msra.mxu0 %v24686_v25  ;;  %v24728_v25 = vld [vmem:[#allocation8 + $0x3e08] ss:$72 sps:$4 sm:$0xff]  }
 0x883   : > { %17169 = vmatpush1.bf16.msra.mxu1 %v24689_v11  ;;  %17127 = vmatprep.subr.bf16.mxu0 %v24694_v47  ;;  %v24731_v11 = vld [vmem:[#allocation8 + $0x4708] ss:$72 sps:$4 sm:$0xff]   ;;  %v24736_v47 = vld [vmem:[#allocation8 + $0x3d7c] ss:$72 sps:$4 sm:$0xff]  }
 0x884   : > { %17170 = vmatprep.subr.bf16.mxu1 %v24697_v61  ;;  %v24739_v61 = vld [vmem:[#allocation8 + $0x467c] ss:$72 sps:$4 sm:$0xff]  }
 0x886   : > { %17128 = vmatpush1.bf16.msra.mxu0 %v24692_v18  ;;  %v24734_v18 = vld [vmem:[#allocation8 + $0x3d78] ss:$72 sps:$4 sm:$0xff]  }
 0x887   : > { %17171 = vmatpush1.bf16.msra.mxu1 %v24695_v24  ;;  %17129 = vmatprep.subr.bf16.mxu0 %v24700_v51  ;;  %v24737_v24 = vld [vmem:[#allocation8 + $0x4678] ss:$72 sps:$4 sm:$0xff]   ;;  %v24742_v51 = vld [vmem:[#allocation8 + $0x3cec] ss:$72 sps:$4 sm:$0xff]  }
 0x888   : > { %17172 = vmatprep.subr.bf16.mxu1 %v24703_v63  ;;  %v24745_v63 = vld [vmem:[#allocation8 + $0x45ec] ss:$72 sps:$4 sm:$0xff]  }
 0x88a   : > { %17130 = vmatpush1.bf16.msra.mxu0 %v24698_v58  ;;  %v24740_v58 = vld [vmem:[#allocation8 + $0x3ce8] ss:$72 sps:$4 sm:$0xff]  }
 0x88b   : > { %17173 = vmatpush1.bf16.msra.mxu1 %v24701_v60  ;;  %17131 = vmatprep.subr.bf16.mxu0 %v24706_v23  ;;  %v24743_v60 = vld [vmem:[#allocation8 + $0x45e8] ss:$72 sps:$4 sm:$0xff]   ;;  %v24748_v23 = vld [vmem:[#allocation8 + $0x3c5c] ss:$72 sps:$4 sm:$0xff]  }
 0x88c   : > { %17174 = vmatprep.subr.bf16.mxu1 %v24709_v54  ;;  %v24751_v54 = vld [vmem:[#allocation8 + $0x455c] ss:$72 sps:$4 sm:$0xff]  }
 0x88e   : > { %17132 = vmatpush1.bf16.msra.mxu0 %v24704_v33  ;;  %v24746_v33 = vld [vmem:[#allocation8 + $0x3c58] ss:$72 sps:$4 sm:$0xff]  }
 0x88f   : > { %17175 = vmatpush1.bf16.msra.mxu1 %v24707_v45  ;;  %17133 = vmatprep.subr.bf16.mxu0 %v24712_v10  ;;  %v24749_v45 = vld [vmem:[#allocation8 + $0x4558] ss:$72 sps:$4 sm:$0xff]   ;;  %v24754_v10 = vld [vmem:[#allocation8 + $0x3bcc] ss:$72 sps:$4 sm:$0xff]  }
 0x890   : > { %17176 = vmatprep.subr.bf16.mxu1 %v24715_v5  ;;  %v24757_v5 = vld [vmem:[#allocation8 + $0x44cc] ss:$72 sps:$4 sm:$0xff]  }
 0x892   : > { %17134 = vmatpush1.bf16.msra.mxu0 %v24710_v36  ;;  %v24752_v36 = vld [vmem:[#allocation8 + $0x3bc8] ss:$72 sps:$4 sm:$0xff]  }
 0x893   : > { %17177 = vmatpush1.bf16.msra.mxu1 %v24713_v48  ;;  %17135 = vmatprep.subr.bf16.mxu0 %v24718_v30  ;;  %v24755_v48 = vld [vmem:[#allocation8 + $0x44c8] ss:$72 sps:$4 sm:$0xff]   ;;  %v24760_v30 = vld [vmem:[#allocation8 + $0x3b3c] ss:$72 sps:$4 sm:$0xff]  }
 0x894   : > { %17178 = vmatprep.subr.bf16.mxu1 %v24721_v32  ;;  %v24763_v32 = vld [vmem:[#allocation8 + $0x443c] ss:$72 sps:$4 sm:$0xff]  }
 0x896   : > { %17136 = vmatpush1.bf16.msra.mxu0 %v24716_v15  ;;  %v24758_v15 = vld [vmem:[#allocation8 + $0x3b38] ss:$72 sps:$4 sm:$0xff]  }
 0x897   : > { %17179 = vmatpush1.bf16.msra.mxu1 %v24719_v6  ;;  %17137 = vmatprep.subr.bf16.mxu0 %v24724_v37  ;;  %v24761_v6 = vld [vmem:[#allocation8 + $0x4438] ss:$72 sps:$4 sm:$0xff]   ;;  %v24766_v37 = vld [vmem:[#allocation8 + $0x3aac] ss:$72 sps:$4 sm:$0xff]  }
 0x898   : > { %17180 = vmatprep.subr.bf16.mxu1 %v24727_v46  ;;  %v24769_v46 = vld [vmem:[#allocation8 + $0x43ac] ss:$72 sps:$4 sm:$0xff]  }
 0x89a   : > { %17138 = vmatpush2.bf16.msra.mxu0 %v24722_v19  ;;  %v24764_v19 = vld [vmem:[#allocation8 + $0x3aa8] ss:$72 sps:$4 sm:$0xff]  }
 0x89b   : > { %17181 = vmatpush2.bf16.msra.mxu1 %v24725_v22  ;;  %17139 = vmatprep.subr.bf16.mxu0 %v24730_v34  ;;  %v24767_v22 = vld [vmem:[#allocation8 + $0x43a8] ss:$72 sps:$4 sm:$0xff]   ;;  %v24772_v34 = vld [vmem:[#allocation8 + $0x3a24] ss:$72 sps:$4 sm:$0xff]  }
 0x89c   : > { %17182 = vmatprep.subr.bf16.mxu1 %v24733_v4  ;;  %v24775_v4 = vld [vmem:[#allocation8 + $0x4324] ss:$72 sps:$4 sm:$0xff]  }
 0x89e   : > { %17140 = vmatpush2.bf16.msra.mxu0 %v24728_v25  ;;  %v24770_v25 = vld [vmem:[#allocation8 + $0x3a20] ss:$72 sps:$4 sm:$0xff]  }
 0x89f   : > { %17183 = vmatpush2.bf16.msra.mxu1 %v24731_v11  ;;  %17141 = vmatprep.subr.bf16.mxu0 %v24736_v47  ;;  %v24773_v11 = vld [vmem:[#allocation8 + $0x4320] ss:$72 sps:$4 sm:$0xff]   ;;  %v24778_v47 = vld [vmem:[#allocation8 + $0x3994] ss:$72 sps:$4 sm:$0xff]  }
 0x8a0   : > { %17184 = vmatprep.subr.bf16.mxu1 %v24739_v61  ;;  %v24781_v61 = vld [vmem:[#allocation8 + $0x4294] ss:$72 sps:$4 sm:$0xff]  }
 0x8a2   : > { %17142 = vmatpush2.bf16.msra.mxu0 %v24734_v18  ;;  %v24776_v18 = vld [vmem:[#allocation8 + $0x3990] ss:$72 sps:$4 sm:$0xff]  }
 0x8a3   : > { %17185 = vmatpush2.bf16.msra.mxu1 %v24737_v24  ;;  %17143 = vmatprep.subr.bf16.mxu0 %v24742_v51  ;;  %v24779_v24 = vld [vmem:[#allocation8 + $0x4290] ss:$72 sps:$4 sm:$0xff]   ;;  %v24784_v51 = vld [vmem:[#allocation8 + $0x3904] ss:$72 sps:$4 sm:$0xff]  }
 0x8a4   : > { %17186 = vmatprep.subr.bf16.mxu1 %v24745_v63  ;;  %v24787_v63 = vld [vmem:[#allocation8 + $0x4204] ss:$72 sps:$4 sm:$0xff]  }
 0x8a6   : > { %17144 = vmatpush2.bf16.msra.mxu0 %v24740_v58  ;;  %v24782_v58 = vld [vmem:[#allocation8 + $0x3900] ss:$72 sps:$4 sm:$0xff]  }
 0x8a7   : > { %17187 = vmatpush2.bf16.msra.mxu1 %v24743_v60  ;;  %17145 = vmatprep.subr.bf16.mxu0 %v24748_v23  ;;  %v24785_v60 = vld [vmem:[#allocation8 + $0x4200] ss:$72 sps:$4 sm:$0xff]   ;;  %v24790_v23 = vld [vmem:[#allocation8 + $0x3874] ss:$72 sps:$4 sm:$0xff]  }
 0x8a8   : > { %17188 = vmatprep.subr.bf16.mxu1 %v24751_v54  ;;  %v24793_v54 = vld [vmem:[#allocation8 + $0x4174] ss:$72 sps:$4 sm:$0xff]  }
 0x8aa   : > { %17146 = vmatpush2.bf16.msra.mxu0 %v24746_v33  ;;  %v24788_v33 = vld [vmem:[#allocation8 + $0x3870] ss:$72 sps:$4 sm:$0xff]  }
 0x8ab   : > { %17189 = vmatpush2.bf16.msra.mxu1 %v24749_v45  ;;  %17147 = vmatprep.subr.bf16.mxu0 %v24754_v10  ;;  %v24791_v45 = vld [vmem:[#allocation8 + $0x4170] ss:$72 sps:$4 sm:$0xff]   ;;  %v24796_v10 = vld [vmem:[#allocation8 + $0x37e4] ss:$72 sps:$4 sm:$0xff]  }
 0x8ac   : > { %17190 = vmatprep.subr.bf16.mxu1 %v24757_v5  ;;  %v24799_v5 = vld [vmem:[#allocation8 + $0x40e4] ss:$72 sps:$4 sm:$0xff]  }
 0x8ae   : > { %17148 = vmatpush2.bf16.msra.mxu0 %v24752_v36  ;;  %v24794_v36 = vld [vmem:[#allocation8 + $0x37e0] ss:$72 sps:$4 sm:$0xff]  }
 0x8af   : > { %17191 = vmatpush2.bf16.msra.mxu1 %v24755_v48  ;;  %17149 = vmatprep.subr.bf16.mxu0 %v24760_v30  ;;  %v24797_v48 = vld [vmem:[#allocation8 + $0x40e0] ss:$72 sps:$4 sm:$0xff]   ;;  %v24802_v30 = vld [vmem:[#allocation8 + $0x3754] ss:$72 sps:$4 sm:$0xff]  }
 0x8b0   : > { %17192 = vmatprep.subr.bf16.mxu1 %v24763_v32  ;;  %v24805_v32 = vld [vmem:[#allocation8 + $0x4054] ss:$72 sps:$4 sm:$0xff]  }
 0x8b2   : > { %17150 = vmatpush2.bf16.msra.mxu0 %v24758_v15  ;;  %v24800_v15 = vld [vmem:[#allocation8 + $0x3750] ss:$72 sps:$4 sm:$0xff]  }
 0x8b3   : > { %17193 = vmatpush2.bf16.msra.mxu1 %v24761_v6  ;;  %17151 = vmatprep.subr.bf16.mxu0 %v24766_v37  ;;  %v24803_v6 = vld [vmem:[#allocation8 + $0x4050] ss:$72 sps:$4 sm:$0xff]   ;;  %v24808_v37 = vld [vmem:[#allocation8 + $0x36c4] ss:$72 sps:$4 sm:$0xff]  }
 0x8b4   : > { %17194 = vmatprep.subr.bf16.mxu1 %v24769_v46  ;;  %v24811_v46 = vld [vmem:[#allocation8 + $0x3fc4] ss:$72 sps:$4 sm:$0xff]  }
 0x8b6   : > { %17152 = vmatpush2.bf16.msra.mxu0 %v24764_v19  ;;  %v24806_v19 = vld [vmem:[#allocation8 + $0x36c0] ss:$72 sps:$4 sm:$0xff]  }
 0x8b7   : > { %17195 = vmatpush2.bf16.msra.mxu1 %v24767_v22  ;;  %17207 = vmatprep.subr.bf16.mxu0 %v24772_v34  ;;  %v24809_v22 = vld [vmem:[#allocation8 + $0x3fc0] ss:$72 sps:$4 sm:$0xff]   ;;  %v24814_v34 = vld [vmem:[#allocation8 + $0x3634] ss:$72 sps:$4 sm:$0xff]  }
 0x8b8   : > { %17250 = vmatprep.subr.bf16.mxu1 %v24775_v4  ;;  %v24817_v4 = vld [vmem:[#allocation8 + $0x3f34] ss:$72 sps:$4 sm:$0xff]  }
 0x8b9   : > { %17154 = vmatmul.mubr.bf16.vlgmr.msra.gmra.mxu0 %v26040_v26 }
 0x8ba   : > { %17197 = vmatmul.mubr.bf16.vlgmr.msra.gmra.mxu1 %v26043_v3  ;;  %17208 = vmatpush1.bf16.msra.mxu0 %v24770_v25  ;;  %v24812_v25 = vld [vmem:[#allocation8 + $0x3630] ss:$72 sps:$4 sm:$0xff]  }
 0x8bb   : > { %17251 = vmatpush1.bf16.msra.mxu1 %v24773_v11  ;;  %17209 = vmatprep.subr.bf16.mxu0 %v24778_v47  ;;  %v24815_v11 = vld [vmem:[#allocation8 + $0x3f30] ss:$72 sps:$4 sm:$0xff]   ;;  %v24820_v47 = vld [vmem:[#allocation8 + $0x3ea4] ss:$72 sps:$4 sm:$0xff]  }
 0x8bc   : > { %17252 = vmatprep.subr.bf16.mxu1 %v24781_v61  ;;  %17239 = vmatprep.mubr.bf16.mxu0 %v26006_v20  ;;  %v24823_v61 = vld [vmem:[#allocation8 + $0x47a4] ss:$72 sps:$4 sm:$0xff]  }
 0x8bd   : > { %17282 = vmatprep.mubr.bf16.mxu1 %v26009_v38 }
 0x8be   : > { %17210 = vmatpush1.bf16.msra.mxu0 %v24776_v18  ;;  %v24818_v18 = vld [vmem:[#allocation8 + $0x3ea0] ss:$72 sps:$4 sm:$0xff]  }
 0x8bf   : > { %17253 = vmatpush1.bf16.msra.mxu1 %v24779_v24  ;;  %17211 = vmatprep.subr.bf16.mxu0 %v24784_v51  ;;  %v24821_v24 = vld [vmem:[#allocation8 + $0x47a0] ss:$72 sps:$4 sm:$0xff]   ;;  %v24826_v51 = vld [vmem:[#allocation8 + $0x3e14] ss:$72 sps:$4 sm:$0xff]  }
 0x8c0   : > { %17254 = vmatprep.subr.bf16.mxu1 %v24787_v63  ;;  %v24829_v63 = vld [vmem:[#allocation8 + $0x4714] ss:$72 sps:$4 sm:$0xff]  }
 0x8c2   : > { %17212 = vmatpush1.bf16.msra.mxu0 %v24782_v58  ;;  %v24824_v58 = vld [vmem:[#allocation8 + $0x3e10] ss:$72 sps:$4 sm:$0xff]  }
 0x8c3   : > { %17255 = vmatpush1.bf16.msra.mxu1 %v24785_v60  ;;  %17213 = vmatprep.subr.bf16.mxu0 %v24790_v23  ;;  %v24827_v60 = vld [vmem:[#allocation8 + $0x4710] ss:$72 sps:$4 sm:$0xff]   ;;  %v24832_v23 = vld [vmem:[#allocation8 + $0x3d84] ss:$72 sps:$4 sm:$0xff]  }
 0x8c4   : > { %17256 = vmatprep.subr.bf16.mxu1 %v24793_v54  ;;  %v24835_v54 = vld [vmem:[#allocation8 + $0x4684] ss:$72 sps:$4 sm:$0xff]  }
 0x8c6   : > { %17214 = vmatpush1.bf16.msra.mxu0 %v24788_v33  ;;  %v24830_v33 = vld [vmem:[#allocation8 + $0x3d80] ss:$72 sps:$4 sm:$0xff]  }
 0x8c7   : > { %17257 = vmatpush1.bf16.msra.mxu1 %v24791_v45  ;;  %17215 = vmatprep.subr.bf16.mxu0 %v24796_v10  ;;  %v24833_v45 = vld [vmem:[#allocation8 + $0x4680] ss:$72 sps:$4 sm:$0xff]   ;;  %v24838_v10 = vld [vmem:[#allocation8 + $0x3cf4] ss:$72 sps:$4 sm:$0xff]  }
 0x8c8   : > { %17258 = vmatprep.subr.bf16.mxu1 %v24799_v5  ;;  %v24841_v5 = vld [vmem:[#allocation8 + $0x45f4] ss:$72 sps:$4 sm:$0xff]  }
 0x8ca   : > { %17216 = vmatpush1.bf16.msra.mxu0 %v24794_v36  ;;  %v24836_v36 = vld [vmem:[#allocation8 + $0x3cf0] ss:$72 sps:$4 sm:$0xff]  }
 0x8cb   : > { %17259 = vmatpush1.bf16.msra.mxu1 %v24797_v48  ;;  %17217 = vmatprep.subr.bf16.mxu0 %v24802_v30  ;;  %v24839_v48 = vld [vmem:[#allocation8 + $0x45f0] ss:$72 sps:$4 sm:$0xff]   ;;  %v24844_v30 = vld [vmem:[#allocation8 + $0x3c64] ss:$72 sps:$4 sm:$0xff]  }
 0x8cc   : > { %17260 = vmatprep.subr.bf16.mxu1 %v24805_v32  ;;  %v24847_v32 = vld [vmem:[#allocation8 + $0x4564] ss:$72 sps:$4 sm:$0xff]  }
 0x8ce   : > { %17218 = vmatpush1.bf16.msra.mxu0 %v24800_v15  ;;  %v24842_v15 = vld [vmem:[#allocation8 + $0x3c60] ss:$72 sps:$4 sm:$0xff]  }
 0x8cf   : > { %17261 = vmatpush1.bf16.msra.mxu1 %v24803_v6  ;;  %17219 = vmatprep.subr.bf16.mxu0 %v24808_v37  ;;  %v24845_v6 = vld [vmem:[#allocation8 + $0x4560] ss:$72 sps:$4 sm:$0xff]   ;;  %v24850_v37 = vld [vmem:[#allocation8 + $0x3bd4] ss:$72 sps:$4 sm:$0xff]  }
 0x8d0   : > { %17262 = vmatprep.subr.bf16.mxu1 %v24811_v46  ;;  %v24853_v46 = vld [vmem:[#allocation8 + $0x44d4] ss:$72 sps:$4 sm:$0xff]  }
 0x8d2   : > { %17220 = vmatpush1.bf16.msra.mxu0 %v24806_v19  ;;  %v24848_v19 = vld [vmem:[#allocation8 + $0x3bd0] ss:$72 sps:$4 sm:$0xff]  }
 0x8d3   : > { %17263 = vmatpush1.bf16.msra.mxu1 %v24809_v22  ;;  %17221 = vmatprep.subr.bf16.mxu0 %v24814_v34  ;;  %v24851_v22 = vld [vmem:[#allocation8 + $0x44d0] ss:$72 sps:$4 sm:$0xff]   ;;  %v24856_v34 = vld [vmem:[#allocation8 + $0x3b44] ss:$72 sps:$4 sm:$0xff]  }
 0x8d4   : > { %17264 = vmatprep.subr.bf16.mxu1 %v24817_v4  ;;  %v24859_v4 = vld [vmem:[#allocation8 + $0x4444] ss:$72 sps:$4 sm:$0xff]  }
 0x8d6   : > { %17222 = vmatpush1.bf16.msra.mxu0 %v24812_v25  ;;  %v24854_v25 = vld [vmem:[#allocation8 + $0x3b40] ss:$72 sps:$4 sm:$0xff]  }
 0x8d7   : > { %17265 = vmatpush1.bf16.msra.mxu1 %v24815_v11  ;;  %17223 = vmatprep.subr.bf16.mxu0 %v24820_v47  ;;  %v24857_v11 = vld [vmem:[#allocation8 + $0x4440] ss:$72 sps:$4 sm:$0xff]   ;;  %v24862_v47 = vld [vmem:[#allocation8 + $0x3ab4] ss:$72 sps:$4 sm:$0xff]  }
 0x8d8   : > { %17266 = vmatprep.subr.bf16.mxu1 %v24823_v61  ;;  %v24865_v61 = vld [vmem:[#allocation8 + $0x43b4] ss:$72 sps:$4 sm:$0xff]  }
 0x8da   : > { %17224 = vmatpush2.bf16.msra.mxu0 %v24818_v18  ;;  %v24860_v18 = vld [vmem:[#allocation8 + $0x3ab0] ss:$72 sps:$4 sm:$0xff]  }
 0x8db   : > { %17267 = vmatpush2.bf16.msra.mxu1 %v24821_v24  ;;  %17225 = vmatprep.subr.bf16.mxu0 %v24826_v51  ;;  %v24863_v24 = vld [vmem:[#allocation8 + $0x43b0] ss:$72 sps:$4 sm:$0xff]   ;;  %v24868_v51 = vld [vmem:[#allocation8 + $0x3a2c] ss:$72 sps:$4 sm:$0xff]  }
 0x8dc   : > { %17268 = vmatprep.subr.bf16.mxu1 %v24829_v63  ;;  %v24871_v63 = vld [vmem:[#allocation8 + $0x432c] ss:$72 sps:$4 sm:$0xff]  }
 0x8de   : > { %17226 = vmatpush2.bf16.msra.mxu0 %v24824_v58  ;;  %v24866_v58 = vld [vmem:[#allocation8 + $0x3a28] ss:$72 sps:$4 sm:$0xff]  }
 0x8df   : > { %17269 = vmatpush2.bf16.msra.mxu1 %v24827_v60  ;;  %17227 = vmatprep.subr.bf16.mxu0 %v24832_v23  ;;  %v24869_v60 = vld [vmem:[#allocation8 + $0x4328] ss:$72 sps:$4 sm:$0xff]   ;;  %v24874_v23 = vld [vmem:[#allocation8 + $0x399c] ss:$72 sps:$4 sm:$0xff]  }
 0x8e0   : > { %17270 = vmatprep.subr.bf16.mxu1 %v24835_v54  ;;  %v24877_v54 = vld [vmem:[#allocation8 + $0x429c] ss:$72 sps:$4 sm:$0xff]  }
 0x8e2   : > { %17228 = vmatpush2.bf16.msra.mxu0 %v24830_v33  ;;  %v24872_v33 = vld [vmem:[#allocation8 + $0x3998] ss:$72 sps:$4 sm:$0xff]  }
 0x8e3   : > { %17271 = vmatpush2.bf16.msra.mxu1 %v24833_v45  ;;  %17229 = vmatprep.subr.bf16.mxu0 %v24838_v10  ;;  %v24875_v45 = vld [vmem:[#allocation8 + $0x4298] ss:$72 sps:$4 sm:$0xff]   ;;  %v24880_v10 = vld [vmem:[#allocation8 + $0x390c] ss:$72 sps:$4 sm:$0xff]  }
 0x8e4   : > { %17272 = vmatprep.subr.bf16.mxu1 %v24841_v5  ;;  %v24883_v5 = vld [vmem:[#allocation8 + $0x420c] ss:$72 sps:$4 sm:$0xff]  }
 0x8e6   : > { %17230 = vmatpush2.bf16.msra.mxu0 %v24836_v36  ;;  %v24878_v36 = vld [vmem:[#allocation8 + $0x3908] ss:$72 sps:$4 sm:$0xff]  }
 0x8e7   : > { %17273 = vmatpush2.bf16.msra.mxu1 %v24839_v48  ;;  %17231 = vmatprep.subr.bf16.mxu0 %v24844_v30  ;;  %v24881_v48 = vld [vmem:[#allocation8 + $0x4208] ss:$72 sps:$4 sm:$0xff]   ;;  %v24886_v30 = vld [vmem:[#allocation8 + $0x387c] ss:$72 sps:$4 sm:$0xff]  }
 0x8e8   : > { %17274 = vmatprep.subr.bf16.mxu1 %v24847_v32  ;;  %v24889_v32 = vld [vmem:[#allocation8 + $0x417c] ss:$72 sps:$4 sm:$0xff]  }
 0x8ea   : > { %17232 = vmatpush2.bf16.msra.mxu0 %v24842_v15  ;;  %v24884_v15 = vld [vmem:[#allocation8 + $0x3878] ss:$72 sps:$4 sm:$0xff]  }
 0x8eb   : > { %17275 = vmatpush2.bf16.msra.mxu1 %v24845_v6  ;;  %17233 = vmatprep.subr.bf16.mxu0 %v24850_v37  ;;  %v24887_v6 = vld [vmem:[#allocation8 + $0x4178] ss:$72 sps:$4 sm:$0xff]   ;;  %v24892_v37 = vld [vmem:[#allocation8 + $0x37ec] ss:$72 sps:$4 sm:$0xff]  }
 0x8ec   : > { %17276 = vmatprep.subr.bf16.mxu1 %v24853_v46  ;;  %v24895_v46 = vld [vmem:[#allocation8 + $0x40ec] ss:$72 sps:$4 sm:$0xff]  }
 0x8ee   : > { %17234 = vmatpush2.bf16.msra.mxu0 %v24848_v19  ;;  %v24890_v19 = vld [vmem:[#allocation8 + $0x37e8] ss:$72 sps:$4 sm:$0xff]  }
 0x8ef   : > { %17277 = vmatpush2.bf16.msra.mxu1 %v24851_v22  ;;  %17235 = vmatprep.subr.bf16.mxu0 %v24856_v34  ;;  %v24893_v22 = vld [vmem:[#allocation8 + $0x40e8] ss:$72 sps:$4 sm:$0xff]   ;;  %v24898_v34 = vld [vmem:[#allocation8 + $0x375c] ss:$72 sps:$4 sm:$0xff]  }
 0x8f0   : > { %17278 = vmatprep.subr.bf16.mxu1 %v24859_v4  ;;  %v24901_v4 = vld [vmem:[#allocation8 + $0x405c] ss:$72 sps:$4 sm:$0xff]  }
 0x8f2   : > { %17236 = vmatpush2.bf16.msra.mxu0 %v24854_v25  ;;  %v24896_v25 = vld [vmem:[#allocation8 + $0x3758] ss:$72 sps:$4 sm:$0xff]  }
 0x8f3   : > { %17279 = vmatpush2.bf16.msra.mxu1 %v24857_v11  ;;  %17237 = vmatprep.subr.bf16.mxu0 %v24862_v47  ;;  %v24899_v11 = vld [vmem:[#allocation8 + $0x4058] ss:$72 sps:$4 sm:$0xff]   ;;  %v24904_v47 = vld [vmem:[#allocation8 + $0x36cc] ss:$72 sps:$4 sm:$0xff]  }
 0x8f4   : > { %17280 = vmatprep.subr.bf16.mxu1 %v24865_v61  ;;  %v24907_v61 = vld [vmem:[#allocation8 + $0x3fcc] ss:$72 sps:$4 sm:$0xff]  }
 0x8f6   : > { %17238 = vmatpush2.bf16.msra.mxu0 %v24860_v18  ;;  %v24902_v18 = vld [vmem:[#allocation8 + $0x36c8] ss:$72 sps:$4 sm:$0xff]  }
 0x8f7   : > { %17281 = vmatpush2.bf16.msra.mxu1 %v24863_v24  ;;  %17293 = vmatprep.subr.bf16.mxu0 %v24868_v51  ;;  %v24905_v24 = vld [vmem:[#allocation8 + $0x3fc8] ss:$72 sps:$4 sm:$0xff]   ;;  %v24910_v51 = vld [vmem:[#allocation8 + $0x363c] ss:$72 sps:$4 sm:$0xff]  }
 0x8f8   : > { %17336 = vmatprep.subr.bf16.mxu1 %v24871_v63  ;;  %v24913_v63 = vld [vmem:[#allocation8 + $0x3f3c] ss:$72 sps:$4 sm:$0xff]  }
 0x8f9   : > { %17240 = vmatmul.mubr.bf16.vlgmr.msra.gmra.mxu0 %v26040_v26 }
 0x8fa   : > { %17283 = vmatmul.mubr.bf16.vlgmr.msra.gmra.mxu1 %v26043_v3  ;;  %17294 = vmatpush1.bf16.msra.mxu0 %v24866_v58  ;;  %v24908_v58 = vld [vmem:[#allocation8 + $0x3638] ss:$72 sps:$4 sm:$0xff]  }
 0x8fb   : > { %17337 = vmatpush1.bf16.msra.mxu1 %v24869_v60  ;;  %17295 = vmatprep.subr.bf16.mxu0 %v24874_v23  ;;  %v24911_v60 = vld [vmem:[#allocation8 + $0x3f38] ss:$72 sps:$4 sm:$0xff]   ;;  %v24916_v23 = vld [vmem:[#allocation8 + $0x3eac] ss:$72 sps:$4 sm:$0xff]  }
 0x8fc   : > { %17338 = vmatprep.subr.bf16.mxu1 %v24877_v54  ;;  %17325 = vmatprep.mubr.bf16.mxu0 %v26006_v20  ;;  %v24919_v54 = vld [vmem:[#allocation8 + $0x47ac] ss:$72 sps:$4 sm:$0xff]  }
 0x8fd   : > { %17368 = vmatprep.mubr.bf16.mxu1 %v26009_v38 }
 0x8fe   : > { %17296 = vmatpush1.bf16.msra.mxu0 %v24872_v33  ;;  %v24914_v33 = vld [vmem:[#allocation8 + $0x3ea8] ss:$72 sps:$4 sm:$0xff]  }
 0x8ff   : > { %17339 = vmatpush1.bf16.msra.mxu1 %v24875_v45  ;;  %17297 = vmatprep.subr.bf16.mxu0 %v24880_v10  ;;  %v24917_v45 = vld [vmem:[#allocation8 + $0x47a8] ss:$72 sps:$4 sm:$0xff]   ;;  %v24922_v10 = vld [vmem:[#allocation8 + $0x3e1c] ss:$72 sps:$4 sm:$0xff]  }
 0x900   : > { %17340 = vmatprep.subr.bf16.mxu1 %v24883_v5  ;;  %v24925_v5 = vld [vmem:[#allocation8 + $0x471c] ss:$72 sps:$4 sm:$0xff]  }
 0x902   : > { %17298 = vmatpush1.bf16.msra.mxu0 %v24878_v36  ;;  %v24920_v36 = vld [vmem:[#allocation8 + $0x3e18] ss:$72 sps:$4 sm:$0xff]  }
 0x903   : > { %17341 = vmatpush1.bf16.msra.mxu1 %v24881_v48  ;;  %17299 = vmatprep.subr.bf16.mxu0 %v24886_v30  ;;  %v24923_v48 = vld [vmem:[#allocation8 + $0x4718] ss:$72 sps:$4 sm:$0xff]   ;;  %v24928_v30 = vld [vmem:[#allocation8 + $0x3d8c] ss:$72 sps:$4 sm:$0xff]  }
 0x904   : > { %17342 = vmatprep.subr.bf16.mxu1 %v24889_v32  ;;  %v24931_v32 = vld [vmem:[#allocation8 + $0x468c] ss:$72 sps:$4 sm:$0xff]  }
 0x906   : > { %17300 = vmatpush1.bf16.msra.mxu0 %v24884_v15  ;;  %v24926_v15 = vld [vmem:[#allocation8 + $0x3d88] ss:$72 sps:$4 sm:$0xff]  }
 0x907   : > { %17343 = vmatpush1.bf16.msra.mxu1 %v24887_v6  ;;  %17301 = vmatprep.subr.bf16.mxu0 %v24892_v37  ;;  %v24929_v6 = vld [vmem:[#allocation8 + $0x4688] ss:$72 sps:$4 sm:$0xff]   ;;  %v24934_v37 = vld [vmem:[#allocation8 + $0x3cfc] ss:$72 sps:$4 sm:$0xff]  }
 0x908   : > { %17344 = vmatprep.subr.bf16.mxu1 %v24895_v46  ;;  %v24937_v46 = vld [vmem:[#allocation8 + $0x45fc] ss:$72 sps:$4 sm:$0xff]  }
 0x90a   : > { %17302 = vmatpush1.bf16.msra.mxu0 %v24890_v19  ;;  %v24932_v19 = vld [vmem:[#allocation8 + $0x3cf8] ss:$72 sps:$4 sm:$0xff]  }
 0x90b   : > { %17345 = vmatpush1.bf16.msra.mxu1 %v24893_v22  ;;  %17303 = vmatprep.subr.bf16.mxu0 %v24898_v34  ;;  %v24935_v22 = vld [vmem:[#allocation8 + $0x45f8] ss:$72 sps:$4 sm:$0xff]   ;;  %v24940_v34 = vld [vmem:[#allocation8 + $0x3c6c] ss:$72 sps:$4 sm:$0xff]  }
 0x90c   : > { %17346 = vmatprep.subr.bf16.mxu1 %v24901_v4  ;;  %v24943_v4 = vld [vmem:[#allocation8 + $0x456c] ss:$72 sps:$4 sm:$0xff]  }
 0x90e   : > { %17304 = vmatpush1.bf16.msra.mxu0 %v24896_v25  ;;  %v24938_v25 = vld [vmem:[#allocation8 + $0x3c68] ss:$72 sps:$4 sm:$0xff]  }
 0x90f   : > { %17347 = vmatpush1.bf16.msra.mxu1 %v24899_v11  ;;  %17305 = vmatprep.subr.bf16.mxu0 %v24904_v47  ;;  %v24941_v11 = vld [vmem:[#allocation8 + $0x4568] ss:$72 sps:$4 sm:$0xff]   ;;  %v24946_v47 = vld [vmem:[#allocation8 + $0x3bdc] ss:$72 sps:$4 sm:$0xff]  }
 0x910   : > { %17348 = vmatprep.subr.bf16.mxu1 %v24907_v61  ;;  %v24949_v61 = vld [vmem:[#allocation8 + $0x44dc] ss:$72 sps:$4 sm:$0xff]  }
 0x912   : > { %17306 = vmatpush1.bf16.msra.mxu0 %v24902_v18  ;;  %v24944_v18 = vld [vmem:[#allocation8 + $0x3bd8] ss:$72 sps:$4 sm:$0xff]  }
 0x913   : > { %17349 = vmatpush1.bf16.msra.mxu1 %v24905_v24  ;;  %17307 = vmatprep.subr.bf16.mxu0 %v24910_v51  ;;  %v24947_v24 = vld [vmem:[#allocation8 + $0x44d8] ss:$72 sps:$4 sm:$0xff]   ;;  %v24952_v51 = vld [vmem:[#allocation8 + $0x3b4c] ss:$72 sps:$4 sm:$0xff]  }
 0x914   : > { %17350 = vmatprep.subr.bf16.mxu1 %v24913_v63  ;;  %v24955_v63 = vld [vmem:[#allocation8 + $0x444c] ss:$72 sps:$4 sm:$0xff]  }
 0x916   : > { %17308 = vmatpush1.bf16.msra.mxu0 %v24908_v58  ;;  %v24950_v58 = vld [vmem:[#allocation8 + $0x3b48] ss:$72 sps:$4 sm:$0xff]  }
 0x917   : > { %17351 = vmatpush1.bf16.msra.mxu1 %v24911_v60  ;;  %17309 = vmatprep.subr.bf16.mxu0 %v24916_v23  ;;  %v24953_v60 = vld [vmem:[#allocation8 + $0x4448] ss:$72 sps:$4 sm:$0xff]   ;;  %v24958_v23 = vld [vmem:[#allocation8 + $0x3abc] ss:$72 sps:$4 sm:$0xff]  }
 0x918   : > { %17352 = vmatprep.subr.bf16.mxu1 %v24919_v54  ;;  %v24961_v54 = vld [vmem:[#allocation8 + $0x43bc] ss:$72 sps:$4 sm:$0xff]  }
 0x91a   : > { %17310 = vmatpush2.bf16.msra.mxu0 %v24914_v33  ;;  %v24956_v33 = vld [vmem:[#allocation8 + $0x3ab8] ss:$72 sps:$4 sm:$0xff]  }
 0x91b   : > { %17353 = vmatpush2.bf16.msra.mxu1 %v24917_v45  ;;  %17311 = vmatprep.subr.bf16.mxu0 %v24922_v10  ;;  %v24959_v45 = vld [vmem:[#allocation8 + $0x43b8] ss:$72 sps:$4 sm:$0xff]   ;;  %v24964_v10 = vld [vmem:[#allocation8 + $0x3a34] ss:$72 sps:$4 sm:$0xff]  }
 0x91c   : > { %17354 = vmatprep.subr.bf16.mxu1 %v24925_v5  ;;  %v24967_v5 = vld [vmem:[#allocation8 + $0x4334] ss:$72 sps:$4 sm:$0xff]  }
 0x91e   : > { %17312 = vmatpush2.bf16.msra.mxu0 %v24920_v36  ;;  %v24962_v36 = vld [vmem:[#allocation8 + $0x3a30] ss:$72 sps:$4 sm:$0xff]  }
 0x91f   : > { %17355 = vmatpush2.bf16.msra.mxu1 %v24923_v48  ;;  %17313 = vmatprep.subr.bf16.mxu0 %v24928_v30  ;;  %v24965_v48 = vld [vmem:[#allocation8 + $0x4330] ss:$72 sps:$4 sm:$0xff]   ;;  %v24970_v30 = vld [vmem:[#allocation8 + $0x39a4] ss:$72 sps:$4 sm:$0xff]  }
 0x920   : > { %17356 = vmatprep.subr.bf16.mxu1 %v24931_v32  ;;  %v24973_v32 = vld [vmem:[#allocation8 + $0x42a4] ss:$72 sps:$4 sm:$0xff]  }
 0x922   : > { %17314 = vmatpush2.bf16.msra.mxu0 %v24926_v15  ;;  %v24968_v15 = vld [vmem:[#allocation8 + $0x39a0] ss:$72 sps:$4 sm:$0xff]  }
 0x923   : > { %17357 = vmatpush2.bf16.msra.mxu1 %v24929_v6  ;;  %17315 = vmatprep.subr.bf16.mxu0 %v24934_v37  ;;  %v24971_v6 = vld [vmem:[#allocation8 + $0x42a0] ss:$72 sps:$4 sm:$0xff]   ;;  %v24976_v37 = vld [vmem:[#allocation8 + $0x3914] ss:$72 sps:$4 sm:$0xff]  }
 0x924   : > { %17358 = vmatprep.subr.bf16.mxu1 %v24937_v46  ;;  %v24979_v46 = vld [vmem:[#allocation8 + $0x4214] ss:$72 sps:$4 sm:$0xff]  }
 0x926   : > { %17316 = vmatpush2.bf16.msra.mxu0 %v24932_v19  ;;  %v24974_v19 = vld [vmem:[#allocation8 + $0x3910] ss:$72 sps:$4 sm:$0xff]  }
 0x927   : > { %17359 = vmatpush2.bf16.msra.mxu1 %v24935_v22  ;;  %17317 = vmatprep.subr.bf16.mxu0 %v24940_v34  ;;  %v24977_v22 = vld [vmem:[#allocation8 + $0x4210] ss:$72 sps:$4 sm:$0xff]   ;;  %v24982_v34 = vld [vmem:[#allocation8 + $0x3884] ss:$72 sps:$4 sm:$0xff]  }
 0x928   : > { %17360 = vmatprep.subr.bf16.mxu1 %v24943_v4  ;;  %v24985_v4 = vld [vmem:[#allocation8 + $0x4184] ss:$72 sps:$4 sm:$0xff]  }
 0x92a   : > { %17318 = vmatpush2.bf16.msra.mxu0 %v24938_v25  ;;  %v24980_v25 = vld [vmem:[#allocation8 + $0x3880] ss:$72 sps:$4 sm:$0xff]  }
 0x92b   : > { %17361 = vmatpush2.bf16.msra.mxu1 %v24941_v11  ;;  %17319 = vmatprep.subr.bf16.mxu0 %v24946_v47  ;;  %v24983_v11 = vld [vmem:[#allocation8 + $0x4180] ss:$72 sps:$4 sm:$0xff]   ;;  %v24988_v47 = vld [vmem:[#allocation8 + $0x37f4] ss:$72 sps:$4 sm:$0xff]  }
 0x92c   : > { %17362 = vmatprep.subr.bf16.mxu1 %v24949_v61  ;;  %v24991_v61 = vld [vmem:[#allocation8 + $0x40f4] ss:$72 sps:$4 sm:$0xff]  }
 0x92e   : > { %17320 = vmatpush2.bf16.msra.mxu0 %v24944_v18  ;;  %v24994_v18 = vld [vmem:[#allocation8 + $0x3764] ss:$72 sps:$4 sm:$0xff]  }
 0x92f   : > { %17363 = vmatpush2.bf16.msra.mxu1 %v24947_v24  ;;  %17321 = vmatprep.subr.bf16.mxu0 %v24952_v51  ;;  %v24997_v24 = vld [vmem:[#allocation8 + $0x4064] ss:$72 sps:$4 sm:$0xff]   ;;  %v24992_v51 = vld [vmem:[#allocation8 + $0x3760] ss:$72 sps:$4 sm:$0xff]  }
 0x930   : > { %17364 = vmatprep.subr.bf16.mxu1 %v24955_v63  ;;  %v24995_v63 = vld [vmem:[#allocation8 + $0x4060] ss:$72 sps:$4 sm:$0xff]  }
 0x932   : > { %17322 = vmatpush2.bf16.msra.mxu0 %v24950_v58  ;;  %v25000_v58 = vld [vmem:[#allocation8 + $0x36d4] ss:$72 sps:$4 sm:$0xff]  }
 0x933   : > { %17365 = vmatpush2.bf16.msra.mxu1 %v24953_v60  ;;  %17323 = vmatprep.subr.bf16.mxu0 %v24958_v23  ;;  %v25003_v60 = vld [vmem:[#allocation8 + $0x3fd4] ss:$72 sps:$4 sm:$0xff]   ;;  %v24998_v23 = vld [vmem:[#allocation8 + $0x36d0] ss:$72 sps:$4 sm:$0xff]  }
 0x934   : > { %17366 = vmatprep.subr.bf16.mxu1 %v24961_v54  ;;  %v25001_v54 = vld [vmem:[#allocation8 + $0x3fd0] ss:$72 sps:$4 sm:$0xff]  }
 0x936   : > { %17324 = vmatpush2.bf16.msra.mxu0 %v24956_v33  ;;  %v25006_v33 = vld [vmem:[#allocation8 + $0x3644] ss:$72 sps:$4 sm:$0xff]  }
 0x937   : > { %17367 = vmatpush2.bf16.msra.mxu1 %v24959_v45  ;;  %17379 = vmatprep.subr.bf16.mxu0 %v24964_v10  ;;  %v25009_v45 = vld [vmem:[#allocation8 + $0x3f44] ss:$72 sps:$4 sm:$0xff]   ;;  %v25004_v10 = vld [vmem:[#allocation8 + $0x3640] ss:$72 sps:$4 sm:$0xff]  }
 0x938   : > { %17422 = vmatprep.subr.bf16.mxu1 %v24967_v5  ;;  %v25007_v5 = vld [vmem:[#allocation8 + $0x3f40] ss:$72 sps:$4 sm:$0xff]  }
 0x939   : > { %17326 = vmatmul.mubr.bf16.vlgmr.msra.gmra.mxu0 %v26040_v26 }
 0x93a   : > { %17369 = vmatmul.mubr.bf16.vlgmr.msra.gmra.mxu1 %v26043_v3  ;;  %17380 = vmatpush1.bf16.msra.mxu0 %v24962_v36  ;;  %v25012_v36 = vld [vmem:[#allocation8 + $0x3eb4] ss:$72 sps:$4 sm:$0xff]  }
 0x93b   : > { %17423 = vmatpush1.bf16.msra.mxu1 %v24965_v48  ;;  %17381 = vmatprep.subr.bf16.mxu0 %v24970_v30  ;;  %v25015_v48 = vld [vmem:[#allocation8 + $0x47b4] ss:$72 sps:$4 sm:$0xff]   ;;  %v25010_v30 = vld [vmem:[#allocation8 + $0x3eb0] ss:$72 sps:$4 sm:$0xff]  }
 0x93c   : > { %17424 = vmatprep.subr.bf16.mxu1 %v24973_v32  ;;  %17411 = vmatprep.mubr.bf16.mxu0 %v26006_v20  ;;  %v24986_v20 = vld [vmem:[#allocation8 + $0x37f0] ss:$72 sps:$4 sm:$0xff]  }
 0x93d   : > { %17454 = vmatprep.mubr.bf16.mxu1 %v26009_v38  ;;  %v24989_v38 = vld [vmem:[#allocation8 + $0x40f0] ss:$72 sps:$4 sm:$0xff]  }
 0x93e   : > { %17382 = vmatpush1.bf16.msra.mxu0 %v24968_v15  ;;  %v25013_v32 = vld [vmem:[#allocation8 + $0x47b0] ss:$72 sps:$4 sm:$0xff]   ;;  %v25018_v15 = vld [vmem:[#allocation8 + $0x3e24] ss:$72 sps:$4 sm:$0xff]  }
 0x93f   : > { %17425 = vmatpush1.bf16.msra.mxu1 %v24971_v6  ;;  %17383 = vmatprep.subr.bf16.mxu0 %v24976_v37  ;;  %v25021_v6 = vld [vmem:[#allocation8 + $0x4724] ss:$72 sps:$4 sm:$0xff]   ;;  %v25016_v37 = vld [vmem:[#allocation8 + $0x3e20] ss:$72 sps:$4 sm:$0xff]  }
 0x940   : > { %17426 = vmatprep.subr.bf16.mxu1 %v24979_v46  ;;  %v25019_v46 = vld [vmem:[#allocation8 + $0x4720] ss:$72 sps:$4 sm:$0xff]  }
 0x942   : > { %17384 = vmatpush1.bf16.msra.mxu0 %v24974_v19  ;;  %v25024_v19 = vld [vmem:[#allocation8 + $0x3d94] ss:$72 sps:$4 sm:$0xff]  }
 0x943   : > { %17427 = vmatpush1.bf16.msra.mxu1 %v24977_v22  ;;  %17385 = vmatprep.subr.bf16.mxu0 %v24982_v34  ;;  %v25027_v22 = vld [vmem:[#allocation8 + $0x4694] ss:$72 sps:$4 sm:$0xff]   ;;  %v26113_v34 = vpop.f32.mrf.mxu0 }
 0x944   : > { %17428 = vmatprep.subr.bf16.mxu1 %v24985_v4  ;;  %v26115_v4 = vpop.f32.mrf.mxu1 }
 0x946   : > { %17386 = vmatpush1.bf16.msra.mxu0 %v24980_v25  ;;  %v25022_v25 = vld [vmem:[#allocation8 + $0x3d90] ss:$72 sps:$4 sm:$0xff]  }
 0x947   : > { %17429 = vmatpush1.bf16.msra.mxu1 %v24983_v11  ;;  %17387 = vmatprep.subr.bf16.mxu0 %v24988_v47  ;;  %v25025_v11 = vld [vmem:[#allocation8 + $0x4690] ss:$72 sps:$4 sm:$0xff]   ;;  %v25030_v47 = vld [vmem:[#allocation8 + $0x3d04] ss:$72 sps:$4 sm:$0xff]  }
 0x948   : > { %17430 = vmatprep.subr.bf16.mxu1 %v24991_v61  ;;  %v25033_v61 = vld [vmem:[#allocation8 + $0x4604] ss:$72 sps:$4 sm:$0xff]  }
 0x94a   : > { %17388 = vmatpush1.bf16.msra.mxu0 %v24986_v20  ;;  %v16727_v20 = vpop.f32.mrf.mxu0 }
 0x94b   : > { %17431 = vmatpush1.bf16.msra.mxu1 %v24989_v38  ;;  %17389 = vmatprep.subr.bf16.mxu0 %v24994_v18  ;;  %v16770_v38 = vpop.f32.mrf.mxu1  ;;  %v25028_v18 = vld [vmem:[#allocation8 + $0x3d00] ss:$72 sps:$4 sm:$0xff]  }
 0x94c   : > { %17432 = vmatprep.subr.bf16.mxu1 %v24997_v24  ;;  %v25031_v24 = vld [vmem:[#allocation8 + $0x4600] ss:$72 sps:$4 sm:$0xff]  }
 0x94e   : > { %17390 = vmatpush1.bf16.msra.mxu0 %v24992_v51  ;;  %v25036_v51 = vld [vmem:[#allocation8 + $0x3c74] ss:$72 sps:$4 sm:$0xff]  }
 0x94f   : > { %17433 = vmatpush1.bf16.msra.mxu1 %v24995_v63  ;;  %17391 = vmatprep.subr.bf16.mxu0 %v25000_v58  ;;  %v25039_v63 = vld [vmem:[#allocation8 + $0x4574] ss:$72 sps:$4 sm:$0xff]   ;;  %v26117_v58 = vpop.f32.mrf.mxu0 }
 0x950   : > { %17434 = vmatprep.subr.bf16.mxu1 %v25003_v60  ;;  %v26119_v60 = vpop.f32.mrf.mxu1 }
 0x952   : > { %17392 = vmatpush1.bf16.msra.mxu0 %v24998_v23  ;;  %v25034_v23 = vld [vmem:[#allocation8 + $0x3c70] ss:$72 sps:$4 sm:$0xff]  }
 0x953   : > { %17435 = vmatpush1.bf16.msra.mxu1 %v25001_v54  ;;  %17393 = vmatprep.subr.bf16.mxu0 %v25006_v33  ;;  %v25037_v54 = vld [vmem:[#allocation8 + $0x4570] ss:$72 sps:$4 sm:$0xff]   ;;  %v25042_v33 = vld [vmem:[#allocation8 + $0x3be4] ss:$72 sps:$4 sm:$0xff]  }
 0x954   : > { %17436 = vmatprep.subr.bf16.mxu1 %v25009_v45  ;;  %v25045_v45 = vld [vmem:[#allocation8 + $0x44e4] ss:$72 sps:$4 sm:$0xff]  }
 0x956   : > { %17394 = vmatpush1.bf16.msra.mxu0 %v25004_v10  ;;  %v26121_v10 = vpop.f32.mrf.mxu0 }
 0x957   : > { %17437 = vmatpush1.bf16.msra.mxu1 %v25007_v5  ;;  %17395 = vmatprep.subr.bf16.mxu0 %v25012_v36  ;;  %v26123_v5 = vpop.f32.mrf.mxu1 }
 0x958   : > { %17438 = vmatprep.subr.bf16.mxu1 %v25015_v48  ;;  %v26125_v36 = vpop.f32.mrf.mxu0 }
 0x959   : > { %v26127_v48 = vpop.f32.mrf.mxu1 }
 0x95a   : > { %17396 = vmatpush2.bf16.msra.mxu0 %v25010_v30  ;;  %v25040_v30 = vld [vmem:[#allocation8 + $0x3be0] ss:$72 sps:$4 sm:$0xff]  }
 0x95b   : > { %17439 = vmatpush2.bf16.msra.mxu1 %v25013_v32  ;;  %17397 = vmatprep.subr.bf16.mxu0 %v25018_v15  ;;  %v25043_v32 = vld [vmem:[#allocation8 + $0x44e0] ss:$72 sps:$4 sm:$0xff]   ;;  %v25048_v15 = vld [vmem:[#allocation8 + $0x3b54] ss:$72 sps:$4 sm:$0xff]  }
 0x95c   : > { %17440 = vmatprep.subr.bf16.mxu1 %v25021_v6  ;;  %v25051_v6 = vld [vmem:[#allocation8 + $0x4454] ss:$72 sps:$4 sm:$0xff]  }
 0x95e   : > { %17398 = vmatpush2.bf16.msra.mxu0 %v25016_v37  ;;  %v16813_v37 = vpop.f32.mrf.mxu0 }
 0x95f   : > { %17441 = vmatpush2.bf16.msra.mxu1 %v25019_v46  ;;  %17399 = vmatprep.subr.bf16.mxu0 %v25024_v19  ;;  %v16856_v46 = vpop.f32.mrf.mxu1  ;;  %v25046_v19 = vld [vmem:[#allocation8 + $0x3b50] ss:$72 sps:$4 sm:$0xff]  }
 0x960   : > { %17442 = vmatprep.subr.bf16.mxu1 %v25027_v22  ;;  %v25049_v22 = vld [vmem:[#allocation8 + $0x4450] ss:$72 sps:$4 sm:$0xff]  }
 0x962   : > { %17400 = vmatpush2.bf16.msra.mxu0 %v25022_v25  ;;  %v25054_v25 = vld [vmem:[#allocation8 + $0x3ac4] ss:$72 sps:$4 sm:$0xff]  }
 0x963   : > { %17443 = vmatpush2.bf16.msra.mxu1 %v25025_v11  ;;  %17401 = vmatprep.subr.bf16.mxu0 %v25030_v47  ;;  %v25057_v11 = vld [vmem:[#allocation8 + $0x43c4] ss:$72 sps:$4 sm:$0xff]   ;;  %v16771_v47 = vadd.f32 %v16770_v38, %v16727_v20  ;;  %v17584_v20 = vld [vmem:[#allocation9 + $0x178] sm:$0xff] }
 0x964   : > { %17444 = vmatprep.subr.bf16.mxu1 %v25033_v61  ;;  %v16857_v61 = vadd.f32 %v16856_v46, %v16813_v37  ;;  %v17550_v37 = vld [vmem:[#allocation9 + $0x68] sm:$0xff] }
 0x965   : > { %v17582_v46 = vld [vmem:[#allocation9 + $0x168] sm:$0xff] }
 0x966   : > { %17402 = vmatpush2.bf16.msra.mxu0 %v25028_v18  ;;  %v25052_v18 = vld [vmem:[#allocation8 + $0x3ac0] ss:$72 sps:$4 sm:$0xff]  }
 0x967   : > { %17445 = vmatpush2.bf16.msra.mxu1 %v25031_v24  ;;  %17403 = vmatprep.subr.bf16.mxu0 %v25036_v51  ;;  %v25055_v24 = vld [vmem:[#allocation8 + $0x43c0] ss:$72 sps:$4 sm:$0xff]   ;;  %v17466_v51 = vadd.f32 %v16771_v47, %v25911_v0  ;;  %v17551_v0 = vld [vmem:[#allocation9 + $0x70] sm:$0xff]  ;;  %v17564_v47 = vld [vmem:[#allocation9 + $0xd8] sm:$0xff] }
 0x968   : > { %17446 = vmatprep.subr.bf16.mxu1 %v25039_v63  ;;  %v17568_v63 = vld [vmem:[#allocation9 + $0xf8] sm:$0xff] }
 0x96a   : > { %17404 = vmatpush2.bf16.msra.mxu0 %v25034_v23  ;;  %v17600_v23 = vld [vmem:[#allocation9 + $0x1f8] sm:$0xff] }
 0x96b   : > { %17447 = vmatpush2.bf16.msra.mxu1 %v25037_v54  ;;  %17405 = vmatprep.subr.bf16.mxu0 %v25042_v33  ;;  %v17468_v54 = vadd.f32 %v16857_v61, %v25928_v16  ;;  %v17552_v33 = vld [vmem:[#allocation9 + $0x78] sm:$0xff]  ;;  %v17566_v16 = vld [vmem:[#allocation9 + $0xe8] sm:$0xff] }
 0x96c   : > { %17448 = vmatprep.subr.bf16.mxu1 %v25045_v45  ;;  %v17502_v45 = vmul.f32 %v17466_v51, %v17466_v51  ;;  %v17596_v61 = vld [vmem:[#allocation9 + $0x1d8] sm:$0xff]  ;;  %v17563_v51 = vld [vmem:[#allocation9 + $0xd0] sm:$0xff] }
 0x96d   : > { %v17504_v38 = vmul.f32 %v17468_v54, %v17468_v54 }
 0x96e   : > { %17406 = vmatpush2.bf16.msra.mxu0 %v25040_v30  ;;  %v17567_v30 = vld [vmem:[#allocation9 + $0xf0] sm:$0xff] }
 0x96f   : > { %17449 = vmatpush2.bf16.msra.mxu1 %v25043_v32  ;;  %17407 = vmatprep.subr.bf16.mxu0 %v25048_v15  ;;  %v17599_v32 = vld [vmem:[#allocation9 + $0x1f0] sm:$0xff] }
 0x970   : > { %17450 = vmatprep.subr.bf16.mxu1 %v25051_v6  ;;  %v17583_v15 = vld [vmem:[#allocation9 + $0x170] sm:$0xff]  ;;  %v17598_v6 = vld [vmem:[#allocation9 + $0x1e8] sm:$0xff] }
 0x972   : > { %17408 = vmatpush2.bf16.msra.mxu0 %v25046_v19  ;;  %v17565_v19 = vld [vmem:[#allocation9 + $0xe0] sm:$0xff] }
 0x973   : > { %17451 = vmatpush2.bf16.msra.mxu1 %v25049_v22  ;;  %17409 = vmatprep.subr.bf16.mxu0 %v25054_v25  ;;  %v26133_v22 = vpop.f32.mrf.mxu0  ;;  %v17549_v25 = vld [vmem:[#allocation9 + $0x60] sm:$0xff] }
 0x974   : > { %17452 = vmatprep.subr.bf16.mxu1 %v25057_v11  ;;  %v17581_v11 = vld [vmem:[#allocation9 + $0x160] sm:$0xff] }
 0x976   : > { %17410 = vmatpush2.bf16.msra.mxu0 %v25052_v18  ;;  %v17548_v18 = vld [vmem:[#allocation9 + $0x58] sm:$0xff] }
 0x977   : > { %17453 = vmatpush2.bf16.msra.mxu1 %v25055_v24  ;;  %21101 = vmatprep.subr.mxu0 %v17568_v63  ;;  %v17580_v24 = vld [vmem:[#allocation9 + $0x158] sm:$0xff]  ;;  %v17595_v63 = vld [vmem:[#allocation9 + $0x1d0] sm:$0xff] }
 0x978   : > { %21139 = vmatprep.subr.mxu1 %v17600_v23  ;;  %v26137_v23 = vpop.f32.mrf.mxu0 }
 0x979   : > { %17412 = vmatmul.mubr.bf16.vlgmr.msra.gmra.mxu0 %v26040_v26  ;;  %v17597_v26 = vld [vmem:[#allocation9 + $0x1e0] sm:$0xff] }
 0x97a   : > { %17455 = vmatmul.mubr.bf16.vlgmr.msra.gmra.mxu1 %v26043_v3  ;;  %21102 = vmatpush3.msra.mxu0 %v17552_v33  ;;  %v26135_v3 = vpop.f32.mrf.mxu1  ;;  %v17547_v33 = vld [vmem:[#allocation9 + $0x50] sm:$0xff] }
 0x97b   : > { %17889 = vmatprep.mubr.f32.mxu0 %v17502_v45  ;;  %21140 = vmatpush3.msra.mxu1 %v17584_v20  ;;  %v17579_v45 = vld [vmem:[#allocation9 + $0x150] sm:$0xff]  ;;  %v17562_v20 = vld [vmem:[#allocation9 + $0xc8] sm:$0xff] }
 0x97c   : > { %17964 = vmatprep.mubr.f32.mxu1 %v17504_v38  ;;  %21103 = vmatprep.subr.mxu0 %v17567_v30  ;;  %v26139_v54 = vpop.f32.mrf.mxu1  ;;  %v17594_v38 = vld [vmem:[#allocation9 + $0x1c8] sm:$0xff]  ;;  %v26141_v30 = vpop.f32.mrf.mxu0 }
 0x97d   : > { %21141 = vmatprep.subr.mxu1 %v17599_v32  ;;  %21104 = vmatpush3.msra.mxu0 %v17551_v0  ;;  %v17546_v0 = vld [vmem:[#allocation9 + $0x48] sm:$0xff] }
 0x97e   : > { %21142 = vmatpush3.msra.mxu1 %v17583_v15  ;;  %21105 = vmatprep.subr.mxu0 %v17566_v16  ;;  %v26143_v32 = vpop.f32.mrf.mxu1  ;;  %v17578_v15 = vld [vmem:[#allocation9 + $0x148] sm:$0xff]  ;;  %v17561_v16 = vld [vmem:[#allocation9 + $0xc0] sm:$0xff] }
 0x97f   : > { %21143 = vmatprep.subr.mxu1 %v17598_v6  ;;  %21106 = vmatpush3.msra.mxu0 %v17550_v37  ;;  %v17593_v6 = vld [vmem:[#allocation9 + $0x1c0] sm:$0xff] }
 0x980   : > { %21144 = vmatpush3.msra.mxu1 %v17582_v46  ;;  %21107 = vmatprep.subr.mxu0 %v17565_v19  ;;  %v17545_v37 = vld [vmem:[#allocation9 + $0x40] sm:$0xff]  ;;  %v17560_v19 = vld [vmem:[#allocation9 + $0xb8] sm:$0xff] }
 0x981   : > { %21145 = vmatprep.subr.mxu1 %v17597_v26  ;;  %21108 = vmatpush3.msra.mxu0 %v17549_v25  ;;  %v17577_v46 = vld [vmem:[#allocation9 + $0x140] sm:$0xff]  ;;  %v17592_v26 = vld [vmem:[#allocation9 + $0x1b8] sm:$0xff]  ;;  %v26145_v25 = vpop.f32.mrf.mxu0 }
 0x982   : > { %21146 = vmatpush3.msra.mxu1 %v17581_v11  ;;  %21109 = vmatprep.subr.mxu0 %v17564_v47  ;;  %v26147_v11 = vpop.f32.mrf.mxu1  ;;  %v17544_v47 = vld [vmem:[#allocation9 + $0x38] sm:$0xff] }
 0x983   : > { %21147 = vmatprep.subr.mxu1 %v17596_v61  ;;  %21110 = vmatpush3.msra.mxu0 %v17548_v18  ;;  %v17576_v61 = vld [vmem:[#allocation9 + $0x138] sm:$0xff]  ;;  %v17559_v18 = vld [vmem:[#allocation9 + $0xb0] sm:$0xff]  ;;  %v26153_v52 = vpop.f32.mrf.mxu0 }
 0x984   : > { %21148 = vmatpush3.msra.mxu1 %v17580_v24  ;;  %21111 = vmatprep.subr.mxu0 %v17563_v51  ;;  %v17591_v24 = vld [vmem:[#allocation9 + $0x1b0] sm:$0xff] }
 0x985   : > { %21149 = vmatprep.subr.mxu1 %v17595_v63  ;;  %21112 = vmatpush3.msra.mxu0 %v17547_v33  ;;  %v17543_v51 = vld [vmem:[#allocation9 + $0x30] sm:$0xff] }
 0x986   : > { %21150 = vmatpush3.msra.mxu1 %v17579_v45  ;;  %21113 = vmatprep.subr.mxu0 %v17562_v20  ;;  %v17575_v63 = vld [vmem:[#allocation9 + $0x130] sm:$0xff]  ;;  %v26433_v45 = vld [vmem:[#allocation25_spill] sm:$0xff] }
 0x987   : > { %21151 = vmatprep.subr.mxu1 %v17594_v38  ;;  %21114 = vmatpush3.msra.mxu0 %v17546_v0  ;;  %v26432_v33 = vld [vmem:[#allocation24_spill] sm:$0xff]  ;;  %v17558_v38 = vld [vmem:[#allocation9 + $0xa8] sm:$0xff] }
 0x988   : > { %21152 = vmatpush3.msra.mxu1 %v17578_v15  ;;  %21115 = vmatprep.subr.mxu0 %v17561_v16  ;;  %v4559_v20 = vadd.f32 %v26433_v45, %v26432_v33  ;;  %v17590_v0 = vld [vmem:[#allocation9 + $0x1a8] sm:$0xff]  ;;  %v17557_v33 = vld [vmem:[#allocation9 + $0xa0] sm:$0xff] }
 0x989   : > { %21153 = vmatprep.subr.mxu1 %v17593_v6  ;;  %21116 = vmatpush3.msra.mxu0 %v17545_v37  ;;  %v26434_v15 = vld [vmem:[#allocation26_spill] sm:$0xff]  ;;  %v26435_v16 = vld [vmem:[#allocation27_spill] sm:$0xff]  ;;  %v26155_v37 = vpop.f32.mrf.mxu1 }
 0x98a   : > { %21154 = vmatpush3.msra.mxu1 %v17577_v46  ;;  %21117 = vmatprep.subr.mxu0 %v17560_v19  ;;  %v4645_v6 = vadd.f32 %v26435_v16, %v26434_v15  ;;  %v17542_v46 = vld [vmem:[#allocation9 + $0x28] sm:$0xff]  ;;  %v17573_v15 = vld [vmem:[#allocation9 + $0x120] sm:$0xff]  ;;  %v17556_v16 = vld [vmem:[#allocation9 + $0x98] sm:$0xff] }
 0x98b   : > { %21155 = vmatprep.subr.mxu1 %v17592_v26  ;;  %21118 = vmatpush3.msra.mxu0 %v17544_v47  ;;  %v17574_v19 = vld [vmem:[#allocation9 + $0x128] sm:$0xff]  ;;  %v17589_v47 = vld [vmem:[#allocation9 + $0x1a0] sm:$0xff] }
 0x98c   : > { %21156 = vmatpush3.msra.mxu1 %v17576_v61  ;;  %21119 = vmatprep.subr.mxu0 %v17559_v18  ;;  %v26436_v26 = vld [vmem:[#allocation34_spill] sm:$0xff]  ;;  %v26437_v61 = vld [vmem:[#allocation37_spill] sm:$0xff]  ;;  %v16769_v18 = vadd.f32 %v26115_v4, %v26113_v34  ;;  %v16775_v34 = vadd.f32 %v26123_v5, %v26121_v10  ;;  %v16861_v4 = vadd.f32 %v26139_v54, %v26137_v23 }
 0x98d   : > { %21157 = vmatprep.subr.mxu1 %v17591_v24  ;;  %v8170_v59 = vadd.f32 %v26436_v26, %v4559_v20  ;;  %21120 = vmatpush3.msra.mxu0 %v17543_v51  ;;  %v8256_v45 = vadd.f32 %v26437_v61, %v4645_v6  ;;  %v16855_v24 = vadd.f32 %v26127_v48, %v26125_v36  ;;  %v26163_v51 = vpop.f32.mrf.mxu0  ;;  %v17540_v20 = vld [vmem:[#allocation9 + $0x18] sm:$0xff]  ;;  %v26439_v26 = vld [vmem:[#allocation38_spill] sm:$0xff] }
 0x98e   : > { %21158 = vmatpush3.msra.mxu1 %v17575_v63  ;;  %21121 = vmatprep.subr.mxu0 %v17558_v38  ;;  %v26165_v63 = vpop.f32.mrf.mxu1  ;;  %v17572_v38 = vld [vmem:[#allocation9 + $0x118] sm:$0xff]  ;;  %v17465_v10 = vadd.f32 %v16769_v18, %v25907_v57  ;;  %v17538_v23 = vld [vmem:[#allocation9 + $0x8] sm:$0xff]  ;;  %v17569_v18 = vld [vmem:[#allocation9 + $0x100] sm:$0xff] }
 0x98f   : > { %21159 = vmatprep.subr.mxu1 %v17590_v0  ;;  %21122 = vmatpush3.msra.mxu0 %v17542_v46  ;;  %v26438_v0 = vld [vmem:[#allocation35_spill] sm:$0xff]  ;;  %v8299_v61 = vadd.f32 %v26439_v26, %v8256_v45  ;;  %v26173_v36 = vpop.f32.mrf.mxu0  ;;  %v17467_v5 = vadd.f32 %v16855_v24, %v25924_v56  ;;  %v17537_v56 = vld [vmem:[#allocation9] sm:$0xff] }
 0x990   : > { %21160 = vmatpush3.msra.mxu1 %v17574_v19  ;;  %21123 = vmatprep.subr.mxu0 %v17557_v33  ;;  %v8213_v6 = vadd.f32 %v26438_v0, %v8170_v59  ;;  %v17555_v46 = vld [vmem:[#allocation9 + $0x90] sm:$0xff]  ;;  %v26175_v48 = vpop.f32.mrf.mxu1  ;;  %v17586_v45 = vld [vmem:[#allocation9 + $0x188] sm:$0xff]  ;;  %v17501_v24 = vmul.f32 %v17465_v10, %v17465_v10 }
 0x991   : > { %21161 = vmatprep.subr.mxu1 %v17589_v47  ;;  %21124 = vmatpush3.msra.mxu0 %v17541_v62  ;;  %v17587_v19 = vld [vmem:[#allocation9 + $0x190] sm:$0xff]  ;;  %v17554_v47 = vld [vmem:[#allocation9 + $0x88] sm:$0xff]  ;;  %v16985_v0 = vpop.f32.mrf.mxu0 }
 0x992   : > { %21162 = vmatpush3.msra.mxu1 %v17573_v15  ;;  %21125 = vmatprep.subr.mxu0 %v17556_v16  ;;  %v17539_v33 = vld [vmem:[#allocation9 + $0x10] sm:$0xff]  ;;  %v13177_v62 = vadd.f32 %v25916_v31, %v8213_v6  ;;  %v13179_v15 = vadd.f32 %v25933_v12, %v8299_v61  ;;  %v17570_v54 = vld [vmem:[#allocation9 + $0x108] sm:$0xff]  ;;  %v17553_v31 = vld [vmem:[#allocation9 + $0x80] sm:$0xff]  ;;  %v17028_v57 = vpop.f32.mrf.mxu1  ;;  %v17503_v6 = vmul.f32 %v17467_v5, %v17467_v5 }
 0x993   : > { %21163 = vmatprep.subr.mxu1 %v17588_v28  ;;  %v17571_v59 = vld [vmem:[#allocation9 + $0x110] sm:$0xff]  ;;  %21126 = vmatpush3.msra.mxu0 %v17540_v20  ;;  %v16773_v28 = vadd.f32 %v26119_v60, %v26117_v58  ;;  %v17585_v16 = vld [vmem:[#allocation9 + $0x180] sm:$0xff]  ;;  %v16943_v58 = vadd.f32 %v26147_v11, %v26145_v25  ;;  %v17632_v60 = vld [vmem:[#allocation9 + $0x2f8] sm:$0xff] }
 0x994   : > { %21164 = vmatpush3.msra.mxu1 %v17572_v38  ;;  %21127 = vmatprep.subr.mxu0 %v17555_v46  ;;  %v17484_v20 = vadd.f32 %v16775_v34, %v13177_v62  ;;  %v16859_v38 = vadd.f32 %v26135_v3, %v26133_v22  ;;  %v17486_v12 = vadd.f32 %v16861_v4, %v13179_v15  ;;  %v17664_v46 = vld [vmem:[#allocation9 + $0x3f8] sm:$0xff]  ;;  %v17631_v25 = vld [vmem:[#allocation9 + $0x2f0] sm:$0xff]  ;;  %v17662_v15 = vld [vmem:[#allocation9 + $0x3e8] sm:$0xff] }
 0x995   : > { %21165 = vmatprep.subr.mxu1 %v17587_v19  ;;  %21128 = vmatpush3.msra.mxu0 %v17539_v33  ;;  %v17483_v22 = vadd.f32 %v16773_v28, %v25914_v29  ;;  %v17029_v3 = vadd.f32 %v17028_v57, %v16985_v0  ;;  %v17616_v34 = vld [vmem:[#allocation9 + $0x278] sm:$0xff]  ;;  %v17663_v11 = vld [vmem:[#allocation9 + $0x3f0] sm:$0xff]  ;;  %v17470_v33 = vadd.f32 %v16943_v58, %v25945_v21  ;;  %v17614_v10 = vld [vmem:[#allocation9 + $0x268] sm:$0xff]  ;;  %v26191_v28 = vpop.f32.mrf.mxu0 }
 0x996   : > { %21166 = vmatpush3.msra.mxu1 %v17571_v59  ;;  %21129 = vmatprep.subr.mxu0 %v17554_v47  ;;  %v17520_v19 = vmul.f32 %v17484_v20, %v17484_v20  ;;  %v17485_v26 = vadd.f32 %v16859_v38, %v25931_v35  ;;  %v17522_v61 = vmul.f32 %v17486_v12, %v17486_v12  ;;  %v17648_v4 = vld [vmem:[#allocation9 + $0x378] sm:$0xff]  ;;  %v17615_v29 = vld [vmem:[#allocation9 + $0x270] sm:$0xff]  ;;  %v17646_v21 = vld [vmem:[#allocation9 + $0x368] sm:$0xff] }
 0x997   : > { %21167 = vmatprep.subr.mxu1 %v17586_v45  ;;  %21130 = vmatpush3.msra.mxu0 %v17538_v23  ;;  %v17647_v59 = vld [vmem:[#allocation9 + $0x370] sm:$0xff]  ;;  %v17472_v62 = vadd.f32 %v17029_v3, %v25965_v50  ;;  %v17519_v35 = vmul.f32 %v17483_v22, %v17483_v22  ;;  %v17630_v45 = vld [vmem:[#allocation9 + $0x2e8] sm:$0xff]  ;;  %v17506_v5 = vmul.f32 %v17470_v33, %v17470_v33  ;;  %v17661_v50 = vld [vmem:[#allocation9 + $0x3e0] sm:$0xff] }
 0x998   : > { %21168 = vmatpush3.msra.mxu1 %v17570_v54  ;;  %21131 = vmatprep.subr.mxu0 %v17553_v31  ;;  %v17521_v47 = vmul.f32 %v17485_v26, %v17485_v26  ;;  %v17629_v54 = vld [vmem:[#allocation9 + $0x2e0] sm:$0xff]  ;;  %v26193_v31 = vpop.f32.mrf.mxu1  ;;  %v17628_v38 = vld [vmem:[#allocation9 + $0x2d8] sm:$0xff]  ;;  %v17611_v58 = vld [vmem:[#allocation9 + $0x250] sm:$0xff] }
 0x999   : > { %21169 = vmatprep.subr.mxu1 %v17585_v16  ;;  %21132 = vmatpush3.msra.mxu0 %v17537_v56  ;;  %v17508_v23 = vmul.f32 %v17472_v62, %v17472_v62  ;;  %v17613_v16 = vld [vmem:[#allocation9 + $0x260] sm:$0xff]  ;;  %v17660_v12 = vld [vmem:[#allocation9 + $0x3d8] sm:$0xff]  ;;  %v17627_v56 = vld [vmem:[#allocation9 + $0x2d0] sm:$0xff] }
 0x99a   : > { %21170 = vmatpush3.msra.mxu1 %v17569_v18  ;;  %17890 = vmatmul.mubr.f32.vlgmr.msra.gmra.mxu0 %v17501_v24  ;;  %v17645_v20 = vld [vmem:[#allocation9 + $0x360] sm:$0xff]  ;;  %v17612_v0 = vld [vmem:[#allocation9 + $0x258] sm:$0xff]  ;;  %v17659_v18 = vld [vmem:[#allocation9 + $0x3d0] sm:$0xff]  ;;  %v26195_v24 = vpop.f32.mrf.mxu0 }
 0x99b   : > { %17965 = vmatmul.mubr.f32.vlgmr.msra.gmra.mxu1 %v17503_v6  ;;  %21177 = vmatprep.subr.mxu0 %v17632_v60  ;;  %v17644_v57 = vld [vmem:[#allocation9 + $0x358] sm:$0xff]  ;;  %v26197_v6 = vpop.f32.mrf.mxu1  ;;  %v17643_v60 = vld [vmem:[#allocation9 + $0x350] sm:$0xff]  ;;  %v17658_v22 = vld [vmem:[#allocation9 + $0x3c8] sm:$0xff] }
 0x99c   : > { %21215 = vmatprep.subr.mxu1 %v17664_v46  ;;  %17894 = vmatprep.mubr.f32.mxu0 %v17520_v19  ;;  %v17626_v46 = vld [vmem:[#allocation9 + $0x2c8] sm:$0xff]  ;;  %v26199_v3 = vpop.f32.mrf.mxu0  ;;  %v17624_v33 = vld [vmem:[#allocation9 + $0x2b8] sm:$0xff] }
 0x99d   : > { %17969 = vmatprep.mubr.f32.mxu1 %v17522_v61  ;;  %21178 = vmatpush3.msra.mxu0 %v17616_v34  ;;  %v26201_v19 = vpop.f32.mrf.mxu1  ;;  %v17610_v26 = vld [vmem:[#allocation9 + $0x248] sm:$0xff]  ;;  %v17625_v34 = vld [vmem:[#allocation9 + $0x2c0] sm:$0xff] }
 0x99e   : > { %21216 = vmatpush3.msra.mxu1 %v17648_v4  ;;  %21179 = vmatprep.subr.mxu0 %v17631_v25  ;;  %v17642_v61 = vld [vmem:[#allocation9 + $0x348] sm:$0xff]  ;;  %v17657_v4 = vld [vmem:[#allocation9 + $0x3c0] sm:$0xff] }
 0x99f   : > { %21217 = vmatprep.subr.mxu1 %v17663_v11  ;;  %21180 = vmatpush3.msra.mxu0 %v17615_v29  ;;  %v17609_v25 = vld [vmem:[#allocation9 + $0x240] sm:$0xff]  ;;  %v17656_v29 = vld [vmem:[#allocation9 + $0x3b8] sm:$0xff]  ;;  %v26205_v62 = vpop.f32.mrf.mxu1 }
 0x9a0   : > { %21218 = vmatpush3.msra.mxu1 %v17647_v59  ;;  %17895 = vmatmul.mubr.f32.gmra.mxu0 %v17519_v35  ;;  %v17641_v11 = vld [vmem:[#allocation9 + $0x340] sm:$0xff]  ;;  %v26203_v59 = vpop.f32.mrf.mxu0  ;;  %v17608_v35 = vld [vmem:[#allocation9 + $0x238] sm:$0xff] }
 0x9a1   : > { %17970 = vmatmul.mubr.f32.gmra.mxu1 %v17521_v47  ;;  %21181 = vmatprep.subr.mxu0 %v17630_v45  ;;  %v17640_v47 = vld [vmem:[#allocation9 + $0x338] sm:$0xff]  ;;  %v17623_v45 = vld [vmem:[#allocation9 + $0x2b0] sm:$0xff] }
 0x9a2   : > { %21219 = vmatprep.subr.mxu1 %v17662_v15  ;;  %21182 = vmatpush3.msra.mxu0 %v17614_v10  ;;  %v17655_v15 = vld [vmem:[#allocation9 + $0x3b0] sm:$0xff] }
 0x9a3   : > { %18039 = vmatprep.mubr.f32.mxu0 %v17506_v5  ;;  %21220 = vmatpush3.msra.mxu1 %v17646_v21  ;;  %v17607_v10 = vld [vmem:[#allocation9 + $0x230] sm:$0xff]  ;;  %v17622_v21 = vld [vmem:[#allocation9 + $0x2a8] sm:$0xff] }
 0x9a4   : > { %18114 = vmatprep.mubr.f32.mxu1 %v17508_v23  ;;  %21183 = vmatprep.subr.mxu0 %v17629_v54  ;;  %v17639_v5 = vld [vmem:[#allocation9 + $0x330] sm:$0xff]  ;;  %v17654_v23 = vld [vmem:[#allocation9 + $0x3a8] sm:$0xff]  ;;  %v26440_v54 = vld [vmem:[#allocation29_spill] sm:$0xff] }
 0x9a5   : > { %21221 = vmatprep.subr.mxu1 %v17661_v50  ;;  %21184 = vmatpush3.msra.mxu0 %v17613_v16  ;;  %v26441_v50 = vld [vmem:[#allocation30_spill] sm:$0xff] }
 0x9a6   : > { %21222 = vmatpush3.msra.mxu1 %v17645_v20  ;;  %21185 = vmatprep.subr.mxu0 %v17628_v38  ;;  %v4731_v16 = vadd.f32 %v26441_v50, %v26440_v54  ;;  %v26209_v20 = vpop.f32.mrf.mxu0  ;;  %v26211_v38 = vpop.f32.mrf.mxu1  ;;  %v17617_v50 = vld [vmem:[#allocation9 + $0x280] sm:$0xff] }
 0x9a7   : > { %21223 = vmatprep.subr.mxu1 %v17660_v12  ;;  %21186 = vmatpush3.msra.mxu0 %v17612_v0  ;;  %v17606_v12 = vld [vmem:[#allocation9 + $0x228] sm:$0xff] }
 0x9a8   : > { %21224 = vmatpush3.msra.mxu1 %v17644_v57  ;;  %21187 = vmatprep.subr.mxu0 %v17627_v56  ;;  %v17638_v0 = vld [vmem:[#allocation9 + $0x328] sm:$0xff]  ;;  %v17621_v57 = vld [vmem:[#allocation9 + $0x2a0] sm:$0xff] }
 0x9a9   : > { %21225 = vmatprep.subr.mxu1 %v17659_v18  ;;  %21188 = vmatpush3.msra.mxu0 %v17611_v58  ;;  %v17653_v56 = vld [vmem:[#allocation9 + $0x3a0] sm:$0xff] }
 0x9aa   : > { %21226 = vmatpush3.msra.mxu1 %v17643_v60  ;;  %21189 = vmatprep.subr.mxu0 %v17626_v46  ;;  %v26442_v18 = vld [vmem:[#allocation41_spill] sm:$0xff] }
 0x9ab   : > { %21227 = vmatprep.subr.mxu1 %v17658_v22  ;;  %21190 = vmatpush3.msra.mxu0 %v17610_v26  ;;  %v8342_v58 = vadd.f32 %v26442_v18, %v4731_v16  ;;  %v17605_v60 = vld [vmem:[#allocation9 + $0x220] sm:$0xff]  ;;  %v17620_v22 = vld [vmem:[#allocation9 + $0x298] sm:$0xff] }
 0x9ac   : > { %21228 = vmatpush3.msra.mxu1 %v17642_v61  ;;  %21191 = vmatprep.subr.mxu0 %v17625_v34  ;;  %v17637_v46 = vld [vmem:[#allocation9 + $0x320] sm:$0xff]  ;;  %v17652_v26 = vld [vmem:[#allocation9 + $0x398] sm:$0xff]  ;;  %v16941_v61 = vadd.f32 %v26143_v32, %v26141_v30  ;;  %v17027_v34 = vadd.f32 %v26175_v48, %v26173_v36  ;;  %v16947_v30 = vadd.f32 %v26165_v63, %v26163_v51  ;;  %v17602_v63 = vld [vmem:[#allocation9 + $0x208] sm:$0xff] }
 0x9ad   : > { %21229 = vmatprep.subr.mxu1 %v17657_v4  ;;  %21192 = vmatpush3.msra.mxu0 %v17609_v25  ;;  %v26218_v4 = vpop.f32.mrf.mxu0  ;;  %v26220_v25 = vpop.f32.mrf.mxu1  ;;  %v17033_v32 = vadd.f32 %v26197_v6, %v26195_v24  ;;  %v17634_v24 = vld [vmem:[#allocation9 + $0x308] sm:$0xff]  ;;  %v16945_v6 = vadd.f32 %v26155_v37, %v26153_v52  ;;  %v17649_v16 = vld [vmem:[#allocation9 + $0x380] sm:$0xff]  ;;  %v17115_v37 = vadd.f32 %v26205_v62, %v26203_v59  ;;  %v17695_v59 = vld [vmem:[#allocation9 + $0x4f0] sm:$0xff] }
 0x9ae   : > { %21230 = vmatpush3.msra.mxu1 %v17641_v11  ;;  %21193 = vmatprep.subr.mxu0 %v17624_v33  ;;  %v17604_v11 = vld [vmem:[#allocation9 + $0x218] sm:$0xff]  ;;  %v17469_v54 = vadd.f32 %v16941_v61, %v25941_v40  ;;  %v17471_v51 = vadd.f32 %v17027_v34, %v25961_v27  ;;  %v17601_v27 = vld [vmem:[#allocation9 + $0x200] sm:$0xff]  ;;  %v17727_v62 = vld [vmem:[#allocation9 + $0x5f0] sm:$0xff] }
 0x9af   : > { %21231 = vmatprep.subr.mxu1 %v17656_v29  ;;  %21194 = vmatpush3.msra.mxu0 %v17608_v35  ;;  %v17636_v33 = vld [vmem:[#allocation9 + $0x318] sm:$0xff]  ;;  %v17619_v29 = vld [vmem:[#allocation9 + $0x290] sm:$0xff]  ;;  %v26227_v36 = vpop.f32.mrf.mxu0  ;;  %v26229_v48 = vpop.f32.mrf.mxu1 }
 0x9b0   : > { %21232 = vmatpush3.msra.mxu1 %v17640_v47  ;;  %21195 = vmatprep.subr.mxu0 %v17623_v45  ;;  %v17651_v35 = vld [vmem:[#allocation9 + $0x390] sm:$0xff]  ;;  %v26443_v47 = vld [vmem:[#allocation42_spill] sm:$0xff]  ;;  %v17505_v18 = vmul.f32 %v17469_v54, %v17469_v54  ;;  %v17507_v52 = vmul.f32 %v17471_v51, %v17471_v51  ;;  %v17680_v61 = vld [vmem:[#allocation9 + $0x478] sm:$0xff] }
 0x9b1   : > { %21233 = vmatprep.subr.mxu1 %v17655_v15  ;;  %21196 = vmatpush3.msra.mxu0 %v17607_v10  ;;  %v8385_v45 = vadd.f32 %v26443_v47, %v8342_v58  ;;  %v17603_v15 = vld [vmem:[#allocation9 + $0x210] sm:$0xff]  ;;  %v17157_v40 = vpop.f32.mrf.mxu0  ;;  %v17696_v58 = vld [vmem:[#allocation9 + $0x4f8] sm:$0xff] }
 0x9b2   : > { %21234 = vmatpush3.msra.mxu1 %v17639_v5  ;;  %21197 = vmatprep.subr.mxu0 %v17622_v21  ;;  %v17635_v10 = vld [vmem:[#allocation9 + $0x310] sm:$0xff]  ;;  %v17618_v5 = vld [vmem:[#allocation9 + $0x288] sm:$0xff]  ;;  %v17712_v34 = vld [vmem:[#allocation9 + $0x578] sm:$0xff] }
 0x9b3   : > { %21235 = vmatprep.subr.mxu1 %v17654_v23  ;;  %21198 = vmatpush3.msra.mxu0 %v17606_v12  ;;  %v17650_v21 = vld [vmem:[#allocation9 + $0x388] sm:$0xff]  ;;  %v13181_v23 = vadd.f32 %v25950_v53, %v8385_v45  ;;  %v17490_v53 = vadd.f32 %v17033_v32, %v25971_v49  ;;  %v17692_v54 = vld [vmem:[#allocation9 + $0x4d8] sm:$0xff] }
 0x9b4   : > { %21236 = vmatpush3.msra.mxu1 %v17638_v0  ;;  %21199 = vmatprep.subr.mxu0 %v17621_v57  ;;  %v17031_v0 = vadd.f32 %v26193_v31, %v26191_v28  ;;  %v17200_v57 = vpop.f32.mrf.mxu1  ;;  %v26444_v28 = vld [vmem:[#allocation36_spill] sm:$0xff]  ;;  %v17694_v45 = vld [vmem:[#allocation9 + $0x4e8] sm:$0xff] }
 0x9b5   : > { %21237 = vmatprep.subr.mxu1 %v17653_v56  ;;  %21200 = vmatpush3.msra.mxu0 %v17605_v60  ;;  %v17488_v12 = vadd.f32 %v16947_v30, %v13181_v23  ;;  %v17633_v56 = vld [vmem:[#allocation9 + $0x300] sm:$0xff]  ;;  %v17728_v60 = vld [vmem:[#allocation9 + $0x5f8] sm:$0xff]  ;;  %v17487_v31 = vadd.f32 %v16945_v6, %v26444_v28  ;;  %v17201_v49 = vadd.f32 %v17200_v57, %v17157_v40  ;;  %v17726_v30 = vld [vmem:[#allocation9 + $0x5e8] sm:$0xff] }
 0x9b6   : > { %21238 = vmatpush3.msra.mxu1 %v17637_v46  ;;  %21201 = vmatprep.subr.mxu0 %v17620_v22  ;;  %v17489_v22 = vadd.f32 %v17031_v0, %v25969_v9  ;;  %v17678_v32 = vld [vmem:[#allocation9 + $0x468] sm:$0xff]  ;;  %v17709_v23 = vld [vmem:[#allocation9 + $0x560] sm:$0xff]  ;;  %v17724_v51 = vld [vmem:[#allocation9 + $0x5d8] sm:$0xff] }
 0x9b7   : > { %21239 = vmatprep.subr.mxu1 %v17652_v26  ;;  %21202 = vmatpush3.msra.mxu0 %v17604_v11  ;;  %v17524_v46 = vmul.f32 %v17488_v12, %v17488_v12  ;;  %v17526_v26 = vmul.f32 %v17490_v53, %v17490_v53  ;;  %v17474_v11 = vadd.f32 %v17115_v37, %v25981_v55  ;;  %v17710_v55 = vld [vmem:[#allocation9 + $0x568] sm:$0xff]  ;;  %v17691_v6 = vld [vmem:[#allocation9 + $0x4d0] sm:$0xff]  ;;  %v17688_v37 = vld [vmem:[#allocation9 + $0x4b8] sm:$0xff] }
 0x9b8   : > { %21240 = vmatpush3.msra.mxu1 %v17636_v33  ;;  %21203 = vmatprep.subr.mxu0 %v17619_v29  ;;  %v17679_v33 = vld [vmem:[#allocation9 + $0x470] sm:$0xff]  ;;  %v17523_v9 = vmul.f32 %v17487_v31, %v17487_v31  ;;  %v17525_v47 = vmul.f32 %v17489_v22, %v17489_v22  ;;  %v17690_v0 = vld [vmem:[#allocation9 + $0x4c8] sm:$0xff]  ;;  %v17704_v28 = vld [vmem:[#allocation9 + $0x538] sm:$0xff]  ;;  %v17159_v31 = vpop.f32.mrf.mxu0 }
 0x9b9   : > { %21241 = vmatprep.subr.mxu1 %v17651_v35  ;;  %21204 = vmatpush3.msra.mxu0 %v17603_v15  ;;  %v17711_v29 = vld [vmem:[#allocation9 + $0x570] sm:$0xff]  ;;  %v17476_v35 = vadd.f32 %v17201_v49, %v26017_v1  ;;  %v17510_v15 = vmul.f32 %v17474_v11, %v17474_v11  ;;  %v17725_v1 = vld [vmem:[#allocation9 + $0x5e0] sm:$0xff]  ;;  %v17722_v53 = vld [vmem:[#allocation9 + $0x5c8] sm:$0xff]  ;;  %v17202_v49 = vpop.f32.mrf.mxu1 }
 0x9ba   : > { %21242 = vmatpush3.msra.mxu1 %v17635_v10  ;;  %21205 = vmatprep.subr.mxu0 %v17618_v5  ;;  %v17693_v5 = vld [vmem:[#allocation9 + $0x4e0] sm:$0xff]  ;;  %v17707_v12 = vld [vmem:[#allocation9 + $0x550] sm:$0xff]  ;;  %v17674_v40 = vld [vmem:[#allocation9 + $0x448] sm:$0xff] }
 0x9bb   : > { %21243 = vmatprep.subr.mxu1 %v17650_v21  ;;  %21206 = vmatpush3.msra.mxu0 %v17602_v63  ;;  %v17512_v10 = vmul.f32 %v17476_v35, %v17476_v35  ;;  %v17677_v21 = vld [vmem:[#allocation9 + $0x460] sm:$0xff]  ;;  %v17676_v63 = vld [vmem:[#allocation9 + $0x458] sm:$0xff]  ;;  %v17706_v57 = vld [vmem:[#allocation9 + $0x548] sm:$0xff] }
 0x9bc   : > { %21244 = vmatpush3.msra.mxu1 %v17634_v24  ;;  %21207 = vmatprep.subr.mxu0 %v17617_v50  ;;  %v17708_v24 = vld [vmem:[#allocation9 + $0x558] sm:$0xff]  ;;  %v17723_v50 = vld [vmem:[#allocation9 + $0x5d0] sm:$0xff]  ;;  %v17702_v11 = vld [vmem:[#allocation9 + $0x528] sm:$0xff] }
 0x9bd   : > { %21245 = vmatprep.subr.mxu1 %v17649_v16  ;;  %21208 = vmatpush3.msra.mxu0 %v17601_v27  ;;  %v17675_v16 = vld [vmem:[#allocation9 + $0x450] sm:$0xff]  ;;  %v17689_v27 = vld [vmem:[#allocation9 + $0x4c0] sm:$0xff] }
 0x9be   : > { %21246 = vmatpush3.msra.mxu1 %v17633_v56  ;;  %18040 = vmatmul.mubr.f32.vlgmr.msra.gmra.mxu0 %v17505_v18  ;;  %v17721_v56 = vld [vmem:[#allocation9 + $0x5c0] sm:$0xff]  ;;  %v17719_v22 = vld [vmem:[#allocation9 + $0x5b0] sm:$0xff] }
 0x9bf   : > { %18115 = vmatmul.mubr.f32.vlgmr.msra.gmra.mxu1 %v17507_v52  ;;  %21253 = vmatprep.subr.mxu0 %v17696_v58  ;;  %v17673_v18 = vld [vmem:[#allocation9 + $0x440] sm:$0xff]  ;;  %v17720_v58 = vld [vmem:[#allocation9 + $0x5b8] sm:$0xff] }
 0x9c0   : > { %21291 = vmatprep.subr.mxu1 %v17728_v60  ;;  %18044 = vmatprep.mubr.f32.mxu0 %v17524_v46  ;;  %v17705_v52 = vld [vmem:[#allocation9 + $0x540] sm:$0xff]  ;;  %v17672_v60 = vld [vmem:[#allocation9 + $0x438] sm:$0xff]  ;;  %v17687_v46 = vld [vmem:[#allocation9 + $0x4b0] sm:$0xff] }
 0x9c1   : > { %18119 = vmatprep.mubr.f32.mxu1 %v17526_v26  ;;  %21254 = vmatpush3.msra.mxu0 %v17680_v61  ;;  %v17671_v26 = vld [vmem:[#allocation9 + $0x430] sm:$0xff]  ;;  %v17685_v35 = vld [vmem:[#allocation9 + $0x4a0] sm:$0xff] }
 0x9c2   : > { %21292 = vmatpush3.msra.mxu1 %v17712_v34  ;;  %21255 = vmatprep.subr.mxu0 %v17695_v59  ;;  %v17703_v61 = vld [vmem:[#allocation9 + $0x530] sm:$0xff]  ;;  %v17686_v34 = vld [vmem:[#allocation9 + $0x4a8] sm:$0xff] }
 0x9c3   : > { %21293 = vmatprep.subr.mxu1 %v17727_v62  ;;  %21256 = vmatpush3.msra.mxu0 %v17679_v33  ;;  %v17718_v59 = vld [vmem:[#allocation9 + $0x5a8] sm:$0xff]  ;;  %v17161_v33 = vpop.f32.mrf.mxu0 }
 0x9c4   : > { %21294 = vmatpush3.msra.mxu1 %v17711_v29  ;;  %18045 = vmatmul.mubr.f32.gmra.mxu0 %v17523_v9  ;;  %v17670_v62 = vld [vmem:[#allocation9 + $0x428] sm:$0xff]  ;;  %v17204_v29 = vpop.f32.mrf.mxu1  ;;  %v17717_v9 = vld [vmem:[#allocation9 + $0x5a0] sm:$0xff] }
 0x9c5   : > { %18120 = vmatmul.mubr.f32.gmra.mxu1 %v17525_v47  ;;  %21257 = vmatprep.subr.mxu0 %v17694_v45  ;;  %v17669_v47 = vld [vmem:[#allocation9 + $0x420] sm:$0xff] }
 0x9c6   : > { %21295 = vmatprep.subr.mxu1 %v17726_v30  ;;  %21258 = vmatpush3.msra.mxu0 %v17678_v32  ;;  %v17701_v45 = vld [vmem:[#allocation9 + $0x520] sm:$0xff]  ;;  %v26245_v30 = vpop.f32.mrf.mxu0  ;;  %v26247_v32 = vpop.f32.mrf.mxu1 }
 0x9c7   : > { %18189 = vmatprep.mubr.f32.mxu0 %v17510_v15  ;;  %21296 = vmatpush3.msra.mxu1 %v17710_v55  ;;  %v17684_v15 = vld [vmem:[#allocation9 + $0x498] sm:$0xff] }
 0x9c8   : > { %18264 = vmatprep.mubr.f32.mxu1 %v17512_v10  ;;  %21259 = vmatprep.subr.mxu0 %v17693_v5  ;;  %v17716_v55 = vld [vmem:[#allocation9 + $0x598] sm:$0xff]  ;;  %v17113_v10 = vadd.f32 %v26201_v19, %v26199_v3  ;;  %v17199_v5 = vadd.f32 %v26229_v48, %v26227_v36  ;;  %v17243_v3 = vpop.f32.mrf.mxu0  ;;  %v17286_v19 = vpop.f32.mrf.mxu1  ;;  %v17682_v36 = vld [vmem:[#allocation9 + $0x488] sm:$0xff] }
 0x9c9   : > { %21297 = vmatprep.subr.mxu1 %v17725_v1  ;;  %21260 = vmatpush3.msra.mxu0 %v17677_v21  ;;  %v17668_v1 = vld [vmem:[#allocation9 + $0x418] sm:$0xff]  ;;  %v17714_v48 = vld [vmem:[#allocation9 + $0x588] sm:$0xff] }
 0x9ca   : > { %21298 = vmatpush3.msra.mxu1 %v17709_v23  ;;  %21261 = vmatprep.subr.mxu0 %v17692_v54  ;;  %v17700_v21 = vld [vmem:[#allocation9 + $0x518] sm:$0xff]  ;;  %v17119_v23 = vadd.f32 %v26220_v25, %v26218_v4  ;;  %v17683_v54 = vld [vmem:[#allocation9 + $0x490] sm:$0xff]  ;;  %v17203_v4 = vadd.f32 %v17202_v49, %v17159_v31  ;;  %v17666_v25 = vld [vmem:[#allocation9 + $0x408] sm:$0xff] }
 0x9cb   : > { %21299 = vmatprep.subr.mxu1 %v17724_v51  ;;  %21262 = vmatpush3.msra.mxu0 %v17676_v63  ;;  %v17715_v51 = vld [vmem:[#allocation9 + $0x590] sm:$0xff]  ;;  %v17205_v63 = vadd.f32 %v17204_v29, %v17161_v33  ;;  %v17757_v29 = vld [vmem:[#allocation9 + $0x6e0] sm:$0xff] }
 0x9cc   : > { %21300 = vmatpush3.msra.mxu1 %v17708_v24  ;;  %21263 = vmatprep.subr.mxu0 %v17691_v6  ;;  %v17667_v24 = vld [vmem:[#allocation9 + $0x410] sm:$0xff] }
 0x9cd   : > { %21301 = vmatprep.subr.mxu1 %v17723_v50  ;;  %21264 = vmatpush3.msra.mxu0 %v17675_v16  ;;  %v17699_v6 = vld [vmem:[#allocation9 + $0x510] sm:$0xff] }
 0x9ce   : > { %21302 = vmatpush3.msra.mxu1 %v17707_v12  ;;  %21265 = vmatprep.subr.mxu0 %v17690_v0  ;;  %v26445_v50 = vld [vmem:[#allocation28_spill] sm:$0xff]  ;;  %v17475_v12 = vadd.f32 %v17199_v5, %v26012_v43  ;;  %v17698_v0 = vld [vmem:[#allocation9 + $0x508] sm:$0xff]  ;;  %v17665_v43 = vld [vmem:[#allocation9 + $0x400] sm:$0xff] }
 0x9cf   : > { %21303 = vmatprep.subr.mxu1 %v17722_v53  ;;  %21266 = vmatpush3.msra.mxu0 %v17674_v40  ;;  %v17473_v16 = vadd.f32 %v17113_v10, %v26445_v50  ;;  %v17117_v53 = vadd.f32 %v26211_v38, %v26209_v20  ;;  %v26446_v40 = vld [vmem:[#allocation40_spill] sm:$0xff]  ;;  %v26447_v38 = vld [vmem:[#allocation39_spill] sm:$0xff] }
 0x9d0   : > { %21304 = vmatpush3.msra.mxu1 %v17706_v57  ;;  %21267 = vmatprep.subr.mxu0 %v17689_v27  ;;  %v17492_v57 = vadd.f32 %v17119_v23, %v26446_v40  ;;  %v17681_v27 = vld [vmem:[#allocation9 + $0x480] sm:$0xff]  ;;  %v17760_v20 = vld [vmem:[#allocation9 + $0x6f8] sm:$0xff]  ;;  %v17755_v10 = vld [vmem:[#allocation9 + $0x6d0] sm:$0xff] }
 0x9d1   : > { %21305 = vmatprep.subr.mxu1 %v17721_v56  ;;  %21268 = vmatpush3.msra.mxu0 %v17673_v18  ;;  %v17713_v56 = vld [vmem:[#allocation9 + $0x580] sm:$0xff]  ;;  %v17494_v18 = vadd.f32 %v17205_v63, %v26023_v44  ;;  %v17491_v31 = vadd.f32 %v17117_v53, %v26447_v38  ;;  %v17744_v44 = vld [vmem:[#allocation9 + $0x678] sm:$0xff]  ;;  %v17774_v5 = vld [vmem:[#allocation9 + $0x768] sm:$0xff] }
 0x9d2   : > { %21306 = vmatpush3.msra.mxu1 %v17705_v52  ;;  %21269 = vmatprep.subr.mxu0 %v17688_v37  ;;  %v17287_v52 = vadd.f32 %v17286_v19, %v17243_v3  ;;  %v17697_v37 = vld [vmem:[#allocation9 + $0x500] sm:$0xff]  ;;  %v17528_v49 = vmul.f32 %v17492_v57, %v17492_v57  ;;  %v17754_v23 = vld [vmem:[#allocation9 + $0x6c8] sm:$0xff]  ;;  %v17788_v63 = vld [vmem:[#allocation9 + $0x7d8] sm:$0xff] }
 0x9d3   : > { %21307 = vmatprep.subr.mxu1 %v17720_v58  ;;  %21270 = vmatpush3.msra.mxu0 %v17672_v60  ;;  %v17509_v58 = vmul.f32 %v17473_v16, %v17473_v16  ;;  %v17511_v60 = vmul.f32 %v17475_v12, %v17475_v12  ;;  %v17737_v3 = vld [vmem:[#allocation9 + $0x640] sm:$0xff]  ;;  %v17787_v19 = vld [vmem:[#allocation9 + $0x7d0] sm:$0xff]  ;;  %v17736_v50 = vld [vmem:[#allocation9 + $0x638] sm:$0xff]  ;;  %v17245_v12 = vpop.f32.mrf.mxu0 }
 0x9d4   : > { %21308 = vmatpush3.msra.mxu1 %v17704_v28  ;;  %21271 = vmatprep.subr.mxu0 %v17687_v46  ;;  %v17493_v28 = vadd.f32 %v17203_v4, %v26020_v7  ;;  %v17530_v46 = vmul.f32 %v17494_v18, %v17494_v18  ;;  %v17786_v16 = vld [vmem:[#allocation9 + $0x7c8] sm:$0xff]  ;;  %v17288_v4 = vpop.f32.mrf.mxu1  ;;  %v17735_v53 = vld [vmem:[#allocation9 + $0x630] sm:$0xff]  ;;  %v17785_v40 = vld [vmem:[#allocation9 + $0x7c0] sm:$0xff] }
 0x9d5   : > { %21309 = vmatprep.subr.mxu1 %v17719_v22  ;;  %21272 = vmatpush3.msra.mxu0 %v17671_v26  ;;  %v17478_v22 = vadd.f32 %v17287_v52, %v26053_v8  ;;  %v17759_v26 = vld [vmem:[#allocation9 + $0x6f0] sm:$0xff]  ;;  %v17776_v8 = vld [vmem:[#allocation9 + $0x778] sm:$0xff]  ;;  %v17750_v57 = vld [vmem:[#allocation9 + $0x6a8] sm:$0xff]  ;;  %v17247_v52 = vpop.f32.mrf.mxu0 }
 0x9d6   : > { %21310 = vmatpush3.msra.mxu1 %v17703_v61  ;;  %21273 = vmatprep.subr.mxu0 %v17686_v34  ;;  %v17792_v61 = vld [vmem:[#allocation9 + $0x7f8] sm:$0xff]  ;;  %v17743_v34 = vld [vmem:[#allocation9 + $0x670] sm:$0xff]  ;;  %v17529_v7 = vmul.f32 %v17493_v28, %v17493_v28 }
 0x9d7   : > { %21311 = vmatprep.subr.mxu1 %v17718_v59  ;;  %21274 = vmatpush3.msra.mxu0 %v17670_v62  ;;  %v17758_v59 = vld [vmem:[#allocation9 + $0x6e8] sm:$0xff]  ;;  %v17527_v62 = vmul.f32 %v17491_v31, %v17491_v31  ;;  %v17514_v33 = vmul.f32 %v17478_v22, %v17478_v22  ;;  %v17784_v18 = vld [vmem:[#allocation9 + $0x7b8] sm:$0xff]  ;;  %v17783_v28 = vld [vmem:[#allocation9 + $0x7b0] sm:$0xff] }
 0x9d8   : > { %21312 = vmatpush3.msra.mxu1 %v17702_v11  ;;  %21275 = vmatprep.subr.mxu0 %v17685_v35  ;;  %v17742_v11 = vld [vmem:[#allocation9 + $0x668] sm:$0xff]  ;;  %v17741_v35 = vld [vmem:[#allocation9 + $0x660] sm:$0xff]  ;;  %v17748_v38 = vld [vmem:[#allocation9 + $0x698] sm:$0xff] }
 0x9d9   : > { %21313 = vmatprep.subr.mxu1 %v17717_v9  ;;  %21276 = vmatpush3.msra.mxu0 %v17669_v47  ;;  %v17791_v9 = vld [vmem:[#allocation9 + $0x7f0] sm:$0xff]  ;;  %v17756_v47 = vld [vmem:[#allocation9 + $0x6d8] sm:$0xff] }
 0x9da   : > { %21314 = vmatpush3.msra.mxu1 %v17701_v45  ;;  %21277 = vmatprep.subr.mxu0 %v17684_v15  ;;  %v17775_v45 = vld [vmem:[#allocation9 + $0x770] sm:$0xff]  ;;  %v17740_v15 = vld [vmem:[#allocation9 + $0x658] sm:$0xff] }
 0x9db   : > { %21315 = vmatprep.subr.mxu1 %v17716_v55  ;;  %21278 = vmatpush3.msra.mxu0 %v17668_v1  ;;  %v17790_v55 = vld [vmem:[#allocation9 + $0x7e8] sm:$0xff]  ;;  %v17739_v1 = vld [vmem:[#allocation9 + $0x650] sm:$0xff] }
 0x9dc   : > { %21316 = vmatpush3.msra.mxu1 %v17700_v21  ;;  %21279 = vmatprep.subr.mxu0 %v17683_v54  ;;  %v17789_v21 = vld [vmem:[#allocation9 + $0x7e0] sm:$0xff]  ;;  %v17767_v31 = vld [vmem:[#allocation9 + $0x730] sm:$0xff] }
 0x9dd   : > { %21317 = vmatprep.subr.mxu1 %v17715_v51  ;;  %21280 = vmatpush3.msra.mxu0 %v17667_v24  ;;  %v17773_v54 = vld [vmem:[#allocation9 + $0x760] sm:$0xff]  ;;  %v17738_v51 = vld [vmem:[#allocation9 + $0x648] sm:$0xff] }
 0x9de   : > { %21318 = vmatpush3.msra.mxu1 %v17699_v6  ;;  %21281 = vmatprep.subr.mxu0 %v17682_v36  ;;  %v17753_v24 = vld [vmem:[#allocation9 + $0x6c0] sm:$0xff]  ;;  %v17772_v6 = vld [vmem:[#allocation9 + $0x758] sm:$0xff] }
 0x9df   : > { %21319 = vmatprep.subr.mxu1 %v17714_v48  ;;  %21282 = vmatpush3.msra.mxu0 %v17666_v25  ;;  %v17752_v36 = vld [vmem:[#allocation9 + $0x6b8] sm:$0xff]  ;;  %v17771_v48 = vld [vmem:[#allocation9 + $0x750] sm:$0xff] }
 0x9e0   : > { %21320 = vmatpush3.msra.mxu1 %v17698_v0  ;;  %21283 = vmatprep.subr.mxu0 %v17681_v27  ;;  %v17751_v25 = vld [vmem:[#allocation9 + $0x6b0] sm:$0xff]  ;;  %v17770_v0 = vld [vmem:[#allocation9 + $0x748] sm:$0xff]  ;;  %v17769_v27 = vld [vmem:[#allocation9 + $0x740] sm:$0xff] }
 0x9e1   : > { %21321 = vmatprep.subr.mxu1 %v17713_v56  ;;  %21284 = vmatpush3.msra.mxu0 %v17665_v43  ;;  %v17734_v56 = vld [vmem:[#allocation9 + $0x628] sm:$0xff]  ;;  %v17290_v43 = vpop.f32.mrf.mxu1 }
 0x9e2   : > { %21322 = vmatpush3.msra.mxu1 %v17697_v37  ;;  %18190 = vmatmul.mubr.f32.vlgmr.msra.gmra.mxu0 %v17509_v58  ;;  %v17749_v37 = vld [vmem:[#allocation9 + $0x6a0] sm:$0xff]  ;;  %v17768_v58 = vld [vmem:[#allocation9 + $0x738] sm:$0xff] }
 0x9e3   : > { %18265 = vmatmul.mubr.f32.vlgmr.msra.gmra.mxu1 %v17511_v60  ;;  %21329 = vmatprep.subr.mxu0 %v17760_v20  ;;  %v17733_v60 = vld [vmem:[#allocation9 + $0x620] sm:$0xff]  ;;  %v17285_v20 = vadd.f32 %v26247_v32, %v26245_v30 }
 0x9e4   : > { %18194 = vmatprep.mubr.f32.mxu0 %v17528_v49  ;;  %18269 = vmatprep.mubr.f32.mxu1 %v17530_v46  ;;  %v17291_v49 = vadd.f32 %v17290_v43, %v17247_v52  ;;  %v17782_v46 = vld [vmem:[#allocation9 + $0x7a8] sm:$0xff]  ;;  %v17805_v52 = vld [vmem:[#allocation9 + $0x860] sm:$0xff]  ;;  %v17804_v43 = vld [vmem:[#allocation9 + $0x858] sm:$0xff] }
 0x9e5   : > { %21330 = vmatpush3.msra.mxu0 %v17744_v44  ;;  %21367 = vmatprep.subr.mxu1 %v17792_v61  ;;  %v17732_v44 = vld [vmem:[#allocation9 + $0x618] sm:$0xff]  ;;  %v17747_v61 = vld [vmem:[#allocation9 + $0x690] sm:$0xff] }
 0x9e6   : > { %21331 = vmatprep.subr.mxu0 %v17759_v26  ;;  %18195 = vmatmul.mubr.f32.gmra.mxu0 %v17527_v62  ;;  %v17477_v62 = vadd.f32 %v17285_v20, %v26048_v2  ;;  %v17817_v20 = vld [vmem:[#allocation9 + $0x8c0] sm:$0xff] }
 0x9e7   : > { %21332 = vmatpush3.msra.mxu0 %v17743_v34  ;;  %18270 = vmatmul.mubr.f32.gmra.mxu1 %v17529_v7  ;;  %v17766_v34 = vld [vmem:[#allocation9 + $0x728] sm:$0xff]  ;;  %v17731_v7 = vld [vmem:[#allocation9 + $0x610] sm:$0xff] }
 0x9e8   : > { %21333 = vmatprep.subr.mxu0 %v17758_v59  ;;  %18339 = vmatprep.mubr.f32.mxu0 %v17514_v33  ;;  %v17781_v59 = vld [vmem:[#allocation9 + $0x7a0] sm:$0xff] }
 0x9e9   : > { %21334 = vmatpush3.msra.mxu0 %v17742_v11  ;;  %21368 = vmatpush3.msra.mxu1 %v17776_v8  ;;  %v17746_v11 = vld [vmem:[#allocation9 + $0x688] sm:$0xff]  ;;  %v17765_v33 = vld [vmem:[#allocation9 + $0x720] sm:$0xff]  ;;  %v17289_v8 = vadd.f32 %v17288_v4, %v17245_v12  ;;  %v17824_v12 = vld [vmem:[#allocation9 + $0x8f8] sm:$0xff] }
 0x9ea   : > { %21335 = vmatprep.subr.mxu0 %v17757_v29  ;;  %21369 = vmatprep.subr.mxu1 %v17791_v9  ;;  %v17730_v9 = vld [vmem:[#allocation9 + $0x608] sm:$0xff] }
 0x9eb   : > { %21336 = vmatpush3.msra.mxu0 %v17741_v35  ;;  %21370 = vmatpush3.msra.mxu1 %v17775_v45  ;;  %v17496_v35 = vadd.f32 %v17291_v49, %v26059_v17  ;;  %v17513_v17 = vmul.f32 %v17477_v62, %v17477_v62  ;;  %v17800_v49 = vld [vmem:[#allocation9 + $0x838] sm:$0xff]  ;;  %v17810_v62 = vld [vmem:[#allocation9 + $0x888] sm:$0xff] }
 0x9ec   : > { %21337 = vmatprep.subr.mxu0 %v17756_v47  ;;  %21371 = vmatprep.subr.mxu1 %v17790_v55  ;;  %v17780_v47 = vld [vmem:[#allocation9 + $0x798] sm:$0xff]  ;;  %v17745_v55 = vld [vmem:[#allocation9 + $0x680] sm:$0xff] }
 0x9ed   : > { %21338 = vmatpush3.msra.mxu0 %v17740_v15  ;;  %21372 = vmatpush3.msra.mxu1 %v17774_v5  ;;  %v17764_v5 = vld [vmem:[#allocation9 + $0x718] sm:$0xff] }
 0x9ee   : > { %21339 = vmatprep.subr.mxu0 %v17755_v10  ;;  %21373 = vmatprep.subr.mxu1 %v17789_v21  ;;  %v17779_v21 = vld [vmem:[#allocation9 + $0x790] sm:$0xff] }
 0x9ef   : > { %21340 = vmatpush3.msra.mxu0 %v17739_v1  ;;  %21374 = vmatpush3.msra.mxu1 %v17773_v54  ;;  %v17729_v1 = vld [vmem:[#allocation9 + $0x600] sm:$0xff] }
 0x9f0   : > { %21341 = vmatprep.subr.mxu0 %v17754_v23  ;;  %21375 = vmatprep.subr.mxu1 %v17788_v63 }
 0x9f1   : > { %21342 = vmatpush3.msra.mxu0 %v17738_v51  ;;  %21376 = vmatpush3.msra.mxu1 %v17772_v6  ;;  %v17763_v51 = vld [vmem:[#allocation9 + $0x710] sm:$0xff]  ;;  %v17532_v6 = vmul.f32 %v17496_v35, %v17496_v35 }
 0x9f2   : > { %21343 = vmatprep.subr.mxu0 %v17753_v24  ;;  %21377 = vmatprep.subr.mxu1 %v17787_v19  ;;  %v17495_v24 = vadd.f32 %v17289_v8, %v26056_v14  ;;  %v17778_v19 = vld [vmem:[#allocation9 + $0x788] sm:$0xff]  ;;  %v17761_v14 = vld [vmem:[#allocation9 + $0x700] sm:$0xff] }
 0x9f3   : > { %21344 = vmatpush3.msra.mxu0 %v17737_v3  ;;  %21378 = vmatpush3.msra.mxu1 %v17771_v48 }
 0x9f4   : > { %21345 = vmatprep.subr.mxu0 %v17752_v36  ;;  %21379 = vmatprep.subr.mxu1 %v17786_v16  ;;  %v17777_v16 = vld [vmem:[#allocation9 + $0x780] sm:$0xff]  ;;  %v17531_v4 = vmul.f32 %v17495_v24, %v17495_v24 }
 0x9f5   : > { %21346 = vmatpush3.msra.mxu0 %v17736_v50  ;;  %21380 = vmatpush3.msra.mxu1 %v17770_v0  ;;  %v17762_v50 = vld [vmem:[#allocation9 + $0x708] sm:$0xff]  ;;  %v17808_v0 = vld [vmem:[#allocation9 + $0x878] sm:$0xff] }
 0x9f6   : > { %21347 = vmatprep.subr.mxu0 %v17751_v25  ;;  %21381 = vmatprep.subr.mxu1 %v17785_v40  ;;  %v17823_v40 = vld [vmem:[#allocation9 + $0x8f0] sm:$0xff] }
 0x9f7   : > { %21348 = vmatpush3.msra.mxu0 %v17735_v53  ;;  %21382 = vmatpush3.msra.mxu1 %v17769_v27  ;;  %v17806_v27 = vld [vmem:[#allocation9 + $0x868] sm:$0xff] }
 0x9f8   : > { %21349 = vmatprep.subr.mxu0 %v17750_v57  ;;  %21383 = vmatprep.subr.mxu1 %v17784_v18  ;;  %v17822_v57 = vld [vmem:[#allocation9 + $0x8e8] sm:$0xff]  ;;  %v17821_v18 = vld [vmem:[#allocation9 + $0x8e0] sm:$0xff] }
 0x9f9   : > { %21350 = vmatpush3.msra.mxu0 %v17734_v56  ;;  %21384 = vmatpush3.msra.mxu1 %v17768_v58  ;;  %v17327_v22 = vpop.f32.mrf.mxu0  ;;  %v17803_v58 = vld [vmem:[#allocation9 + $0x850] sm:$0xff] }
 0x9fa   : > { %21351 = vmatprep.subr.mxu0 %v17749_v37  ;;  %v17370_v26 = vpop.f32.mrf.mxu1  ;;  %21385 = vmatprep.subr.mxu1 %v17783_v28  ;;  %v17819_v37 = vld [vmem:[#allocation9 + $0x8d0] sm:$0xff]  ;;  %v17802_v28 = vld [vmem:[#allocation9 + $0x848] sm:$0xff] }
 0x9fb   : > { %21352 = vmatpush3.msra.mxu0 %v17733_v60  ;;  %21386 = vmatpush3.msra.mxu1 %v17767_v31  ;;  %v17329_v30 = vpop.f32.mrf.mxu0  ;;  %v17371_v10 = vadd.f32 %v17370_v26, %v17327_v22  ;;  %v17818_v60 = vld [vmem:[#allocation9 + $0x8c8] sm:$0xff]  ;;  %v17816_v31 = vld [vmem:[#allocation9 + $0x8b8] sm:$0xff] }
 0x9fc   : > { %21353 = vmatprep.subr.mxu0 %v17748_v38  ;;  %v17372_v32 = vpop.f32.mrf.mxu1  ;;  %21387 = vmatprep.subr.mxu1 %v17782_v46  ;;  %v17801_v38 = vld [vmem:[#allocation9 + $0x840] sm:$0xff]  ;;  %v17799_v46 = vld [vmem:[#allocation9 + $0x830] sm:$0xff]  ;;  %v17814_v22 = vld [vmem:[#allocation9 + $0x8a8] sm:$0xff] }
 0x9fd   : > { %21354 = vmatpush3.msra.mxu0 %v17732_v44  ;;  %v17373_v29 = vadd.f32 %v17372_v32, %v17329_v30  ;;  %21388 = vmatpush3.msra.mxu1 %v17766_v34  ;;  %v17331_v45 = vpop.f32.mrf.mxu0  ;;  %v17815_v44 = vld [vmem:[#allocation9 + $0x8b0] sm:$0xff]  ;;  %v17798_v26 = vld [vmem:[#allocation9 + $0x828] sm:$0xff]  ;;  %v17797_v34 = vld [vmem:[#allocation9 + $0x820] sm:$0xff] }
 0x9fe   : > { %21355 = vmatprep.subr.mxu0 %v17747_v61  ;;  %v17374_v15 = vpop.f32.mrf.mxu1  ;;  %21389 = vmatprep.subr.mxu1 %v17781_v59  ;;  %v17813_v61 = vld [vmem:[#allocation9 + $0x8a0] sm:$0xff]  ;;  %v17796_v59 = vld [vmem:[#allocation9 + $0x818] sm:$0xff]  ;;  %v17811_v30 = vld [vmem:[#allocation9 + $0x890] sm:$0xff] }
 0x9ff   : > { %21356 = vmatpush3.msra.mxu0 %v17731_v7  ;;  %v17480_v2 = vadd.f32 %v17373_v29, %v26069_v42  ;;  %21390 = vmatpush3.msra.mxu1 %v17765_v33  ;;  %v17333_v23 = vpop.f32.mrf.mxu0  ;;  %v17479_v42 = vadd.f32 %v17371_v10, %v26064_v39  ;;  %v17375_v36 = vadd.f32 %v17374_v15, %v17331_v45  ;;  %v17812_v7 = vld [vmem:[#allocation9 + $0x898] sm:$0xff]  ;;  %v17795_v32 = vld [vmem:[#allocation9 + $0x810] sm:$0xff]  ;;  %v17809_v33 = vld [vmem:[#allocation9 + $0x880] sm:$0xff] }
 0xa00   : > { %21357 = vmatprep.subr.mxu0 %v17746_v11  ;;  %v17376_v54 = vpop.f32.mrf.mxu1  ;;  %21391 = vmatprep.subr.mxu1 %v17780_v47  ;;  %v17794_v11 = vld [vmem:[#allocation9 + $0x808] sm:$0xff]  ;;  %v17793_v29 = vld [vmem:[#allocation9 + $0x800] sm:$0xff] }
 0xa01   : > { %21358 = vmatpush3.msra.mxu0 %v17730_v9  ;;  %v17377_v63 = vadd.f32 %v17376_v54, %v17333_v23  ;;  %v17516_v3 = vmul.f32 %v17480_v2, %v17480_v2  ;;  %21392 = vmatpush3.msra.mxu1 %v17764_v5  ;;  %v17515_v53 = vmul.f32 %v17479_v42, %v17479_v42 }
 0xa02   : > { %21359 = vmatprep.subr.mxu0 %v17745_v55  ;;  %21393 = vmatprep.subr.mxu1 %v17779_v21  ;;  %v17497_v39 = vadd.f32 %v17375_v36, %v26072_v13  ;;  %v17820_v13 = vld [vmem:[#allocation9 + $0x8d8] sm:$0xff]  ;;  %v26448_v55 = vld [vmem:[#allocation31_spill] sm:$0xff] }
 0xa03   : > { %21360 = vmatpush3.msra.mxu0 %v17729_v1  ;;  %v17498_v48 = vadd.f32 %v17377_v63, %v26075_v41  ;;  %21394 = vmatpush3.msra.mxu1 %v17763_v51  ;;  %v17807_v41 = vld [vmem:[#allocation9 + $0x870] sm:$0xff] }
 0xa04   : > { %18340 = vmatmul.mubr.f32.vlgmr.msra.gmra.mxu0 %v17513_v17  ;;  %21395 = vmatprep.subr.mxu1 %v17778_v19  ;;  %v17533_v56 = vmul.f32 %v17497_v39, %v17497_v39  ;;  %v26449_v1 = vld [vmem:[#allocation32_spill] sm:$0xff]  ;;  %v26451_v19 = vld [vmem:[#allocation43_spill] sm:$0xff] }
 0xa05   : > { %18344 = vmatprep.mubr.f32.mxu0 %v17532_v6  ;;  %v17534_v25 = vmul.f32 %v17498_v48, %v17498_v48  ;;  %21396 = vmatpush3.msra.mxu1 %v17762_v50  ;;  %v26450_v6 = vld [vmem:[#allocation33_spill] sm:$0xff] }
 0xa06   : > { %18414 = vmatprep.mubr.f32.mxu1 %v17516_v3  ;;  %21397 = vmatprep.subr.mxu1 %v17777_v16  ;;  %v18525_v50 = vld [vmem:[#allocation11 + $0x78] sm:$0xff]  ;;  %v18524_v16 = vld [vmem:[#allocation11 + $0x70] sm:$0xff] }
 0xa07   : > { %21405 = vmatprep.subr.mxu0 %v17824_v12  ;;  %21398 = vmatpush3.msra.mxu1 %v17761_v14  ;;  %v18523_v12 = vld [vmem:[#allocation11 + $0x68] sm:$0xff]  ;;  %v18522_v14 = vld [vmem:[#allocation11 + $0x60] sm:$0xff]  ;;  %v18517_v39 = vld [vmem:[#allocation11 + $0x38] sm:$0xff] }
 0xa08   : > { %18345 = vmatmul.mubr.f32.gmra.mxu0 %v17531_v4  ;;  %18415 = vmatmul.mubr.f32.vlgmr.msra.gmra.mxu1 %v17515_v53  ;;  %v18521_v4 = vld [vmem:[#allocation11 + $0x58] sm:$0xff]  ;;  %v18518_v53 = vld [vmem:[#allocation11 + $0x40] sm:$0xff] }
 0xa09   : > { %21406 = vmatpush3.msra.mxu0 %v17808_v0  ;;  %18419 = vmatprep.mubr.f32.mxu1 %v17534_v25  ;;  %v18520_v25 = vld [vmem:[#allocation11 + $0x50] sm:$0xff]  ;;  %v18519_v0 = vld [vmem:[#allocation11 + $0x48] sm:$0xff] }
 0xa0a   : > { %21407 = vmatprep.subr.mxu0 %v17823_v40  ;;  %21461 = vmatprep.subr.mxu1 %v18525_v50  ;;  %v18516_v40 = vld [vmem:[#allocation11 + $0x30] sm:$0xff] }
 0xa0b   : > { %21408 = vmatpush3.msra.mxu0 %v17807_v41  ;;  %21462 = vmatpush3.msra.mxu1 %v18525_v50  ;;  %v18515_v41 = vld [vmem:[#allocation11 + $0x28] sm:$0xff] }
 0xa0c   : > { %21409 = vmatprep.subr.mxu0 %v17822_v57  ;;  %18420 = vmatmul.mubr.f32.gmra.mxu1 %v17533_v56  ;;  %v18514_v57 = vld [vmem:[#allocation11 + $0x20] sm:$0xff]  ;;  %v18512_v56 = vld [vmem:[#allocation11 + $0x10] sm:$0xff] }
 0xa0d   : > { %21410 = vmatpush3.msra.mxu0 %v17806_v27  ;;  %21463 = vmatprep.subr.mxu1 %v18524_v16  ;;  %v18513_v27 = vld [vmem:[#allocation11 + $0x18] sm:$0xff] }
 0xa0e   : > { %21411 = vmatprep.subr.mxu0 %v17821_v18  ;;  %21464 = vmatpush3.msra.mxu1 %v18524_v16  ;;  %v18511_v18 = vld [vmem:[#allocation11 + $0x8] sm:$0xff] }
 0xa0f   : > { %21412 = vmatpush3.msra.mxu0 %v17805_v52  ;;  %21465 = vmatprep.subr.mxu1 %v18523_v12  ;;  %v18510_v52 = vld [vmem:[#allocation11] sm:$0xff] }
 0xa10   : > { %21413 = vmatprep.subr.mxu0 %v17820_v13  ;;  %21466 = vmatpush3.msra.mxu1 %v18523_v12 }
 0xa11   : > { %21414 = vmatpush3.msra.mxu0 %v17804_v43  ;;  %21467 = vmatprep.subr.mxu1 %v18522_v14 }
 0xa12   : > { %21415 = vmatprep.subr.mxu0 %v17819_v37  ;;  %21468 = vmatpush3.msra.mxu1 %v18522_v14 }
 0xa13   : > { %21416 = vmatpush3.msra.mxu0 %v17803_v58  ;;  %21469 = vmatprep.subr.mxu1 %v18521_v4 }
 0xa14   : > { %21417 = vmatprep.subr.mxu0 %v17818_v60  ;;  %21470 = vmatpush3.msra.mxu1 %v18521_v4 }
 0xa15   : > { %21418 = vmatpush3.msra.mxu0 %v17802_v28  ;;  %21471 = vmatprep.subr.mxu1 %v18520_v25 }
 0xa16   : > { %21419 = vmatprep.subr.mxu0 %v17817_v20  ;;  %21472 = vmatpush3.msra.mxu1 %v18520_v25 }
 0xa17   : > { %21420 = vmatpush3.msra.mxu0 %v17801_v38  ;;  %21473 = vmatprep.subr.mxu1 %v18519_v0 }
 0xa18   : > { %21421 = vmatprep.subr.mxu0 %v17816_v31  ;;  %21474 = vmatpush3.msra.mxu1 %v18519_v0 }
 0xa19   : > { %21422 = vmatpush3.msra.mxu0 %v17800_v49  ;;  %21475 = vmatprep.subr.mxu1 %v18518_v53 }
 0xa1a   : > { %21423 = vmatprep.subr.mxu0 %v17815_v44  ;;  %21476 = vmatpush3.msra.mxu1 %v18518_v53 }
 0xa1b   : > { %21424 = vmatpush3.msra.mxu0 %v17799_v46  ;;  %21477 = vmatprep.subr.mxu1 %v18517_v39 }
 0xa1c   : > { %21425 = vmatprep.subr.mxu0 %v17814_v22  ;;  %21478 = vmatpush3.msra.mxu1 %v18517_v39 }
 0xa1d   : > { %21426 = vmatpush3.msra.mxu0 %v17798_v26  ;;  %21479 = vmatprep.subr.mxu1 %v18516_v40 }
 0xa1e   : > { %21427 = vmatprep.subr.mxu0 %v17813_v61  ;;  %21480 = vmatpush3.msra.mxu1 %v18516_v40 }
 0xa1f   : > { %21428 = vmatpush3.msra.mxu0 %v17797_v34  ;;  %21481 = vmatprep.subr.mxu1 %v18515_v41 }
 0xa20   : > { %21429 = vmatprep.subr.mxu0 %v17812_v7  ;;  %21482 = vmatpush3.msra.mxu1 %v18515_v41 }
 0xa21   : > { %21430 = vmatpush3.msra.mxu0 %v17796_v59  ;;  %21483 = vmatprep.subr.mxu1 %v18514_v57 }
 0xa22   : > { %21431 = vmatprep.subr.mxu0 %v17811_v30  ;;  %21484 = vmatpush3.msra.mxu1 %v18514_v57 }
 0xa23   : > { %21432 = vmatpush3.msra.mxu0 %v17795_v32  ;;  %21485 = vmatprep.subr.mxu1 %v18513_v27 }
 0xa24   : > { %21433 = vmatprep.subr.mxu0 %v17810_v62  ;;  %21486 = vmatpush3.msra.mxu1 %v18513_v27 }
 0xa25   : > { %21434 = vmatpush3.msra.mxu0 %v17794_v11  ;;  %21487 = vmatprep.subr.mxu1 %v18512_v56 }
 0xa26   : > { %21435 = vmatprep.subr.mxu0 %v17809_v33  ;;  %21488 = vmatpush3.msra.mxu1 %v18512_v56 }
 0xa27   : > { %21436 = vmatpush3.msra.mxu0 %v17793_v29  ;;  %21489 = vmatprep.subr.mxu1 %v18511_v18 }
 0xa28   : > { %21490 = vmatpush3.msra.mxu1 %v18511_v18 }
 0xa29   : > { %21491 = vmatprep.subr.mxu1 %v18510_v52 }
 0xa2a   : > { %21492 = vmatpush3.msra.mxu1 %v18510_v52 }
 0xa39   : > { %v17413_v8 = vpop.f32.mrf.mxu0 }
 0xa3a   : > { %v17456_v35 = vpop.f32.mrf.mxu1 }
 0xa3b   : > { %v17457_v9 = vadd.f32 %v17456_v35, %v17413_v8  ;;  %v17415_v47 = vpop.f32.mrf.mxu0 }
 0xa3c   : > { %v17458_v45 = vpop.f32.mrf.mxu1 }
 0xa3d   : > { %v17459_v15 = vadd.f32 %v17458_v45, %v17415_v47  ;;  %v17481_v10 = vadd.f32 %v17457_v9, %v26448_v55  ;;  %v17417_v2 = vpop.f32.mrf.mxu0 }
 0xa3e   : > { %v17460_v5 = vpop.f32.mrf.mxu1 }
 0xa3f   : > { %v17482_v21 = vadd.f32 %v17459_v15, %v26449_v1  ;;  %v17461_v23 = vadd.f32 %v17460_v5, %v17417_v2  ;;  %v17419_v54 = vpop.f32.mrf.mxu0  ;;  %v17517_v24 = vmul.f32 %v17481_v10, %v17481_v10 }
 0xa40   : > { %v17462_v17 = vpop.f32.mrf.mxu1 }
 0xa41   : > { %v17518_v51 = vmul.f32 %v17482_v21, %v17482_v21  ;;  %v17463_v63 = vadd.f32 %v17462_v17, %v17419_v54  ;;  %v17499_v3 = vadd.f32 %v17461_v23, %v26450_v6 }
 0xa43   : > { %v17500_v42 = vadd.f32 %v17463_v63, %v26451_v19  ;;  %18489 = vmatprep.mubr.f32.mxu0 %v17518_v51  ;;  %v17535_v48 = vmul.f32 %v17499_v3, %v17499_v3 }
 0xa44   : > { %18490 = vmatmul.mubr.f32.vlgmr.msra.gmra.mxu0 %v17517_v24 }
 0xa45   : > { %v17536_v36 = vmul.f32 %v17500_v42, %v17500_v42 }
 0xa47   : > { %18494 = vmatprep.mubr.f32.mxu0 %v17536_v36 }
 0xa48   : > { %18495 = vmatmul.mubr.f32.gmra.mxu0 %v17535_v48 }
 0xa5a   : > { %v21133_v13 = vpop.f32.mrf.mxu0 }
 0xa5b   : > { %v21171_v43 = vpop.f32.mrf.mxu1 }
 0xa5c   : > { %v21134_v37 = vpop.f32.mrf.mxu0 }
 0xa5d   : > { %v21172_v58 = vpop.f32.mrf.mxu1  ;;  %v21135_v33 = vadd.f32 %v21134_v37, %v21133_v13 }
 0xa5e   : > { %v21173_v29 = vadd.f32 %v21172_v58, %v21171_v43 }
 0xa60   : > { %v21136_v60 = vpop.f32.mrf.mxu0  ;;  %v17967_v45 = vadd.f32 %v21173_v29, %v21135_v33 }
 0xa61   : > { %v21174_v28 = vpop.f32.mrf.mxu1 }
 0xa62   : > { %v21137_v20 = vpop.f32.mrf.mxu0 }
 0xa63   : > { %v21175_v38 = vpop.f32.mrf.mxu1  ;;  %v21138_v15 = vadd.f32 %v21137_v20, %v21136_v60 }
 0xa64   : > { %v21176_v55 = vadd.f32 %v21175_v38, %v21174_v28 }
 0xa66   : > { %v17972_v21 = vadd.f32 %v21176_v55, %v21138_v15 }
 0xa7e   : > { %v21209_v31 = vpop.f32.mrf.mxu0 }
 0xa7f   : > { %v21247_v49 = vpop.f32.mrf.mxu1 }
 0xa80   : > { %v21210_v44 = vpop.f32.mrf.mxu0 }
 0xa81   : > { %v21248_v46 = vpop.f32.mrf.mxu1  ;;  %v21211_v35 = vadd.f32 %v21210_v44, %v21209_v31 }
 0xa82   : > { %v21249_v23 = vadd.f32 %v21248_v46, %v21247_v49 }
 0xa83   : > { %v18042_v2 = vadd.f32 %v21211_v35, %v17967_v45 }
 0xa84   : > { %v21212_v22 = vpop.f32.mrf.mxu0 }
 0xa85   : > { %v21250_v26 = vpop.f32.mrf.mxu1  ;;  %v18117_v51 = vadd.f32 %v21249_v23, %v18042_v2 }
 0xa86   : > { %v21213_v61 = vpop.f32.mrf.mxu0 }
 0xa87   : > { %v21251_v34 = vpop.f32.mrf.mxu1  ;;  %v21214_v5 = vadd.f32 %v21213_v61, %v21212_v22 }
 0xa88   : > { %v21252_v6 = vadd.f32 %v21251_v34, %v21250_v26 }
 0xa89   : > { %v18047_v63 = vadd.f32 %v21214_v5, %v17972_v21 }
 0xa8b   : > { %v18122_v36 = vadd.f32 %v21252_v6, %v18047_v63 }
 0xaa2   : > { %v21285_v7 = vpop.f32.mrf.mxu0 }
 0xaa3   : > { %v21323_v59 = vpop.f32.mrf.mxu1 }
 0xaa4   : > { %v21286_v30 = vpop.f32.mrf.mxu0 }
 0xaa5   : > { %v21324_v32 = vpop.f32.mrf.mxu1  ;;  %v21287_v54 = vadd.f32 %v21286_v30, %v21285_v7  ;;  %v25302_v7 = vmov 0.0  }
 0xaa6   : > { %v21288_v62 = vpop.f32.mrf.mxu0  ;;  %v21325_v48 = vadd.f32 %v21324_v32, %v21323_v59  ;;  %369 = vst [vmem:[#allocation2] sm:$0x1] %v25302_v7  ;;  %v18601_v59 = vlaneseq }
 0xaa7   : > { %v21326_v11 = vpop.f32.mrf.mxu1  ;;  %v18192_v3 = vadd.f32 %v21287_v54, %v18117_v51 }
 0xaa8   : > { %v21289_v8 = vpop.f32.mrf.mxu0  ;;  %v18602_v30 = vshrl.u32 %v18601_v59, 7 }
 0xaa9   : > { %v21327_v9 = vpop.f32.mrf.mxu1  ;;  %v21290_v19 = vadd.f32 %v21289_v8, %v21288_v62  ;;  %v18267_v12 = vadd.f32 %v21325_v48, %v18192_v3 }
 0xaaa   : > { %v21328_v53 = vadd.f32 %v21327_v9, %v21326_v11  ;;  %v18603_v32 = vadd.s32 8, %v18602_v30 }
 0xaab   : > { %v18197_v14 = vadd.f32 %v21290_v19, %v18122_v36 }
 0xaac   : > { %vm18609_vm3 = vcmp.lt.s32.totalorder %v18603_v32, 9 }
 0xaad   : > { %v18272_v57 = vadd.f32 %v21328_v53, %v18197_v14  ;;  %v18616_v15 = vld [vmem:[#allocation2] sm:$0x1] }
 0xac4   : > { %v21361_v47 = vpop.f32.mrf.mxu0 }
 0xac6   : > { %v21362_v1 = vpop.f32.mrf.mxu0 }
 0xac7   : > { %v21363_v50 = vadd.f32 %v21362_v1, %v21361_v47 }
 0xac8   : > { %v21399_v10 = vpop.f32.mrf.mxu1  ;;  %v21364_v24 = vpop.f32.mrf.mxu0 }
 0xac9   : > { %v18342_v39 = vadd.f32 %v21363_v50, %v18267_v12 }
 0xaca   : > { %v21400_v17 = vpop.f32.mrf.mxu1  ;;  %v21365_v16 = vpop.f32.mrf.mxu0 }
 0xacb   : > { %v21401_v4 = vadd.f32 %v21400_v17, %v21399_v10  ;;  %v21366_v40 = vadd.f32 %v21365_v16, %v21364_v24 }
 0xacc   : > { %v21402_v42 = vpop.f32.mrf.mxu1 }
 0xacd   : > { %v18417_v27 = vadd.f32 %v21401_v4, %v18342_v39  ;;  %v18347_v13 = vadd.f32 %v21366_v40, %v18272_v57 }
 0xace   : > { %v21403_v25 = vpop.f32.mrf.mxu1 }
 0xacf   : > { %v21404_v56 = vadd.f32 %v21403_v25, %v21402_v42 }
 0xad1   : > { %v18422_v58 = vadd.f32 %v21404_v56, %v18347_v13 }
 0xb04   : > { %v21437_v0 = vpop.f32.mrf.mxu0 }
 0xb06   : > { %v21438_v41 = vpop.f32.mrf.mxu0 }
 0xb07   : > { %v21439_v18 = vadd.f32 %v21438_v41, %v21437_v0 }
 0xb08   : > { %v21440_v52 = vpop.f32.mrf.mxu0 }
 0xb09   : > { %v18492_v43 = vadd.f32 %v21439_v18, %v18417_v27 }
 0xb0a   : > { %v21441_v37 = vpop.f32.mrf.mxu0 }
 0xb0b   : > { %v18500_v60 = vmax.f32 %v18492_v43, 1e-10  ;;  %v21442_v28 = vadd.f32 %v21441_v37, %v21440_v52 }
 0xb0d   : > { %25058 = vlog2.f32 %v18500_v60  ;;  %v18497_v20 = vadd.f32 %v21442_v28, %v18422_v58 }
 0xb0f   : > { %v18501_v38 = vmax.f32 %v18497_v20, 1e-10 }
 0xb11   : > { %25060 = vlog2.f32 %v18501_v38 }
 0xb1a   : > { %v25059_v31 = vpop.eup %25058 }
 0xb1b   : > { %v18503_v49 = vmul.f32 0.6931472, %v25059_v31 }
 0xb1d   : > { %v18506_v44 = vmul.f32 0.4342945, %v18503_v49 }
 0xb1e   : > { %v25061_v46 = vpop.eup %25060 }
 0xb1f   : > { %v18505_v22 = vmul.f32 0.6931472, %v25061_v46  ;;  %v18508_v26 = vmul.f32 10.0, %v18506_v44 }
 0xb21   : > { %v18507_v61 = vmul.f32 0.4342945, %v18505_v22  ;;  %21493 = vmatprep.mubr.f32.mxu1 %v18508_v26 }
 0xb23   : > { %v18509_v34 = vmul.f32 10.0, %v18507_v61 }
 0xb25   : > { %21494 = vmatmul.mubr.f32.vlgmr.msra.gmra.mxu1 %v18509_v34 }
 0xbe5   : > { %v21495_v62 = vpop.f32.mrf.mxu1 }
 0xbe6   : > { %v18615_v11 = vsel %vm18609_vm3, %v21495_v62, 0.0 }
 0xbe7   : > { %v18592_v33 = vpop.f32.mrf.mxu1 }
 0xbe8   : > { %v18617_v29 = vadd.f32 %v18615_v11, %v18592_v33 }
 0xbea   : > { %v18618_v8 = vrot.slane %v18617_v29, 4 }
 0xbec   : > { %v18619_v35 = vadd.f32 %v18618_v8, %v18617_v29 }
 0xbee   : > { %v18620_v9 = vrot.slane %v18619_v35, 2 }
 0xbf0   : > { %v18621_v47 = vadd.f32 %v18620_v9, %v18619_v35 }
 0xbf2   : > { %v18622_v45 = vrot.slane %v18621_v47, 1 }
 0xbf4   : > { %v18623_v55 = vadd.f32 %v18622_v45, %v18621_v47 }
 0xbf6   : > { %v18624_v10 = vadd.f32 %v18623_v55, %v18616_v15 }
 0xbf8   : > { %18625 = vst [vmem:[#allocation2] sm:$0x1] %v18624_v10 }
 0xbff   : > { %v18629_v2 = vld [vmem:[#allocation2] sm:$0x1] }
 0xc00   : > { %v18630_v5 = vmul.f32 0.11111111, %v18629_v2 }
 0xc02   : > { %18631 = vst [vmem:[%s356_s26] sm:$0x1] %v18630_v5 }
 0xc03   : > { %25210 = shalt.err (!%p25207_p12)
}
 0xc04   : > { %s25211_s14 = scalar_lea.hbm %s18643_s9, 16  ;;  %s25215_s11 = scalar_lea.hbm %s26323_s5, 32 }
 0xc05   : > { %p25212_p0 = scmp.ne.s32.totalorder %s18643_s9, %s25211_s14  ;;  %p25216_p11 = scmp.lt.s32.totalorder %s18643_s9, %s26323_s5 }
 0xc06   : > { %p25217_p7 = scmp.lt.s32.totalorder %s25215_s11, %s25211_s14 }
 0xc07   : > { %p25213_p5 = pnand %p25212_p0, %p25432_p3 }
 0xc08   : > { %p25218_p10 = por %p25217_p7, %p25216_p11 }
 0xc09   : > { %p25214_p8 = pneg %p25213_p5 }
 0xc0b   : > { %p25219_p4 = pnand %p25218_p10, %p25214_p8 }
 0xc0d   : > { %25222 = shalt.err (!%p25219_p4)
}
 0xc0e   : > { %21513 = dma.vmem_to_hbm [thread:$0]  (%p25432_p3), %s18646_s16, 16, %s18643_s9, %s18633_s10  }
 0xc0f PF: > { %s26452_s3 = sld [smem:[#allocation19_spill]]  ;;  %s18657_s4 = sand.u32 1, %s25269_s18  }
 0xc10   : > { %p26453_p1 = scmp.ne.s32.totalorder %s26353_s27, 0  ;;  %s18658_s20 = scalar_lea.sflag [#allocation5], %s18657_s4 }
 0xc15   : > { %p26454_p2 = scmp.ge.s32.totalorder %s26452_s3, 2 }
 0xc17   : > { %p21533_p6 = pnand %p26454_p2, %p26453_p1 }
 0xc19   : > { %p21534_p9 = pneg %p21533_p6 }
 0xc1b   : > { %25264 = dma.done.wait (%p21534_p9), %s18658_s20, 16  }
 0xc1c   : > { %25266 = vsyncadd (%p21534_p9), %s18658_s20, 4294967280  ;;  %s25_s23 = sadd.s32 1, %s26452_s3   ;;  %s26455_s28 = sld [smem:[#allocation18_spill]] }
 0xc1d   : > { %p22_p13 = scmp.ge.s32.totalorder %s25_s23, 4   ;;  %s26456_s20 = sld [smem:[#allocation21_spill]] }
 0xc1e   : > { %s26457_s6 = sld [smem:[#allocation20_spill]]  ;;  %s26458_s18 = smov %s25273_s19 }
 0xc1f   : > { %s26460_s21 = smov %s25285_s22 }
 0xc20   :  { %24 = sbr.rel (!%p22_p13) target bundleno = 14 (0xe), region = 118 }
 0xc22   : > { %s26459_s19 = smov %s26455_s28 }
 0xc24   : > { %s26461_s22 = smov %s26457_s6 }
 0xc25   :  { %18662 = vsyncpa [#allocation4], 1 }
 0xc26   :  { %18664 = vsyncpa [#allocation4 + $0x1], 1 }
 0xc27   :  { %18665 = vsyncpa [#allocation7], 1 }
 0xc28   :  { %18667 = vsyncpa [#allocation7 + $0x1], 1 }
 0xc29   :  { %18668 = vsyncpa [#allocation10], 1 }
 0xc2a   :  { %18669 = vsyncpa [#allocation5], 1 }
 0xc2b   :  { %18671 = vsyncpa [#allocation5 + $0x1], 1 }

</bundles_post_ra>
